<compile_context>
chip_gen: v5e
topology: v5e:2x2
jax: 0.10.0
libtpu: 0.0.40
codegen_flags: <defaults>
</compile_context>

<pallas_src>
import numpy as np

import jax
import jax.numpy as jnp
from jax.experimental import pallas as pl
from jax.experimental.pallas import tpu as pltpu

# ---- module hyper-parameters (small, consistent with the PyTorch module) -----
NZ = 32              # nz      : latent size
NDF = 16             # ndf     : base channel count  -> channels 128/64/32/16/3
NC = 3               # nc      : output image channels
IMAGE_SIZE = 16      # args.image_size
OUT_SIZE = IMAGE_SIZE // 16      # out_size = 1
BATCH = 2
BN_EPS = 1e-3
LANE = 128
LEAKY_SLOPE = 0.2


# ------------------------------------------------------------------------------
# Host-side constant gather matrices.
#   A[t, sy*s_in + sx, oy*s_out + ox] = 1 iff conv tap t=(dy,dx) at output
#   (oy,ox) reads upsampled-padded pixel (oy+dy, ox+dx), which (when not in the
#   zero pad) maps back to source pixel (sy,sx) = ((oy+dy-1)//2, (ox+dx-1)//2).
# This folds UpsamplingNearest2d(x2) + zero-pad(1) + per-tap im2col into a
# single 0/1 matrix that the kernel applies with the MXU.
# ------------------------------------------------------------------------------
def _gather_mats(s_in):
    s_out = 2 * s_in
    a = np.zeros((9, s_in * s_in, s_out * s_out), np.float32)
    for dy in range(3):
        for dx in range(3):
            t = dy * 3 + dx
            for oy in range(s_out):
                for ox in range(s_out):
                    py, px = oy + dy, ox + dx            # padded-plane coords
                    if 1 <= py <= s_out and 1 <= px <= s_out:
                        sy, sx = (py - 1) // 2, (px - 1) // 2
                        a[t, sy * s_in + sx, oy * s_out + ox] = 1.0
    return jnp.asarray(a, jnp.bfloat16)                  # 0/1 -> exact in bf16


# ------------------------------------------------------------------------------
# Fused decoder kernel (one grid step == one batch element).
# ------------------------------------------------------------------------------
def _decoder_kernel(z_ref, wd_ref, bd_ref, *rest):
    out_ref = rest[-1]
    conv_refs = rest[:-1]                                # (w, A, b) x 4
    n_layers = len(conv_refs) // 3

    # decoder_dense: h = relu(Wd @ z + bd), channel-major (128, 1) == (C, H*W).
    h = jnp.dot(wd_ref[...], z_ref[0], preferred_element_type=jnp.float32)
    h = jnp.maximum(h + bd_ref[...], 0.0)
    x = h.astype(jnp.bfloat16)                           # (128, 1)

    for i in range(n_layers):
        w_ref = conv_refs[3 * i]                         # (9, 128, 128) bf16
        a_ref = conv_refs[3 * i + 1]                     # (9, HW_in, HW_out) bf16
        b_ref = conv_refs[3 * i + 2]                     # (128, 1) f32
        last = i == n_layers - 1
        m = a_ref.shape[2]

        acc = jnp.zeros((w_ref.shape[1], m), jnp.float32)
        for t in range(9):                               # static, fully unrolled
            a_t = a_ref[t]                               # (HW_in, HW_out) 0/1
            if a_t.shape[0] == 1:
                g = x * a_t                              # outer-product gather
            else:
                g = jnp.dot(x, a_t,
                            preferred_element_type=jnp.float32
                            ).astype(jnp.bfloat16)       # exact 0/1 gather
            acc = acc + jnp.dot(w_ref[t], g,
                                preferred_element_type=jnp.float32)

        y = acc + b_ref[...]                             # folded-BN bias (f32)
        if not last:
            y = jnp.maximum(y, LEAKY_SLOPE * y)          # LeakyReLU(0.2)
            x = y.astype(jnp.bfloat16)
        else:
            # lane-dense output: (NC, H*W) with H*W = 256 on the lane axis
            out_ref[0] = y[:NC, :].astype(out_ref.dtype)


# ------------------------------------------------------------------------------
# pallas_call wrapper: single fused launch, batch-parallel grid.
# ------------------------------------------------------------------------------
@jax.jit
def decoder_forward(z_bf16, kparams):
    n = z_bf16.shape[0]
    z3 = z_bf16.reshape(n, NZ, 1)                        # channel-major per batch

    def full_spec(a):
        return pl.BlockSpec(a.shape, lambda i, _nd=a.ndim: (0,) * _nd)

    in_specs = [pl.BlockSpec((1, NZ, 1), lambda i: (i, 0, 0))]
    in_specs += [full_spec(p) for p in kparams]

    hw = IMAGE_SIZE * IMAGE_SIZE
    out = pl.pallas_call(
        _decoder_kernel,
        out_shape=jax.ShapeDtypeStruct((n, NC, hw), jnp.float32),
        grid_spec=pltpu.PrefetchScalarGridSpec(
            num_scalar_prefetch=0,
            grid=(n,),
            in_specs=in_specs,
            out_specs=pl.BlockSpec((1, NC, hw), lambda i: (i, 0, 0)),
        ),
        compiler_params=pltpu.CompilerParams(
            dimension_semantics=("parallel",),           # batch across TCs (v7x)
        ),
    )(z3, *kparams)
    return out.reshape(n, NC, IMAGE_SIZE, IMAGE_SIZE)    # free NCHW reshape


# ------------------------------------------------------------------------------
# Deterministic synthetic parameters with BN folded at init.
# ------------------------------------------------------------------------------
def init_params(key, nz=NZ, ndf=NDF, nc=NC, out_size=OUT_SIZE, eps=BN_EPS):
    feat = ndf * 8 * out_size * out_size                 # 128
    assert feat == LANE, "this config assumes ndf*8*out_size^2 == 128"

    key, k1, k2 = jax.random.split(key, 3)
    dense_w = (jax.random.normal(k1, (feat, nz), jnp.float32)
               / np.sqrt(nz)).astype(jnp.bfloat16)       # PyTorch (out,in) layout
    dense_b = 0.01 * jax.random.normal(k2, (feat,), jnp.float32)

    kparams = [dense_w, dense_b.reshape(feat, 1)]
    ref_convs = []

    chans = [ndf * 8, ndf * 4, ndf * 2, ndf, nc]
    s_in = out_size
    for i in range(4):
        cin, cout = chans[i], chans[i + 1]
        key, kw, kb, kg, kbe, km, kv = jax.random.split(key, 7)
        w = jax.random.normal(kw, (cout, cin, 3, 3), jnp.float32) / np.sqrt(9 * cin)
        b = 0.01 * jax.random.normal(kb, (cout,), jnp.float32)
        if i < 3:   # Normalize (eval-mode BN) + LeakyReLU follow this conv
            gamma = 1.0 + 0.1 * jax.random.normal(kg, (cout,), jnp.float32)
            beta = 0.1 * jax.random.normal(kbe, (cout,), jnp.float32)
            rmean = 0.1 * jax.random.normal(km, (cout,), jnp.float32)
            rvar = 0.9 + 0.1 * jnp.abs(jax.random.normal(kv, (cout,), jnp.float32))
            scale = gamma / jnp.sqrt(rvar + eps)
            bias = (b - rmean) * scale + beta
        else:
            scale = jnp.ones((cout,), jnp.float32)
            bias = b

        w_fold = (w * scale[:, None, None, None]).astype(jnp.bfloat16)
        ref_convs.append((w_fold, bias))

        # kernel layout: (9, Cout_p, Cin_p) per-tap weights, channels padded to 128
        wt = jnp.transpose(w_fold.astype(jnp.float32),
                           (2, 3, 0, 1)).reshape(9, cout, cin)
        wt = jnp.pad(wt, ((0, 0), (0, LANE - cout),
                          (0, LANE - cin))).astype(jnp.bfloat16)
        bcol = jnp.pad(bias, (0, LANE - cout)).reshape(LANE, 1)
        kparams += [wt, _gather_mats(s_in), bcol]
        s_in *= 2

    return tuple(kparams), (dense_w, dense_b, ref_convs)


# ------------------------------------------------------------------------------
# Pure-JAX reference (same folded bf16 weights, f32 activations) for validation.
# ------------------------------------------------------------------------------
@jax.jit
def ref_decoder(z, dense_w, dense_b, convs):
    zf = z.astype(jnp.float32)
    h = jnp.maximum(zf @ dense_w.astype(jnp.float32).T + dense_b[None, :], 0.0)
    x = h.reshape(z.shape[0], NDF * 8, OUT_SIZE, OUT_SIZE)
    n = len(convs)
    for i, (w, b) in enumerate(convs):
        x = jnp.repeat(jnp.repeat(x, 2, axis=2), 2, axis=3)          # nearest x2
        x = jax.lax.conv_general_dilated(
            x, w.astype(jnp.float32), (1, 1), ((1, 1), (1, 1)),
            dimension_numbers=("NCHW", "OIHW", "NCHW"))
        x = x + b.reshape(1, -1, 1, 1)
        if i < n - 1:
            x = jnp.maximum(x, LEAKY_SLOPE * x)
    return x


if __name__ == "__main__":
    key = jax.random.PRNGKey(0)
    key, kz, kp = jax.random.split(key, 3)

    z = jax.random.normal(kz, (BATCH, NZ), jnp.float32).astype(jnp.bfloat16)
    kparams, (dense_w, dense_b, ref_convs) = init_params(kp)

    out = decoder_forward(z, kparams)
    out = jax.block_until_ready(out)

    assert out.shape == (BATCH, NC, IMAGE_SIZE, IMAGE_SIZE), out.shape
    assert out.dtype == jnp.float32
    assert bool(jnp.all(jnp.isfinite(out)))

    ref = ref_decoder(z, dense_w, dense_b, ref_convs)
    tol = 5e-2 * max(1.0, float(jnp.max(jnp.abs(ref))))
    max_err = float(jnp.max(jnp.abs(out - ref.astype(jnp.float32))))
    assert max_err < tol, f"mismatch vs reference: {max_err} (tol {tol})"

    print("KERNEL_OK")
</pallas_src>

<mosaic_0001>
module attributes {stable_mosaic.version = 11 : i64} {
  func.func @_decoder_kernel(%arg0: i32, %arg1: memref<1x32x1xbf16, #tpu.memory_space<vmem>>, %arg2: memref<128x32xbf16, #tpu.memory_space<vmem>>, %arg3: memref<128x1xf32, #tpu.memory_space<vmem>>, %arg4: memref<9x128x128xbf16, #tpu.memory_space<vmem>>, %arg5: memref<9x1x4xbf16, #tpu.memory_space<vmem>>, %arg6: memref<128x1xf32, #tpu.memory_space<vmem>>, %arg7: memref<9x128x128xbf16, #tpu.memory_space<vmem>>, %arg8: memref<9x4x16xbf16, #tpu.memory_space<vmem>>, %arg9: memref<128x1xf32, #tpu.memory_space<vmem>>, %arg10: memref<9x128x128xbf16, #tpu.memory_space<vmem>>, %arg11: memref<9x16x64xbf16, #tpu.memory_space<vmem>>, %arg12: memref<128x1xf32, #tpu.memory_space<vmem>>, %arg13: memref<9x128x128xbf16, #tpu.memory_space<vmem>>, %arg14: memref<9x64x256xbf16, #tpu.memory_space<vmem>>, %arg15: memref<128x1xf32, #tpu.memory_space<vmem>>, %arg16: memref<1x3x256xf32, #tpu.memory_space<vmem>>) attributes {dimension_semantics = [#tpu.dimension_semantics<parallel>], iteration_bounds = array<i64: 2>, scalar_prefetch = 0 : i64, scratch_operands = 0 : i64, tpu.core_type = #tpu.core_type<tc>, window_params = [{transform_indices = @transform_0, window_bounds = array<i64: 1, 32, 1>}, {pipeline_mode = #tpu.pipeline_mode<synchronous>, transform_indices = @transform_1, window_bounds = array<i64: 128, 32>}, {pipeline_mode = #tpu.pipeline_mode<synchronous>, transform_indices = @transform_2, window_bounds = array<i64: 128, 1>}, {pipeline_mode = #tpu.pipeline_mode<synchronous>, transform_indices = @transform_3, window_bounds = array<i64: 9, 128, 128>}, {pipeline_mode = #tpu.pipeline_mode<synchronous>, transform_indices = @transform_4, window_bounds = array<i64: 9, 1, 4>}, {pipeline_mode = #tpu.pipeline_mode<synchronous>, transform_indices = @transform_5, window_bounds = array<i64: 128, 1>}, {pipeline_mode = #tpu.pipeline_mode<synchronous>, transform_indices = @transform_6, window_bounds = array<i64: 9, 128, 128>}, {pipeline_mode = #tpu.pipeline_mode<synchronous>, transform_indices = @transform_7, window_bounds = array<i64: 9, 4, 16>}, {pipeline_mode = #tpu.pipeline_mode<synchronous>, transform_indices = @transform_8, window_bounds = array<i64: 128, 1>}, {pipeline_mode = #tpu.pipeline_mode<synchronous>, transform_indices = @transform_9, window_bounds = array<i64: 9, 128, 128>}, {pipeline_mode = #tpu.pipeline_mode<synchronous>, transform_indices = @transform_10, window_bounds = array<i64: 9, 16, 64>}, {pipeline_mode = #tpu.pipeline_mode<synchronous>, transform_indices = @transform_11, window_bounds = array<i64: 128, 1>}, {pipeline_mode = #tpu.pipeline_mode<synchronous>, transform_indices = @transform_12, window_bounds = array<i64: 9, 128, 128>}, {pipeline_mode = #tpu.pipeline_mode<synchronous>, transform_indices = @transform_13, window_bounds = array<i64: 9, 64, 256>}, {pipeline_mode = #tpu.pipeline_mode<synchronous>, transform_indices = @transform_14, window_bounds = array<i64: 128, 1>}, {transform_indices = @transform_15, window_bounds = array<i64: 1, 3, 256>}]} {
    %c0 = arith.constant 0 : index
    %c0_0 = arith.constant 0 : index
    %0 = vector.load %arg2[%c0, %c0_0] : memref<128x32xbf16, #tpu.memory_space<vmem>>, vector<128x32xbf16>
    %c0_1 = arith.constant 0 : index
    %c0_2 = arith.constant 0 : index
    %c0_3 = arith.constant 0 : index
    %1 = vector.load %arg1[%c0_1, %c0_2, %c0_3] : memref<1x32x1xbf16, #tpu.memory_space<vmem>>, vector<1x32x1xbf16>
    %2 = vector.shape_cast %1 : vector<1x32x1xbf16> to vector<32x1xbf16>
    %cst = arith.constant dense<0.000000e+00> : vector<128x1xf32>
    %3 = tpu.matmul %0, %2, %cst {dimension_numbers = #tpu.dot_dimension_numbers<[1], [0], [0], [1], [0, 0, 1, 1], [], []>} : vector<128x32xbf16>, vector<32x1xbf16>, vector<128x1xf32> -> vector<128x1xf32>
    %c0_4 = arith.constant 0 : index
    %c0_5 = arith.constant 0 : index
    %4 = vector.load %arg3[%c0_4, %c0_5] : memref<128x1xf32, #tpu.memory_space<vmem>>, vector<128x1xf32>
    %5 = arith.addf %3, %4 : vector<128x1xf32>
    %cst_6 = arith.constant 0.000000e+00 : f32
    %6 = vector.broadcast %cst_6 : f32 to vector<128x1xf32>
    %7 = arith.maximumf %5, %6 : vector<128x1xf32>
    %8 = arith.truncf %7 : vector<128x1xf32> to vector<128x1xbf16>
    %cst_7 = arith.constant 0.000000e+00 : f32
    %9 = vector.broadcast %cst_7 : f32 to vector<128x4xf32>
    %c0_8 = arith.constant 0 : index
    %c0_9 = arith.constant 0 : index
    %c0_10 = arith.constant 0 : index
    %10 = vector.load %arg5[%c0_8, %c0_9, %c0_10] : memref<9x1x4xbf16, #tpu.memory_space<vmem>>, vector<1x1x4xbf16>
    %11 = vector.shape_cast %10 : vector<1x1x4xbf16> to vector<1x4xbf16>
    %12 = vector.broadcast %8 : vector<128x1xbf16> to vector<128x4xbf16>
    %13 = vector.broadcast %11 : vector<1x4xbf16> to vector<128x4xbf16>
    %14 = arith.mulf %12, %13 : vector<128x4xbf16>
    %c0_11 = arith.constant 0 : index
    %c0_12 = arith.constant 0 : index
    %c0_13 = arith.constant 0 : index
    %15 = vector.load %arg4[%c0_11, %c0_12, %c0_13] : memref<9x128x128xbf16, #tpu.memory_space<vmem>>, vector<1x128x128xbf16>
    %16 = vector.shape_cast %15 : vector<1x128x128xbf16> to vector<128x128xbf16>
    %cst_14 = arith.constant dense<0.000000e+00> : vector<128x4xf32>
    %17 = tpu.matmul %16, %14, %cst_14 {dimension_numbers = #tpu.dot_dimension_numbers<[1], [0], [0], [1], [0, 0, 1, 1], [], []>} : vector<128x128xbf16>, vector<128x4xbf16>, vector<128x4xf32> -> vector<128x4xf32>
    %18 = arith.addf %9, %17 : vector<128x4xf32>
    %c1 = arith.constant 1 : index
    %c0_15 = arith.constant 0 : index
    %c0_16 = arith.constant 0 : index
    %19 = vector.load %arg5[%c1, %c0_15, %c0_16] : memref<9x1x4xbf16, #tpu.memory_space<vmem>>, vector<1x1x4xbf16>
    %20 = vector.shape_cast %19 : vector<1x1x4xbf16> to vector<1x4xbf16>
    %21 = vector.broadcast %8 : vector<128x1xbf16> to vector<128x4xbf16>
    %22 = vector.broadcast %20 : vector<1x4xbf16> to vector<128x4xbf16>
    %23 = arith.mulf %21, %22 : vector<128x4xbf16>
    %c1_17 = arith.constant 1 : index
    %c0_18 = arith.constant 0 : index
    %c0_19 = arith.constant 0 : index
    %24 = vector.load %arg4[%c1_17, %c0_18, %c0_19] : memref<9x128x128xbf16, #tpu.memory_space<vmem>>, vector<1x128x128xbf16>
    %25 = vector.shape_cast %24 : vector<1x128x128xbf16> to vector<128x128xbf16>
    %cst_20 = arith.constant dense<0.000000e+00> : vector<128x4xf32>
    %26 = tpu.matmul %25, %23, %cst_20 {dimension_numbers = #tpu.dot_dimension_numbers<[1], [0], [0], [1], [0, 0, 1, 1], [], []>} : vector<128x128xbf16>, vector<128x4xbf16>, vector<128x4xf32> -> vector<128x4xf32>
    %27 = arith.addf %18, %26 : vector<128x4xf32>
    %c2 = arith.constant 2 : index
    %c0_21 = arith.constant 0 : index
    %c0_22 = arith.constant 0 : index
    %28 = vector.load %arg5[%c2, %c0_21, %c0_22] : memref<9x1x4xbf16, #tpu.memory_space<vmem>>, vector<1x1x4xbf16>
    %29 = vector.shape_cast %28 : vector<1x1x4xbf16> to vector<1x4xbf16>
    %30 = vector.broadcast %8 : vector<128x1xbf16> to vector<128x4xbf16>
    %31 = vector.broadcast %29 : vector<1x4xbf16> to vector<128x4xbf16>
    %32 = arith.mulf %30, %31 : vector<128x4xbf16>
    %c2_23 = arith.constant 2 : index
    %c0_24 = arith.constant 0 : index
    %c0_25 = arith.constant 0 : index
    %33 = vector.load %arg4[%c2_23, %c0_24, %c0_25] : memref<9x128x128xbf16, #tpu.memory_space<vmem>>, vector<1x128x128xbf16>
    %34 = vector.shape_cast %33 : vector<1x128x128xbf16> to vector<128x128xbf16>
    %cst_26 = arith.constant dense<0.000000e+00> : vector<128x4xf32>
    %35 = tpu.matmul %34, %32, %cst_26 {dimension_numbers = #tpu.dot_dimension_numbers<[1], [0], [0], [1], [0, 0, 1, 1], [], []>} : vector<128x128xbf16>, vector<128x4xbf16>, vector<128x4xf32> -> vector<128x4xf32>
    %36 = arith.addf %27, %35 : vector<128x4xf32>
    %c3 = arith.constant 3 : index
    %c0_27 = arith.constant 0 : index
    %c0_28 = arith.constant 0 : index
    %37 = vector.load %arg5[%c3, %c0_27, %c0_28] : memref<9x1x4xbf16, #tpu.memory_space<vmem>>, vector<1x1x4xbf16>
    %38 = vector.shape_cast %37 : vector<1x1x4xbf16> to vector<1x4xbf16>
    %39 = vector.broadcast %8 : vector<128x1xbf16> to vector<128x4xbf16>
    %40 = vector.broadcast %38 : vector<1x4xbf16> to vector<128x4xbf16>
    %41 = arith.mulf %39, %40 : vector<128x4xbf16>
    %c3_29 = arith.constant 3 : index
    %c0_30 = arith.constant 0 : index
    %c0_31 = arith.constant 0 : index
    %42 = vector.load %arg4[%c3_29, %c0_30, %c0_31] : memref<9x128x128xbf16, #tpu.memory_space<vmem>>, vector<1x128x128xbf16>
    %43 = vector.shape_cast %42 : vector<1x128x128xbf16> to vector<128x128xbf16>
    %cst_32 = arith.constant dense<0.000000e+00> : vector<128x4xf32>
    %44 = tpu.matmul %43, %41, %cst_32 {dimension_numbers = #tpu.dot_dimension_numbers<[1], [0], [0], [1], [0, 0, 1, 1], [], []>} : vector<128x128xbf16>, vector<128x4xbf16>, vector<128x4xf32> -> vector<128x4xf32>
    %45 = arith.addf %36, %44 : vector<128x4xf32>
    %c4 = arith.constant 4 : index
    %c0_33 = arith.constant 0 : index
    %c0_34 = arith.constant 0 : index
    %46 = vector.load %arg5[%c4, %c0_33, %c0_34] : memref<9x1x4xbf16, #tpu.memory_space<vmem>>, vector<1x1x4xbf16>
    %47 = vector.shape_cast %46 : vector<1x1x4xbf16> to vector<1x4xbf16>
    %48 = vector.broadcast %8 : vector<128x1xbf16> to vector<128x4xbf16>
    %49 = vector.broadcast %47 : vector<1x4xbf16> to vector<128x4xbf16>
    %50 = arith.mulf %48, %49 : vector<128x4xbf16>
    %c4_35 = arith.constant 4 : index
    %c0_36 = arith.constant 0 : index
    %c0_37 = arith.constant 0 : index
    %51 = vector.load %arg4[%c4_35, %c0_36, %c0_37] : memref<9x128x128xbf16, #tpu.memory_space<vmem>>, vector<1x128x128xbf16>
    %52 = vector.shape_cast %51 : vector<1x128x128xbf16> to vector<128x128xbf16>
    %cst_38 = arith.constant dense<0.000000e+00> : vector<128x4xf32>
    %53 = tpu.matmul %52, %50, %cst_38 {dimension_numbers = #tpu.dot_dimension_numbers<[1], [0], [0], [1], [0, 0, 1, 1], [], []>} : vector<128x128xbf16>, vector<128x4xbf16>, vector<128x4xf32> -> vector<128x4xf32>
    %54 = arith.addf %45, %53 : vector<128x4xf32>
    %c5 = arith.constant 5 : index
    %c0_39 = arith.constant 0 : index
    %c0_40 = arith.constant 0 : index
    %55 = vector.load %arg5[%c5, %c0_39, %c0_40] : memref<9x1x4xbf16, #tpu.memory_space<vmem>>, vector<1x1x4xbf16>
    %56 = vector.shape_cast %55 : vector<1x1x4xbf16> to vector<1x4xbf16>
    %57 = vector.broadcast %8 : vector<128x1xbf16> to vector<128x4xbf16>
    %58 = vector.broadcast %56 : vector<1x4xbf16> to vector<128x4xbf16>
    %59 = arith.mulf %57, %58 : vector<128x4xbf16>
    %c5_41 = arith.constant 5 : index
    %c0_42 = arith.constant 0 : index
    %c0_43 = arith.constant 0 : index
    %60 = vector.load %arg4[%c5_41, %c0_42, %c0_43] : memref<9x128x128xbf16, #tpu.memory_space<vmem>>, vector<1x128x128xbf16>
    %61 = vector.shape_cast %60 : vector<1x128x128xbf16> to vector<128x128xbf16>
    %cst_44 = arith.constant dense<0.000000e+00> : vector<128x4xf32>
    %62 = tpu.matmul %61, %59, %cst_44 {dimension_numbers = #tpu.dot_dimension_numbers<[1], [0], [0], [1], [0, 0, 1, 1], [], []>} : vector<128x128xbf16>, vector<128x4xbf16>, vector<128x4xf32> -> vector<128x4xf32>
    %63 = arith.addf %54, %62 : vector<128x4xf32>
    %c6 = arith.constant 6 : index
    %c0_45 = arith.constant 0 : index
    %c0_46 = arith.constant 0 : index
    %64 = vector.load %arg5[%c6, %c0_45, %c0_46] : memref<9x1x4xbf16, #tpu.memory_space<vmem>>, vector<1x1x4xbf16>
    %65 = vector.shape_cast %64 : vector<1x1x4xbf16> to vector<1x4xbf16>
    %66 = vector.broadcast %8 : vector<128x1xbf16> to vector<128x4xbf16>
    %67 = vector.broadcast %65 : vector<1x4xbf16> to vector<128x4xbf16>
    %68 = arith.mulf %66, %67 : vector<128x4xbf16>
    %c6_47 = arith.constant 6 : index
    %c0_48 = arith.constant 0 : index
    %c0_49 = arith.constant 0 : index
    %69 = vector.load %arg4[%c6_47, %c0_48, %c0_49] : memref<9x128x128xbf16, #tpu.memory_space<vmem>>, vector<1x128x128xbf16>
    %70 = vector.shape_cast %69 : vector<1x128x128xbf16> to vector<128x128xbf16>
    %cst_50 = arith.constant dense<0.000000e+00> : vector<128x4xf32>
    %71 = tpu.matmul %70, %68, %cst_50 {dimension_numbers = #tpu.dot_dimension_numbers<[1], [0], [0], [1], [0, 0, 1, 1], [], []>} : vector<128x128xbf16>, vector<128x4xbf16>, vector<128x4xf32> -> vector<128x4xf32>
    %72 = arith.addf %63, %71 : vector<128x4xf32>
    %c7 = arith.constant 7 : index
    %c0_51 = arith.constant 0 : index
    %c0_52 = arith.constant 0 : index
    %73 = vector.load %arg5[%c7, %c0_51, %c0_52] : memref<9x1x4xbf16, #tpu.memory_space<vmem>>, vector<1x1x4xbf16>
    %74 = vector.shape_cast %73 : vector<1x1x4xbf16> to vector<1x4xbf16>
    %75 = vector.broadcast %8 : vector<128x1xbf16> to vector<128x4xbf16>
    %76 = vector.broadcast %74 : vector<1x4xbf16> to vector<128x4xbf16>
    %77 = arith.mulf %75, %76 : vector<128x4xbf16>
    %c7_53 = arith.constant 7 : index
    %c0_54 = arith.constant 0 : index
    %c0_55 = arith.constant 0 : index
    %78 = vector.load %arg4[%c7_53, %c0_54, %c0_55] : memref<9x128x128xbf16, #tpu.memory_space<vmem>>, vector<1x128x128xbf16>
    %79 = vector.shape_cast %78 : vector<1x128x128xbf16> to vector<128x128xbf16>
    %cst_56 = arith.constant dense<0.000000e+00> : vector<128x4xf32>
    %80 = tpu.matmul %79, %77, %cst_56 {dimension_numbers = #tpu.dot_dimension_numbers<[1], [0], [0], [1], [0, 0, 1, 1], [], []>} : vector<128x128xbf16>, vector<128x4xbf16>, vector<128x4xf32> -> vector<128x4xf32>
    %81 = arith.addf %72, %80 : vector<128x4xf32>
    %c8 = arith.constant 8 : index
    %c0_57 = arith.constant 0 : index
    %c0_58 = arith.constant 0 : index
    %82 = vector.load %arg5[%c8, %c0_57, %c0_58] : memref<9x1x4xbf16, #tpu.memory_space<vmem>>, vector<1x1x4xbf16>
    %83 = vector.shape_cast %82 : vector<1x1x4xbf16> to vector<1x4xbf16>
    %84 = vector.broadcast %8 : vector<128x1xbf16> to vector<128x4xbf16>
    %85 = vector.broadcast %83 : vector<1x4xbf16> to vector<128x4xbf16>
    %86 = arith.mulf %84, %85 : vector<128x4xbf16>
    %c8_59 = arith.constant 8 : index
    %c0_60 = arith.constant 0 : index
    %c0_61 = arith.constant 0 : index
    %87 = vector.load %arg4[%c8_59, %c0_60, %c0_61] : memref<9x128x128xbf16, #tpu.memory_space<vmem>>, vector<1x128x128xbf16>
    %88 = vector.shape_cast %87 : vector<1x128x128xbf16> to vector<128x128xbf16>
    %cst_62 = arith.constant dense<0.000000e+00> : vector<128x4xf32>
    %89 = tpu.matmul %88, %86, %cst_62 {dimension_numbers = #tpu.dot_dimension_numbers<[1], [0], [0], [1], [0, 0, 1, 1], [], []>} : vector<128x128xbf16>, vector<128x4xbf16>, vector<128x4xf32> -> vector<128x4xf32>
    %90 = arith.addf %81, %89 : vector<128x4xf32>
    %c0_63 = arith.constant 0 : index
    %c0_64 = arith.constant 0 : index
    %91 = vector.load %arg6[%c0_63, %c0_64] : memref<128x1xf32, #tpu.memory_space<vmem>>, vector<128x1xf32>
    %92 = vector.broadcast %91 : vector<128x1xf32> to vector<128x4xf32>
    %93 = arith.addf %90, %92 : vector<128x4xf32>
    %cst_65 = arith.constant 2.000000e-01 : f32
    %94 = vector.broadcast %cst_65 : f32 to vector<128x4xf32>
    %95 = arith.mulf %94, %93 : vector<128x4xf32>
    %96 = arith.maximumf %93, %95 : vector<128x4xf32>
    %97 = arith.truncf %96 : vector<128x4xf32> to vector<128x4xbf16>
    %cst_66 = arith.constant 0.000000e+00 : f32
    %98 = vector.broadcast %cst_66 : f32 to vector<128x16xf32>
    %c0_67 = arith.constant 0 : index
    %c0_68 = arith.constant 0 : index
    %c0_69 = arith.constant 0 : index
    %99 = vector.load %arg8[%c0_67, %c0_68, %c0_69] : memref<9x4x16xbf16, #tpu.memory_space<vmem>>, vector<1x4x16xbf16>
    %100 = vector.shape_cast %99 : vector<1x4x16xbf16> to vector<4x16xbf16>
    %cst_70 = arith.constant dense<0.000000e+00> : vector<128x16xf32>
    %101 = tpu.matmul %97, %100, %cst_70 {dimension_numbers = #tpu.dot_dimension_numbers<[1], [0], [0], [1], [0, 0, 1, 1], [], []>} : vector<128x4xbf16>, vector<4x16xbf16>, vector<128x16xf32> -> vector<128x16xf32>
    %102 = arith.truncf %101 : vector<128x16xf32> to vector<128x16xbf16>
    %c0_71 = arith.constant 0 : index
    %c0_72 = arith.constant 0 : index
    %c0_73 = arith.constant 0 : index
    %103 = vector.load %arg7[%c0_71, %c0_72, %c0_73] : memref<9x128x128xbf16, #tpu.memory_space<vmem>>, vector<1x128x128xbf16>
    %104 = vector.shape_cast %103 : vector<1x128x128xbf16> to vector<128x128xbf16>
    %cst_74 = arith.constant dense<0.000000e+00> : vector<128x16xf32>
    %105 = tpu.matmul %104, %102, %cst_74 {dimension_numbers = #tpu.dot_dimension_numbers<[1], [0], [0], [1], [0, 0, 1, 1], [], []>} : vector<128x128xbf16>, vector<128x16xbf16>, vector<128x16xf32> -> vector<128x16xf32>
    %106 = arith.addf %98, %105 : vector<128x16xf32>
    %c1_75 = arith.constant 1 : index
    %c0_76 = arith.constant 0 : index
    %c0_77 = arith.constant 0 : index
    %107 = vector.load %arg8[%c1_75, %c0_76, %c0_77] : memref<9x4x16xbf16, #tpu.memory_space<vmem>>, vector<1x4x16xbf16>
    %108 = vector.shape_cast %107 : vector<1x4x16xbf16> to vector<4x16xbf16>
    %cst_78 = arith.constant dense<0.000000e+00> : vector<128x16xf32>
    %109 = tpu.matmul %97, %108, %cst_78 {dimension_numbers = #tpu.dot_dimension_numbers<[1], [0], [0], [1], [0, 0, 1, 1], [], []>} : vector<128x4xbf16>, vector<4x16xbf16>, vector<128x16xf32> -> vector<128x16xf32>
    %110 = arith.truncf %109 : vector<128x16xf32> to vector<128x16xbf16>
    %c1_79 = arith.constant 1 : index
    %c0_80 = arith.constant 0 : index
    %c0_81 = arith.constant 0 : index
    %111 = vector.load %arg7[%c1_79, %c0_80, %c0_81] : memref<9x128x128xbf16, #tpu.memory_space<vmem>>, vector<1x128x128xbf16>
    %112 = vector.shape_cast %111 : vector<1x128x128xbf16> to vector<128x128xbf16>
    %cst_82 = arith.constant dense<0.000000e+00> : vector<128x16xf32>
    %113 = tpu.matmul %112, %110, %cst_82 {dimension_numbers = #tpu.dot_dimension_numbers<[1], [0], [0], [1], [0, 0, 1, 1], [], []>} : vector<128x128xbf16>, vector<128x16xbf16>, vector<128x16xf32> -> vector<128x16xf32>
    %114 = arith.addf %106, %113 : vector<128x16xf32>
    %c2_83 = arith.constant 2 : index
    %c0_84 = arith.constant 0 : index
    %c0_85 = arith.constant 0 : index
    %115 = vector.load %arg8[%c2_83, %c0_84, %c0_85] : memref<9x4x16xbf16, #tpu.memory_space<vmem>>, vector<1x4x16xbf16>
    %116 = vector.shape_cast %115 : vector<1x4x16xbf16> to vector<4x16xbf16>
    %cst_86 = arith.constant dense<0.000000e+00> : vector<128x16xf32>
    %117 = tpu.matmul %97, %116, %cst_86 {dimension_numbers = #tpu.dot_dimension_numbers<[1], [0], [0], [1], [0, 0, 1, 1], [], []>} : vector<128x4xbf16>, vector<4x16xbf16>, vector<128x16xf32> -> vector<128x16xf32>
    %118 = arith.truncf %117 : vector<128x16xf32> to vector<128x16xbf16>
    %c2_87 = arith.constant 2 : index
    %c0_88 = arith.constant 0 : index
    %c0_89 = arith.constant 0 : index
    %119 = vector.load %arg7[%c2_87, %c0_88, %c0_89] : memref<9x128x128xbf16, #tpu.memory_space<vmem>>, vector<1x128x128xbf16>
    %120 = vector.shape_cast %119 : vector<1x128x128xbf16> to vector<128x128xbf16>
    %cst_90 = arith.constant dense<0.000000e+00> : vector<128x16xf32>
    %121 = tpu.matmul %120, %118, %cst_90 {dimension_numbers = #tpu.dot_dimension_numbers<[1], [0], [0], [1], [0, 0, 1, 1], [], []>} : vector<128x128xbf16>, vector<128x16xbf16>, vector<128x16xf32> -> vector<128x16xf32>
    %122 = arith.addf %114, %121 : vector<128x16xf32>
    %c3_91 = arith.constant 3 : index
    %c0_92 = arith.constant 0 : index
    %c0_93 = arith.constant 0 : index
    %123 = vector.load %arg8[%c3_91, %c0_92, %c0_93] : memref<9x4x16xbf16, #tpu.memory_space<vmem>>, vector<1x4x16xbf16>
    %124 = vector.shape_cast %123 : vector<1x4x16xbf16> to vector<4x16xbf16>
    %cst_94 = arith.constant dense<0.000000e+00> : vector<128x16xf32>
    %125 = tpu.matmul %97, %124, %cst_94 {dimension_numbers = #tpu.dot_dimension_numbers<[1], [0], [0], [1], [0, 0, 1, 1], [], []>} : vector<128x4xbf16>, vector<4x16xbf16>, vector<128x16xf32> -> vector<128x16xf32>
    %126 = arith.truncf %125 : vector<128x16xf32> to vector<128x16xbf16>
    %c3_95 = arith.constant 3 : index
    %c0_96 = arith.constant 0 : index
    %c0_97 = arith.constant 0 : index
    %127 = vector.load %arg7[%c3_95, %c0_96, %c0_97] : memref<9x128x128xbf16, #tpu.memory_space<vmem>>, vector<1x128x128xbf16>
    %128 = vector.shape_cast %127 : vector<1x128x128xbf16> to vector<128x128xbf16>
    %cst_98 = arith.constant dense<0.000000e+00> : vector<128x16xf32>
    %129 = tpu.matmul %128, %126, %cst_98 {dimension_numbers = #tpu.dot_dimension_numbers<[1], [0], [0], [1], [0, 0, 1, 1], [], []>} : vector<128x128xbf16>, vector<128x16xbf16>, vector<128x16xf32> -> vector<128x16xf32>
    %130 = arith.addf %122, %129 : vector<128x16xf32>
    %c4_99 = arith.constant 4 : index
    %c0_100 = arith.constant 0 : index
    %c0_101 = arith.constant 0 : index
    %131 = vector.load %arg8[%c4_99, %c0_100, %c0_101] : memref<9x4x16xbf16, #tpu.memory_space<vmem>>, vector<1x4x16xbf16>
    %132 = vector.shape_cast %131 : vector<1x4x16xbf16> to vector<4x16xbf16>
    %cst_102 = arith.constant dense<0.000000e+00> : vector<128x16xf32>
    %133 = tpu.matmul %97, %132, %cst_102 {dimension_numbers = #tpu.dot_dimension_numbers<[1], [0], [0], [1], [0, 0, 1, 1], [], []>} : vector<128x4xbf16>, vector<4x16xbf16>, vector<128x16xf32> -> vector<128x16xf32>
    %134 = arith.truncf %133 : vector<128x16xf32> to vector<128x16xbf16>
    %c4_103 = arith.constant 4 : index
    %c0_104 = arith.constant 0 : index
    %c0_105 = arith.constant 0 : index
    %135 = vector.load %arg7[%c4_103, %c0_104, %c0_105] : memref<9x128x128xbf16, #tpu.memory_space<vmem>>, vector<1x128x128xbf16>
    %136 = vector.shape_cast %135 : vector<1x128x128xbf16> to vector<128x128xbf16>
    %cst_106 = arith.constant dense<0.000000e+00> : vector<128x16xf32>
    %137 = tpu.matmul %136, %134, %cst_106 {dimension_numbers = #tpu.dot_dimension_numbers<[1], [0], [0], [1], [0, 0, 1, 1], [], []>} : vector<128x128xbf16>, vector<128x16xbf16>, vector<128x16xf32> -> vector<128x16xf32>
    %138 = arith.addf %130, %137 : vector<128x16xf32>
    %c5_107 = arith.constant 5 : index
    %c0_108 = arith.constant 0 : index
    %c0_109 = arith.constant 0 : index
    %139 = vector.load %arg8[%c5_107, %c0_108, %c0_109] : memref<9x4x16xbf16, #tpu.memory_space<vmem>>, vector<1x4x16xbf16>
    %140 = vector.shape_cast %139 : vector<1x4x16xbf16> to vector<4x16xbf16>
    %cst_110 = arith.constant dense<0.000000e+00> : vector<128x16xf32>
    %141 = tpu.matmul %97, %140, %cst_110 {dimension_numbers = #tpu.dot_dimension_numbers<[1], [0], [0], [1], [0, 0, 1, 1], [], []>} : vector<128x4xbf16>, vector<4x16xbf16>, vector<128x16xf32> -> vector<128x16xf32>
    %142 = arith.truncf %141 : vector<128x16xf32> to vector<128x16xbf16>
    %c5_111 = arith.constant 5 : index
    %c0_112 = arith.constant 0 : index
    %c0_113 = arith.constant 0 : index
    %143 = vector.load %arg7[%c5_111, %c0_112, %c0_113] : memref<9x128x128xbf16, #tpu.memory_space<vmem>>, vector<1x128x128xbf16>
    %144 = vector.shape_cast %143 : vector<1x128x128xbf16> to vector<128x128xbf16>
    %cst_114 = arith.constant dense<0.000000e+00> : vector<128x16xf32>
    %145 = tpu.matmul %144, %142, %cst_114 {dimension_numbers = #tpu.dot_dimension_numbers<[1], [0], [0], [1], [0, 0, 1, 1], [], []>} : vector<128x128xbf16>, vector<128x16xbf16>, vector<128x16xf32> -> vector<128x16xf32>
    %146 = arith.addf %138, %145 : vector<128x16xf32>
    %c6_115 = arith.constant 6 : index
    %c0_116 = arith.constant 0 : index
    %c0_117 = arith.constant 0 : index
    %147 = vector.load %arg8[%c6_115, %c0_116, %c0_117] : memref<9x4x16xbf16, #tpu.memory_space<vmem>>, vector<1x4x16xbf16>
    %148 = vector.shape_cast %147 : vector<1x4x16xbf16> to vector<4x16xbf16>
    %cst_118 = arith.constant dense<0.000000e+00> : vector<128x16xf32>
    %149 = tpu.matmul %97, %148, %cst_118 {dimension_numbers = #tpu.dot_dimension_numbers<[1], [0], [0], [1], [0, 0, 1, 1], [], []>} : vector<128x4xbf16>, vector<4x16xbf16>, vector<128x16xf32> -> vector<128x16xf32>
    %150 = arith.truncf %149 : vector<128x16xf32> to vector<128x16xbf16>
    %c6_119 = arith.constant 6 : index
    %c0_120 = arith.constant 0 : index
    %c0_121 = arith.constant 0 : index
    %151 = vector.load %arg7[%c6_119, %c0_120, %c0_121] : memref<9x128x128xbf16, #tpu.memory_space<vmem>>, vector<1x128x128xbf16>
    %152 = vector.shape_cast %151 : vector<1x128x128xbf16> to vector<128x128xbf16>
    %cst_122 = arith.constant dense<0.000000e+00> : vector<128x16xf32>
    %153 = tpu.matmul %152, %150, %cst_122 {dimension_numbers = #tpu.dot_dimension_numbers<[1], [0], [0], [1], [0, 0, 1, 1], [], []>} : vector<128x128xbf16>, vector<128x16xbf16>, vector<128x16xf32> -> vector<128x16xf32>
    %154 = arith.addf %146, %153 : vector<128x16xf32>
    %c7_123 = arith.constant 7 : index
    %c0_124 = arith.constant 0 : index
    %c0_125 = arith.constant 0 : index
    %155 = vector.load %arg8[%c7_123, %c0_124, %c0_125] : memref<9x4x16xbf16, #tpu.memory_space<vmem>>, vector<1x4x16xbf16>
    %156 = vector.shape_cast %155 : vector<1x4x16xbf16> to vector<4x16xbf16>
    %cst_126 = arith.constant dense<0.000000e+00> : vector<128x16xf32>
    %157 = tpu.matmul %97, %156, %cst_126 {dimension_numbers = #tpu.dot_dimension_numbers<[1], [0], [0], [1], [0, 0, 1, 1], [], []>} : vector<128x4xbf16>, vector<4x16xbf16>, vector<128x16xf32> -> vector<128x16xf32>
    %158 = arith.truncf %157 : vector<128x16xf32> to vector<128x16xbf16>
    %c7_127 = arith.constant 7 : index
    %c0_128 = arith.constant 0 : index
    %c0_129 = arith.constant 0 : index
    %159 = vector.load %arg7[%c7_127, %c0_128, %c0_129] : memref<9x128x128xbf16, #tpu.memory_space<vmem>>, vector<1x128x128xbf16>
    %160 = vector.shape_cast %159 : vector<1x128x128xbf16> to vector<128x128xbf16>
    %cst_130 = arith.constant dense<0.000000e+00> : vector<128x16xf32>
    %161 = tpu.matmul %160, %158, %cst_130 {dimension_numbers = #tpu.dot_dimension_numbers<[1], [0], [0], [1], [0, 0, 1, 1], [], []>} : vector<128x128xbf16>, vector<128x16xbf16>, vector<128x16xf32> -> vector<128x16xf32>
    %162 = arith.addf %154, %161 : vector<128x16xf32>
    %c8_131 = arith.constant 8 : index
    %c0_132 = arith.constant 0 : index
    %c0_133 = arith.constant 0 : index
    %163 = vector.load %arg8[%c8_131, %c0_132, %c0_133] : memref<9x4x16xbf16, #tpu.memory_space<vmem>>, vector<1x4x16xbf16>
    %164 = vector.shape_cast %163 : vector<1x4x16xbf16> to vector<4x16xbf16>
    %cst_134 = arith.constant dense<0.000000e+00> : vector<128x16xf32>
    %165 = tpu.matmul %97, %164, %cst_134 {dimension_numbers = #tpu.dot_dimension_numbers<[1], [0], [0], [1], [0, 0, 1, 1], [], []>} : vector<128x4xbf16>, vector<4x16xbf16>, vector<128x16xf32> -> vector<128x16xf32>
    %166 = arith.truncf %165 : vector<128x16xf32> to vector<128x16xbf16>
    %c8_135 = arith.constant 8 : index
    %c0_136 = arith.constant 0 : index
    %c0_137 = arith.constant 0 : index
    %167 = vector.load %arg7[%c8_135, %c0_136, %c0_137] : memref<9x128x128xbf16, #tpu.memory_space<vmem>>, vector<1x128x128xbf16>
    %168 = vector.shape_cast %167 : vector<1x128x128xbf16> to vector<128x128xbf16>
    %cst_138 = arith.constant dense<0.000000e+00> : vector<128x16xf32>
    %169 = tpu.matmul %168, %166, %cst_138 {dimension_numbers = #tpu.dot_dimension_numbers<[1], [0], [0], [1], [0, 0, 1, 1], [], []>} : vector<128x128xbf16>, vector<128x16xbf16>, vector<128x16xf32> -> vector<128x16xf32>
    %170 = arith.addf %162, %169 : vector<128x16xf32>
    %c0_139 = arith.constant 0 : index
    %c0_140 = arith.constant 0 : index
    %171 = vector.load %arg9[%c0_139, %c0_140] : memref<128x1xf32, #tpu.memory_space<vmem>>, vector<128x1xf32>
    %172 = vector.broadcast %171 : vector<128x1xf32> to vector<128x16xf32>
    %173 = arith.addf %170, %172 : vector<128x16xf32>
    %cst_141 = arith.constant 2.000000e-01 : f32
    %174 = vector.broadcast %cst_141 : f32 to vector<128x16xf32>
    %175 = arith.mulf %174, %173 : vector<128x16xf32>
    %176 = arith.maximumf %173, %175 : vector<128x16xf32>
    %177 = arith.truncf %176 : vector<128x16xf32> to vector<128x16xbf16>
    %cst_142 = arith.constant 0.000000e+00 : f32
    %178 = vector.broadcast %cst_142 : f32 to vector<128x64xf32>
    %c0_143 = arith.constant 0 : index
    %c0_144 = arith.constant 0 : index
    %c0_145 = arith.constant 0 : index
    %179 = vector.load %arg11[%c0_143, %c0_144, %c0_145] : memref<9x16x64xbf16, #tpu.memory_space<vmem>>, vector<1x16x64xbf16>
    %180 = vector.shape_cast %179 : vector<1x16x64xbf16> to vector<16x64xbf16>
    %cst_146 = arith.constant dense<0.000000e+00> : vector<128x64xf32>
    %181 = tpu.matmul %177, %180, %cst_146 {dimension_numbers = #tpu.dot_dimension_numbers<[1], [0], [0], [1], [0, 0, 1, 1], [], []>} : vector<128x16xbf16>, vector<16x64xbf16>, vector<128x64xf32> -> vector<128x64xf32>
    %182 = arith.truncf %181 : vector<128x64xf32> to vector<128x64xbf16>
    %c0_147 = arith.constant 0 : index
    %c0_148 = arith.constant 0 : index
    %c0_149 = arith.constant 0 : index
    %183 = vector.load %arg10[%c0_147, %c0_148, %c0_149] : memref<9x128x128xbf16, #tpu.memory_space<vmem>>, vector<1x128x128xbf16>
    %184 = vector.shape_cast %183 : vector<1x128x128xbf16> to vector<128x128xbf16>
    %cst_150 = arith.constant dense<0.000000e+00> : vector<128x64xf32>
    %185 = tpu.matmul %184, %182, %cst_150 {dimension_numbers = #tpu.dot_dimension_numbers<[1], [0], [0], [1], [0, 0, 1, 1], [], []>} : vector<128x128xbf16>, vector<128x64xbf16>, vector<128x64xf32> -> vector<128x64xf32>
    %186 = arith.addf %178, %185 : vector<128x64xf32>
    %c1_151 = arith.constant 1 : index
    %c0_152 = arith.constant 0 : index
    %c0_153 = arith.constant 0 : index
    %187 = vector.load %arg11[%c1_151, %c0_152, %c0_153] : memref<9x16x64xbf16, #tpu.memory_space<vmem>>, vector<1x16x64xbf16>
    %188 = vector.shape_cast %187 : vector<1x16x64xbf16> to vector<16x64xbf16>
    %cst_154 = arith.constant dense<0.000000e+00> : vector<128x64xf32>
    %189 = tpu.matmul %177, %188, %cst_154 {dimension_numbers = #tpu.dot_dimension_numbers<[1], [0], [0], [1], [0, 0, 1, 1], [], []>} : vector<128x16xbf16>, vector<16x64xbf16>, vector<128x64xf32> -> vector<128x64xf32>
    %190 = arith.truncf %189 : vector<128x64xf32> to vector<128x64xbf16>
    %c1_155 = arith.constant 1 : index
    %c0_156 = arith.constant 0 : index
    %c0_157 = arith.constant 0 : index
    %191 = vector.load %arg10[%c1_155, %c0_156, %c0_157] : memref<9x128x128xbf16, #tpu.memory_space<vmem>>, vector<1x128x128xbf16>
    %192 = vector.shape_cast %191 : vector<1x128x128xbf16> to vector<128x128xbf16>
    %cst_158 = arith.constant dense<0.000000e+00> : vector<128x64xf32>
    %193 = tpu.matmul %192, %190, %cst_158 {dimension_numbers = #tpu.dot_dimension_numbers<[1], [0], [0], [1], [0, 0, 1, 1], [], []>} : vector<128x128xbf16>, vector<128x64xbf16>, vector<128x64xf32> -> vector<128x64xf32>
    %194 = arith.addf %186, %193 : vector<128x64xf32>
    %c2_159 = arith.constant 2 : index
    %c0_160 = arith.constant 0 : index
    %c0_161 = arith.constant 0 : index
    %195 = vector.load %arg11[%c2_159, %c0_160, %c0_161] : memref<9x16x64xbf16, #tpu.memory_space<vmem>>, vector<1x16x64xbf16>
    %196 = vector.shape_cast %195 : vector<1x16x64xbf16> to vector<16x64xbf16>
    %cst_162 = arith.constant dense<0.000000e+00> : vector<128x64xf32>
    %197 = tpu.matmul %177, %196, %cst_162 {dimension_numbers = #tpu.dot_dimension_numbers<[1], [0], [0], [1], [0, 0, 1, 1], [], []>} : vector<128x16xbf16>, vector<16x64xbf16>, vector<128x64xf32> -> vector<128x64xf32>
    %198 = arith.truncf %197 : vector<128x64xf32> to vector<128x64xbf16>
    %c2_163 = arith.constant 2 : index
    %c0_164 = arith.constant 0 : index
    %c0_165 = arith.constant 0 : index
    %199 = vector.load %arg10[%c2_163, %c0_164, %c0_165] : memref<9x128x128xbf16, #tpu.memory_space<vmem>>, vector<1x128x128xbf16>
    %200 = vector.shape_cast %199 : vector<1x128x128xbf16> to vector<128x128xbf16>
    %cst_166 = arith.constant dense<0.000000e+00> : vector<128x64xf32>
    %201 = tpu.matmul %200, %198, %cst_166 {dimension_numbers = #tpu.dot_dimension_numbers<[1], [0], [0], [1], [0, 0, 1, 1], [], []>} : vector<128x128xbf16>, vector<128x64xbf16>, vector<128x64xf32> -> vector<128x64xf32>
    %202 = arith.addf %194, %201 : vector<128x64xf32>
    %c3_167 = arith.constant 3 : index
    %c0_168 = arith.constant 0 : index
    %c0_169 = arith.constant 0 : index
    %203 = vector.load %arg11[%c3_167, %c0_168, %c0_169] : memref<9x16x64xbf16, #tpu.memory_space<vmem>>, vector<1x16x64xbf16>
    %204 = vector.shape_cast %203 : vector<1x16x64xbf16> to vector<16x64xbf16>
    %cst_170 = arith.constant dense<0.000000e+00> : vector<128x64xf32>
    %205 = tpu.matmul %177, %204, %cst_170 {dimension_numbers = #tpu.dot_dimension_numbers<[1], [0], [0], [1], [0, 0, 1, 1], [], []>} : vector<128x16xbf16>, vector<16x64xbf16>, vector<128x64xf32> -> vector<128x64xf32>
    %206 = arith.truncf %205 : vector<128x64xf32> to vector<128x64xbf16>
    %c3_171 = arith.constant 3 : index
    %c0_172 = arith.constant 0 : index
    %c0_173 = arith.constant 0 : index
    %207 = vector.load %arg10[%c3_171, %c0_172, %c0_173] : memref<9x128x128xbf16, #tpu.memory_space<vmem>>, vector<1x128x128xbf16>
    %208 = vector.shape_cast %207 : vector<1x128x128xbf16> to vector<128x128xbf16>
    %cst_174 = arith.constant dense<0.000000e+00> : vector<128x64xf32>
    %209 = tpu.matmul %208, %206, %cst_174 {dimension_numbers = #tpu.dot_dimension_numbers<[1], [0], [0], [1], [0, 0, 1, 1], [], []>} : vector<128x128xbf16>, vector<128x64xbf16>, vector<128x64xf32> -> vector<128x64xf32>
    %210 = arith.addf %202, %209 : vector<128x64xf32>
    %c4_175 = arith.constant 4 : index
    %c0_176 = arith.constant 0 : index
    %c0_177 = arith.constant 0 : index
    %211 = vector.load %arg11[%c4_175, %c0_176, %c0_177] : memref<9x16x64xbf16, #tpu.memory_space<vmem>>, vector<1x16x64xbf16>
    %212 = vector.shape_cast %211 : vector<1x16x64xbf16> to vector<16x64xbf16>
    %cst_178 = arith.constant dense<0.000000e+00> : vector<128x64xf32>
    %213 = tpu.matmul %177, %212, %cst_178 {dimension_numbers = #tpu.dot_dimension_numbers<[1], [0], [0], [1], [0, 0, 1, 1], [], []>} : vector<128x16xbf16>, vector<16x64xbf16>, vector<128x64xf32> -> vector<128x64xf32>
    %214 = arith.truncf %213 : vector<128x64xf32> to vector<128x64xbf16>
    %c4_179 = arith.constant 4 : index
    %c0_180 = arith.constant 0 : index
    %c0_181 = arith.constant 0 : index
    %215 = vector.load %arg10[%c4_179, %c0_180, %c0_181] : memref<9x128x128xbf16, #tpu.memory_space<vmem>>, vector<1x128x128xbf16>
    %216 = vector.shape_cast %215 : vector<1x128x128xbf16> to vector<128x128xbf16>
    %cst_182 = arith.constant dense<0.000000e+00> : vector<128x64xf32>
    %217 = tpu.matmul %216, %214, %cst_182 {dimension_numbers = #tpu.dot_dimension_numbers<[1], [0], [0], [1], [0, 0, 1, 1], [], []>} : vector<128x128xbf16>, vector<128x64xbf16>, vector<128x64xf32> -> vector<128x64xf32>
    %218 = arith.addf %210, %217 : vector<128x64xf32>
    %c5_183 = arith.constant 5 : index
    %c0_184 = arith.constant 0 : index
    %c0_185 = arith.constant 0 : index
    %219 = vector.load %arg11[%c5_183, %c0_184, %c0_185] : memref<9x16x64xbf16, #tpu.memory_space<vmem>>, vector<1x16x64xbf16>
    %220 = vector.shape_cast %219 : vector<1x16x64xbf16> to vector<16x64xbf16>
    %cst_186 = arith.constant dense<0.000000e+00> : vector<128x64xf32>
    %221 = tpu.matmul %177, %220, %cst_186 {dimension_numbers = #tpu.dot_dimension_numbers<[1], [0], [0], [1], [0, 0, 1, 1], [], []>} : vector<128x16xbf16>, vector<16x64xbf16>, vector<128x64xf32> -> vector<128x64xf32>
    %222 = arith.truncf %221 : vector<128x64xf32> to vector<128x64xbf16>
    %c5_187 = arith.constant 5 : index
    %c0_188 = arith.constant 0 : index
    %c0_189 = arith.constant 0 : index
    %223 = vector.load %arg10[%c5_187, %c0_188, %c0_189] : memref<9x128x128xbf16, #tpu.memory_space<vmem>>, vector<1x128x128xbf16>
    %224 = vector.shape_cast %223 : vector<1x128x128xbf16> to vector<128x128xbf16>
    %cst_190 = arith.constant dense<0.000000e+00> : vector<128x64xf32>
    %225 = tpu.matmul %224, %222, %cst_190 {dimension_numbers = #tpu.dot_dimension_numbers<[1], [0], [0], [1], [0, 0, 1, 1], [], []>} : vector<128x128xbf16>, vector<128x64xbf16>, vector<128x64xf32> -> vector<128x64xf32>
    %226 = arith.addf %218, %225 : vector<128x64xf32>
    %c6_191 = arith.constant 6 : index
    %c0_192 = arith.constant 0 : index
    %c0_193 = arith.constant 0 : index
    %227 = vector.load %arg11[%c6_191, %c0_192, %c0_193] : memref<9x16x64xbf16, #tpu.memory_space<vmem>>, vector<1x16x64xbf16>
    %228 = vector.shape_cast %227 : vector<1x16x64xbf16> to vector<16x64xbf16>
    %cst_194 = arith.constant dense<0.000000e+00> : vector<128x64xf32>
    %229 = tpu.matmul %177, %228, %cst_194 {dimension_numbers = #tpu.dot_dimension_numbers<[1], [0], [0], [1], [0, 0, 1, 1], [], []>} : vector<128x16xbf16>, vector<16x64xbf16>, vector<128x64xf32> -> vector<128x64xf32>
    %230 = arith.truncf %229 : vector<128x64xf32> to vector<128x64xbf16>
    %c6_195 = arith.constant 6 : index
    %c0_196 = arith.constant 0 : index
    %c0_197 = arith.constant 0 : index
    %231 = vector.load %arg10[%c6_195, %c0_196, %c0_197] : memref<9x128x128xbf16, #tpu.memory_space<vmem>>, vector<1x128x128xbf16>
    %232 = vector.shape_cast %231 : vector<1x128x128xbf16> to vector<128x128xbf16>
    %cst_198 = arith.constant dense<0.000000e+00> : vector<128x64xf32>
    %233 = tpu.matmul %232, %230, %cst_198 {dimension_numbers = #tpu.dot_dimension_numbers<[1], [0], [0], [1], [0, 0, 1, 1], [], []>} : vector<128x128xbf16>, vector<128x64xbf16>, vector<128x64xf32> -> vector<128x64xf32>
    %234 = arith.addf %226, %233 : vector<128x64xf32>
    %c7_199 = arith.constant 7 : index
    %c0_200 = arith.constant 0 : index
    %c0_201 = arith.constant 0 : index
    %235 = vector.load %arg11[%c7_199, %c0_200, %c0_201] : memref<9x16x64xbf16, #tpu.memory_space<vmem>>, vector<1x16x64xbf16>
    %236 = vector.shape_cast %235 : vector<1x16x64xbf16> to vector<16x64xbf16>
    %cst_202 = arith.constant dense<0.000000e+00> : vector<128x64xf32>
    %237 = tpu.matmul %177, %236, %cst_202 {dimension_numbers = #tpu.dot_dimension_numbers<[1], [0], [0], [1], [0, 0, 1, 1], [], []>} : vector<128x16xbf16>, vector<16x64xbf16>, vector<128x64xf32> -> vector<128x64xf32>
    %238 = arith.truncf %237 : vector<128x64xf32> to vector<128x64xbf16>
    %c7_203 = arith.constant 7 : index
    %c0_204 = arith.constant 0 : index
    %c0_205 = arith.constant 0 : index
    %239 = vector.load %arg10[%c7_203, %c0_204, %c0_205] : memref<9x128x128xbf16, #tpu.memory_space<vmem>>, vector<1x128x128xbf16>
    %240 = vector.shape_cast %239 : vector<1x128x128xbf16> to vector<128x128xbf16>
    %cst_206 = arith.constant dense<0.000000e+00> : vector<128x64xf32>
    %241 = tpu.matmul %240, %238, %cst_206 {dimension_numbers = #tpu.dot_dimension_numbers<[1], [0], [0], [1], [0, 0, 1, 1], [], []>} : vector<128x128xbf16>, vector<128x64xbf16>, vector<128x64xf32> -> vector<128x64xf32>
    %242 = arith.addf %234, %241 : vector<128x64xf32>
    %c8_207 = arith.constant 8 : index
    %c0_208 = arith.constant 0 : index
    %c0_209 = arith.constant 0 : index
    %243 = vector.load %arg11[%c8_207, %c0_208, %c0_209] : memref<9x16x64xbf16, #tpu.memory_space<vmem>>, vector<1x16x64xbf16>
    %244 = vector.shape_cast %243 : vector<1x16x64xbf16> to vector<16x64xbf16>
    %cst_210 = arith.constant dense<0.000000e+00> : vector<128x64xf32>
    %245 = tpu.matmul %177, %244, %cst_210 {dimension_numbers = #tpu.dot_dimension_numbers<[1], [0], [0], [1], [0, 0, 1, 1], [], []>} : vector<128x16xbf16>, vector<16x64xbf16>, vector<128x64xf32> -> vector<128x64xf32>
    %246 = arith.truncf %245 : vector<128x64xf32> to vector<128x64xbf16>
    %c8_211 = arith.constant 8 : index
    %c0_212 = arith.constant 0 : index
    %c0_213 = arith.constant 0 : index
    %247 = vector.load %arg10[%c8_211, %c0_212, %c0_213] : memref<9x128x128xbf16, #tpu.memory_space<vmem>>, vector<1x128x128xbf16>
    %248 = vector.shape_cast %247 : vector<1x128x128xbf16> to vector<128x128xbf16>
    %cst_214 = arith.constant dense<0.000000e+00> : vector<128x64xf32>
    %249 = tpu.matmul %248, %246, %cst_214 {dimension_numbers = #tpu.dot_dimension_numbers<[1], [0], [0], [1], [0, 0, 1, 1], [], []>} : vector<128x128xbf16>, vector<128x64xbf16>, vector<128x64xf32> -> vector<128x64xf32>
    %250 = arith.addf %242, %249 : vector<128x64xf32>
    %c0_215 = arith.constant 0 : index
    %c0_216 = arith.constant 0 : index
    %251 = vector.load %arg12[%c0_215, %c0_216] : memref<128x1xf32, #tpu.memory_space<vmem>>, vector<128x1xf32>
    %252 = vector.broadcast %251 : vector<128x1xf32> to vector<128x64xf32>
    %253 = arith.addf %250, %252 : vector<128x64xf32>
    %cst_217 = arith.constant 2.000000e-01 : f32
    %254 = vector.broadcast %cst_217 : f32 to vector<128x64xf32>
    %255 = arith.mulf %254, %253 : vector<128x64xf32>
    %256 = arith.maximumf %253, %255 : vector<128x64xf32>
    %257 = arith.truncf %256 : vector<128x64xf32> to vector<128x64xbf16>
    %cst_218 = arith.constant 0.000000e+00 : f32
    %258 = vector.broadcast %cst_218 : f32 to vector<128x256xf32>
    %c0_219 = arith.constant 0 : index
    %c0_220 = arith.constant 0 : index
    %c0_221 = arith.constant 0 : index
    %259 = vector.load %arg14[%c0_219, %c0_220, %c0_221] : memref<9x64x256xbf16, #tpu.memory_space<vmem>>, vector<1x64x256xbf16>
    %260 = vector.shape_cast %259 : vector<1x64x256xbf16> to vector<64x256xbf16>
    %cst_222 = arith.constant dense<0.000000e+00> : vector<128x256xf32>
    %261 = tpu.matmul %257, %260, %cst_222 {dimension_numbers = #tpu.dot_dimension_numbers<[1], [0], [0], [1], [0, 0, 1, 1], [], []>} : vector<128x64xbf16>, vector<64x256xbf16>, vector<128x256xf32> -> vector<128x256xf32>
    %262 = arith.truncf %261 : vector<128x256xf32> to vector<128x256xbf16>
    %c0_223 = arith.constant 0 : index
    %c0_224 = arith.constant 0 : index
    %c0_225 = arith.constant 0 : index
    %263 = vector.load %arg13[%c0_223, %c0_224, %c0_225] : memref<9x128x128xbf16, #tpu.memory_space<vmem>>, vector<1x128x128xbf16>
    %264 = vector.shape_cast %263 : vector<1x128x128xbf16> to vector<128x128xbf16>
    %cst_226 = arith.constant dense<0.000000e+00> : vector<128x256xf32>
    %265 = tpu.matmul %264, %262, %cst_226 {dimension_numbers = #tpu.dot_dimension_numbers<[1], [0], [0], [1], [0, 0, 1, 1], [], []>} : vector<128x128xbf16>, vector<128x256xbf16>, vector<128x256xf32> -> vector<128x256xf32>
    %266 = arith.addf %258, %265 : vector<128x256xf32>
    %c1_227 = arith.constant 1 : index
    %c0_228 = arith.constant 0 : index
    %c0_229 = arith.constant 0 : index
    %267 = vector.load %arg14[%c1_227, %c0_228, %c0_229] : memref<9x64x256xbf16, #tpu.memory_space<vmem>>, vector<1x64x256xbf16>
    %268 = vector.shape_cast %267 : vector<1x64x256xbf16> to vector<64x256xbf16>
    %cst_230 = arith.constant dense<0.000000e+00> : vector<128x256xf32>
    %269 = tpu.matmul %257, %268, %cst_230 {dimension_numbers = #tpu.dot_dimension_numbers<[1], [0], [0], [1], [0, 0, 1, 1], [], []>} : vector<128x64xbf16>, vector<64x256xbf16>, vector<128x256xf32> -> vector<128x256xf32>
    %270 = arith.truncf %269 : vector<128x256xf32> to vector<128x256xbf16>
    %c1_231 = arith.constant 1 : index
    %c0_232 = arith.constant 0 : index
    %c0_233 = arith.constant 0 : index
    %271 = vector.load %arg13[%c1_231, %c0_232, %c0_233] : memref<9x128x128xbf16, #tpu.memory_space<vmem>>, vector<1x128x128xbf16>
    %272 = vector.shape_cast %271 : vector<1x128x128xbf16> to vector<128x128xbf16>
    %cst_234 = arith.constant dense<0.000000e+00> : vector<128x256xf32>
    %273 = tpu.matmul %272, %270, %cst_234 {dimension_numbers = #tpu.dot_dimension_numbers<[1], [0], [0], [1], [0, 0, 1, 1], [], []>} : vector<128x128xbf16>, vector<128x256xbf16>, vector<128x256xf32> -> vector<128x256xf32>
    %274 = arith.addf %266, %273 : vector<128x256xf32>
    %c2_235 = arith.constant 2 : index
    %c0_236 = arith.constant 0 : index
    %c0_237 = arith.constant 0 : index
    %275 = vector.load %arg14[%c2_235, %c0_236, %c0_237] : memref<9x64x256xbf16, #tpu.memory_space<vmem>>, vector<1x64x256xbf16>
    %276 = vector.shape_cast %275 : vector<1x64x256xbf16> to vector<64x256xbf16>
    %cst_238 = arith.constant dense<0.000000e+00> : vector<128x256xf32>
    %277 = tpu.matmul %257, %276, %cst_238 {dimension_numbers = #tpu.dot_dimension_numbers<[1], [0], [0], [1], [0, 0, 1, 1], [], []>} : vector<128x64xbf16>, vector<64x256xbf16>, vector<128x256xf32> -> vector<128x256xf32>
    %278 = arith.truncf %277 : vector<128x256xf32> to vector<128x256xbf16>
    %c2_239 = arith.constant 2 : index
    %c0_240 = arith.constant 0 : index
    %c0_241 = arith.constant 0 : index
    %279 = vector.load %arg13[%c2_239, %c0_240, %c0_241] : memref<9x128x128xbf16, #tpu.memory_space<vmem>>, vector<1x128x128xbf16>
    %280 = vector.shape_cast %279 : vector<1x128x128xbf16> to vector<128x128xbf16>
    %cst_242 = arith.constant dense<0.000000e+00> : vector<128x256xf32>
    %281 = tpu.matmul %280, %278, %cst_242 {dimension_numbers = #tpu.dot_dimension_numbers<[1], [0], [0], [1], [0, 0, 1, 1], [], []>} : vector<128x128xbf16>, vector<128x256xbf16>, vector<128x256xf32> -> vector<128x256xf32>
    %282 = arith.addf %274, %281 : vector<128x256xf32>
    %c3_243 = arith.constant 3 : index
    %c0_244 = arith.constant 0 : index
    %c0_245 = arith.constant 0 : index
    %283 = vector.load %arg14[%c3_243, %c0_244, %c0_245] : memref<9x64x256xbf16, #tpu.memory_space<vmem>>, vector<1x64x256xbf16>
    %284 = vector.shape_cast %283 : vector<1x64x256xbf16> to vector<64x256xbf16>
    %cst_246 = arith.constant dense<0.000000e+00> : vector<128x256xf32>
    %285 = tpu.matmul %257, %284, %cst_246 {dimension_numbers = #tpu.dot_dimension_numbers<[1], [0], [0], [1], [0, 0, 1, 1], [], []>} : vector<128x64xbf16>, vector<64x256xbf16>, vector<128x256xf32> -> vector<128x256xf32>
    %286 = arith.truncf %285 : vector<128x256xf32> to vector<128x256xbf16>
    %c3_247 = arith.constant 3 : index
    %c0_248 = arith.constant 0 : index
    %c0_249 = arith.constant 0 : index
    %287 = vector.load %arg13[%c3_247, %c0_248, %c0_249] : memref<9x128x128xbf16, #tpu.memory_space<vmem>>, vector<1x128x128xbf16>
    %288 = vector.shape_cast %287 : vector<1x128x128xbf16> to vector<128x128xbf16>
    %cst_250 = arith.constant dense<0.000000e+00> : vector<128x256xf32>
    %289 = tpu.matmul %288, %286, %cst_250 {dimension_numbers = #tpu.dot_dimension_numbers<[1], [0], [0], [1], [0, 0, 1, 1], [], []>} : vector<128x128xbf16>, vector<128x256xbf16>, vector<128x256xf32> -> vector<128x256xf32>
    %290 = arith.addf %282, %289 : vector<128x256xf32>
    %c4_251 = arith.constant 4 : index
    %c0_252 = arith.constant 0 : index
    %c0_253 = arith.constant 0 : index
    %291 = vector.load %arg14[%c4_251, %c0_252, %c0_253] : memref<9x64x256xbf16, #tpu.memory_space<vmem>>, vector<1x64x256xbf16>
    %292 = vector.shape_cast %291 : vector<1x64x256xbf16> to vector<64x256xbf16>
    %cst_254 = arith.constant dense<0.000000e+00> : vector<128x256xf32>
    %293 = tpu.matmul %257, %292, %cst_254 {dimension_numbers = #tpu.dot_dimension_numbers<[1], [0], [0], [1], [0, 0, 1, 1], [], []>} : vector<128x64xbf16>, vector<64x256xbf16>, vector<128x256xf32> -> vector<128x256xf32>
    %294 = arith.truncf %293 : vector<128x256xf32> to vector<128x256xbf16>
    %c4_255 = arith.constant 4 : index
    %c0_256 = arith.constant 0 : index
    %c0_257 = arith.constant 0 : index
    %295 = vector.load %arg13[%c4_255, %c0_256, %c0_257] : memref<9x128x128xbf16, #tpu.memory_space<vmem>>, vector<1x128x128xbf16>
    %296 = vector.shape_cast %295 : vector<1x128x128xbf16> to vector<128x128xbf16>
    %cst_258 = arith.constant dense<0.000000e+00> : vector<128x256xf32>
    %297 = tpu.matmul %296, %294, %cst_258 {dimension_numbers = #tpu.dot_dimension_numbers<[1], [0], [0], [1], [0, 0, 1, 1], [], []>} : vector<128x128xbf16>, vector<128x256xbf16>, vector<128x256xf32> -> vector<128x256xf32>
    %298 = arith.addf %290, %297 : vector<128x256xf32>
    %c5_259 = arith.constant 5 : index
    %c0_260 = arith.constant 0 : index
    %c0_261 = arith.constant 0 : index
    %299 = vector.load %arg14[%c5_259, %c0_260, %c0_261] : memref<9x64x256xbf16, #tpu.memory_space<vmem>>, vector<1x64x256xbf16>
    %300 = vector.shape_cast %299 : vector<1x64x256xbf16> to vector<64x256xbf16>
    %cst_262 = arith.constant dense<0.000000e+00> : vector<128x256xf32>
    %301 = tpu.matmul %257, %300, %cst_262 {dimension_numbers = #tpu.dot_dimension_numbers<[1], [0], [0], [1], [0, 0, 1, 1], [], []>} : vector<128x64xbf16>, vector<64x256xbf16>, vector<128x256xf32> -> vector<128x256xf32>
    %302 = arith.truncf %301 : vector<128x256xf32> to vector<128x256xbf16>
    %c5_263 = arith.constant 5 : index
    %c0_264 = arith.constant 0 : index
    %c0_265 = arith.constant 0 : index
    %303 = vector.load %arg13[%c5_263, %c0_264, %c0_265] : memref<9x128x128xbf16, #tpu.memory_space<vmem>>, vector<1x128x128xbf16>
    %304 = vector.shape_cast %303 : vector<1x128x128xbf16> to vector<128x128xbf16>
    %cst_266 = arith.constant dense<0.000000e+00> : vector<128x256xf32>
    %305 = tpu.matmul %304, %302, %cst_266 {dimension_numbers = #tpu.dot_dimension_numbers<[1], [0], [0], [1], [0, 0, 1, 1], [], []>} : vector<128x128xbf16>, vector<128x256xbf16>, vector<128x256xf32> -> vector<128x256xf32>
    %306 = arith.addf %298, %305 : vector<128x256xf32>
    %c6_267 = arith.constant 6 : index
    %c0_268 = arith.constant 0 : index
    %c0_269 = arith.constant 0 : index
    %307 = vector.load %arg14[%c6_267, %c0_268, %c0_269] : memref<9x64x256xbf16, #tpu.memory_space<vmem>>, vector<1x64x256xbf16>
    %308 = vector.shape_cast %307 : vector<1x64x256xbf16> to vector<64x256xbf16>
    %cst_270 = arith.constant dense<0.000000e+00> : vector<128x256xf32>
    %309 = tpu.matmul %257, %308, %cst_270 {dimension_numbers = #tpu.dot_dimension_numbers<[1], [0], [0], [1], [0, 0, 1, 1], [], []>} : vector<128x64xbf16>, vector<64x256xbf16>, vector<128x256xf32> -> vector<128x256xf32>
    %310 = arith.truncf %309 : vector<128x256xf32> to vector<128x256xbf16>
    %c6_271 = arith.constant 6 : index
    %c0_272 = arith.constant 0 : index
    %c0_273 = arith.constant 0 : index
    %311 = vector.load %arg13[%c6_271, %c0_272, %c0_273] : memref<9x128x128xbf16, #tpu.memory_space<vmem>>, vector<1x128x128xbf16>
    %312 = vector.shape_cast %311 : vector<1x128x128xbf16> to vector<128x128xbf16>
    %cst_274 = arith.constant dense<0.000000e+00> : vector<128x256xf32>
    %313 = tpu.matmul %312, %310, %cst_274 {dimension_numbers = #tpu.dot_dimension_numbers<[1], [0], [0], [1], [0, 0, 1, 1], [], []>} : vector<128x128xbf16>, vector<128x256xbf16>, vector<128x256xf32> -> vector<128x256xf32>
    %314 = arith.addf %306, %313 : vector<128x256xf32>
    %c7_275 = arith.constant 7 : index
    %c0_276 = arith.constant 0 : index
    %c0_277 = arith.constant 0 : index
    %315 = vector.load %arg14[%c7_275, %c0_276, %c0_277] : memref<9x64x256xbf16, #tpu.memory_space<vmem>>, vector<1x64x256xbf16>
    %316 = vector.shape_cast %315 : vector<1x64x256xbf16> to vector<64x256xbf16>
    %cst_278 = arith.constant dense<0.000000e+00> : vector<128x256xf32>
    %317 = tpu.matmul %257, %316, %cst_278 {dimension_numbers = #tpu.dot_dimension_numbers<[1], [0], [0], [1], [0, 0, 1, 1], [], []>} : vector<128x64xbf16>, vector<64x256xbf16>, vector<128x256xf32> -> vector<128x256xf32>
    %318 = arith.truncf %317 : vector<128x256xf32> to vector<128x256xbf16>
    %c7_279 = arith.constant 7 : index
    %c0_280 = arith.constant 0 : index
    %c0_281 = arith.constant 0 : index
    %319 = vector.load %arg13[%c7_279, %c0_280, %c0_281] : memref<9x128x128xbf16, #tpu.memory_space<vmem>>, vector<1x128x128xbf16>
    %320 = vector.shape_cast %319 : vector<1x128x128xbf16> to vector<128x128xbf16>
    %cst_282 = arith.constant dense<0.000000e+00> : vector<128x256xf32>
    %321 = tpu.matmul %320, %318, %cst_282 {dimension_numbers = #tpu.dot_dimension_numbers<[1], [0], [0], [1], [0, 0, 1, 1], [], []>} : vector<128x128xbf16>, vector<128x256xbf16>, vector<128x256xf32> -> vector<128x256xf32>
    %322 = arith.addf %314, %321 : vector<128x256xf32>
    %c8_283 = arith.constant 8 : index
    %c0_284 = arith.constant 0 : index
    %c0_285 = arith.constant 0 : index
    %323 = vector.load %arg14[%c8_283, %c0_284, %c0_285] : memref<9x64x256xbf16, #tpu.memory_space<vmem>>, vector<1x64x256xbf16>
    %324 = vector.shape_cast %323 : vector<1x64x256xbf16> to vector<64x256xbf16>
    %cst_286 = arith.constant dense<0.000000e+00> : vector<128x256xf32>
    %325 = tpu.matmul %257, %324, %cst_286 {dimension_numbers = #tpu.dot_dimension_numbers<[1], [0], [0], [1], [0, 0, 1, 1], [], []>} : vector<128x64xbf16>, vector<64x256xbf16>, vector<128x256xf32> -> vector<128x256xf32>
    %326 = arith.truncf %325 : vector<128x256xf32> to vector<128x256xbf16>
    %c8_287 = arith.constant 8 : index
    %c0_288 = arith.constant 0 : index
    %c0_289 = arith.constant 0 : index
    %327 = vector.load %arg13[%c8_287, %c0_288, %c0_289] : memref<9x128x128xbf16, #tpu.memory_space<vmem>>, vector<1x128x128xbf16>
    %328 = vector.shape_cast %327 : vector<1x128x128xbf16> to vector<128x128xbf16>
    %cst_290 = arith.constant dense<0.000000e+00> : vector<128x256xf32>
    %329 = tpu.matmul %328, %326, %cst_290 {dimension_numbers = #tpu.dot_dimension_numbers<[1], [0], [0], [1], [0, 0, 1, 1], [], []>} : vector<128x128xbf16>, vector<128x256xbf16>, vector<128x256xf32> -> vector<128x256xf32>
    %330 = arith.addf %322, %329 : vector<128x256xf32>
    %c0_291 = arith.constant 0 : index
    %c0_292 = arith.constant 0 : index
    %331 = vector.load %arg15[%c0_291, %c0_292] : memref<128x1xf32, #tpu.memory_space<vmem>>, vector<128x1xf32>
    %332 = vector.broadcast %331 : vector<128x1xf32> to vector<128x256xf32>
    %333 = arith.addf %330, %332 : vector<128x256xf32>
    %334 = vector.extract_strided_slice %333 {offsets = [0, 0], sizes = [3, 256], strides = [1, 1]} : vector<128x256xf32> to vector<3x256xf32>
    %c0_293 = arith.constant 0 : index
    %c0_294 = arith.constant 0 : index
    %c0_295 = arith.constant 0 : index
    %335 = vector.load %arg16[%c0_293, %c0_294, %c0_295] : memref<1x3x256xf32, #tpu.memory_space<vmem>>, vector<1x3x256xf32>
    %336 = vector.shape_cast %335 : vector<1x3x256xf32> to vector<3x256xf32>
    %337 = vector.shape_cast %334 : vector<3x256xf32> to vector<1x3x256xf32>
    tpu.vector_store %arg16[%c0_293, %c0_294, %c0_295], %337 {strides = array<i32>} : memref<1x3x256xf32, #tpu.memory_space<vmem>>, vector<1x3x256xf32>,
    return
  }
  func.func @transform_0(%arg0: i32) -> (i32, i32, i32) {
    %c0_i32 = arith.constant 0 : i32
    %c0_i32_0 = arith.constant 0 : i32
    %c0_i32_1 = arith.constant 0 : i32
    return %arg0, %c0_i32, %c0_i32_0 : i32, i32, i32
  }
  func.func @transform_1(%arg0: i32) -> (i32, i32) {
    %c0_i32 = arith.constant 0 : i32
    %c0_i32_0 = arith.constant 0 : i32
    %c0_i32_1 = arith.constant 0 : i32
    return %c0_i32, %c0_i32_0 : i32, i32
  }
  func.func @transform_2(%arg0: i32) -> (i32, i32) {
    %c0_i32 = arith.constant 0 : i32
    %c0_i32_0 = arith.constant 0 : i32
    %c0_i32_1 = arith.constant 0 : i32
    return %c0_i32, %c0_i32_0 : i32, i32
  }
  func.func @transform_3(%arg0: i32) -> (i32, i32, i32) {
    %c0_i32 = arith.constant 0 : i32
    %c0_i32_0 = arith.constant 0 : i32
    %c0_i32_1 = arith.constant 0 : i32
    %c0_i32_2 = arith.constant 0 : i32
    return %c0_i32, %c0_i32_0, %c0_i32_1 : i32, i32, i32
  }
  func.func @transform_4(%arg0: i32) -> (i32, i32, i32) {
    %c0_i32 = arith.constant 0 : i32
    %c0_i32_0 = arith.constant 0 : i32
    %c0_i32_1 = arith.constant 0 : i32
    %c0_i32_2 = arith.constant 0 : i32
    return %c0_i32, %c0_i32_0, %c0_i32_1 : i32, i32, i32
  }
  func.func @transform_5(%arg0: i32) -> (i32, i32) {
    %c0_i32 = arith.constant 0 : i32
    %c0_i32_0 = arith.constant 0 : i32
    %c0_i32_1 = arith.constant 0 : i32
    return %c0_i32, %c0_i32_0 : i32, i32
  }
  func.func @transform_6(%arg0: i32) -> (i32, i32, i32) {
    %c0_i32 = arith.constant 0 : i32
    %c0_i32_0 = arith.constant 0 : i32
    %c0_i32_1 = arith.constant 0 : i32
    %c0_i32_2 = arith.constant 0 : i32
    return %c0_i32, %c0_i32_0, %c0_i32_1 : i32, i32, i32
  }
  func.func @transform_7(%arg0: i32) -> (i32, i32, i32) {
    %c0_i32 = arith.constant 0 : i32
    %c0_i32_0 = arith.constant 0 : i32
    %c0_i32_1 = arith.constant 0 : i32
    %c0_i32_2 = arith.constant 0 : i32
    return %c0_i32, %c0_i32_0, %c0_i32_1 : i32, i32, i32
  }
  func.func @transform_8(%arg0: i32) -> (i32, i32) {
    %c0_i32 = arith.constant 0 : i32
    %c0_i32_0 = arith.constant 0 : i32
    %c0_i32_1 = arith.constant 0 : i32
    return %c0_i32, %c0_i32_0 : i32, i32
  }
  func.func @transform_9(%arg0: i32) -> (i32, i32, i32) {
    %c0_i32 = arith.constant 0 : i32
    %c0_i32_0 = arith.constant 0 : i32
    %c0_i32_1 = arith.constant 0 : i32
    %c0_i32_2 = arith.constant 0 : i32
    return %c0_i32, %c0_i32_0, %c0_i32_1 : i32, i32, i32
  }
  func.func @transform_10(%arg0: i32) -> (i32, i32, i32) {
    %c0_i32 = arith.constant 0 : i32
    %c0_i32_0 = arith.constant 0 : i32
    %c0_i32_1 = arith.constant 0 : i32
    %c0_i32_2 = arith.constant 0 : i32
    return %c0_i32, %c0_i32_0, %c0_i32_1 : i32, i32, i32
  }
  func.func @transform_11(%arg0: i32) -> (i32, i32) {
    %c0_i32 = arith.constant 0 : i32
    %c0_i32_0 = arith.constant 0 : i32
    %c0_i32_1 = arith.constant 0 : i32
    return %c0_i32, %c0_i32_0 : i32, i32
  }
  func.func @transform_12(%arg0: i32) -> (i32, i32, i32) {
    %c0_i32 = arith.constant 0 : i32
    %c0_i32_0 = arith.constant 0 : i32
    %c0_i32_1 = arith.constant 0 : i32
    %c0_i32_2 = arith.constant 0 : i32
    return %c0_i32, %c0_i32_0, %c0_i32_1 : i32, i32, i32
  }
  func.func @transform_13(%arg0: i32) -> (i32, i32, i32) {
    %c0_i32 = arith.constant 0 : i32
    %c0_i32_0 = arith.constant 0 : i32
    %c0_i32_1 = arith.constant 0 : i32
    %c0_i32_2 = arith.constant 0 : i32
    return %c0_i32, %c0_i32_0, %c0_i32_1 : i32, i32, i32
  }
  func.func @transform_14(%arg0: i32) -> (i32, i32) {
    %c0_i32 = arith.constant 0 : i32
    %c0_i32_0 = arith.constant 0 : i32
    %c0_i32_1 = arith.constant 0 : i32
    return %c0_i32, %c0_i32_0 : i32, i32
  }
  func.func @transform_15(%arg0: i32) -> (i32, i32, i32) {
    %c0_i32 = arith.constant 0 : i32
    %c0_i32_0 = arith.constant 0 : i32
    %c0_i32_1 = arith.constant 0 : i32
    return %arg0, %c0_i32, %c0_i32_0 : i32, i32, i32
  }
}

</mosaic_0001>

<bundles_post_ra>
// kernel: decoder_forward.1
= control target key start
LH: loop header
LB: loop body
LE: loop exit
PB: predicated region body
PF: predicated region fallthrough
CT: control target
= control target key end

     0   :  { %s15057_s0 = inlined_call_operand.vmem [shape: bf16[2,32,1], index: 0, kind: input, shape index: {}]   ;;  %s15058_s1 = inlined_call_operand.vmem [shape: bf16[128,32], index: 1, kind: input, shape index: {}]   ;;  %s15059_s2 = inlined_call_operand.vmem [shape: f32[128,1], index: 2, kind: input, shape index: {}]   ;;  %s15060_s3 = inlined_call_operand.hbm [shape: bf16[9,128,128], index: 3, kind: input, shape index: {}]   ;;  %s15061_s4 = inlined_call_operand.vmem [shape: bf16[9,1,4], index: 4, kind: input, shape index: {}]   ;;  %s15062_s5 = inlined_call_operand.vmem [shape: f32[128,1], index: 5, kind: input, shape index: {}]   ;;  %s15063_s6 = inlined_call_operand.hbm [shape: bf16[9,128,128], index: 6, kind: input, shape index: {}]   ;;  %s15064_s7 = inlined_call_operand.vmem [shape: bf16[9,4,16], index: 7, kind: input, shape index: {}]   ;;  %s15065_s8 = inlined_call_operand.vmem [shape: f32[128,1], index: 8, kind: input, shape index: {}]   ;;  %s15066_s9 = inlined_call_operand.hbm [shape: bf16[9,128,128], index: 9, kind: input, shape index: {}]   ;;  %s15067_s10 = inlined_call_operand.vmem [shape: bf16[9,16,64], index: 10, kind: input, shape index: {}]   ;;  %s15068_s11 = inlined_call_operand.vmem [shape: f32[128,1], index: 11, kind: input, shape index: {}]   ;;  %s15069_s12 = inlined_call_operand.hbm [shape: bf16[9,128,128], index: 12, kind: input, shape index: {}]   ;;  %s15070_s13 = inlined_call_operand.hbm [shape: bf16[9,64,256], index: 13, kind: input, shape index: {}]   ;;  %s15071_s14 = inlined_call_operand.vmem [shape: f32[128,1], index: 14, kind: input, shape index: {}]   ;;  %s15072_s15 = inlined_call_operand.vmem [shape: f32[2,3,256], index: 15, kind: output, shape index: {}]  }
   0x1   :  { %15108 = sst [smem:[#allocation32_spill]] %s15060_s3 }
   0x2   :  { %15109 = sst [smem:[#allocation33_spill]] %s15063_s6 }
   0x3   :  { %15110 = sst [smem:[#allocation34_spill]] %s15069_s12 }
   0x4   :  { %15111 = sst [smem:[#allocation35_spill]] %s15072_s15 }
   0x5   :  { %20 = vsyncpa [#allocation3], 0 }
   0x6   :  { %21 = vsyncpa [#allocation5], 0 }
   0x7   :  { %22 = vsyncpa [#allocation8], 0  ;;  %s11693_s18 = smov 0  }
   0x8 LB: > { %15112 = sst [smem:[#allocation13_spill]] %s11600_s18  ;;  %s11699_s19 = sadd.s32 4294967295, %s11600_s18   ;;  %s11600_s18 = sphi %s11693_s18, %s28_s18  }
   0x9   : > { %p9102_p0 = scmp.ge.s32.totalorder %s11600_s18, 1  ;;  %p379_p1 = scmp.lt.s32.totalorder %s11600_s18, 3 }
   0xa   : > { %p11400_p2 = scmp.eq.s32.totalorder %s11699_s19, 0  ;;  %s15113_s6 = sld [smem:[#allocation33_spill]] }
   0xb   : > { %p11707_p3 = pnand %p9102_p0, %p379_p1  ;;  %s15115_s12 = sld [smem:[#allocation34_spill]] }
   0xc   : > { %s11602_s27 = smov [#allocation4]   ;;  %s11603_s30 = smov [#allocation7]  }
   0xd   : > { %p11384_p4 = pneg %p11707_p3  ;;  %s418_s28 = sshll.u32 %s11602_s27, 4  ;;  %s419_s28 = int_to_ptr.vmem [resolvable:$true] %s418_s28 }
   0xe   : > { %s458_s16 = sshll.u32 %s11603_s30, 4  ;;  %s15117_s3 = sld [smem:[#allocation32_spill]]  ;;  %s459_s16 = int_to_ptr.vmem [resolvable:$true] %s458_s16 }
   0xf   : > { %p11718_p5 = pnand %p11400_p2, %p11384_p4  ;;  %s11604_s24 = smov 64  }
  0x10   : > { %s416_s22 = sshll.u32 %s15113_s6, 4  ;;  %s11605_s25 = smov 4   ;;  %s417_s22 = int_to_ptr.hbm [resolvable:$true] %s416_s22 }
  0x11   : > { %s456_s26 = sshll.u32 %s15115_s12, 4  ;;  %s11606_s27 = smov [#allocation2]   ;;  %s457_s26 = int_to_ptr.hbm [resolvable:$true] %s456_s26 }
  0x12   : > { %11390 = dma.hbm_to_vmem [thread:$0]  (!%p11718_p5), %s417_s22, 9216, %s419_s28, [#allocation5], %s11604_s24, %s11604_s24, %s11605_s25  }
  0x13   : > { %11396 = dma.hbm_to_vmem [thread:$0]  (!%p11718_p5), %s457_s26, 9216, %s459_s16, [#allocation8], %s11604_s24, %s11604_s24, %s11605_s25  }
  0x14   : > { %s396_s21 = sshll.u32 %s15117_s3, 4  ;;  %s398_s6 = sshll.u32 %s11606_s27, 4  ;;  %s397_s21 = int_to_ptr.hbm [resolvable:$true] %s396_s21  ;;  %s399_s6 = int_to_ptr.vmem [resolvable:$true] %s398_s6 }
  0x15   : > { %s436_s30 = sshll.u32 %s15066_s9, 4  ;;  %s470_s3 = sshll.u32 %s15070_s13, 4  ;;  %s437_s30 = int_to_ptr.hbm [resolvable:$true] %s436_s30  ;;  %s471_s3 = int_to_ptr.hbm [resolvable:$true] %s470_s3 }
  0x16   : > { %11387 = dma.hbm_to_vmem [thread:$0]  (!%p11718_p5), %s397_s21, 9216, %s399_s6, [#allocation3], %s11604_s24, %s11604_s24, %s11605_s25  }
  0x17   : > { %s11607_s15 = smov [#allocation6]   ;;  %s11608_s26 = smov [#allocation9]  }
  0x18   : > { %s438_s22 = sshll.u32 %s11607_s15, 4  ;;  %s472_s28 = sshll.u32 %s11608_s26, 4  ;;  %s439_s22 = int_to_ptr.vmem [resolvable:$true] %s438_s22  ;;  %s473_s28 = int_to_ptr.vmem [resolvable:$true] %s472_s28 }
  0x19   : > { %11393 = dma.hbm_to_vmem [thread:$0]  (!%p11718_p5), %s437_s30, 9216, %s439_s22, [#allocation5], %s11604_s24, %s11604_s24, %s11605_s25  }
  0x1a   : > { %s11609_s12 = smov 128   ;;  %s11610_s18 = smov 8  }
  0x1b   : > { %11399 = dma.hbm_to_vmem [thread:$0]  (!%p11718_p5), %s471_s3, 9216, %s473_s28, [#allocation8], %s11609_s12, %s11609_s12, %s11610_s18  }
  0x1c   : > { %499 = sbr.rel (%p11707_p3) target bundleno = 4650 (0x122a), region = 80 }
  0x21   : > { %11587 = dma.done.wait (%p11400_p2), [#allocation3], 9216  }
  0x22   : > { %11589 = vsyncadd (%p11400_p2), [#allocation3], 4294958080 }
  0x23   : > { %11591 = dma.done.wait (%p11400_p2), [#allocation5], 18432  }
  0x24   : > { %11593 = vsyncadd (%p11400_p2), [#allocation5], 4294948864 }
  0x25   : > { %11595 = dma.done.wait (%p11400_p2), [#allocation8], 18432  }
  0x26   : > { %11597 = vsyncadd (%p11400_p2), [#allocation8], 4294948864  ;;  %p568_p6 = scmp.lt.s32.totalorder %s11699_s19, 1  ;;  %v10967_v2 = vld [vmem:[%s15058_s1] sm:$0xff]  ;;  %v10972_v3 = vld [vmem:[%s15058_s1 + $0x28] sm:$0xff]  ;;  %vm667_vm0 = vcmask 261120  }
  0x27   : > { %v10968_v4 = vld [vmem:[%s15058_s1 + $0x8] sm:$0xff]  ;;  %v10973_v5 = vld [vmem:[%s15058_s1 + $0x30] sm:$0xff]  ;;  %v10974_v7 = vld [vmem:[%s15058_s1 + $0x38] sm:$0xff]  ;;  %v11611_v10 = vmov 0   ;;  %vm2526_vm1 = vcmask 1041408   ;;  %vm2501_vm2 = vcmask 31744  }
  0x28   : > { %s15267_s19 = smov (!%p568_p6, %s11699_s19), 1  ;;  %v10969_v6 = vld [vmem:[%s15058_s1 + $0x10] sm:$0xff]  ;;  %v10970_v8 = vld [vmem:[%s15058_s1 + $0x18] sm:$0xff]  ;;  %v10971_v9 = vld [vmem:[%s15058_s1 + $0x20] sm:$0xff]  ;;  %11429 = vset.pattern.permute.xlu2 %v11611_v10  ;;  %11430 = vset.pattern.permute.xlu1 %v11611_v10  ;;  %vm4380_vm3 = vcmask 130048   ;;  %vm6327_vm4 = vcmask 523264  }
  0x29   : > { %s10965_s3 = sshll.u32 %s15267_s19, 4  ;;  %11431 = vset.pattern.permute.xlu0 %v11611_v10  ;;  %v609_v12 = vld [vmem:[%s15059_s2 + $0x50] sm:$0xff]  ;;  %v610_v18 = vld [vmem:[%s15059_s2 + $0x58] sm:$0xff]  ;;  %v611_v24 = vld [vmem:[%s15059_s2 + $0x60] sm:$0xff]  ;;  %s10966_s21 = sshll.u32 %s15267_s19, 3  ;;  %vm8991_vm5 = vcmask 1043456  }
  0x2a   : > { %s572_s23 = scalar_lea.vmem %s15057_s0, %s10965_s3  ;;  %v612_v30 = vld [vmem:[%s15059_s2 + $0x68] sm:$0xff]  ;;  %v613_v36 = vld [vmem:[%s15059_s2 + $0x70] sm:$0xff]  ;;  %v614_v42 = vld [vmem:[%s15059_s2 + $0x78] sm:$0xff]  ;;  %s15264_s27 = sld [smem:[#allocation35_spill]] }
  0x2b   : > { %v10976_v0 = vld [vmem:[%s572_s23 + $0x8] sm:$0xff]  ;;  %v10975_v1 = vld [vmem:[%s572_s23] sm:$0xff]  ;;  %v605_v44 = vld [vmem:[%s15059_s2 + $0x30] sm:$0xff] }
  0x2c   : > { %698 = vmatpush.bf16.msra.mxu0 %v10976_v0  ;;  %11346 = vmatpush.bf16.msra.mxu3 %v10976_v0  ;;  %v604_v49 = vld [vmem:[%s15059_s2 + $0x28] sm:$0xff]  ;;  %v606_v54 = vld [vmem:[%s15059_s2 + $0x38] sm:$0xff]  ;;  %v599_v58 = vld [vmem:[%s15059_s2] sm:$0xff] }
  0x2d   : > { %v607_v63 = vld [vmem:[%s15059_s2 + $0x40] sm:$0xff] }
  0x30   : > { %699 = vmatpush.bf16.msra.mxu0 %v10975_v1  ;;  %11347 = vmatpush.bf16.msra.mxu3 %v10975_v1  ;;  %s577_s30 = scalar_lea.vmem %s15264_s27, %s10966_s21 }
  0x33   : > { %9159 = vmatmul.msk.bf16.vlgmr.msra.gmra.mxu0 %vm667_vm0, %v10967_v2  ;;  %9164 = vmatmul.msk.bf16.vlgmr.msra.gmra.mxu3 %vm667_vm0, %v10972_v3  ;;  %v601_v3 = vld [vmem:[%s15059_s2 + $0x10] sm:$0xff] }
  0x43   : > { %9160 = vmatmul.msk.bf16.gmra.mxu0 %vm667_vm0, %v10968_v4  ;;  %9165 = vmatmul.msk.bf16.gmra.mxu3 %vm667_vm0, %v10973_v5 }
  0x53   : > { %9161 = vmatmul.msk.bf16.gmra.mxu0 %vm667_vm0, %v10969_v6  ;;  %9166 = vmatmul.msk.bf16.gmra.mxu3 %vm667_vm0, %v10974_v7 }
  0x63   : > { %9162 = vmatmul.msk.bf16.gmra.mxu0 %vm667_vm0, %v10970_v8  ;;  %v608_v8 = vld [vmem:[%s15059_s2 + $0x48] sm:$0xff] }
  0x73   : > { %9163 = vmatmul.msk.bf16.gmra.mxu0 %vm667_vm0, %v10971_v9 }
  0xb0   : > { %v701_v11 = vpop.f32.mrf.mxu0 }
  0xb1   : > { %v702_v60 = vadd.f32 %v701_v11, %v599_v58 }
  0xb3   : > { %v741_v1 = vmax.f32 %v702_v60, 0.0  ;;  %v2359_v60 = vld [vmem:[%s15062_s5 + $0x58] sm:$0xff] }
  0xb5   : > { %v757_v5 = vpack.c.bf16 %v741_v1, %v741_v1 }
  0xb6   : > { %v726_v13 = vpop.f32.mrf.mxu3 }
  0xb7   : > { %v727_v14 = vadd.f32 %v726_v13, %v609_v12  ;;  %v600_v12 = vld [vmem:[%s15059_s2 + $0x8] sm:$0xff]  ;;  %v603_v13 = vld [vmem:[%s15059_s2 + $0x20] sm:$0xff] }
  0xb8   : > { %v11790_v15 = vpop.f32.mrf.mxu0 }
  0xb9   : > { %v751_v16 = vmax.f32 %v727_v14, 0.0 }
  0xbb   : > { %v767_v17 = vpack.c.bf16 %v751_v16, %v751_v16  ;;  %v704_v16 = vadd.f32 %v11790_v15, %v600_v12  ;;  %v2363_v12 = vld [vmem:[%s15062_s5 + $0x78] sm:$0xff] }
  0xbd   : > { %866 = vperm.xlu2 %11429, %v767_v17  }
  0xbe   : > { %v728_v19 = vpop.f32.mrf.mxu3 }
  0xbf   : > { %v729_v20 = vadd.f32 %v728_v19, %v610_v18 }
  0xc0   : > { %v706_v21 = vpop.f32.mrf.mxu0 }
  0xc1   : > { %v752_v22 = vmax.f32 %v729_v20, 0.0  ;;  %v707_v6 = vadd.f32 %v706_v21, %v601_v3  ;;  %v2349_v20 = vld [vmem:[%s15062_s5 + $0x8] sm:$0xff]  ;;  %v742_v21 = vmax.f32 %v704_v16, 0.0 }
  0xc3   : > { %v768_v23 = vpack.c.bf16 %v752_v22, %v752_v22  ;;  %v743_v10 = vmax.f32 %v707_v6, 0.0  ;;  %v2357_v6 = vld [vmem:[%s15062_s5 + $0x48] sm:$0xff] }
  0xc5   : > { %875 = vperm.xlu2 %11429, %v768_v23   ;;  %v759_v17 = vpack.c.bf16 %v743_v10, %v743_v10  ;;  %v602_v23 = vld [vmem:[%s15059_s2 + $0x18] sm:$0xff]  ;;  %v4221_v10 = vld [vmem:[%s15065_s8 + $0x8] sm:$0xff] }
  0xc6   : > { %v731_v25 = vpop.f32.mrf.mxu3 }
  0xc7   : > { %v732_v26 = vadd.f32 %v731_v25, %v611_v24  ;;  %v758_v24 = vpack.c.bf16 %v742_v21, %v742_v21 }
  0xc8   : > { %v11798_v27 = vpop.f32.mrf.mxu0 }
  0xc9   : > { %v753_v28 = vmax.f32 %v732_v26, 0.0  ;;  %v709_v25 = vadd.f32 %v11798_v27, %v602_v23  ;;  %v2352_v26 = vld [vmem:[%s15062_s5 + $0x20] sm:$0xff]  ;;  %v11612_v27 = vmov 839922192  }
  0xcb   : > { %v769_v29 = vpack.c.bf16 %v753_v28, %v753_v28  ;;  %v744_v28 = vmax.f32 %v709_v25, 0.0  ;;  %v4225_v25 = vld [vmem:[%s15065_s8 + $0x28] sm:$0xff] }
  0xcd   : > { %884 = vperm.xlu1 %11430, %v769_v29   ;;  %v2350_v29 = vld [vmem:[%s15062_s5 + $0x10] sm:$0xff] }
  0xce   : > { %v733_v31 = vpop.f32.mrf.mxu3 }
  0xcf   : > { %v734_v32 = vadd.f32 %v733_v31, %v612_v30  ;;  %v760_v30 = vpack.c.bf16 %v744_v28, %v744_v28  ;;  %v2355_v31 = vld [vmem:[%s15062_s5 + $0x38] sm:$0xff]  ;;  %v9167_v28 = vld [vmem:[%s15061_s4 + $0x1] sm:$0x1] }
  0xd0   : > { %v711_v33 = vpop.f32.mrf.mxu0 }
  0xd1   : > { %v754_v34 = vmax.f32 %v734_v32, 0.0  ;;  %v712_v18 = vadd.f32 %v711_v33, %v603_v13  ;;  %v780_v32 = vunpack.c.l.s4 %v11612_v27  ;;  %v2348_v33 = vld [vmem:[%s15062_s5] sm:$0xff] }
  0xd2   : > { %v4224_v13 = vld [vmem:[%s15065_s8 + $0x20] sm:$0xff] }
  0xd3   : > { %v770_v35 = vpack.c.bf16 %v754_v34, %v754_v34  ;;  %v745_v22 = vmax.f32 %v712_v18, 0.0  ;;  %v2353_v34 = vld [vmem:[%s15062_s5 + $0x28] sm:$0xff]  ;;  %v4227_v18 = vld [vmem:[%s15065_s8 + $0x38] sm:$0xff] }
  0xd5   : > { %893 = vperm.xlu1 %11430, %v770_v35   ;;  %v761_v15 = vpack.c.bf16 %v745_v22, %v745_v22  ;;  %v9331_v35 = vld [vmem:[%s15061_s4 + $0x5] sm:$0x1] }
  0xd6   : > { %v736_v37 = vpop.f32.mrf.mxu3 }
  0xd7   : > { %v737_v38 = vadd.f32 %v736_v37, %v613_v36  ;;  %v2358_v36 = vld [vmem:[%s15062_s5 + $0x50] sm:$0xff]  ;;  %v9364_v37 = vld [vmem:[%s15061_s4 + $0x6] sm:$0x1] }
  0xd8   : > { %v713_v39 = vpop.f32.mrf.mxu0 }
  0xd9   : > { %v755_v40 = vmax.f32 %v737_v38, 0.0  ;;  %v714_v52 = vadd.f32 %v713_v39, %v604_v49  ;;  %v11868_v38 = vunpack.c.0.s8 %v780_v32  ;;  %v2361_v49 = vld [vmem:[%s15062_s5 + $0x68] sm:$0xff] }
  0xdb   : > { %v771_v41 = vpack.c.bf16 %v755_v40, %v755_v40  ;;  %v746_v56 = vmax.f32 %v714_v52, 0.0  ;;  %v1707_v40 = vpack.i.b16 %v9331_v35, %v9331_v35 }
  0xdd   : > { %902 = vperm.xlu0 %11431, %v771_v41   ;;  %v762_v61 = vpack.c.bf16 %v746_v56, %v746_v56  ;;  %v9430_v41 = vld [vmem:[%s15061_s4 + $0x8] sm:$0x1] }
  0xde   : > { %v738_v43 = vpop.f32.mrf.mxu3 }
  0xdf   : > { %v739_v45 = vadd.f32 %v738_v43, %v614_v42  ;;  %v1868_v42 = vpack.i.b16 %v9364_v37, %v9364_v37  ;;  %v2190_v43 = vpack.i.b16 %v9430_v41, %v9430_v41  ;;  %v4233_v41 = vld [vmem:[%s15065_s8 + $0x68] sm:$0xff] }
  0xe0   : > { %v716_v46 = vpop.f32.mrf.mxu0 }
  0xe1   : > { %v756_v47 = vmax.f32 %v739_v45, 0.0  ;;  %v717_v48 = vadd.f32 %v716_v46, %v605_v44  ;;  %v1709_v45 = vperm.slane %v1707_v40, 0  ;;  %v2351_v46 = vld [vmem:[%s15062_s5 + $0x18] sm:$0xff]  ;;  %v4228_v40 = vld [vmem:[%s15065_s8 + $0x40] sm:$0xff] }
  0xe3   : > { %v772_v50 = vpack.c.bf16 %v756_v47, %v756_v47  ;;  %v747_v51 = vmax.f32 %v717_v48, 0.0  ;;  %v2356_v47 = vld [vmem:[%s15062_s5 + $0x40] sm:$0xff]  ;;  %v1870_v48 = vperm.slane %v1868_v42, 0 }
  0xe5   : > { %v763_v53 = vpack.c.bf16 %v747_v51, %v747_v51  ;;  %911 = vperm.xlu0 %11431, %v772_v50   ;;  %v2192_v50 = vperm.slane %v2190_v43, 0 }
  0xe7   : > { %830 = vperm.xlu2 %11429, %v763_v53   ;;  %v11885_v53 = vunpack.c.l.bf16 %v1709_v45 }
  0xe8   : > { %v718_v55 = vpop.f32.mrf.mxu0 }
  0xe9   : > { %v719_v57 = vadd.f32 %v718_v55, %v606_v54  ;;  %15118 = vst [vmem:[#allocation14_spill] sm:$0xff] %v11885_v53  ;;  %v11888_v55 = vunpack.c.l.bf16 %v1870_v48 }
  0xeb   : > { %v748_v59 = vmax.f32 %v719_v57, 0.0  ;;  %v11892_v57 = vunpack.c.l.bf16 %v2192_v50 }
  0xed   : > { %v764_v62 = vpack.c.bf16 %v748_v59, %v748_v59  ;;  %v2354_v59 = vld [vmem:[%s15062_s5 + $0x30] sm:$0xff] }
  0xef   : > { %839 = vperm.xlu0 %11431, %v764_v62   ;;  %821 = vperm.xlu2 %11429, %v762_v61   ;;  %v4220_v62 = vld [vmem:[%s15065_s8] sm:$0xff] }
  0xf0   : > { %v721_v0 = vpop.f32.mrf.mxu0 }
  0xf1   : > { %v722_v2 = vadd.f32 %v721_v0, %v607_v63 }
  0xf3   : > { %v749_v4 = vmax.f32 %v722_v2, 0.0 }
  0xf5   : > { %v765_v7 = vpack.c.bf16 %v749_v4, %v749_v4 }
  0xf7   : > { %848 = vperm.xlu0 %11431, %v765_v7   ;;  %776 = vperm.xlu2 %11429, %v757_v5   ;;  %v2362_v7 = vld [vmem:[%s15062_s5 + $0x70] sm:$0xff] }
  0xf8   : > { %v723_v9 = vpop.f32.mrf.mxu0 }
  0xf9   : > { %v724_v11 = vadd.f32 %v723_v9, %v608_v8  ;;  %v4223_v8 = vld [vmem:[%s15065_s8 + $0x18] sm:$0xff]  ;;  %v2360_v9 = vld [vmem:[%s15062_s5 + $0x60] sm:$0xff] }
  0xfb   : > { %v750_v14 = vmax.f32 %v724_v11, 0.0  ;;  %v4226_v11 = vld [vmem:[%s15065_s8 + $0x30] sm:$0xff] }
  0xfd   : > { %v766_v19 = vpack.c.bf16 %v750_v14, %v750_v14  ;;  %v4229_v14 = vld [vmem:[%s15065_s8 + $0x48] sm:$0xff] }
  0xff   : > { %857 = vperm.xlu1 %11430, %v766_v19   ;;  %794 = vperm.xlu0 %11431, %v759_v17   ;;  %v4222_v17 = vld [vmem:[%s15065_s8 + $0x10] sm:$0xff] }
 0x100   : > { %2371 = vperm.xlu2 %11429, %v2349_v20   ;;  %v4232_v20 = vld [vmem:[%s15065_s8 + $0x60] sm:$0xff] }
 0x107   : > { %812 = vperm.xlu1 %11430, %v761_v15   ;;  %785 = vperm.xlu0 %11431, %v758_v24   ;;  %v4230_v15 = vld [vmem:[%s15065_s8 + $0x50] sm:$0xff] }
 0x108   : > { %2386 = vperm.xlu2 %11429, %v2352_v26   ;;  %v4235_v26 = vld [vmem:[%s15065_s8 + $0x78] sm:$0xff] }
 0x10f   : > { %803 = vperm.xlu1 %11430, %v760_v30   ;;  %2376 = vperm.xlu0 %11431, %v2350_v29   ;;  %v9265_v29 = vld [vmem:[%s15061_s4 + $0x3] sm:$0x1] }
 0x110   : > { %2401 = vperm.xlu2 %11429, %v2355_v31  }
 0x117   : > { %2366 = vperm.xlu1 %11430, %v2348_v33   ;;  %2391 = vperm.xlu0 %11431, %v2353_v34   ;;  %v867_v39 = vpop.permute.xlu2 %866  ;;  %v982_v33 = vpack.i.b16 %v9167_v28, %v9167_v28  ;;  %v1385_v34 = vpack.i.b16 %v9265_v29, %v9265_v29 }
 0x118   : > { %2416 = vperm.xlu2 %11429, %v2358_v36   ;;  %v872_v44 = vperm.slane %v867_v39, %v11868_v38 }
 0x119   : > { %v984_v42 = vperm.slane %v982_v33, 0  ;;  %v1387_v43 = vperm.slane %v1385_v34, 0 }
 0x11a   : > { %v11883_v51 = vunpack.c.l.bf16 %v872_v44 }
 0x11b   : > { %v12031_v50 = vunpack.c.l.bf16 %v984_v42 }
 0x11c   : > { %v11896_v58 = vmul.f32 %v11885_v53, %v11883_v51  ;;  %v11906_v61 = vmul.f32 %v11888_v55, %v11883_v51  ;;  %v11921_v1 = vmul.f32 %v11892_v57, %v11883_v51 }
 0x11d   : > { %v996_v33 = vmul.f32 %v12031_v50, %v11883_v51 }
 0x11f   : > { %2381 = vperm.xlu1 %11430, %v2351_v46   ;;  %2406 = vperm.xlu0 %11431, %v2356_v47   ;;  %v876_v52 = vpop.permute.xlu2 %875  ;;  %v6129_v46 = vld [vmem:[%s15068_s11 + $0x10] sm:$0xff] }
 0x120   : > { %2431 = vperm.xlu2 %11429, %v2361_v49   ;;  %v881_v54 = vperm.slane %v876_v52, %v11868_v38  ;;  %v12033_v52 = vunpack.c.l.bf16 %v1387_v43 }
 0x122   : > { %v11890_v56 = vunpack.c.l.bf16 %v881_v54  ;;  %v1399_v42 = vmul.f32 %v12033_v52, %v11883_v51 }
 0x124   : > { %v11913_v63 = vmul.f32 %v11885_v53, %v11890_v56  ;;  %v11917_v0 = vmul.f32 %v11888_v55, %v11890_v56  ;;  %v11929_v4 = vmul.f32 %v11892_v57, %v11890_v56 }
 0x127   : > { %2396 = vperm.xlu1 %11430, %v2354_v59   ;;  %2421 = vperm.xlu0 %11431, %v2359_v60  }
 0x128   : > { %4238 = vperm.xlu2 %11429, %v4220_v62  }
 0x12f   : > { %2411 = vperm.xlu1 %11430, %v2357_v6   ;;  %2436 = vperm.xlu0 %11431, %v2362_v7  }
 0x130   : > { %4253 = vperm.xlu2 %11429, %v4223_v8   ;;  %v4231_v8 = vld [vmem:[%s15065_s8 + $0x58] sm:$0xff] }
 0x137   : > { %2426 = vperm.xlu1 %11430, %v2360_v9   ;;  %4243 = vperm.xlu0 %11431, %v4221_v10   ;;  %v6127_v9 = vld [vmem:[%s15068_s11] sm:$0xff] }
 0x138   : > { %4268 = vperm.xlu2 %11429, %v4226_v11  }
 0x13f   : > { %2441 = vperm.xlu1 %11430, %v2363_v12   ;;  %4258 = vperm.xlu0 %11431, %v4224_v13   ;;  %v885_v16 = vpop.permute.xlu1 %884  ;;  %v6132_v13 = vld [vmem:[%s15068_s11 + $0x28] sm:$0xff] }
 0x140   : > { %4283 = vperm.xlu2 %11429, %v4229_v14   ;;  %v890_v19 = vperm.slane %v885_v16, %v11868_v38 }
 0x141   : > { %v831_v7 = vpop.permute.xlu2 %830 }
 0x142   : > { %v11971_v23 = vunpack.c.l.bf16 %v890_v19 }
 0x144   : > { %v11992_v30 = vmul.f32 %v11885_v53, %v11971_v23  ;;  %v12000_v32 = vmul.f32 %v11888_v55, %v11971_v23  ;;  %v12019_v44 = vmul.f32 %v11892_v57, %v11971_v23  ;;  %v998_v14 = vmul.f32 %v12031_v50, %v11971_v23 }
 0x147   : > { %4248 = vperm.xlu1 %11430, %v4222_v17   ;;  %4273 = vperm.xlu0 %11431, %v4227_v18   ;;  %v894_v21 = vpop.permute.xlu1 %893 }
 0x148   : > { %4298 = vperm.xlu2 %11429, %v4232_v20   ;;  %v899_v22 = vperm.slane %v894_v21, %v11868_v38 }
 0x14a   : > { %v11973_v24 = vunpack.c.l.bf16 %v899_v22  ;;  %v836_v22 = vperm.slane %v831_v7, %v11868_v38  ;;  %v6135_v7 = vld [vmem:[%s15068_s11 + $0x40] sm:$0xff] }
 0x14c   : > { %v11996_v31 = vmul.f32 %v11885_v53, %v11973_v24  ;;  %v12006_v36 = vmul.f32 %v11888_v55, %v11973_v24  ;;  %v12023_v45 = vmul.f32 %v11892_v57, %v11973_v24  ;;  %v999_v20 = vmul.f32 %v12031_v50, %v11973_v24 }
 0x14d   : > { %v12102_v43 = vunpack.c.l.bf16 %v836_v22 }
 0x14f   : > { %v903_v27 = vpop.permute.xlu0 %902  ;;  %4263 = vperm.xlu1 %11430, %v4225_v25   ;;  %4288 = vperm.xlu0 %11431, %v4230_v15   ;;  %v1401_v25 = vmul.f32 %v12033_v52, %v11971_v23 }
 0x150   : > { %4313 = vperm.xlu2 %11429, %v4235_v26   ;;  %v908_v37 = vperm.slane %v903_v27, %v11868_v38  ;;  %v1402_v26 = vmul.f32 %v12033_v52, %v11973_v24 }
 0x152   : > { %v12028_v47 = vunpack.c.l.bf16 %v908_v37  ;;  %v1008_v37 = vpack.c.bf16 %v999_v20, %v998_v14  ;;  %v12127_v14 = vmul.f32 %v11888_v55, %v12102_v43  ;;  %v12137_v20 = vmul.f32 %v11892_v57, %v12102_v43 }
 0x154   : > { %v1000_v60 = vmul.f32 %v12031_v50, %v12028_v47  ;;  %v1403_v62 = vmul.f32 %v12033_v52, %v12028_v47  ;;  %v12045_v6 = vmul.f32 %v11885_v53, %v12028_v47  ;;  %v12059_v12 = vmul.f32 %v11888_v55, %v12028_v47  ;;  %15121 = vst [vmem:[#allocation17_spill] sm:$0xff] %v12127_v14 }
 0x155   : > { %v12078_v21 = vmul.f32 %v11892_v57, %v12028_v47  ;;  %15123 = vst [vmem:[#allocation19_spill] sm:$0xff] %v12137_v20 }
 0x157   : > { %v912_v48 = vpop.permute.xlu0 %911  ;;  %4278 = vperm.xlu1 %11430, %v4228_v40   ;;  %4303 = vperm.xlu0 %11431, %v4233_v41   ;;  %v997_v40 = vmul.f32 %v12031_v50, %v11890_v56 }
 0x158   : > { %v917_v49 = vperm.slane %v912_v48, %v11868_v38  ;;  %6155 = vperm.xlu2 %11429, %v6129_v46   ;;  %v1411_v48 = vpack.c.bf16 %v1402_v26, %v1401_v25  ;;  %v6128_v25 = vld [vmem:[%s15068_s11 + $0x8] sm:$0xff]  ;;  %v6133_v26 = vld [vmem:[%s15068_s11 + $0x30] sm:$0xff] }
 0x15a   : > { %v12037_v59 = vunpack.c.l.bf16 %v917_v49  ;;  %v4234_v49 = vld [vmem:[%s15065_s8 + $0x70] sm:$0xff] }
 0x15c   : > { %v1001_v10 = vmul.f32 %v12031_v50, %v12037_v59  ;;  %v1404_v11 = vmul.f32 %v12033_v52, %v12037_v59  ;;  %v12068_v16 = vmul.f32 %v11885_v53, %v12037_v59  ;;  %v12072_v17 = vmul.f32 %v11888_v55, %v12037_v59 }
 0x15d   : > { %v12091_v29 = vmul.f32 %v11892_v57, %v12037_v59 }
 0x15e   : > { %v1009_v18 = vpack.c.bf16 %v1001_v10, %v1000_v60  ;;  %v1412_v19 = vpack.c.bf16 %v1404_v11, %v1403_v62  ;;  %v6130_v60 = vld [vmem:[%s15068_s11 + $0x18] sm:$0xff]  ;;  %v1400_v62 = vmul.f32 %v12033_v52, %v11890_v56  ;;  %v12123_v11 = vmul.f32 %v11885_v53, %v12102_v43 }
 0x15f   : > { %4293 = vperm.xlu1 %11430, %v4231_v8   ;;  %6145 = vperm.xlu0 %11431, %v6127_v9   ;;  %v1007_v8 = vpack.c.bf16 %v997_v40, %v996_v33  ;;  %v9397_v33 = vld [vmem:[%s15061_s4 + $0x7] sm:$0x1] }
 0x160   : > { %6170 = vperm.xlu2 %11429, %v6132_v13   ;;  %1075 = vmatpush.bf16.msra.mxu1 %v1009_v18  ;;  %v1410_v10 = vpack.c.bf16 %v1400_v62, %v1399_v42  ;;  %15120 = vst [vmem:[#allocation16_spill] sm:$0xff] %v12123_v11  ;;  %v822_v42 = vpop.permute.xlu2 %821 }
 0x161   : > { %11348 = vmatpush.bf16.msra.mxu2 %v1009_v18  ;;  %11349 = vmatpush.bf16.msrb.mxu3 %v1009_v18  ;;  %v840_v27 = vpop.permute.xlu0 %839 }
 0x162   : > { %1478 = vmatpush.bf16.msrb.mxu0 %v1412_v19  ;;  %v845_v34 = vperm.slane %v840_v27, %v11868_v38 }
 0x164   : > { %v12104_v46 = vunpack.c.l.bf16 %v845_v34  ;;  %1076 = vmatpush.bf16.msra.mxu1 %v1008_v37  ;;  %v6138_v34 = vld [vmem:[%s15068_s11 + $0x58] sm:$0xff] }
 0x165   : > { %11350 = vmatpush.bf16.msra.mxu2 %v1008_v37  ;;  %11351 = vmatpush.bf16.msrb.mxu3 %v1008_v37 }
 0x166   : > { %1479 = vmatpush.bf16.msrb.mxu0 %v1411_v48  ;;  %v12119_v9 = vmul.f32 %v11885_v53, %v12104_v46  ;;  %v12133_v19 = vmul.f32 %v11888_v55, %v12104_v46  ;;  %v12141_v22 = vmul.f32 %v11892_v57, %v12104_v46  ;;  %v993_v5 = vmul.f32 %v12031_v50, %v12104_v46 }
 0x167   : > { %4308 = vperm.xlu1 %11430, %v4234_v49   ;;  %6160 = vperm.xlu0 %11431, %v6130_v60   ;;  %v1396_v39 = vmul.f32 %v12033_v52, %v12104_v46 }
 0x168   : > { %15119 = vst [vmem:[#allocation15_spill] sm:$0xff] %v12119_v9  ;;  %6185 = vperm.xlu2 %11429, %v6135_v7   ;;  %1077 = vmatpush.bf16.msra.mxu1 %v1007_v8  ;;  %v6131_v7 = vld [vmem:[%s15068_s11 + $0x20] sm:$0xff] }
 0x169   : > { %11352 = vmatpush.bf16.msra.mxu2 %v1007_v8  ;;  %11353 = vmatpush.bf16.msrb.mxu3 %v1007_v8  ;;  %v849_v13 = vpop.permute.xlu0 %848  ;;  %15122 = vst [vmem:[#allocation18_spill] sm:$0xff] %v12133_v19  ;;  %v6136_v8 = vld [vmem:[%s15068_s11 + $0x48] sm:$0xff] }
 0x16a   : > { %1480 = vmatpush.bf16.msrb.mxu0 %v1410_v10  ;;  %15124 = vst [vmem:[#allocation20_spill] sm:$0xff] %v12141_v22  ;;  %v854_v37 = vperm.slane %v849_v13, %v11868_v38  ;;  %v827_v10 = vperm.slane %v822_v42, %v11868_v38  ;;  %v6141_v13 = vld [vmem:[%s15068_s11 + $0x70] sm:$0xff]  ;;  %v9232_v42 = vld [vmem:[%s15061_s4 + $0x2] sm:$0x1] }
 0x16b   : > { %v1224_v35 = vpack.i.b16 %v9232_v42, %v9232_v42 }
 0x16c   : > { %v12157_v48 = vunpack.c.l.bf16 %v854_v37  ;;  %v12196_v2 = vunpack.c.l.bf16 %v827_v10  ;;  %v1395_v10 = vmul.f32 %v12033_v52, %v12102_v43 }
 0x16e   : > { %v1397_v37 = vmul.f32 %v12033_v52, %v12157_v48  ;;  %v1394_v41 = vmul.f32 %v12033_v52, %v12196_v2 }
 0x16f   : > { %6150 = vperm.xlu1 %11430, %v6128_v25   ;;  %6175 = vperm.xlu0 %11431, %v6133_v26   ;;  %v773_v25 = vld [vmem:[%s15061_s4] sm:$0x1]  ;;  %v994_v26 = vmul.f32 %v12031_v50, %v12157_v48 }
 0x170   : > { %6200 = vperm.xlu2 %11429, %v6138_v34   ;;  %v919_v3 = vpack.i.b16 %v773_v25, %v773_v25  ;;  %v12207_v25 = vmul.f32 %v11885_v53, %v12157_v48 }
 0x171   : > { %v858_v40 = vpop.permute.xlu1 %857  ;;  %v12160_v60 = vpop.permute.xlu0 %794 }
 0x172   : > { %v863_v49 = vperm.slane %v858_v40, %v11868_v38 }
 0x174   : > { %v12162_v62 = vunpack.c.l.bf16 %v863_v49  ;;  %v9298_v49 = vld [vmem:[%s15061_s4 + $0x4] sm:$0x1] }
 0x176   : > { %v995_v34 = vmul.f32 %v12031_v50, %v12162_v62  ;;  %v1398_v40 = vmul.f32 %v12033_v52, %v12162_v62  ;;  %v12237_v19 = vmul.f32 %v11888_v55, %v12162_v62 }
 0x177   : > { %6165 = vperm.xlu1 %11430, %v6131_v7   ;;  %6190 = vperm.xlu0 %11431, %v6136_v8   ;;  %v1546_v7 = vpack.i.b16 %v9298_v49, %v9298_v49  ;;  %v1408_v49 = vpack.c.bf16 %v1396_v39, %v1395_v10  ;;  %v800_v39 = vperm.slane %v12160_v60, %v11868_v38  ;;  %v1226_v10 = vperm.slane %v1224_v35, 0 }
 0x178   : > { %6215 = vperm.xlu2 %11429, %v6141_v13   ;;  %v1006_v27 = vpack.c.bf16 %v995_v34, %v994_v26  ;;  %v1409_v18 = vpack.c.bf16 %v1398_v40, %v1397_v37  ;;  %v992_v13 = vmul.f32 %v12031_v50, %v12102_v43  ;;  %v2029_v26 = vpack.i.b16 %v9397_v33, %v9397_v33 }
 0x179   : > { %v813_v54 = vpop.permute.xlu1 %812  ;;  %v12211_v34 = vmul.f32 %v11885_v53, %v12162_v62  ;;  %v921_v40 = vperm.slane %v919_v3, 0  ;;  %v786_v42 = vpop.permute.xlu0 %785  ;;  %v991_v33 = vmul.f32 %v12031_v50, %v12196_v2  ;;  %v1548_v28 = vperm.slane %v1546_v7, 0  ;;  %15125 = vst [vmem:[#allocation21_spill] sm:$0xff] %v12237_v19 }
 0x17a   : > { %v818_v8 = vperm.slane %v813_v54, %v11868_v38  ;;  %1078 = vmatpush.bf16.msra.mxu1 %v1006_v27  ;;  %11354 = vmatpush.bf16.msra.mxu2 %v1006_v27  ;;  %v1005_v37 = vpack.c.bf16 %v993_v5, %v992_v13  ;;  %v777_v3 = vpop.permute.xlu2 %776  ;;  %v2031_v15 = vperm.slane %v2029_v26, 0  ;;  %v791_v20 = vperm.slane %v786_v42, %v11868_v38 }
 0x17b   : > { %11355 = vmatpush.bf16.msrb.mxu3 %v1006_v27  ;;  %1481 = vmatpush.bf16.msrb.mxu0 %v1409_v18  ;;  %v6134_v18 = vld [vmem:[%s15068_s11 + $0x38] sm:$0xff]  ;;  %v6139_v27 = vld [vmem:[%s15068_s11 + $0x60] sm:$0xff]  ;;  %v782_v60 = vperm.slane %v777_v3, %v11868_v38  ;;  %v12241_v35 = vmul.f32 %v11892_v57, %v12162_v62  ;;  %v12246_v26 = vunpack.c.l.bf16 %v921_v40  ;;  %v12250_v42 = vunpack.c.l.bf16 %v1548_v28 }
 0x17c   : > { %v12213_v54 = vunpack.c.l.bf16 %v818_v8  ;;  %v12268_v40 = vmul.f32 %v11885_v53, %v12196_v2  ;;  %v12288_v3 = vmul.f32 %v11892_v57, %v12196_v2 }
 0x17d   : > { %15126 = vst [vmem:[#allocation22_spill] sm:$0xff] %v12241_v35  ;;  %v12274_v28 = vunpack.c.l.bf16 %v782_v60  ;;  %v953_v60 = vmul.f32 %v12246_v26, %v12028_v47 }
 0x17e   : > { %1079 = vmatpush.bf16.msra.mxu1 %v1005_v37  ;;  %11356 = vmatpush.bf16.msra.mxu2 %v1005_v37  ;;  %v990_v8 = vmul.f32 %v12031_v50, %v12213_v54  ;;  %v1393_v13 = vmul.f32 %v12033_v52, %v12213_v54  ;;  %15129 = vst [vmem:[#allocation25_spill] sm:$0xff] %v12268_v40 }
 0x17f   : > { %11357 = vmatpush.bf16.msrb.mxu3 %v1005_v37  ;;  %1482 = vmatpush.bf16.msrb.mxu0 %v1408_v49  ;;  %v12243_v37 = vunpack.c.l.bf16 %v800_v39  ;;  %v12252_v49 = vunpack.c.l.bf16 %v2031_v15  ;;  %v12272_v15 = vmul.f32 %v11888_v55, %v12196_v2  ;;  %15131 = vst [vmem:[#allocation27_spill] sm:$0xff] %v12288_v3  ;;  %v986_v35 = vmul.f32 %v12031_v50, %v12274_v28 }
 0x180   : > { %6180 = vperm.xlu1 %11430, %v6134_v18   ;;  %6205 = vperm.xlu0 %11431, %v6139_v27   ;;  %v1004_v5 = vpack.c.bf16 %v991_v33, %v990_v8  ;;  %v1407_v22 = vpack.c.bf16 %v1394_v41, %v1393_v13  ;;  %v12248_v41 = vunpack.c.l.bf16 %v1226_v10  ;;  %v12256_v18 = vmul.f32 %v11888_v55, %v12157_v48 }
 0x181   : > { %v804_v14 = vpop.permute.xlu1 %803  ;;  %v12260_v27 = vmul.f32 %v11892_v57, %v12157_v48  ;;  %15130 = vst [vmem:[#allocation26_spill] sm:$0xff] %v12272_v15  ;;  %v988_v39 = vmul.f32 %v12031_v50, %v12243_v37  ;;  %v1391_v13 = vmul.f32 %v12033_v52, %v12243_v37  ;;  %v12306_v33 = vmul.f32 %v11885_v53, %v12213_v54  ;;  %v10987_v53 = vld [vmem:[#allocation2 + $0x50] sm:$0xff]  ;;  %v10985_v15 = vld [vmem:[#allocation2 + $0x40] sm:$0xff] }
 0x182   : > { %v809_v7 = vperm.slane %v804_v14, %v11868_v38  ;;  %1080 = vmatpush.bf16.msra.mxu1 %v1004_v5  ;;  %11358 = vmatpush.bf16.msra.mxu2 %v1004_v5  ;;  %15127 = vst [vmem:[#allocation23_spill] sm:$0xff] %v12256_v18  ;;  %v12262_v38 = vunpack.c.l.bf16 %v791_v20  ;;  %v6142_v20 = vld [vmem:[%s15068_s11 + $0x78] sm:$0xff]  ;;  %v2047_v19 = vmul.f32 %v12252_v49, %v12028_v47 }
 0x183   : > { %11359 = vmatpush.bf16.msrb.mxu3 %v1004_v5  ;;  %1483 = vmatpush.bf16.msrb.mxu0 %v1407_v22  ;;  %15128 = vst [vmem:[#allocation24_spill] sm:$0xff] %v12260_v27  ;;  %v6137_v22 = vld [vmem:[%s15068_s11 + $0x50] sm:$0xff]  ;;  %v1564_v5 = vmul.f32 %v12250_v42, %v12028_v47  ;;  %v1563_v3 = vmul.f32 %v12250_v42, %v11973_v24 }
 0x184   : > { %v12264_v14 = vunpack.c.l.bf16 %v809_v7  ;;  %v1242_v7 = vmul.f32 %v12248_v41, %v12028_v47  ;;  %15132 = vst [vmem:[#allocation28_spill] sm:$0xff] %v12306_v33  ;;  %v987_v27 = vmul.f32 %v12031_v50, %v12262_v38  ;;  %v1390_v18 = vmul.f32 %v12033_v52, %v12262_v38 }
 0x185   : > { %v1389_v47 = vmul.f32 %v12033_v52, %v12274_v28  ;;  %v951_v33 = vmul.f32 %v12246_v26, %v11971_v23 }
 0x186   : > { %v989_v8 = vmul.f32 %v12031_v50, %v12264_v14  ;;  %v1392_v10 = vmul.f32 %v12033_v52, %v12264_v14  ;;  %v12326_v50 = vmul.f32 %v11892_v57, %v12213_v54  ;;  %v6140_v52 = vld [vmem:[%s15068_s11 + $0x68] sm:$0xff] }
 0x188   : > { %6195 = vperm.xlu1 %11430, %v6137_v22   ;;  %6220 = vperm.xlu0 %11431, %v6142_v20   ;;  %v1003_v11 = vpack.c.bf16 %v989_v8, %v988_v39  ;;  %v1406_v9 = vpack.c.bf16 %v1392_v10, %v1391_v13  ;;  %v954_v22 = vmul.f32 %v12246_v26, %v12037_v59 }
 0x189   : > { %v12322_v20 = vmul.f32 %v11888_v55, %v12213_v54  ;;  %15134 = vst [vmem:[#allocation30_spill] sm:$0xff] %v12326_v50  ;;  %v1243_v39 = vmul.f32 %v12248_v41, %v12037_v59  ;;  %v1565_v8 = vmul.f32 %v12250_v42, %v12037_v59  ;;  %v1002_v13 = vpack.c.bf16 %v987_v27, %v986_v35 }
 0x18a   : > { %1081 = vmatpush.bf16.msra.mxu1 %v1003_v11  ;;  %11360 = vmatpush.bf16.msra.mxu2 %v1003_v11  ;;  %v2048_v10 = vmul.f32 %v12252_v49, %v12037_v59  ;;  %v1240_v35 = vmul.f32 %v12248_v41, %v11971_v23  ;;  %v1562_v59 = vmul.f32 %v12250_v42, %v11971_v23 }
 0x18b   : > { %15133 = vst [vmem:[#allocation29_spill] sm:$0xff] %v12322_v20  ;;  %11361 = vmatpush.bf16.msrb.mxu3 %v1003_v11  ;;  %1484 = vmatpush.bf16.msrb.mxu0 %v1406_v9  ;;  %v1405_v9 = vpack.c.bf16 %v1390_v18, %v1389_v47  ;;  %v962_v27 = vpack.c.bf16 %v954_v22, %v953_v60  ;;  %v10991_v20 = vld [vmem:[#allocation2 + $0x70] sm:$0xff] }
 0x18c   : > { %v952_v18 = vmul.f32 %v12246_v26, %v11973_v24  ;;  %v1241_v47 = vmul.f32 %v12248_v41, %v11973_v24  ;;  %v1251_v11 = vpack.c.bf16 %v1243_v39, %v1242_v7  ;;  %v1573_v50 = vpack.c.bf16 %v1565_v8, %v1564_v5 }
 0x18d   : > { %v2056_v40 = vpack.c.bf16 %v2048_v10, %v2047_v19  ;;  %v2045_v60 = vmul.f32 %v12252_v49, %v11971_v23  ;;  %v2046_v22 = vmul.f32 %v12252_v49, %v11973_v24  ;;  %v949_v7 = vmul.f32 %v12246_v26, %v11883_v51 }
 0x18e   : > { %1082 = vmatpush.bf16.msra.mxu1 %v1002_v13  ;;  %11362 = vmatpush.bf16.msra.mxu2 %v1002_v13  ;;  %v1238_v5 = vmul.f32 %v12248_v41, %v11883_v51  ;;  %v1560_v39 = vmul.f32 %v12250_v42, %v11883_v51  ;;  %v961_v19 = vpack.c.bf16 %v952_v18, %v951_v33  ;;  %v8980_v33 = vld [vmem:[%s15071_s14] sm:$0xff] }
 0x18f   : > { %11363 = vmatpush.bf16.msrb.mxu3 %v1002_v13  ;;  %1485 = vmatpush.bf16.msrb.mxu0 %v1405_v9  ;;  %v950_v23 = vmul.f32 %v12246_v26, %v11890_v56  ;;  %v1239_v24 = vmul.f32 %v12248_v41, %v11890_v56  ;;  %v1250_v8 = vpack.c.bf16 %v1241_v47, %v1240_v35 }
 0x190   : > { %6210 = vperm.xlu1 %11430, %v6140_v52   ;;  %v1561_v13 = vmul.f32 %v12250_v42, %v11890_v56  ;;  %v2055_v10 = vpack.c.bf16 %v2046_v22, %v2045_v60  ;;  %v1237_v9 = vmul.f32 %v12248_v41, %v12162_v62  ;;  %v947_v52 = vmul.f32 %v12246_v26, %v12157_v48 }
 0x191   : > { %1093 = vmatmul.bf16.vlgmr.msra.gmra.mxu2 %v10987_v53  ;;  %1083 = vmatmul.bf16.vlgmr.msra.gmra.mxu1 %v10985_v15  ;;  %v2044_v53 = vmul.f32 %v12252_v49, %v11890_v56  ;;  %v1249_v15 = vpack.c.bf16 %v1239_v24, %v1238_v5  ;;  %v2042_v35 = vmul.f32 %v12252_v49, %v12162_v62 }
 0x192   : > { %1172 = vmatpush.bf16.msrb.mxu2 %v962_v27  ;;  %1639 = vmatpush.bf16.msrb.mxu1 %v1573_v50  ;;  %v1572_v50 = vpack.c.bf16 %v1563_v3, %v1562_v59  ;;  %v960_v3 = vpack.c.bf16 %v950_v23, %v949_v7  ;;  %v1236_v59 = vmul.f32 %v12248_v41, %v12157_v48 }
 0x193   : > { %1317 = vmatpush.bf16.msra.mxu3 %v1251_v11  ;;  %2122 = vmatpush.bf16.msra.mxu0 %v2056_v40  ;;  %v2043_v40 = vmul.f32 %v12252_v49, %v11883_v51  ;;  %v1571_v11 = vpack.c.bf16 %v1561_v13, %v1560_v39  ;;  %v1559_v51 = vmul.f32 %v12250_v42, %v12162_v62  ;;  %v10988_v13 = vld [vmem:[#allocation2 + $0x58] sm:$0xff] }
 0x194   : > { %1113 = vmatmul.bf16.vlgmr.msrb.gmra.mxu3 %v10991_v20  ;;  %v948_v20 = vmul.f32 %v12246_v26, %v12162_v62  ;;  %v1558_v27 = vmul.f32 %v12250_v42, %v12157_v48  ;;  %v2041_v47 = vmul.f32 %v12252_v49, %v12157_v48  ;;  %v946_v60 = vmul.f32 %v12246_v26, %v12104_v46 }
 0x195   : > { %v2054_v56 = vpack.c.bf16 %v2044_v53, %v2043_v40  ;;  %v1248_v22 = vpack.c.bf16 %v1237_v9, %v1236_v59  ;;  %v1235_v62 = vmul.f32 %v12248_v41, %v12104_v46  ;;  %v1557_v5 = vmul.f32 %v12250_v42, %v12104_v46 }
 0x196   : > { %1173 = vmatpush.bf16.msrb.mxu2 %v961_v19  ;;  %1640 = vmatpush.bf16.msrb.mxu1 %v1572_v50  ;;  %v959_v18 = vpack.c.bf16 %v948_v20, %v947_v52  ;;  %v1570_v7 = vpack.c.bf16 %v1559_v51, %v1558_v27  ;;  %v2053_v39 = vpack.c.bf16 %v2042_v35, %v2041_v47 }
 0x197   : > { %1318 = vmatpush.bf16.msra.mxu3 %v1250_v8  ;;  %2123 = vmatpush.bf16.msra.mxu0 %v2055_v10  ;;  %v945_v19 = vmul.f32 %v12246_v26, %v12102_v43  ;;  %v2040_v23 = vmul.f32 %v12252_v49, %v12104_v46  ;;  %v1234_v48 = vmul.f32 %v12248_v41, %v12102_v43 }
 0x198   : > { %8983 = vperm.xlu1 %11430, %v8980_v33   ;;  %v1556_v24 = vmul.f32 %v12250_v42, %v12102_v43  ;;  %v2039_v50 = vmul.f32 %v12252_v49, %v12102_v43  ;;  %v943_v10 = vmul.f32 %v12246_v26, %v12213_v54  ;;  %v1232_v46 = vmul.f32 %v12248_v41, %v12213_v54 }
 0x199   : > { %v958_v8 = vpack.c.bf16 %v946_v60, %v945_v19  ;;  %v1247_v40 = vpack.c.bf16 %v1235_v62, %v1234_v48  ;;  %v1554_v33 = vmul.f32 %v12250_v42, %v12213_v54  ;;  %v2037_v43 = vmul.f32 %v12252_v49, %v12213_v54 }
 0x19a   : > { %1174 = vmatpush.bf16.msrb.mxu2 %v960_v3  ;;  %1641 = vmatpush.bf16.msrb.mxu1 %v1571_v11  ;;  %v1569_v53 = vpack.c.bf16 %v1557_v5, %v1556_v24  ;;  %v10992_v3 = vld [vmem:[#allocation2 + $0x78] sm:$0xff]  ;;  %v2052_v20 = vpack.c.bf16 %v2040_v23, %v2039_v50  ;;  %v1233_v11 = vmul.f32 %v12248_v41, %v12196_v2  ;;  %v10986_v24 = vld [vmem:[#allocation2 + $0x48] sm:$0xff] }
 0x19b   : > { %1319 = vmatpush.bf16.msra.mxu3 %v1249_v15  ;;  %2124 = vmatpush.bf16.msra.mxu0 %v2054_v56  ;;  %v944_v15 = vmul.f32 %v12246_v26, %v12196_v2  ;;  %v1555_v9 = vmul.f32 %v12250_v42, %v12196_v2  ;;  %v2038_v56 = vmul.f32 %v12252_v49, %v12196_v2 }
 0x19c   : > { %v942_v52 = vmul.f32 %v12246_v26, %v12264_v14  ;;  %v1246_v35 = vpack.c.bf16 %v1233_v11, %v1232_v46  ;;  %v1231_v54 = vmul.f32 %v12248_v41, %v12264_v14  ;;  %v1553_v27 = vmul.f32 %v12250_v42, %v12264_v14 }
 0x19d   : > { %v957_v51 = vpack.c.bf16 %v944_v15, %v943_v10  ;;  %v1568_v59 = vpack.c.bf16 %v1555_v9, %v1554_v33  ;;  %v941_v47 = vmul.f32 %v12246_v26, %v12243_v37  ;;  %v2036_v2 = vmul.f32 %v12252_v49, %v12264_v14  ;;  %v10993_v15 = vld [vmem:[#allocation2 + $0x80] sm:$0xff] }
 0x19e   : > { %1175 = vmatpush.bf16.msrb.mxu2 %v959_v18  ;;  %1642 = vmatpush.bf16.msrb.mxu1 %v1570_v7  ;;  %v2051_v18 = vpack.c.bf16 %v2038_v56, %v2037_v43  ;;  %v1230_v60 = vmul.f32 %v12248_v41, %v12243_v37  ;;  %v2035_v62 = vmul.f32 %v12252_v49, %v12243_v37  ;;  %v15154_v9 = vld [vmem:[#allocation18_spill] sm:$0xff]  ;;  %v10990_v56 = vld [vmem:[#allocation2 + $0x68] sm:$0xff] }
 0x19f   : > { %1320 = vmatpush.bf16.msra.mxu3 %v1248_v22  ;;  %2125 = vmatpush.bf16.msra.mxu0 %v2053_v39  ;;  %v1552_v22 = vmul.f32 %v12250_v42, %v12243_v37  ;;  %v956_v7 = vpack.c.bf16 %v942_v52, %v941_v47  ;;  %v940_v5 = vmul.f32 %v12246_v26, %v12262_v38  ;;  %v15160_v52 = vld [vmem:[#allocation14_spill] sm:$0xff]  ;;  %v15162_v47 = vld [vmem:[#allocation28_spill] sm:$0xff] }
 0x1a0   : > { %v1245_v39 = vpack.c.bf16 %v1231_v54, %v1230_v60  ;;  %v1229_v23 = vmul.f32 %v12248_v41, %v12262_v38  ;;  %v1551_v48 = vmul.f32 %v12250_v42, %v12262_v38  ;;  %v939_v50 = vmul.f32 %v12246_v26, %v12274_v28 }
 0x1a1   : > { %1098 = vmatmul.bf16.gmra.mxu2 %v10988_v13  ;;  %v1567_v19 = vpack.c.bf16 %v1553_v27, %v1552_v22  ;;  %v2034_v13 = vmul.f32 %v12252_v49, %v12262_v38  ;;  %v1228_v10 = vmul.f32 %v12248_v41, %v12274_v28  ;;  %v2033_v46 = vmul.f32 %v12252_v49, %v12274_v28  ;;  %v10989_v49 = vld [vmem:[#allocation2 + $0x60] sm:$0xff] }
 0x1a2   : > { %1176 = vmatpush.bf16.msrb.mxu2 %v958_v8  ;;  %1643 = vmatpush.bf16.msrb.mxu1 %v1569_v53  ;;  %v2050_v8 = vpack.c.bf16 %v2036_v2, %v2035_v62  ;;  %v955_v53 = vpack.c.bf16 %v940_v5, %v939_v50  ;;  %v15136_v41 = vpack.c.bf16 %v12072_v17, %v12059_v12  ;;  %v11001_v12 = vld [vmem:[#allocation2 + $0xc0] sm:$0xff]  ;;  %v15167_v5 = vld [vmem:[#allocation27_spill] sm:$0xff] }
 0x1a3   : > { %1321 = vmatpush.bf16.msra.mxu3 %v1247_v40  ;;  %2126 = vmatpush.bf16.msra.mxu0 %v2052_v20  ;;  %v1550_v40 = vmul.f32 %v12250_v42, %v12274_v28  ;;  %v1244_v33 = vpack.c.bf16 %v1229_v23, %v1228_v10  ;;  %v2049_v26 = vpack.c.bf16 %v2034_v13, %v2033_v46  ;;  %v11009_v17 = vld [vmem:[#allocation2 + $0x100] sm:$0xff] }
 0x1a4   : > { %1118 = vmatmul.bf16.gmra.mxu3 %v10992_v3  ;;  %1088 = vmatmul.bf16.gmra.mxu1 %v10986_v24  ;;  %v15135_v20 = vpack.c.bf16 %v12068_v16, %v12045_v6  ;;  %v15137_v42 = vpack.c.bf16 %v12091_v29, %v12078_v21  ;;  %v15138_v43 = vpack.c.bf16 %v11996_v31, %v11992_v30  ;;  %v15151_v29 = vld [vmem:[#allocation15_spill] sm:$0xff]  ;;  %v15164_v22 = vld [vmem:[#allocation26_spill] sm:$0xff] }
 0x1a5   : > { %v1566_v3 = vpack.c.bf16 %v1551_v48, %v1550_v40  ;;  %v15139_v11 = vpack.c.bf16 %v12006_v36, %v12000_v32  ;;  %v15140_v6 = vpack.c.bf16 %v12023_v45, %v12019_v44  ;;  %v15141_v16 = vpack.c.bf16 %v11913_v63, %v11896_v58  ;;  %1486 = vmatmul.bf16.vlgmr.msrb.gmra.mxu0 %v11001_v12  ;;  %v15145_v36 = vld [vmem:[#allocation21_spill] sm:$0xff]  ;;  %v15146_v44 = vld [vmem:[#allocation23_spill] sm:$0xff]  ;;  %v15148_v58 = vld [vmem:[#allocation22_spill] sm:$0xff] }
 0x1a6   : > { %1177 = vmatpush.bf16.msrb.mxu2 %v957_v51  ;;  %1644 = vmatpush.bf16.msrb.mxu1 %v1568_v59  ;;  %v15142_v30 = vpack.c.bf16 %v11917_v0, %v11906_v61  ;;  %v15143_v31 = vpack.c.bf16 %v11929_v4, %v11921_v1  ;;  %v15144_v32 = vpack.c.bf16 %v12211_v34, %v12207_v25  ;;  %v15149_v63 = vld [vmem:[#allocation24_spill] sm:$0xff]  ;;  %v15155_v1 = vld [vmem:[#allocation17_spill] sm:$0xff]  ;;  %v15158_v25 = vld [vmem:[#allocation19_spill] sm:$0xff] }
 0x1a7   : > { %1322 = vmatpush.bf16.msra.mxu3 %v1246_v35  ;;  %2127 = vmatpush.bf16.msra.mxu0 %v2051_v18  ;;  %v15147_v45 = vpack.c.bf16 %v15145_v36, %v15146_v44  ;;  %v15150_v21 = vpack.c.bf16 %v15148_v58, %v15149_v63  ;;  %v15152_v61 = vld [vmem:[#allocation16_spill] sm:$0xff]  ;;  %v15156_v4 = vpack.c.bf16 %v15154_v9, %v15155_v1  ;;  %v10994_v59 = vld [vmem:[#allocation2 + $0x88] sm:$0xff]  ;;  %v15161_v18 = vld [vmem:[#allocation25_spill] sm:$0xff] }
 0x1a8   : > { %v15153_v0 = vpack.c.bf16 %v15151_v29, %v15152_v61  ;;  %v15157_v51 = vld [vmem:[#allocation20_spill] sm:$0xff]  ;;  %v1714_v35 = vmul.f32 %v15160_v52, %v12264_v14  ;;  %v1875_v54 = vmul.f32 %v11888_v55, %v12264_v14  ;;  %v2197_v27 = vmul.f32 %v11892_v57, %v12264_v14  ;;  %v11013_v12 = vld [vmem:[#allocation2 + $0x120] sm:$0xff]  ;;  %v10982_v9 = vld [vmem:[#allocation2 + $0x28] sm:$0xff] }
 0x1a9   : > { %v15159_v34 = vpack.c.bf16 %v15157_v51, %v15158_v25  ;;  %v15163_v2 = vpack.c.bf16 %v15161_v18, %v15162_v47  ;;  %v1713_v60 = vmul.f32 %v15160_v52, %v12243_v37  ;;  %v1874_v23 = vmul.f32 %v11888_v55, %v12243_v37  ;;  %v10999_v36 = vld [vmem:[#allocation2 + $0xb0] sm:$0xff]  ;;  %v11000_v1 = vld [vmem:[#allocation2 + $0xb8] sm:$0xff]  ;;  %v11033_v47 = vld [vmem:[#allocation2 + $0x1c0] sm:$0xff] }
 0x1aa   : > { %1178 = vmatpush.bf16.msrb.mxu2 %v956_v7  ;;  %1645 = vmatpush.bf16.msrb.mxu1 %v1567_v19  ;;  %v15165_v7 = vld [vmem:[#allocation29_spill] sm:$0xff]  ;;  %v2196_v14 = vmul.f32 %v11892_v57, %v12243_v37  ;;  %v1712_v24 = vmul.f32 %v15160_v52, %v12262_v38  ;;  %v1873_v10 = vmul.f32 %v11888_v55, %v12262_v38  ;;  %v11010_v37 = vld [vmem:[#allocation2 + $0x108] sm:$0xff] }
 0x1ab   : > { %1323 = vmatpush.bf16.msra.mxu3 %v1245_v39  ;;  %2128 = vmatpush.bf16.msra.mxu0 %v2050_v8  ;;  %v15166_v62 = vpack.c.bf16 %v15164_v22, %v15165_v7  ;;  %v15168_v39 = vld [vmem:[#allocation30_spill] sm:$0xff]  ;;  %v1728_v48 = vpack.c.bf16 %v1714_v35, %v1713_v60  ;;  %v11002_v8 = vld [vmem:[#allocation2 + $0xc8] sm:$0xff]  ;;  %v1889_v50 = vpack.c.bf16 %v1875_v54, %v1874_v23  ;;  %v10983_v54 = vld [vmem:[#allocation2 + $0x30] sm:$0xff] }
 0x1ac   : > { %v15169_v19 = vpack.c.bf16 %v15167_v5, %v15168_v39  ;;  %v2211_v13 = vpack.c.bf16 %v2197_v27, %v2196_v14  ;;  %v2195_v40 = vmul.f32 %v11892_v57, %v12262_v38  ;;  %v1872_v46 = vmul.f32 %v11888_v55, %v12274_v28  ;;  %v10977_v38 = vld [vmem:[#allocation2] sm:$0xff]  ;;  %v10996_v55 = vld [vmem:[#allocation2 + $0x98] sm:$0xff]  ;;  %v11026_v14 = vld [vmem:[#allocation2 + $0x188] sm:$0xff] }
 0x1ad   : > { %v11025_v27 = vld [vmem:[#allocation2 + $0x180] sm:$0xff] }
 0x1ae   : > { %1179 = vmatpush.bf16.msrb.mxu2 %v955_v53  ;;  %1646 = vmatpush.bf16.msrb.mxu1 %v1566_v3  ;;  %v1711_v53 = vmul.f32 %v15160_v52, %v12274_v28  ;;  %v11041_v7 = vld [vmem:[#allocation2 + $0x200] sm:$0xff] }
 0x1af   : > { %1324 = vmatpush.bf16.msra.mxu3 %v1244_v33  ;;  %2129 = vmatpush.bf16.msra.mxu0 %v2049_v26  ;;  %v2194_v33 = vmul.f32 %v11892_v57, %v12274_v28  ;;  %v1888_v26 = vpack.c.bf16 %v1873_v10, %v1872_v46  ;;  %v11004_v57 = vld [vmem:[#allocation2 + $0xd8] sm:$0xff]  ;;  %v11042_v10 = vld [vmem:[#allocation2 + $0x208] sm:$0xff]  ;;  %v11017_v46 = vld [vmem:[#allocation2 + $0x140] sm:$0xff] }
 0x1b0   : > { %v1727_v3 = vpack.c.bf16 %v1712_v24, %v1711_v53  ;;  %v11012_v28 = vld [vmem:[#allocation2 + $0x118] sm:$0xff]  ;;  %v11034_v24 = vld [vmem:[#allocation2 + $0x1c8] sm:$0xff] }
 0x1b1   : > { %1103 = vmatmul.bf16.gmra.mxu2 %v10989_v49  ;;  %v11011_v49 = vld [vmem:[#allocation2 + $0x110] sm:$0xff] }
 0x1b2   : > { %1800 = vmatpush.bf16.msra.mxu2 %v15135_v20  ;;  %2283 = vmatpush.bf16.msra.mxu1 %v15137_v42  ;;  %v2210_v20 = vpack.c.bf16 %v2195_v40, %v2194_v33  ;;  %v11003_v42 = vld [vmem:[#allocation2 + $0xd0] sm:$0xff] }
 0x1b3   : > { %1961 = vmatpush.bf16.msrb.mxu3 %v15136_v41  ;;  %v10995_v41 = vld [vmem:[#allocation2 + $0x90] sm:$0xff] }
 0x1b4   : > { %1325 = vmatmul.bf16.vlgmr.msra.gmra.mxu3 %v10993_v15  ;;  %1647 = vmatmul.bf16.vlgmr.msrb.gmra.mxu1 %v11009_v17  ;;  %v10978_v15 = vld [vmem:[#allocation2 + $0x8] sm:$0xff] }
 0x1b5   : > { %1491 = vmatmul.bf16.gmra.mxu0 %v11002_v8  ;;  %v10998_v17 = vld [vmem:[#allocation2 + $0xa8] sm:$0xff] }
 0x1b6   : > { %1801 = vmatpush.bf16.msra.mxu2 %v15138_v43  ;;  %2284 = vmatpush.bf16.msra.mxu1 %v15140_v6  ;;  %v10979_v43 = vld [vmem:[#allocation2 + $0x10] sm:$0xff]  ;;  %v11005_v6 = vld [vmem:[#allocation2 + $0xe0] sm:$0xff] }
 0x1b7   : > { %1962 = vmatpush.bf16.msrb.mxu3 %v15139_v11  ;;  %v10997_v11 = vld [vmem:[#allocation2 + $0xa0] sm:$0xff] }
 0x1ba   : > { %1802 = vmatpush.bf16.msra.mxu2 %v15141_v16  ;;  %2285 = vmatpush.bf16.msra.mxu1 %v15143_v31  ;;  %v10980_v16 = vld [vmem:[#allocation2 + $0x18] sm:$0xff]  ;;  %v11014_v31 = vld [vmem:[#allocation2 + $0x128] sm:$0xff] }
 0x1bb   : > { %1963 = vmatpush.bf16.msrb.mxu3 %v15142_v30  ;;  %v11006_v30 = vld [vmem:[#allocation2 + $0xe8] sm:$0xff] }
 0x1be   : > { %1803 = vmatpush.bf16.msra.mxu2 %v15144_v32  ;;  %2286 = vmatpush.bf16.msra.mxu1 %v15150_v21  ;;  %v10981_v32 = vld [vmem:[#allocation2 + $0x20] sm:$0xff]  ;;  %v11015_v21 = vld [vmem:[#allocation2 + $0x130] sm:$0xff] }
 0x1bf   : > { %1964 = vmatpush.bf16.msrb.mxu3 %v15147_v45  ;;  %v11007_v45 = vld [vmem:[#allocation2 + $0xf0] sm:$0xff] }
 0x1c1   : > { %1108 = vmatmul.bf16.gmra.mxu2 %v10990_v56  ;;  %v11016_v56 = vld [vmem:[#allocation2 + $0x138] sm:$0xff] }
 0x1c2   : > { %1804 = vmatpush.bf16.msra.mxu2 %v15153_v0  ;;  %2287 = vmatpush.bf16.msra.mxu1 %v15159_v34 }
 0x1c3   : > { %1965 = vmatpush.bf16.msrb.mxu3 %v15156_v4  ;;  %v11008_v4 = vld [vmem:[#allocation2 + $0xf8] sm:$0xff] }
 0x1c4   : > { %1330 = vmatmul.bf16.gmra.mxu3 %v10994_v59  ;;  %1652 = vmatmul.bf16.gmra.mxu1 %v11010_v37 }
 0x1c5   : > { %1496 = vmatmul.bf16.gmra.mxu0 %v11003_v42 }
 0x1c6   : > { %1805 = vmatpush.bf16.msra.mxu2 %v15163_v2  ;;  %2288 = vmatpush.bf16.msra.mxu1 %v15169_v19  ;;  %v10984_v19 = vld [vmem:[#allocation2 + $0x38] sm:$0xff] }
 0x1c7   : > { %1966 = vmatpush.bf16.msrb.mxu3 %v15166_v62 }
 0x1ca   : > { %1806 = vmatpush.bf16.msra.mxu2 %v1728_v48  ;;  %2289 = vmatpush.bf16.msra.mxu1 %v2211_v13 }
 0x1cb   : > { %1967 = vmatpush.bf16.msrb.mxu3 %v1889_v50 }
 0x1ce   : > { %1807 = vmatpush.bf16.msra.mxu2 %v1727_v3  ;;  %2290 = vmatpush.bf16.msra.mxu1 %v2210_v20  ;;  %v11027_v3 = vld [vmem:[#allocation2 + $0x190] sm:$0xff] }
 0x1cf   : > { %1968 = vmatpush.bf16.msrb.mxu3 %v1888_v26  ;;  %v11035_v20 = vld [vmem:[#allocation2 + $0x1d0] sm:$0xff] }
 0x1d1   : > { %1180 = vmatmul.bf16.vlgmr.msrb.gmra.mxu2 %v10977_v38 }
 0x1d4   : > { %1335 = vmatmul.bf16.gmra.mxu3 %v10995_v41  ;;  %1657 = vmatmul.bf16.gmra.mxu1 %v11011_v49 }
 0x1d5   : > { %1501 = vmatmul.bf16.gmra.mxu0 %v11004_v57 }
 0x1e1   : > { %1185 = vmatmul.bf16.gmra.mxu2 %v10978_v15 }
 0x1e4   : > { %1340 = vmatmul.bf16.gmra.mxu3 %v10996_v55  ;;  %1662 = vmatmul.bf16.gmra.mxu1 %v11012_v28  ;;  %v11043_v55 = vld [vmem:[#allocation2 + $0x210] sm:$0xff] }
 0x1e5   : > { %1506 = vmatmul.bf16.gmra.mxu0 %v11005_v6 }
 0x1f1   : > { %1190 = vmatmul.bf16.gmra.mxu2 %v10979_v43 }
 0x1f4   : > { %1345 = vmatmul.bf16.gmra.mxu3 %v10997_v11  ;;  %1667 = vmatmul.bf16.gmra.mxu1 %v11013_v12 }
 0x1f5   : > { %1511 = vmatmul.bf16.gmra.mxu0 %v11006_v30  ;;  %v11028_v30 = vld [vmem:[#allocation2 + $0x198] sm:$0xff] }
 0x201   : > { %1195 = vmatmul.bf16.gmra.mxu2 %v10980_v16  ;;  %v11018_v16 = vld [vmem:[#allocation2 + $0x148] sm:$0xff] }
 0x204   : > { %1350 = vmatmul.bf16.gmra.mxu3 %v10998_v17  ;;  %1672 = vmatmul.bf16.gmra.mxu1 %v11014_v31 }
 0x205   : > { %1516 = vmatmul.bf16.gmra.mxu0 %v11007_v45 }
 0x20e   : > { %v12536_v44 = vpop.f32.mrf.mxu1 }
 0x211   : > { %1200 = vmatmul.bf16.gmra.mxu2 %v10981_v32 }
 0x214   : > { %1355 = vmatmul.bf16.gmra.mxu3 %v10999_v36  ;;  %v12538_v58 = vpop.f32.mrf.mxu2  ;;  %1677 = vmatmul.bf16.gmra.mxu1 %v11015_v21  ;;  %v11036_v36 = vld [vmem:[#allocation2 + $0x1d8] sm:$0xff] }
 0x215   : > { %1521 = vmatmul.bf16.gmra.mxu0 %v11008_v4 }
 0x216   : > { %v12544_v61 = vpop.f32.mrf.mxu1 }
 0x217   : > { %v12540_v63 = vpop.f32.mrf.mxu3 }
 0x21c   : > { %v12542_v29 = vpop.f32.mrf.mxu2 }
 0x21f   : > { %v12546_v0 = vpop.f32.mrf.mxu3 }
 0x221   : > { %1205 = vmatmul.bf16.gmra.mxu2 %v10982_v9  ;;  %v12552_v34 = vpop.f32.mrf.mxu1 }
 0x222   : > { %v1487_v18 = vpop.f32.mrf.mxu0 }
 0x224   : > { %1360 = vmatmul.bf16.gmra.mxu3 %v11000_v1  ;;  %v12548_v51 = vpop.f32.mrf.mxu2  ;;  %1682 = vmatmul.bf16.gmra.mxu1 %v11016_v56 }
 0x225   : > { %2130 = vmatmul.bf16.vlgmr.msra.gmra.mxu0 %v11033_v47 }
 0x227   : > { %v12550_v25 = vpop.f32.mrf.mxu3 }
 0x229   : > { %v12558_v59 = vpop.f32.mrf.mxu1 }
 0x22a   : > { %v1489_v62 = vpop.f32.mrf.mxu0 }
 0x22c   : > { %v12554_v52 = vpop.f32.mrf.mxu2 }
 0x22f   : > { %v12556_v35 = vpop.f32.mrf.mxu3 }
 0x231   : > { %1210 = vmatmul.bf16.gmra.mxu2 %v10983_v54  ;;  %v1648_v22 = vpop.f32.mrf.mxu1 }
 0x232   : > { %v1492_v48 = vpop.f32.mrf.mxu0 }
 0x234   : > { %1969 = vmatmul.bf16.vlgmr.msrb.gmra.mxu3 %v11025_v27  ;;  %v12560_v2 = vpop.f32.mrf.mxu2  ;;  %2291 = vmatmul.bf16.vlgmr.msra.gmra.mxu1 %v11041_v7  ;;  %v11019_v7 = vld [vmem:[#allocation2 + $0x150] sm:$0xff] }
 0x235   : > { %2135 = vmatmul.bf16.gmra.mxu0 %v11034_v24 }
 0x237   : > { %v1326_v60 = vpop.f32.mrf.mxu3 }
 0x239   : > { %v1650_v23 = vpop.f32.mrf.mxu1 }
 0x23a   : > { %v1494_v40 = vpop.f32.mrf.mxu0 }
 0x23c   : > { %v12562_v5 = vpop.f32.mrf.mxu2 }
 0x23f   : > { %v1328_v39 = vpop.f32.mrf.mxu3 }
 0x241   : > { %1215 = vmatmul.bf16.gmra.mxu2 %v10984_v19  ;;  %v1653_v13 = vpop.f32.mrf.mxu1 }
 0x242   : > { %v1497_v26 = vpop.f32.mrf.mxu0 }
 0x244   : > { %1974 = vmatmul.bf16.gmra.mxu3 %v11026_v14  ;;  %v12564_v8 = vpop.f32.mrf.mxu2  ;;  %2296 = vmatmul.bf16.gmra.mxu1 %v11042_v10 }
 0x245   : > { %2140 = vmatmul.bf16.gmra.mxu0 %v11035_v20 }
 0x247   : > { %v1331_v50 = vpop.f32.mrf.mxu3 }
 0x249   : > { %v1655_v33 = vpop.f32.mrf.mxu1 }
 0x24a   : > { %v12569_v57 = vpop.f32.mrf.mxu0 }
 0x24c   : > { %v12566_v53 = vpop.f32.mrf.mxu2 }
 0x24f   : > { %v1333_v37 = vpop.f32.mrf.mxu3 }
 0x251   : > { %1808 = vmatmul.bf16.vlgmr.msra.gmra.mxu2 %v11017_v46  ;;  %v1658_v49 = vpop.f32.mrf.mxu1 }
 0x252   : > { %v12574_v32 = vpop.f32.mrf.mxu0 }
 0x254   : > { %1979 = vmatmul.bf16.gmra.mxu3 %v11027_v3  ;;  %v1181_v38 = vpop.f32.mrf.mxu2  ;;  %2301 = vmatmul.bf16.gmra.mxu1 %v11043_v55  ;;  %v11045_v3 = vld [vmem:[#allocation2 + $0x220] sm:$0xff]  ;;  %v11030_v55 = vld [vmem:[#allocation2 + $0x1a8] sm:$0xff] }
 0x255   : > { %v1182_v42 = vadd.f32 %v1181_v38, %v12536_v44  ;;  %2145 = vmatmul.bf16.gmra.mxu0 %v11036_v36 }
 0x257   : > { %v1336_v41 = vpop.f32.mrf.mxu3  ;;  %v1366_v15 = vadd.f32 %v1326_v60, %v1182_v42 }
 0x259   : > { %v1527_v28 = vadd.f32 %v1487_v18, %v1366_v15  ;;  %v1660_v17 = vpop.f32.mrf.mxu1 }
 0x25a   : > { %v12579_v54 = vpop.f32.mrf.mxu0 }
 0x25b   : > { %v12571_v43 = vadd.f32 %v1648_v22, %v1527_v28 }
 0x25c   : > { %v1183_v11 = vpop.f32.mrf.mxu2 }
 0x25d   : > { %v1184_v12 = vadd.f32 %v1183_v11, %v12544_v61  ;;  %v11044_v61 = vld [vmem:[#allocation2 + $0x218] sm:$0xff] }
 0x25f   : > { %v1338_v6 = vpop.f32.mrf.mxu3  ;;  %v1367_v31 = vadd.f32 %v1328_v39, %v1184_v12  ;;  %v11029_v39 = vld [vmem:[#allocation2 + $0x1a0] sm:$0xff] }
 0x261   : > { %1813 = vmatmul.bf16.gmra.mxu2 %v11018_v16  ;;  %v1528_v44 = vadd.f32 %v1489_v62, %v1367_v31  ;;  %v1663_v4 = vpop.f32.mrf.mxu1  ;;  %v11046_v31 = vld [vmem:[#allocation2 + $0x228] sm:$0xff] }
 0x263   : > { %v12576_v45 = vadd.f32 %v1650_v23, %v1528_v44  ;;  %v1507_v23 = vpop.f32.mrf.mxu0 }
 0x264   : > { %1984 = vmatmul.bf16.gmra.mxu3 %v11028_v30  ;;  %v1186_v21 = vpop.f32.mrf.mxu2  ;;  %2306 = vmatmul.bf16.gmra.mxu1 %v11044_v61  ;;  %v11031_v61 = vld [vmem:[#allocation2 + $0x1b0] sm:$0xff] }
 0x265   : > { %v1187_v1 = vadd.f32 %v1186_v21, %v12552_v34  ;;  %v11037_v34 = vld [vmem:[#allocation2 + $0x1e0] sm:$0xff] }
 0x266   : > { %2150 = vmatmul.bf16.gmra.mxu0 %v11037_v34 }
 0x267   : > { %v1341_v9 = vpop.f32.mrf.mxu3  ;;  %v1368_v56 = vadd.f32 %v1331_v50, %v1187_v1 }
 0x269   : > { %v1529_v27 = vadd.f32 %v1492_v48, %v1368_v56  ;;  %v1665_v62 = vpop.f32.mrf.mxu1 }
 0x26b   : > { %v12581_v18 = vadd.f32 %v1653_v13, %v1529_v27  ;;  %v11039_v27 = vld [vmem:[#allocation2 + $0x1f0] sm:$0xff] }
 0x26c   : > { %v1188_v47 = vpop.f32.mrf.mxu2 }
 0x26d   : > { %v1189_v22 = vadd.f32 %v1188_v47, %v12558_v59  ;;  %v12587_v59 = vpop.f32.mrf.mxu0 }
 0x26f   : > { %v1343_v60 = vpop.f32.mrf.mxu3  ;;  %v1369_v19 = vadd.f32 %v1333_v37, %v1189_v22 }
 0x271   : > { %1818 = vmatmul.bf16.gmra.mxu2 %v11019_v7  ;;  %v1530_v14 = vadd.f32 %v1494_v40, %v1369_v19  ;;  %v1668_v10 = vpop.f32.mrf.mxu1  ;;  %v11047_v19 = vld [vmem:[#allocation2 + $0x230] sm:$0xff] }
 0x273   : > { %v12584_v24 = vadd.f32 %v1655_v33, %v1530_v14  ;;  %v11020_v33 = vld [vmem:[#allocation2 + $0x158] sm:$0xff] }
 0x274   : > { %1989 = vmatmul.bf16.gmra.mxu3 %v11029_v39  ;;  %v1191_v50 = vpop.f32.mrf.mxu2  ;;  %2311 = vmatmul.bf16.gmra.mxu1 %v11045_v3 }
 0x275   : > { %v1192_v13 = vadd.f32 %v1191_v50, %v12538_v58  ;;  %v1512_v58 = vpop.f32.mrf.mxu0 }
 0x277   : > { %v1346_v48 = vpop.f32.mrf.mxu3  ;;  %v1370_v46 = vadd.f32 %v1336_v41, %v1192_v13  ;;  %v11038_v41 = vld [vmem:[#allocation2 + $0x1e8] sm:$0xff] }
 0x278   : > { %2155 = vmatmul.bf16.gmra.mxu0 %v11038_v41  ;;  %v11023_v41 = vld [vmem:[#allocation2 + $0x170] sm:$0xff] }
 0x279   : > { %v1531_v20 = vadd.f32 %v1497_v26, %v1370_v46  ;;  %v12594_v15 = vpop.f32.mrf.mxu1 }
 0x27b   : > { %v12589_v37 = vadd.f32 %v1658_v49, %v1531_v20 }
 0x27c   : > { %v1193_v38 = vpop.f32.mrf.mxu2 }
 0x27d   : > { %v1194_v40 = vadd.f32 %v1193_v38, %v12542_v29  ;;  %v12600_v36 = vpop.f32.mrf.mxu0 }
 0x27f   : > { %v12591_v42 = vpop.f32.mrf.mxu3  ;;  %v1371_v28 = vadd.f32 %v1338_v6, %v1194_v40 }
 0x281   : > { %1823 = vmatmul.bf16.gmra.mxu2 %v11020_v33  ;;  %v1532_v11 = vadd.f32 %v12569_v57, %v1371_v28  ;;  %v1673_v30 = vpop.f32.mrf.mxu1 }
 0x283   : > { %v12597_v26 = vadd.f32 %v1660_v17, %v1532_v11  ;;  %v11021_v17 = vld [vmem:[#allocation2 + $0x160] sm:$0xff] }
 0x284   : > { %1994 = vmatmul.bf16.gmra.mxu3 %v11030_v55  ;;  %v1196_v49 = vpop.f32.mrf.mxu2  ;;  %2316 = vmatmul.bf16.gmra.mxu1 %v11046_v31 }
 0x285   : > { %v1197_v16 = vadd.f32 %v1196_v49, %v12548_v51  ;;  %v9471_v49 = vld [vmem:[%s15064_s7 + $0x2] sm:$0x3] }
 0x287   : > { %v1351_v12 = vpop.f32.mrf.mxu3  ;;  %v1372_v29 = vadd.f32 %v1341_v9, %v1197_v16  ;;  %v1517_v9 = vpop.f32.mrf.mxu0 }
 0x288   : > { %2160 = vmatmul.bf16.gmra.mxu0 %v11039_v27 }
 0x289   : > { %v1533_v6 = vadd.f32 %v12574_v32, %v1372_v29  ;;  %v12608_v56 = vpop.f32.mrf.mxu1 }
 0x28b   : > { %v12603_v44 = vadd.f32 %v1663_v4, %v1533_v6 }
 0x28c   : > { %v1198_v21 = vpop.f32.mrf.mxu2 }
 0x28d   : > { %v1199_v57 = vadd.f32 %v1198_v21, %v12554_v52 }
 0x28f   : > { %v12605_v1 = vpop.f32.mrf.mxu3  ;;  %v1373_v51 = vadd.f32 %v1343_v60, %v1199_v57  ;;  %v12614_v14 = vpop.f32.mrf.mxu0 }
 0x291   : > { %1828 = vmatmul.bf16.gmra.mxu2 %v11021_v17  ;;  %v1534_v47 = vadd.f32 %v12579_v54, %v1373_v51  ;;  %v1678_v39 = vpop.f32.mrf.mxu1  ;;  %v11022_v54 = vld [vmem:[#allocation2 + $0x168] sm:$0xff]  ;;  %v11024_v51 = vld [vmem:[#allocation2 + $0x178] sm:$0xff] }
 0x293   : > { %v12611_v32 = vadd.f32 %v1665_v62, %v1534_v47  ;;  %v11032_v62 = vld [vmem:[#allocation2 + $0x1b8] sm:$0xff] }
 0x294   : > { %1999 = vmatmul.bf16.gmra.mxu3 %v11031_v61  ;;  %v1201_v4 = vpop.f32.mrf.mxu2  ;;  %2321 = vmatmul.bf16.gmra.mxu1 %v11047_v19 }
 0x295   : > { %v1202_v7 = vadd.f32 %v1201_v4, %v12560_v2  ;;  %v11040_v2 = vld [vmem:[#allocation2 + $0x1f8] sm:$0xff] }
 0x297   : > { %v1356_v22 = vpop.f32.mrf.mxu3  ;;  %v1374_v52 = vadd.f32 %v1346_v48, %v1202_v7  ;;  %v1522_v20 = vpop.f32.mrf.mxu0 }
 0x298   : > { %2165 = vmatmul.bf16.gmra.mxu0 %v11040_v2 }
 0x299   : > { %v1535_v34 = vadd.f32 %v1507_v23, %v1374_v52  ;;  %v12622_v46 = vpop.f32.mrf.mxu1 }
 0x29b   : > { %v12616_v60 = vadd.f32 %v1668_v10, %v1535_v34  ;;  %v11048_v10 = vld [vmem:[#allocation2 + $0x238] sm:$0xff] }
 0x29c   : > { %v12618_v50 = vpop.f32.mrf.mxu2 }
 0x29f   : > { %v12620_v13 = vpop.f32.mrf.mxu3  ;;  %v12634_v16 = vpop.f32.mrf.mxu0 }
 0x2a1   : > { %1833 = vmatmul.bf16.gmra.mxu2 %v11022_v54  ;;  %v1683_v40 = vpop.f32.mrf.mxu1 }
 0x2a4   : > { %2004 = vmatmul.bf16.gmra.mxu3 %v11032_v62  ;;  %v1206_v48 = vpop.f32.mrf.mxu2  ;;  %2326 = vmatmul.bf16.gmra.mxu1 %v11048_v10  ;;  %v2500_v62 = vld [vmem:[%s15064_s7] sm:$0x3] }
 0x2a5   : > { %v1207_v23 = vadd.f32 %v1206_v48, %v12564_v8  ;;  %v2606_v8 = vsel %vm2526_vm1, %v9471_v49, 0  ;;  %v2528_v2 = vsel %vm2526_vm1, %v2500_v62, 0 }
 0x2a6   : > { %2615 = vmatpush.bf16.msra.mxu3 %v2606_v8  ;;  %2537 = vmatpush.bf16.msrb.mxu2 %v2528_v2  ;;  %v2367_v8 = vpop.permute.xlu1 %2366 }
 0x2a7   : > { %v1361_v3 = vpop.f32.mrf.mxu3  ;;  %v1376_v38 = vadd.f32 %v1351_v12, %v1207_v23  ;;  %v2131_v21 = vpop.f32.mrf.mxu0 }
 0x2a9   : > { %v1537_v33 = vadd.f32 %v1512_v58, %v1376_v38  ;;  %v12637_v12 = vpop.f32.mrf.mxu1 }
 0x2ab   : > { %v12625_v55 = vadd.f32 %v1673_v30, %v1537_v33 }
 0x2ac   : > { %v12627_v28 = vpop.f32.mrf.mxu2 }
 0x2af   : > { %v12629_v11 = vpop.f32.mrf.mxu3  ;;  %v2133_v4 = vpop.f32.mrf.mxu0 }
 0x2b1   : > { %1838 = vmatmul.bf16.gmra.mxu2 %v11023_v41  ;;  %v2292_v61 = vpop.f32.mrf.mxu1 }
 0x2b4   : > { %v1211_v58 = vpop.f32.mrf.mxu2 }
 0x2b5   : > { %v1212_v30 = vadd.f32 %v1211_v58, %v12540_v63 }
 0x2b7   : > { %v1378_v29 = vadd.f32 %v1356_v22, %v1212_v30  ;;  %v1970_v31 = vpop.f32.mrf.mxu3 }
 0x2b9   : > { %v1539_v6 = vadd.f32 %v1517_v9, %v1378_v29  ;;  %v2294_v52 = vpop.f32.mrf.mxu1 }
 0x2bb   : > { %v12640_v57 = vadd.f32 %v1678_v39, %v1539_v6  ;;  %v2136_v39 = vpop.f32.mrf.mxu0 }
 0x2bc   : > { %v12642_v17 = vpop.f32.mrf.mxu2 }
 0x2bf   : > { %v1972_v27 = vpop.f32.mrf.mxu3 }
 0x2c1   : > { %1843 = vmatmul.bf16.gmra.mxu2 %v11024_v51  ;;  %v2297_v54 = vpop.f32.mrf.mxu1  ;;  %v2372_v51 = vpop.permute.xlu2 %2371 }
 0x2c4   : > { %v1216_v47 = vpop.f32.mrf.mxu2 }
 0x2c5   : > { %v1217_v7 = vadd.f32 %v1216_v47, %v12550_v25 }
 0x2c7   : > { %v1380_v19 = vadd.f32 %v1361_v3, %v1217_v7  ;;  %v1975_v9 = vpop.f32.mrf.mxu3 }
 0x2c9   : > { %v1541_v34 = vadd.f32 %v1522_v20, %v1380_v19  ;;  %v2138_v20 = vpop.f32.mrf.mxu0  ;;  %v2299_v10 = vpop.f32.mrf.mxu1 }
 0x2cb   : > { %v12645_v63 = vadd.f32 %v1683_v40, %v1541_v34 }
 0x2cc   : > { %v12647_v22 = vpop.f32.mrf.mxu2 }
 0x2cf   : > { %v1977_v23 = vpop.f32.mrf.mxu3 }
 0x2d1   : > { %v2141_v6 = vpop.f32.mrf.mxu0  ;;  %v2302_v19 = vpop.f32.mrf.mxu1 }
 0x2d4   : > { %v1809_v48 = vpop.f32.mrf.mxu2 }
 0x2d5   : > { %v1849_v25 = vadd.f32 %v1809_v48, %v12571_v43 }
 0x2d7   : > { %v2010_v3 = vadd.f32 %v1970_v31, %v1849_v25  ;;  %v1980_v58 = vpop.f32.mrf.mxu3 }
 0x2d9   : > { %v2171_v38 = vadd.f32 %v2131_v21, %v2010_v3 }
 0x2db   : > { %v2332_v33 = vadd.f32 %v2292_v61, %v2171_v38  ;;  %v2377_v38 = vpop.permute.xlu0 %2376 }
 0x2dc   : > { %v1811_v40 = vpop.f32.mrf.mxu2 }
 0x2dd   : > { %v1850_v41 = vadd.f32 %v1811_v40, %v12576_v45  ;;  %v2444_v30 = vadd.f32 %v2367_v8, %v2332_v33  ;;  %v2382_v33 = vpop.permute.xlu1 %2381 }
 0x2df   : > { %v2011_v49 = vadd.f32 %v1972_v27, %v1850_v41  ;;  %v2460_v43 = vmul.f32 0.2, %v2444_v30  ;;  %v1982_v45 = vpop.f32.mrf.mxu3 }
 0x2e1   : > { %v2172_v29 = vadd.f32 %v2133_v4, %v2011_v49  ;;  %v2476_v2 = vmax.f32 %v2444_v30, %v2460_v43  ;;  %v2143_v4 = vpop.f32.mrf.mxu0 }
 0x2e3   : > { %v2333_v47 = vadd.f32 %v2294_v52, %v2172_v29 }
 0x2e4   : > { %v1814_v7 = vpop.f32.mrf.mxu2 }
 0x2e5   : > { %v2445_v34 = vadd.f32 %v2372_v51, %v2333_v47  ;;  %v1851_v31 = vadd.f32 %v1814_v7, %v12581_v18  ;;  %v2304_v18 = vpop.f32.mrf.mxu1 }
 0x2e7   : > { %v2461_v21 = vmul.f32 0.2, %v2445_v34  ;;  %v2012_v62 = vadd.f32 %v1975_v9, %v1851_v31  ;;  %v1985_v8 = vpop.f32.mrf.mxu3 }
 0x2e9   : > { %v2477_v61 = vmax.f32 %v2445_v34, %v2461_v21  ;;  %v2173_v48 = vadd.f32 %v2136_v39, %v2012_v62 }
 0x2eb   : > { %v12656_v27 = vpack.c.bf16 %v2477_v61, %v2476_v2  ;;  %v2334_v3 = vadd.f32 %v2297_v54, %v2173_v48  ;;  %v2387_v2 = vpop.permute.xlu2 %2386 }
 0x2ec   : > { %v1816_v25 = vpop.f32.mrf.mxu2 }
 0x2ed   : > { %v1852_v52 = vadd.f32 %v1816_v25, %v12584_v24  ;;  %9463 = vmatmul.msk.bf16.vlgmr.msrb.gmra.mxu2 %vm2501_vm2, %v12656_v27  ;;  %9472 = vmatmul.msk.bf16.vlgmr.msra.gmra.mxu3 %vm2501_vm2, %v12656_v27  ;;  %v2446_v40 = vadd.f32 %v2377_v38, %v2334_v3  ;;  %v2146_v24 = vpop.f32.mrf.mxu0  ;;  %v2307_v7 = vpop.f32.mrf.mxu1 }
 0x2ee   : > { %v2392_v3 = vpop.permute.xlu0 %2391 }
 0x2ef   : > { %v2013_v9 = vadd.f32 %v1977_v23, %v1852_v52  ;;  %v2462_v30 = vmul.f32 0.2, %v2446_v40 }
 0x2f1   : > { %v2174_v39 = vadd.f32 %v2138_v20, %v2013_v9  ;;  %v2478_v43 = vmax.f32 %v2446_v40, %v2462_v30 }
 0x2f3   : > { %v2335_v41 = vadd.f32 %v2299_v10, %v2174_v39 }
 0x2f4   : > { %v1819_v49 = vpop.f32.mrf.mxu2 }
 0x2f5   : > { %v2447_v29 = vadd.f32 %v2382_v33, %v2335_v41  ;;  %v1853_v54 = vadd.f32 %v1819_v49, %v12589_v37  ;;  %v1987_v37 = vpop.f32.mrf.mxu3  ;;  %v2309_v25 = vpop.f32.mrf.mxu1 }
 0x2f7   : > { %v2463_v51 = vmul.f32 0.2, %v2447_v29  ;;  %v2014_v47 = vadd.f32 %v1980_v58, %v1853_v54  ;;  %v2148_v58 = vpop.f32.mrf.mxu0 }
 0x2f9   : > { %v2479_v34 = vmax.f32 %v2447_v29, %v2463_v51  ;;  %v2175_v31 = vadd.f32 %v2141_v6, %v2014_v47  ;;  %v2397_v51 = vpop.permute.xlu1 %2396 }
 0x2fb   : > { %v12664_v21 = vpack.c.bf16 %v2479_v34, %v2478_v43  ;;  %v2336_v62 = vadd.f32 %v2302_v19, %v2175_v31  ;;  %v2402_v34 = vpop.permute.xlu2 %2401 }
 0x2fc   : > { %v1821_v23 = vpop.f32.mrf.mxu2 }
 0x2fd   : > { %v1854_v20 = vadd.f32 %v1821_v23, %v12597_v26  ;;  %9464 = vmatmul.msk.bf16.gmra.mxu2 %vm2501_vm2, %v12664_v21  ;;  %9473 = vmatmul.msk.bf16.gmra.mxu3 %vm2501_vm2, %v12664_v21  ;;  %v2448_v61 = vadd.f32 %v2387_v2, %v2336_v62  ;;  %v1990_v39 = vpop.f32.mrf.mxu3  ;;  %v2312_v54 = vpop.f32.mrf.mxu1 }
 0x2ff   : > { %v2015_v10 = vadd.f32 %v1982_v45, %v1854_v20  ;;  %v2464_v9 = vmul.f32 0.2, %v2448_v61  ;;  %v2151_v30 = vpop.f32.mrf.mxu0 }
 0x301   : > { %v2176_v48 = vadd.f32 %v2143_v4, %v2015_v10  ;;  %v2480_v33 = vmax.f32 %v2448_v61, %v2464_v9 }
 0x303   : > { %v2337_v6 = vadd.f32 %v2304_v18, %v2176_v48 }
 0x304   : > { %v1824_v52 = vpop.f32.mrf.mxu2 }
 0x305   : > { %v2449_v19 = vadd.f32 %v2392_v3, %v2337_v6  ;;  %v1855_v26 = vadd.f32 %v1824_v52, %v12603_v44  ;;  %v1204_v44 = vadd.f32 %v12618_v50, %v12562_v5  ;;  %v1992_v43 = vpop.f32.mrf.mxu3  ;;  %v2314_v2 = vpop.f32.mrf.mxu1 }
 0x307   : > { %v2465_v38 = vmul.f32 0.2, %v2449_v19  ;;  %v2016_v40 = vadd.f32 %v1985_v8, %v1855_v26  ;;  %v1375_v31 = vadd.f32 %v12591_v42, %v1204_v44  ;;  %v2407_v26 = vpop.permute.xlu0 %2406 }
 0x309   : > { %v2481_v41 = vmax.f32 %v2449_v19, %v2465_v38  ;;  %v2177_v49 = vadd.f32 %v2146_v24, %v2016_v40  ;;  %v1536_v5 = vadd.f32 %v12587_v59, %v1375_v31  ;;  %v1209_v59 = vadd.f32 %v12627_v28, %v12566_v53 }
 0x30b   : > { %v12672_v45 = vpack.c.bf16 %v2481_v41, %v2480_v33  ;;  %v2338_v4 = vadd.f32 %v2307_v7, %v2177_v49  ;;  %v1697_v3 = vadd.f32 %v12594_v15, %v1536_v5  ;;  %v1377_v15 = vadd.f32 %v12605_v1, %v1209_v59  ;;  %v2412_v41 = vpop.permute.xlu1 %2411 }
 0x30c   : > { %v1826_v29 = vpop.f32.mrf.mxu2 }
 0x30d   : > { %v1856_v18 = vadd.f32 %v1826_v29, %v12611_v32  ;;  %9465 = vmatmul.msk.bf16.gmra.mxu2 %vm2501_vm2, %v12672_v45  ;;  %9474 = vmatmul.msk.bf16.gmra.mxu3 %vm2501_vm2, %v12672_v45  ;;  %v2450_v24 = vadd.f32 %v2397_v51, %v2338_v4  ;;  %v2153_v32 = vpop.f32.mrf.mxu0  ;;  %v2317_v38 = vpop.f32.mrf.mxu1 }
 0x30f   : > { %v2017_v8 = vadd.f32 %v1987_v37, %v1856_v18  ;;  %v2466_v62 = vmul.f32 0.2, %v2450_v24 }
 0x311   : > { %v2178_v47 = vadd.f32 %v2148_v58, %v2017_v8  ;;  %v2482_v50 = vmax.f32 %v2450_v24, %v2466_v62  ;;  %v1538_v8 = vadd.f32 %v12600_v36, %v1377_v15  ;;  %v1214_v36 = vadd.f32 %v12642_v17, %v12546_v0 }
 0x313   : > { %v2339_v7 = vadd.f32 %v2309_v25, %v2178_v47  ;;  %v1995_v25 = vpop.f32.mrf.mxu3  ;;  %v1699_v1 = vadd.f32 %v12608_v56, %v1538_v8  ;;  %v1379_v56 = vadd.f32 %v12620_v13, %v1214_v36  ;;  %v2427_v15 = vpop.permute.xlu1 %2426 }
 0x314   : > { %v1829_v23 = vpop.f32.mrf.mxu2 }
 0x315   : > { %v2451_v20 = vadd.f32 %v2402_v34, %v2339_v7  ;;  %v1857_v10 = vadd.f32 %v1829_v23, %v12616_v60  ;;  %v2156_v60 = vpop.f32.mrf.mxu0  ;;  %v2319_v47 = vpop.f32.mrf.mxu1  ;;  %v1540_v0 = vadd.f32 %v12614_v14, %v1379_v56  ;;  %v9544_v14 = vld [vmem:[%s15064_s7 + $0x4] sm:$0x3] }
 0x316   : > { %v2417_v23 = vpop.permute.xlu2 %2416 }
 0x317   : > { %v2467_v61 = vmul.f32 0.2, %v2451_v20  ;;  %v2018_v48 = vadd.f32 %v1990_v39, %v1857_v10  ;;  %v1701_v59 = vadd.f32 %v12622_v46, %v1540_v0  ;;  %v1219_v46 = vadd.f32 %v12647_v22, %v12556_v35 }
 0x319   : > { %v2483_v37 = vmax.f32 %v2451_v20, %v2467_v61  ;;  %v2179_v6 = vadd.f32 %v2151_v30, %v2018_v48 }
 0x31b   : > { %v12684_v58 = vpack.c.bf16 %v2483_v37, %v2482_v50  ;;  %v2340_v52 = vadd.f32 %v2312_v54, %v2179_v6  ;;  %v1997_v4 = vpop.f32.mrf.mxu3 }
 0x31c   : > { %v1831_v42 = vpop.f32.mrf.mxu2 }
 0x31d   : > { %v1858_v9 = vadd.f32 %v1831_v42, %v1697_v3  ;;  %9466 = vmatmul.msk.bf16.gmra.mxu2 %vm2501_vm2, %v12684_v58  ;;  %9475 = vmatmul.msk.bf16.gmra.mxu3 %vm2501_vm2, %v12684_v58  ;;  %v2452_v40 = vadd.f32 %v2407_v26, %v2340_v52  ;;  %v2158_v53 = vpop.f32.mrf.mxu0  ;;  %v2322_v48 = vpop.f32.mrf.mxu1 }
 0x31f   : > { %v2019_v19 = vadd.f32 %v1992_v43, %v1858_v9  ;;  %v2468_v30 = vmul.f32 0.2, %v2452_v40 }
 0x321   : > { %v2180_v39 = vadd.f32 %v2153_v32, %v2019_v19  ;;  %v2484_v28 = vmax.f32 %v2452_v40, %v2468_v30  ;;  %v2879_v40 = vsel %vm2526_vm1, %v9544_v14, 0  ;;  %v1381_v30 = vadd.f32 %v12629_v11, %v1219_v46 }
 0x322   : > { %2888 = vmatpush.bf16.msra.mxu2 %v2879_v40 }
 0x323   : > { %v2341_v33 = vadd.f32 %v2314_v2, %v2180_v39  ;;  %v2000_v32 = vpop.f32.mrf.mxu3  ;;  %v2422_v2 = vpop.permute.xlu0 %2421  ;;  %v1542_v35 = vadd.f32 %v12634_v16, %v1381_v30 }
 0x324   : > { %v1834_v49 = vpop.f32.mrf.mxu2 }
 0x325   : > { %v2453_v29 = vadd.f32 %v2412_v41, %v2341_v33  ;;  %v1859_v54 = vadd.f32 %v1834_v49, %v12625_v55  ;;  %v2161_v10 = vpop.f32.mrf.mxu0  ;;  %v2432_v49 = vpop.permute.xlu2 %2431  ;;  %v1703_v11 = vadd.f32 %v12637_v12, %v1542_v35 }
 0x327   : > { %v2469_v18 = vmul.f32 0.2, %v2453_v29  ;;  %v2020_v44 = vadd.f32 %v1995_v25, %v1859_v54 }
 0x329   : > { %v2485_v51 = vmax.f32 %v2453_v29, %v2469_v18  ;;  %v2181_v24 = vadd.f32 %v2156_v60, %v2020_v44 }
 0x32b   : > { %v12696_v43 = vpack.c.bf16 %v2485_v51, %v2484_v28  ;;  %v2342_v31 = vadd.f32 %v2317_v38, %v2181_v24  ;;  %v2002_v9 = vpop.f32.mrf.mxu3  ;;  %v2437_v16 = vpop.permute.xlu0 %2436 }
 0x32c   : > { %v1836_v34 = vpop.f32.mrf.mxu2 }
 0x32d   : > { %v1860_v7 = vadd.f32 %v1836_v34, %v1699_v1  ;;  %9467 = vmatmul.msk.bf16.gmra.mxu2 %vm2501_vm2, %v12696_v43  ;;  %9476 = vmatmul.msk.bf16.gmra.mxu3 %vm2501_vm2, %v12696_v43  ;;  %v2454_v62 = vadd.f32 %v2417_v23, %v2342_v31  ;;  %v2163_v13 = vpop.f32.mrf.mxu0 }
 0x32f   : > { %v2021_v55 = vadd.f32 %v1997_v4, %v1860_v7  ;;  %v2470_v50 = vmul.f32 0.2, %v2454_v62 }
 0x331   : > { %v2182_v20 = vadd.f32 %v2158_v53, %v2021_v55  ;;  %v2486_v17 = vmax.f32 %v2454_v62, %v2470_v50 }
 0x333   : > { %v2343_v61 = vadd.f32 %v2319_v47, %v2182_v20  ;;  %v2005_v54 = vpop.f32.mrf.mxu3 }
 0x334   : > { %v1839_v5 = vpop.f32.mrf.mxu2 }
 0x335   : > { %v2455_v37 = vadd.f32 %v2422_v2, %v2343_v61  ;;  %v1861_v6 = vadd.f32 %v1839_v5, %v12640_v57  ;;  %v2324_v57 = vpop.f32.mrf.mxu1  ;;  %v2166_v53 = vpop.f32.mrf.mxu0 }
 0x336   : > { %v2442_v2 = vpop.permute.xlu1 %2441 }
 0x337   : > { %v2471_v3 = vmul.f32 0.2, %v2455_v37  ;;  %v2022_v42 = vadd.f32 %v2000_v32, %v1861_v6 }
 0x339   : > { %v2487_v25 = vmax.f32 %v2455_v37, %v2471_v3  ;;  %v2183_v52 = vadd.f32 %v2161_v10, %v2022_v42 }
 0x33b   : > { %v12708_v60 = vpack.c.bf16 %v2487_v25, %v2486_v17  ;;  %v2344_v26 = vadd.f32 %v2322_v48, %v2183_v52 }
 0x33c   : > { %v1841_v19 = vpop.f32.mrf.mxu2 }
 0x33d   : > { %v1862_v38 = vadd.f32 %v1841_v19, %v1701_v59  ;;  %9468 = vmatmul.msk.bf16.gmra.mxu2 %vm2501_vm2, %v12708_v60  ;;  %9477 = vmatmul.msk.bf16.gmra.mxu3 %vm2501_vm2, %v12708_v60  ;;  %v2456_v33 = vadd.f32 %v2427_v15, %v2344_v26  ;;  %v2327_v22 = vpop.f32.mrf.mxu1  ;;  %v2168_v23 = vpop.f32.mrf.mxu0 }
 0x33f   : > { %v2023_v39 = vadd.f32 %v2002_v9, %v1862_v38  ;;  %v2472_v18 = vmul.f32 0.2, %v2456_v33 }
 0x341   : > { %v2184_v41 = vadd.f32 %v2163_v13, %v2023_v39  ;;  %v2488_v24 = vmax.f32 %v2456_v33, %v2472_v18 }
 0x343   : > { %v2345_v29 = vadd.f32 %v2324_v57, %v2184_v41 }
 0x344   : > { %v1844_v4 = vpop.f32.mrf.mxu2 }
 0x345   : > { %v2457_v44 = vadd.f32 %v2432_v49, %v2345_v29  ;;  %v1863_v8 = vadd.f32 %v1844_v4, %v12645_v63  ;;  %v2007_v63 = vpop.f32.mrf.mxu3  ;;  %v2329_v20 = vpop.f32.mrf.mxu1 }
 0x347   : > { %v2473_v28 = vmul.f32 0.2, %v2457_v44  ;;  %v2024_v51 = vadd.f32 %v2005_v54, %v1863_v8 }
 0x349   : > { %v2489_v47 = vmax.f32 %v2457_v44, %v2473_v28  ;;  %v2185_v1 = vadd.f32 %v2166_v53, %v2024_v51  ;;  %v9626_v44 = vld [vmem:[%s15064_s7 + $0x8] sm:$0x3] }
 0x34a   : > { %v3263_v8 = vsel %vm2526_vm1, %v9626_v44, 0 }
 0x34b   : > { %v12724_v34 = vpack.c.bf16 %v2489_v47, %v2488_v24  ;;  %v2346_v7 = vadd.f32 %v2327_v22, %v2185_v1  ;;  %3272 = vmatpush.bf16.msrb.mxu2 %v3263_v8  ;;  %v11063_v8 = vld [vmem:[#allocation4 + $0x70] sm:$0xff] }
 0x34c   : > { %v1846_v31 = vpop.f32.mrf.mxu2 }
 0x34d   : > { %v1864_v36 = vadd.f32 %v1846_v31, %v1703_v11  ;;  %9469 = vmatmul.msk.bf16.gmra.mxu2 %vm2501_vm2, %v12724_v34  ;;  %9478 = vmatmul.msk.bf16.gmra.mxu3 %vm2501_vm2, %v12724_v34  ;;  %v2458_v32 = vadd.f32 %v2437_v16, %v2346_v7 }
 0x34f   : > { %v2025_v55 = vadd.f32 %v2007_v63, %v1864_v36  ;;  %v2474_v56 = vmul.f32 0.2, %v2458_v32 }
 0x351   : > { %v2186_v62 = vadd.f32 %v2168_v23, %v2025_v55  ;;  %v2490_v48 = vmax.f32 %v2458_v32, %v2474_v56 }
 0x353   : > { %v2347_v10 = vadd.f32 %v2329_v20, %v2186_v62 }
 0x355   : > { %v2459_v12 = vadd.f32 %v2442_v2, %v2347_v10 }
 0x357   : > { %v2475_v61 = vmul.f32 0.2, %v2459_v12 }
 0x359   : > { %v2491_v5 = vmax.f32 %v2459_v12, %v2475_v61 }
 0x35b   : > { %v12731_v50 = vpack.c.bf16 %v2491_v5, %v2490_v48  ;;  %v11057_v48 = vld [vmem:[#allocation4 + $0x40] sm:$0xff] }
 0x35c   : > { %v11049_v5 = vld [vmem:[#allocation4] sm:$0xff] }
 0x35d   : > { %9470 = vmatmul.msk.bf16.gmra.mxu2 %vm2501_vm2, %v12731_v50  ;;  %9479 = vmatmul.msk.bf16.gmra.mxu3 %vm2501_vm2, %v12731_v50 }
 0x36d   : > { %9545 = vmatmul.msk.bf16.vlgmr.msra.gmra.mxu2 %vm2501_vm2, %v12656_v27 }
 0x370   : > { %v12739_v37 = vpop.f32.mrf.mxu2  ;;  %v12741_v6 = vpop.f32.mrf.mxu3 }
 0x378   : > { %v12743_v3 = vpop.f32.mrf.mxu2  ;;  %v12745_v42 = vpop.f32.mrf.mxu3 }
 0x379   : > { %v2579_v0 = vpack.c.bf16 %v12743_v3, %v12739_v37  ;;  %v2657_v61 = vpack.c.bf16 %v12745_v42, %v12741_v6  ;;  %v11058_v6 = vld [vmem:[#allocation4 + $0x48] sm:$0xff] }
 0x37a   : > { %v11050_v42 = vld [vmem:[#allocation4 + $0x8] sm:$0xff] }
 0x37d   : > { %9546 = vmatmul.msk.bf16.gmra.mxu2 %vm2501_vm2, %v12664_v21 }
 0x380   : > { %v12751_v17 = vpop.f32.mrf.mxu2  ;;  %v12753_v25 = vpop.f32.mrf.mxu3 }
 0x388   : > { %v12755_v52 = vpop.f32.mrf.mxu2  ;;  %v12757_v9 = vpop.f32.mrf.mxu3 }
 0x389   : > { %v2580_v59 = vpack.c.bf16 %v12755_v52, %v12751_v17  ;;  %v2658_v12 = vpack.c.bf16 %v12757_v9, %v12753_v25  ;;  %v11051_v9 = vld [vmem:[#allocation4 + $0x10] sm:$0xff] }
 0x38d   : > { %9547 = vmatmul.msk.bf16.gmra.mxu2 %vm2501_vm2, %v12672_v45 }
 0x390   : > { %v2549_v13 = vpop.f32.mrf.mxu2  ;;  %v2627_v19 = vpop.f32.mrf.mxu3 }
 0x398   : > { %v2551_v26 = vpop.f32.mrf.mxu2  ;;  %v2629_v38 = vpop.f32.mrf.mxu3 }
 0x399   : > { %v2581_v14 = vpack.c.bf16 %v2551_v26, %v2549_v13  ;;  %v2659_v2 = vpack.c.bf16 %v2629_v38, %v2627_v19  ;;  %v11060_v38 = vld [vmem:[#allocation4 + $0x58] sm:$0xff] }
 0x39d   : > { %9548 = vmatmul.msk.bf16.gmra.mxu2 %vm2501_vm2, %v12684_v58 }
 0x3a0   : > { %v2554_v57 = vpop.f32.mrf.mxu2  ;;  %v2632_v40 = vpop.f32.mrf.mxu3 }
 0x3a8   : > { %v2556_v46 = vpop.f32.mrf.mxu2  ;;  %v2634_v39 = vpop.f32.mrf.mxu3 }
 0x3a9   : > { %v2582_v15 = vpack.c.bf16 %v2556_v46, %v2554_v57  ;;  %v2660_v20 = vpack.c.bf16 %v2634_v39, %v2632_v40  ;;  %v11061_v46 = vld [vmem:[#allocation4 + $0x60] sm:$0xff] }
 0x3aa   : > { %v11053_v39 = vld [vmem:[#allocation4 + $0x20] sm:$0xff] }
 0x3ad   : > { %9549 = vmatmul.msk.bf16.gmra.mxu2 %vm2501_vm2, %v12696_v43 }
 0x3b0   : > { %v2559_v33 = vpop.f32.mrf.mxu2  ;;  %v2637_v41 = vpop.f32.mrf.mxu3 }
 0x3b8   : > { %v2561_v49 = vpop.f32.mrf.mxu2  ;;  %v2639_v30 = vpop.f32.mrf.mxu3 }
 0x3b9   : > { %v2583_v23 = vpack.c.bf16 %v2561_v49, %v2559_v33  ;;  %v2661_v32 = vpack.c.bf16 %v2639_v30, %v2637_v41  ;;  %v9708_v33 = vld [vmem:[%s15064_s7 + $0xc] sm:$0x3]  ;;  %v9585_v49 = vld [vmem:[%s15064_s7 + $0x6] sm:$0x3] }
 0x3ba   : > { %v3647_v41 = vsel %vm2526_vm1, %v9708_v33, 0  ;;  %v3071_v30 = vsel %vm2526_vm1, %v9585_v49, 0 }
 0x3bb   : > { %3656 = vmatpush.bf16.msra.mxu2 %v3647_v41  ;;  %v11069_v41 = vld [vmem:[#allocation4 + $0xa0] sm:$0xff] }
 0x3bd   : > { %9550 = vmatmul.msk.bf16.gmra.mxu2 %vm2501_vm2, %v12708_v60 }
 0x3c0   : > { %v2564_v29 = vpop.f32.mrf.mxu2  ;;  %v2642_v54 = vpop.f32.mrf.mxu3 }
 0x3c8   : > { %v2566_v4 = vpop.f32.mrf.mxu2  ;;  %v2644_v18 = vpop.f32.mrf.mxu3 }
 0x3c9   : > { %v2584_v55 = vpack.c.bf16 %v2566_v4, %v2564_v29  ;;  %v2662_v16 = vpack.c.bf16 %v2644_v18, %v2642_v54  ;;  %v11062_v54 = vld [vmem:[#allocation4 + $0x68] sm:$0xff] }
 0x3ca   : > { %v11054_v4 = vld [vmem:[#allocation4 + $0x28] sm:$0xff] }
 0x3cd   : > { %9551 = vmatmul.msk.bf16.gmra.mxu2 %vm2501_vm2, %v12724_v34 }
 0x3d0   : > { %v2569_v53 = vpop.f32.mrf.mxu2  ;;  %v2647_v28 = vpop.f32.mrf.mxu3 }
 0x3d8   : > { %v2571_v51 = vpop.f32.mrf.mxu2  ;;  %v2649_v35 = vpop.f32.mrf.mxu3 }
 0x3d9   : > { %v2585_v7 = vpack.c.bf16 %v2571_v51, %v2569_v53  ;;  %v2663_v36 = vpack.c.bf16 %v2649_v35, %v2647_v28  ;;  %v11055_v53 = vld [vmem:[#allocation4 + $0x30] sm:$0xff] }
 0x3dd   : > { %9552 = vmatmul.msk.bf16.gmra.mxu2 %vm2501_vm2, %v12731_v50 }
 0x3e0   : > { %v2574_v22 = vpop.f32.mrf.mxu2  ;;  %v2652_v24 = vpop.f32.mrf.mxu3 }
 0x3e8   : > { %v2576_v47 = vpop.f32.mrf.mxu2  ;;  %v2654_v1 = vpop.f32.mrf.mxu3 }
 0x3e9   : > { %v2586_v11 = vpack.c.bf16 %v2576_v47, %v2574_v22  ;;  %v2664_v31 = vpack.c.bf16 %v2654_v1, %v2652_v24  ;;  %v11064_v1 = vld [vmem:[#allocation4 + $0x78] sm:$0xff] }
 0x3eb   : > { %2730 = vmatpush.bf16.msrb.mxu0 %v2664_v31  ;;  %2827 = vmatpush.bf16.msrb.mxu1 %v2586_v11  ;;  %v11056_v11 = vld [vmem:[#allocation4 + $0x38] sm:$0xff] }
 0x3ed   : > { %9627 = vmatmul.msk.bf16.vlgmr.msrb.gmra.mxu2 %vm2501_vm2, %v12656_v27 }
 0x3ef   : > { %2731 = vmatpush.bf16.msrb.mxu0 %v2663_v36  ;;  %2828 = vmatpush.bf16.msrb.mxu1 %v2585_v7 }
 0x3f0   : > { %v12779_v63 = vpop.f32.mrf.mxu2 }
 0x3f3   : > { %2732 = vmatpush.bf16.msrb.mxu0 %v2662_v16  ;;  %2829 = vmatpush.bf16.msrb.mxu1 %v2584_v55  ;;  %v11065_v55 = vld [vmem:[#allocation4 + $0x80] sm:$0xff] }
 0x3f7   : > { %2733 = vmatpush.bf16.msrb.mxu0 %v2661_v32  ;;  %2830 = vmatpush.bf16.msrb.mxu1 %v2583_v23 }
 0x3f8   : > { %v12781_v62 = vpop.f32.mrf.mxu2 }
 0x3f9   : > { %v2930_v10 = vpack.c.bf16 %v12781_v62, %v12779_v63  ;;  %v11066_v62 = vld [vmem:[#allocation4 + $0x88] sm:$0xff] }
 0x3fb   : > { %2734 = vmatpush.bf16.msrb.mxu0 %v2660_v20  ;;  %2831 = vmatpush.bf16.msrb.mxu1 %v2582_v15 }
 0x3fd   : > { %9628 = vmatmul.msk.bf16.gmra.mxu2 %vm2501_vm2, %v12664_v21 }
 0x3ff   : > { %2735 = vmatpush.bf16.msrb.mxu0 %v2659_v2  ;;  %2832 = vmatpush.bf16.msrb.mxu1 %v2581_v14  ;;  %v11052_v14 = vld [vmem:[#allocation4 + $0x18] sm:$0xff] }
 0x400   : > { %v12787_v56 = vpop.f32.mrf.mxu2 }
 0x403   : > { %2736 = vmatpush.bf16.msrb.mxu0 %v2658_v12  ;;  %2833 = vmatpush.bf16.msrb.mxu1 %v2580_v59 }
 0x407   : > { %2737 = vmatpush.bf16.msrb.mxu0 %v2657_v61  ;;  %2834 = vmatpush.bf16.msrb.mxu1 %v2579_v0  ;;  %v11059_v0 = vld [vmem:[#allocation4 + $0x50] sm:$0xff] }
 0x408   : > { %v12799_v13 = vpop.f32.mrf.mxu2 }
 0x409   : > { %v2931_v25 = vpack.c.bf16 %v12799_v13, %v12787_v56 }
 0x40a   : > { %2738 = vmatmul.bf16.vlgmr.msrb.gmra.mxu0 %v11057_v48  ;;  %2835 = vmatmul.bf16.vlgmr.msrb.gmra.mxu1 %v11049_v5 }
 0x40b   : > { %3080 = vmatpush.bf16.msra.mxu0 %v3071_v30 }
 0x40d   : > { %9629 = vmatmul.msk.bf16.gmra.mxu2 %vm2501_vm2, %v12672_v45 }
 0x410   : > { %v12805_v17 = vpop.f32.mrf.mxu2 }
 0x418   : > { %v12807_v52 = vpop.f32.mrf.mxu2 }
 0x419   : > { %v2932_v37 = vpack.c.bf16 %v12807_v52, %v12805_v17 }
 0x41a   : > { %2743 = vmatmul.bf16.gmra.mxu0 %v11058_v6  ;;  %2840 = vmatmul.bf16.gmra.mxu1 %v11050_v42  ;;  %v11067_v42 = vld [vmem:[#allocation4 + $0x90] sm:$0xff] }
 0x41d   : > { %9630 = vmatmul.msk.bf16.gmra.mxu2 %vm2501_vm2, %v12684_v58 }
 0x420   : > { %v2905_v3 = vpop.f32.mrf.mxu2 }
 0x428   : > { %v2907_v59 = vpop.f32.mrf.mxu2 }
 0x429   : > { %v2933_v19 = vpack.c.bf16 %v2907_v59, %v2905_v3 }
 0x42a   : > { %2748 = vmatmul.bf16.gmra.mxu0 %v11059_v0  ;;  %2845 = vmatmul.bf16.gmra.mxu1 %v11051_v9 }
 0x42d   : > { %9631 = vmatmul.msk.bf16.gmra.mxu2 %vm2501_vm2, %v12696_v43 }
 0x430   : > { %v2910_v26 = vpop.f32.mrf.mxu2 }
 0x438   : > { %v2912_v57 = vpop.f32.mrf.mxu2 }
 0x439   : > { %v2934_v47 = vpack.c.bf16 %v2912_v57, %v2910_v26 }
 0x43a   : > { %2753 = vmatmul.bf16.gmra.mxu0 %v11060_v38  ;;  %2850 = vmatmul.bf16.gmra.mxu1 %v11052_v14  ;;  %v11068_v38 = vld [vmem:[#allocation4 + $0x98] sm:$0xff] }
 0x43d   : > { %9632 = vmatmul.msk.bf16.gmra.mxu2 %vm2501_vm2, %v12708_v60 }
 0x440   : > { %v2915_v40 = vpop.f32.mrf.mxu2 }
 0x448   : > { %v2917_v15 = vpop.f32.mrf.mxu2 }
 0x449   : > { %v2935_v24 = vpack.c.bf16 %v2917_v15, %v2915_v40 }
 0x44a   : > { %2758 = vmatmul.bf16.gmra.mxu0 %v11061_v46  ;;  %2855 = vmatmul.bf16.gmra.mxu1 %v11053_v39 }
 0x44d   : > { %9633 = vmatmul.msk.bf16.gmra.mxu2 %vm2501_vm2, %v12724_v34 }
 0x450   : > { %v2920_v29 = vpop.f32.mrf.mxu2 }
 0x458   : > { %v2922_v18 = vpop.f32.mrf.mxu2 }
 0x459   : > { %v2936_v35 = vpack.c.bf16 %v2922_v18, %v2920_v29 }
 0x45a   : > { %2763 = vmatmul.bf16.gmra.mxu0 %v11062_v54  ;;  %2860 = vmatmul.bf16.gmra.mxu1 %v11054_v4  ;;  %v9790_v4 = vld [vmem:[%s15064_s7 + $0x10] sm:$0x3] }
 0x45b   : > { %v4031_v18 = vsel %vm2526_vm1, %v9790_v4, 0  ;;  %v11072_v4 = vld [vmem:[#allocation4 + $0xb8] sm:$0xff] }
 0x45c   : > { %4040 = vmatpush.bf16.msrb.mxu2 %v4031_v18 }
 0x45d   : > { %9634 = vmatmul.msk.bf16.gmra.mxu2 %vm2501_vm2, %v12731_v50 }
 0x460   : > { %v2925_v44 = vpop.f32.mrf.mxu2 }
 0x468   : > { %v2927_v28 = vpop.f32.mrf.mxu2 }
 0x469   : > { %v2937_v51 = vpack.c.bf16 %v2927_v28, %v2925_v44  ;;  %v9667_v44 = vld [vmem:[%s15064_s7 + $0xa] sm:$0x3] }
 0x46a   : > { %2768 = vmatmul.bf16.gmra.mxu0 %v11063_v8  ;;  %2865 = vmatmul.bf16.gmra.mxu1 %v11055_v53  ;;  %v3455_v8 = vsel %vm2526_vm1, %v9667_v44, 0 }
 0x46b   : > { %3003 = vmatpush.bf16.msrb.mxu3 %v2937_v51  ;;  %3464 = vmatpush.bf16.msrb.mxu0 %v3455_v8 }
 0x46d   : > { %9709 = vmatmul.msk.bf16.vlgmr.msra.gmra.mxu2 %vm2501_vm2, %v12656_v27 }
 0x46f   : > { %3004 = vmatpush.bf16.msrb.mxu3 %v2936_v35  ;;  %v11070_v35 = vld [vmem:[#allocation4 + $0xa8] sm:$0xff] }
 0x470   : > { %v12831_v22 = vpop.f32.mrf.mxu2 }
 0x473   : > { %3005 = vmatpush.bf16.msrb.mxu3 %v2935_v24 }
 0x477   : > { %3006 = vmatpush.bf16.msrb.mxu3 %v2934_v47 }
 0x478   : > { %v12833_v31 = vpop.f32.mrf.mxu2 }
 0x479   : > { %v3314_v7 = vpack.c.bf16 %v12833_v31, %v12831_v22  ;;  %v9749_v22 = vld [vmem:[%s15064_s7 + $0xe] sm:$0x3] }
 0x47a   : > { %2773 = vmatmul.bf16.gmra.mxu0 %v11064_v1  ;;  %2870 = vmatmul.bf16.gmra.mxu1 %v11056_v11 }
 0x47b   : > { %3007 = vmatpush.bf16.msrb.mxu3 %v2933_v19 }
 0x47d   : > { %9710 = vmatmul.msk.bf16.gmra.mxu2 %vm2501_vm2, %v12664_v21 }
 0x47f   : > { %3008 = vmatpush.bf16.msrb.mxu3 %v2932_v37 }
 0x480   : > { %v12842_v36 = vpop.f32.mrf.mxu2 }
 0x483   : > { %3009 = vmatpush.bf16.msrb.mxu3 %v2931_v25 }
 0x487   : > { %v2739_v16 = vpop.f32.mrf.mxu0  ;;  %v2836_v23 = vpop.f32.mrf.mxu1  ;;  %3010 = vmatpush.bf16.msrb.mxu3 %v2930_v10 }
 0x488   : > { %v12850_v32 = vadd.f32 %v2836_v23, %v2739_v16  ;;  %v12852_v20 = vpop.f32.mrf.mxu2 }
 0x489   : > { %v3315_v2 = vpack.c.bf16 %v12852_v20, %v12842_v36 }
 0x48a   : > { %3011 = vmatmul.bf16.vlgmr.msrb.gmra.mxu3 %v11065_v55  ;;  %9586 = vmatmul.msk.bf16.vlgmr.msra.gmra.mxu0 %vm2501_vm2, %v12656_v27 }
 0x48d   : > { %9711 = vmatmul.msk.bf16.gmra.mxu2 %vm2501_vm2, %v12672_v45 }
 0x48f   : > { %v12860_v56 = vpop.f32.mrf.mxu0  ;;  %v12862_v12 = vpop.f32.mrf.mxu1 }
 0x490   : > { %v12864_v63 = vpop.f32.mrf.mxu2 }
 0x497   : > { %v2744_v10 = vpop.f32.mrf.mxu0  ;;  %v2841_v61 = vpop.f32.mrf.mxu1 }
 0x498   : > { %v12866_v48 = vadd.f32 %v2841_v61, %v2744_v10  ;;  %v12868_v5 = vpop.f32.mrf.mxu2 }
 0x499   : > { %v3316_v13 = vpack.c.bf16 %v12868_v5, %v12864_v63 }
 0x49a   : > { %3016 = vmatmul.bf16.gmra.mxu3 %v11066_v62  ;;  %9587 = vmatmul.msk.bf16.gmra.mxu0 %vm2501_vm2, %v12664_v21  ;;  %v11071_v62 = vld [vmem:[#allocation4 + $0xb0] sm:$0xff] }
 0x49d   : > { %9712 = vmatmul.msk.bf16.gmra.mxu2 %vm2501_vm2, %v12684_v58 }
 0x49f   : > { %v12876_v25 = vpop.f32.mrf.mxu0  ;;  %v12878_v17 = vpop.f32.mrf.mxu1 }
 0x4a0   : > { %v12880_v6 = vpop.f32.mrf.mxu2 }
 0x4a7   : > { %v2749_v52 = vpop.f32.mrf.mxu0  ;;  %v2846_v37 = vpop.f32.mrf.mxu1 }
 0x4a8   : > { %v12882_v3 = vadd.f32 %v2846_v37, %v2749_v52  ;;  %v12884_v0 = vpop.f32.mrf.mxu2 }
 0x4a9   : > { %v3317_v9 = vpack.c.bf16 %v12884_v0, %v12880_v6 }
 0x4aa   : > { %3021 = vmatmul.bf16.gmra.mxu3 %v11067_v42  ;;  %9588 = vmatmul.msk.bf16.gmra.mxu0 %vm2501_vm2, %v12672_v45 }
 0x4ad   : > { %9713 = vmatmul.msk.bf16.gmra.mxu2 %vm2501_vm2, %v12696_v43 }
 0x4af   : > { %v12892_v59 = vpop.f32.mrf.mxu0  ;;  %v12894_v19 = vpop.f32.mrf.mxu1 }
 0x4b0   : > { %v3294_v26 = vpop.f32.mrf.mxu2 }
 0x4b7   : > { %v2754_v14 = vpop.f32.mrf.mxu0  ;;  %v2851_v57 = vpop.f32.mrf.mxu1 }
 0x4b8   : > { %v12896_v40 = vadd.f32 %v2851_v57, %v2754_v14  ;;  %v3296_v46 = vpop.f32.mrf.mxu2 }
 0x4ba   : > { %3026 = vmatmul.bf16.gmra.mxu3 %v11068_v38  ;;  %9589 = vmatmul.msk.bf16.gmra.mxu0 %vm2501_vm2, %v12684_v58 }
 0x4bd   : > { %9714 = vmatmul.msk.bf16.gmra.mxu2 %vm2501_vm2, %v12708_v60 }
 0x4bf   : > { %v12902_v39 = vpop.f32.mrf.mxu0  ;;  %v12904_v15 = vpop.f32.mrf.mxu1 }
 0x4c0   : > { %v3299_v33 = vpop.f32.mrf.mxu2 }
 0x4c7   : > { %v2759_v49 = vpop.f32.mrf.mxu0  ;;  %v2856_v30 = vpop.f32.mrf.mxu1 }
 0x4c8   : > { %v12906_v29 = vadd.f32 %v2856_v30, %v2759_v49  ;;  %v3301_v54 = vpop.f32.mrf.mxu2  ;;  %v3318_v30 = vpack.c.bf16 %v3296_v46, %v3294_v26 }
 0x4c9   : > { %v3319_v49 = vpack.c.bf16 %v3301_v54, %v3299_v33 }
 0x4ca   : > { %3031 = vmatmul.bf16.gmra.mxu3 %v11069_v41  ;;  %9590 = vmatmul.msk.bf16.gmra.mxu0 %vm2501_vm2, %v12696_v43 }
 0x4cd   : > { %9715 = vmatmul.msk.bf16.gmra.mxu2 %vm2501_vm2, %v12724_v34 }
 0x4cf   : > { %v12920_v53 = vpop.f32.mrf.mxu0  ;;  %v12922_v28 = vpop.f32.mrf.mxu1 }
 0x4d0   : > { %15170 = vst [vmem:[#allocation21_spill] sm:$0xff] %v12920_v53  ;;  %v3304_v51 = vpop.f32.mrf.mxu2 }
 0x4d1   : > { %15171 = vst [vmem:[#allocation23_spill] sm:$0xff] %v12922_v28 }
 0x4d7   : > { %v2764_v24 = vpop.f32.mrf.mxu0  ;;  %v2861_v47 = vpop.f32.mrf.mxu1 }
 0x4d8   : > { %v12924_v1 = vadd.f32 %v2861_v47, %v2764_v24  ;;  %v3306_v11 = vpop.f32.mrf.mxu2 }
 0x4d9   : > { %v3320_v38 = vpack.c.bf16 %v3306_v11, %v3304_v51 }
 0x4da   : > { %3036 = vmatmul.bf16.gmra.mxu3 %v11070_v35  ;;  %9591 = vmatmul.msk.bf16.gmra.mxu0 %vm2501_vm2, %v12708_v60 }
 0x4dd   : > { %9716 = vmatmul.msk.bf16.gmra.mxu2 %vm2501_vm2, %v12731_v50 }
 0x4df   : > { %v12930_v55 = vpop.f32.mrf.mxu0  ;;  %v12932_v16 = vpop.f32.mrf.mxu1 }
 0x4e0   : > { %15172 = vst [vmem:[#allocation22_spill] sm:$0xff] %v12930_v55  ;;  %v3309_v23 = vpop.f32.mrf.mxu2 }
 0x4e1   : > { %15173 = vst [vmem:[#allocation24_spill] sm:$0xff] %v12932_v16 }
 0x4e7   : > { %v2769_v10 = vpop.f32.mrf.mxu0  ;;  %v2866_v61 = vpop.f32.mrf.mxu1 }
 0x4e8   : > { %v12934_v42 = vadd.f32 %v2866_v61, %v2769_v10  ;;  %v3311_v52 = vpop.f32.mrf.mxu2 }
 0x4e9   : > { %v3321_v37 = vpack.c.bf16 %v3311_v52, %v3309_v23 }
 0x4ea   : > { %3041 = vmatmul.bf16.gmra.mxu3 %v11071_v62  ;;  %9592 = vmatmul.msk.bf16.gmra.mxu0 %vm2501_vm2, %v12724_v34 }
 0x4eb   : > { %3387 = vmatpush.bf16.msra.mxu3 %v3321_v37 }
 0x4ed   : > { %9791 = vmatmul.msk.bf16.vlgmr.msrb.gmra.mxu2 %vm2501_vm2, %v12656_v27 }
 0x4ef   : > { %v12940_v14 = vpop.f32.mrf.mxu0  ;;  %v12942_v57 = vpop.f32.mrf.mxu1  ;;  %3388 = vmatpush.bf16.msra.mxu3 %v3320_v38 }
 0x4f0   : > { %15174 = vst [vmem:[#allocation15_spill] sm:$0xff] %v12940_v14  ;;  %v12944_v41 = vpop.f32.mrf.mxu2 }
 0x4f1   : > { %15175 = vst [vmem:[#allocation16_spill] sm:$0xff] %v12942_v57 }
 0x4f3   : > { %3389 = vmatpush.bf16.msra.mxu3 %v3319_v49 }
 0x4f7   : > { %v2774_v18 = vpop.f32.mrf.mxu0  ;;  %v2871_v44 = vpop.f32.mrf.mxu1  ;;  %3390 = vmatpush.bf16.msra.mxu3 %v3318_v30 }
 0x4f8   : > { %v12946_v8 = vadd.f32 %v2871_v44, %v2774_v18  ;;  %v12948_v51 = vpop.f32.mrf.mxu2 }
 0x4fa   : > { %3046 = vmatmul.bf16.gmra.mxu3 %v11072_v4  ;;  %9593 = vmatmul.msk.bf16.gmra.mxu0 %vm2501_vm2, %v12731_v50 }
 0x4fb   : > { %3391 = vmatpush.bf16.msra.mxu3 %v3317_v9 }
 0x4fd   : > { %9792 = vmatmul.msk.bf16.gmra.mxu2 %vm2501_vm2, %v12664_v21 }
 0x4ff   : > { %v12959_v26 = vpop.f32.mrf.mxu0  ;;  %3392 = vmatpush.bf16.msra.mxu3 %v3316_v13 }
 0x500   : > { %15176 = vst [vmem:[#allocation18_spill] sm:$0xff] %v12959_v26  ;;  %v12964_v46 = vpop.f32.mrf.mxu2 }
 0x503   : > { %3393 = vmatpush.bf16.msra.mxu3 %v3315_v2 }
 0x507   : > { %v12969_v33 = vpop.f32.mrf.mxu0  ;;  %3394 = vmatpush.bf16.msra.mxu3 %v3314_v7 }
 0x508   : > { %v12974_v6 = vpop.f32.mrf.mxu2 }
 0x50a   : > { %9668 = vmatmul.msk.bf16.vlgmr.msrb.gmra.mxu0 %vm2501_vm2, %v12656_v27 }
 0x50d   : > { %v3012_v63 = vpop.f32.mrf.mxu3  ;;  %9793 = vmatmul.msk.bf16.gmra.mxu2 %vm2501_vm2, %v12672_v45 }
 0x50e   : > { %v12983_v36 = vadd.f32 %v3012_v63, %v12850_v32 }
 0x50f   : > { %v12985_v20 = vpop.f32.mrf.mxu0 }
 0x510   : > { %v12989_v31 = vpop.f32.mrf.mxu2 }
 0x515   : > { %v12991_v7 = vpop.f32.mrf.mxu3 }
 0x517   : > { %v12993_v2 = vpop.f32.mrf.mxu0 }
 0x518   : > { %v12995_v5 = vpop.f32.mrf.mxu2 }
 0x51a   : > { %9669 = vmatmul.msk.bf16.gmra.mxu0 %vm2501_vm2, %v12664_v21 }
 0x51d   : > { %v3017_v32 = vpop.f32.mrf.mxu3  ;;  %9794 = vmatmul.msk.bf16.gmra.mxu2 %vm2501_vm2, %v12684_v58 }
 0x51e   : > { %v13004_v9 = vadd.f32 %v3017_v32, %v12866_v48 }
 0x51f   : > { %v13006_v54 = vpop.f32.mrf.mxu0 }
 0x520   : > { %v13010_v47 = vpop.f32.mrf.mxu2 }
 0x525   : > { %v13012_v11 = vpop.f32.mrf.mxu3 }
 0x527   : > { %v13014_v23 = vpop.f32.mrf.mxu0 }
 0x528   : > { %v3675_v62 = vpop.f32.mrf.mxu2 }
 0x529   : > { %v3701_v10 = vpack.c.bf16 %v3675_v62, %v13010_v47 }
 0x52a   : > { %9670 = vmatmul.msk.bf16.gmra.mxu0 %vm2501_vm2, %v12672_v45 }
 0x52d   : > { %v3022_v61 = vpop.f32.mrf.mxu3  ;;  %9795 = vmatmul.msk.bf16.gmra.mxu2 %vm2501_vm2, %v12696_v43 }
 0x52e   : > { %v13022_v48 = vadd.f32 %v3022_v61, %v12882_v3 }
 0x52f   : > { %v13024_v52 = vpop.f32.mrf.mxu0 }
 0x530   : > { %v3678_v38 = vpop.f32.mrf.mxu2 }
 0x535   : > { %v13028_v49 = vpop.f32.mrf.mxu3 }
 0x537   : > { %v13030_v30 = vpop.f32.mrf.mxu0 }
 0x538   : > { %v3680_v4 = vpop.f32.mrf.mxu2 }
 0x53a   : > { %9671 = vmatmul.msk.bf16.gmra.mxu0 %vm2501_vm2, %v12684_v58 }
 0x53d   : > { %v3027_v18 = vpop.f32.mrf.mxu3  ;;  %9796 = vmatmul.msk.bf16.gmra.mxu2 %vm2501_vm2, %v12708_v60 }
 0x53e   : > { %v13037_v3 = vadd.f32 %v3027_v18, %v12896_v40  ;;  %v3839_v40 = vsel %vm2526_vm1, %v9749_v22, 0 }
 0x53f   : > { %v13039_v44 = vpop.f32.mrf.mxu0  ;;  %3848 = vmatpush.bf16.msra.mxu0 %v3839_v40 }
 0x540   : > { %v3683_v32 = vpop.f32.mrf.mxu2 }
 0x545   : > { %v13043_v47 = vpop.f32.mrf.mxu3 }
 0x547   : > { %v3102_v62 = vpop.f32.mrf.mxu0 }
 0x548   : > { %v3685_v61 = vpop.f32.mrf.mxu2 }
 0x54a   : > { %9672 = vmatmul.msk.bf16.gmra.mxu0 %vm2501_vm2, %v12696_v43 }
 0x54d   : > { %v3032_v18 = vpop.f32.mrf.mxu3  ;;  %9797 = vmatmul.msk.bf16.gmra.mxu2 %vm2501_vm2, %v12724_v34 }
 0x54e   : > { %v13054_v24 = vadd.f32 %v3032_v18, %v12906_v29 }
 0x54f   : > { %v3104_v37 = vpop.f32.mrf.mxu0 }
 0x550   : > { %15177 = vst [vmem:[#allocation17_spill] sm:$0xff] %v13054_v24  ;;  %v3688_v63 = vpop.f32.mrf.mxu2 }
 0x555   : > { %v13056_v35 = vpop.f32.mrf.mxu3 }
 0x556   : > { %15178 = vst [vmem:[#allocation20_spill] sm:$0xff] %v13056_v35 }
 0x557   : > { %v3107_v0 = vpop.f32.mrf.mxu0 }
 0x558   : > { %v3690_v13 = vpop.f32.mrf.mxu2 }
 0x559   : > { %v3704_v55 = vpack.c.bf16 %v3690_v13, %v3688_v63  ;;  %v15182_v63 = vpack.c.bf16 %v12974_v6, %v12964_v46 }
 0x55a   : > { %9673 = vmatmul.msk.bf16.gmra.mxu0 %vm2501_vm2, %v12708_v60 }
 0x55d   : > { %v3037_v26 = vpop.f32.mrf.mxu3  ;;  %9798 = vmatmul.msk.bf16.gmra.mxu2 %vm2501_vm2, %v12731_v50 }
 0x55e   : > { %v13063_v22 = vadd.f32 %v3037_v26, %v12924_v1  ;;  %v3703_v26 = vpack.c.bf16 %v3685_v61, %v3683_v32  ;;  %v3126_v61 = vpack.c.bf16 %v3104_v37, %v3102_v62  ;;  %v15186_v37 = vpack.c.bf16 %v13006_v54, %v12993_v2  ;;  %v11073_v62 = vld [vmem:[#allocation4 + $0xc0] sm:$0xff] }
 0x55f   : > { %v3109_v40 = vpop.f32.mrf.mxu0 }
 0x560   : > { %15179 = vst [vmem:[#allocation19_spill] sm:$0xff] %v13063_v22  ;;  %v3693_v57 = vpop.f32.mrf.mxu2  ;;  %v11081_v22 = vld [vmem:[#allocation4 + $0x100] sm:$0xff] }
 0x561   : > { %3395 = vmatmul.bf16.vlgmr.msra.gmra.mxu3 %v11081_v22  ;;  %v11083_v22 = vld [vmem:[#allocation4 + $0x110] sm:$0xff] }
 0x565   : > { %v13065_v29 = vpop.f32.mrf.mxu3 }
 0x566   : > { %15180 = vst [vmem:[#allocation14_spill] sm:$0xff] %v13065_v29  ;;  %v3702_v29 = vpack.c.bf16 %v3680_v4, %v3678_v38  ;;  %v11082_v4 = vld [vmem:[#allocation4 + $0x108] sm:$0xff] }
 0x567   : > { %v3112_v18 = vpop.f32.mrf.mxu0 }
 0x568   : > { %v3695_v14 = vpop.f32.mrf.mxu2 }
 0x569   : > { %v3705_v16 = vpack.c.bf16 %v3695_v14, %v3693_v57 }
 0x56a   : > { %9674 = vmatmul.msk.bf16.gmra.mxu0 %vm2501_vm2, %v12724_v34 }
 0x56b   : > { %3771 = vmatpush.bf16.msrb.mxu3 %v3705_v16 }
 0x56d   : > { %v3042_v35 = vpop.f32.mrf.mxu3 }
 0x56e   : > { %v13070_v28 = vadd.f32 %v3042_v35, %v12934_v42  ;;  %v15181_v35 = vpack.c.bf16 %v12995_v5, %v12989_v31  ;;  %v3127_v31 = vpack.c.bf16 %v3109_v40, %v3107_v0  ;;  %v11084_v40 = vld [vmem:[#allocation4 + $0x118] sm:$0xff] }
 0x56f   : > { %v3114_v53 = vpop.f32.mrf.mxu0  ;;  %3772 = vmatpush.bf16.msrb.mxu3 %v3704_v55 }
 0x570   : > { %v13072_v1 = vpop.f32.mrf.mxu2  ;;  %v3128_v32 = vpack.c.bf16 %v3114_v53, %v3112_v18  ;;  %v11085_v18 = vld [vmem:[#allocation4 + $0x120] sm:$0xff] }
 0x571   : > { %3400 = vmatmul.bf16.gmra.mxu3 %v11082_v4 }
 0x573   : > { %3773 = vmatpush.bf16.msrb.mxu3 %v3703_v26 }
 0x575   : > { %v13074_v24 = vpop.f32.mrf.mxu3 }
 0x577   : > { %v3117_v14 = vpop.f32.mrf.mxu0  ;;  %3774 = vmatpush.bf16.msrb.mxu3 %v3702_v29 }
 0x578   : > { %v13076_v57 = vpop.f32.mrf.mxu2 }
 0x57a   : > { %9675 = vmatmul.msk.bf16.gmra.mxu0 %vm2501_vm2, %v12731_v50 }
 0x57b   : > { %3775 = vmatpush.bf16.msrb.mxu3 %v3701_v10 }
 0x57d   : > { %v3047_v16 = vpop.f32.mrf.mxu3 }
 0x57e   : > { %v13081_v55 = vadd.f32 %v3047_v16, %v12946_v8  ;;  %v15183_v8 = vpack.c.bf16 %v12948_v51, %v12944_v41  ;;  %v15184_v41 = vpack.c.bf16 %v13039_v44, %v13030_v30  ;;  %v15185_v51 = vpack.c.bf16 %v13024_v52, %v13014_v23  ;;  %v11075_v16 = vld [vmem:[#allocation4 + $0xd0] sm:$0xff] }
 0x57f   : > { %v3119_v42 = vpop.f32.mrf.mxu0  ;;  %3776 = vmatpush.bf16.msrb.mxu3 %v15181_v35  ;;  %v15187_v30 = vpack.c.bf16 %v12985_v20, %v12969_v33 }
 0x580   : > { %v3129_v13 = vpack.c.bf16 %v3119_v42, %v3117_v14  ;;  %v13086_v38 = vpop.f32.mrf.mxu2 }
 0x581   : > { %3405 = vmatmul.bf16.gmra.mxu3 %v11083_v22 }
 0x582   : > { %3195 = vmatpush.bf16.msra.mxu1 %v3129_v13  ;;  %v11086_v13 = vld [vmem:[#allocation4 + $0x128] sm:$0xff] }
 0x583   : > { %3777 = vmatpush.bf16.msrb.mxu3 %v15182_v63 }
 0x586   : > { %3196 = vmatpush.bf16.msra.mxu1 %v3128_v32  ;;  %v11076_v32 = vld [vmem:[#allocation4 + $0xd8] sm:$0xff] }
 0x587   : > { %v13091_v10 = vpop.f32.mrf.mxu0  ;;  %3778 = vmatpush.bf16.msrb.mxu3 %v15183_v8 }
 0x588   : > { %v13096_v5 = vpop.f32.mrf.mxu2 }
 0x58a   : > { %3197 = vmatpush.bf16.msra.mxu1 %v3127_v31  ;;  %9750 = vmatmul.msk.bf16.vlgmr.msra.gmra.mxu0 %vm2501_vm2, %v12656_v27 }
 0x58e   : > { %3198 = vmatpush.bf16.msra.mxu1 %v3126_v61 }
 0x58f   : > { %v13100_v46 = vpop.f32.mrf.mxu0 }
 0x590   : > { %v3506_v53 = vpack.c.bf16 %v13100_v46, %v13091_v10  ;;  %v13104_v6 = vpop.f32.mrf.mxu2 }
 0x591   : > { %3410 = vmatmul.bf16.gmra.mxu3 %v11084_v40 }
 0x592   : > { %3199 = vmatpush.bf16.msra.mxu1 %v15184_v41  ;;  %v11077_v41 = vld [vmem:[#allocation4 + $0xe0] sm:$0xff] }
 0x596   : > { %3200 = vmatpush.bf16.msra.mxu1 %v15185_v51 }
 0x597   : > { %v13112_v27 = vpop.f32.mrf.mxu0 }
 0x598   : > { %v13114_v0 = vpop.f32.mrf.mxu2 }
 0x59a   : > { %3201 = vmatpush.bf16.msra.mxu1 %v15186_v37  ;;  %9751 = vmatmul.msk.bf16.gmra.mxu0 %vm2501_vm2, %v12664_v21  ;;  %v11074_v21 = vld [vmem:[#allocation4 + $0xc8] sm:$0xff] }
 0x59e   : > { %3202 = vmatpush.bf16.msra.mxu1 %v15187_v30 }
 0x59f   : > { %v13124_v44 = vpop.f32.mrf.mxu0 }
 0x5a0   : > { %v3507_v23 = vpack.c.bf16 %v13124_v44, %v13112_v27  ;;  %v13128_v52 = vpop.f32.mrf.mxu2 }
 0x5a1   : > { %3203 = vmatmul.bf16.vlgmr.msra.gmra.mxu1 %v11073_v62  ;;  %3415 = vmatmul.bf16.gmra.mxu3 %v11085_v18  ;;  %v11088_v62 = vld [vmem:[#allocation4 + $0x138] sm:$0xff]  ;;  %v11078_v18 = vld [vmem:[#allocation4 + $0xe8] sm:$0xff] }
 0x5a7   : > { %v13130_v2 = vpop.f32.mrf.mxu0 }
 0x5a8   : > { %v4059_v54 = vpop.f32.mrf.mxu2 }
 0x5aa   : > { %9752 = vmatmul.msk.bf16.gmra.mxu0 %vm2501_vm2, %v12672_v45 }
 0x5af   : > { %v13134_v29 = vpop.f32.mrf.mxu0 }
 0x5b0   : > { %v3508_v33 = vpack.c.bf16 %v13134_v29, %v13130_v2  ;;  %v4062_v20 = vpop.f32.mrf.mxu2  ;;  %v11100_v2 = vld [vmem:[#allocation4 + $0x198] sm:$0xff] }
 0x5b1   : > { %3208 = vmatmul.bf16.gmra.mxu1 %v11074_v21  ;;  %3420 = vmatmul.bf16.gmra.mxu3 %v11086_v13 }
 0x5b7   : > { %v13138_v26 = vpop.f32.mrf.mxu0 }
 0x5b8   : > { %v4064_v14 = vpop.f32.mrf.mxu2 }
 0x5ba   : > { %9753 = vmatmul.msk.bf16.gmra.mxu0 %vm2501_vm2, %v12684_v58  ;;  %v11087_v58 = vld [vmem:[#allocation4 + $0x130] sm:$0xff] }
 0x5bf   : > { %v13142_v42 = vpop.f32.mrf.mxu0 }
 0x5c0   : > { %v3509_v45 = vpack.c.bf16 %v13142_v42, %v13138_v26  ;;  %v4067_v35 = vpop.f32.mrf.mxu2 }
 0x5c1   : > { %3213 = vmatmul.bf16.gmra.mxu1 %v11075_v16  ;;  %3425 = vmatmul.bf16.gmra.mxu3 %v11087_v58  ;;  %v13152_v16 = vpop.f32.mrf.mxu3  ;;  %v4086_v58 = vpack.c.bf16 %v4064_v14, %v4062_v20  ;;  %v4083_v20 = vpack.c.bf16 %v13096_v5, %v13086_v38  ;;  %v11098_v14 = vld [vmem:[#allocation4 + $0x188] sm:$0xff] }
 0x5c7   : > { %v3486_v4 = vpop.f32.mrf.mxu0 }
 0x5c8   : > { %v4069_v63 = vpop.f32.mrf.mxu2 }
 0x5ca   : > { %9754 = vmatmul.msk.bf16.gmra.mxu0 %vm2501_vm2, %v12696_v43 }
 0x5cf   : > { %v3488_v8 = vpop.f32.mrf.mxu0 }
 0x5d0   : > { %v4072_v31 = vpop.f32.mrf.mxu2 }
 0x5d1   : > { %3218 = vmatmul.bf16.gmra.mxu1 %v11076_v32  ;;  %3430 = vmatmul.bf16.gmra.mxu3 %v11088_v62  ;;  %v11097_v32 = vld [vmem:[#allocation4 + $0x180] sm:$0xff] }
 0x5d7   : > { %v3491_v61 = vpop.f32.mrf.mxu0 }
 0x5d8   : > { %v4074_v22 = vpop.f32.mrf.mxu2 }
 0x5d9   : > { %v4088_v21 = vpack.c.bf16 %v4074_v22, %v4072_v31  ;;  %v11079_v31 = vld [vmem:[#allocation4 + $0xf0] sm:$0xff] }
 0x5da   : > { %9755 = vmatmul.msk.bf16.gmra.mxu0 %vm2501_vm2, %v12708_v60  ;;  %v4087_v60 = vpack.c.bf16 %v4069_v63, %v4067_v35 }
 0x5df   : > { %v3493_v51 = vpop.f32.mrf.mxu0 }
 0x5e0   : > { %v4077_v37 = vpop.f32.mrf.mxu2 }
 0x5e1   : > { %3223 = vmatmul.bf16.gmra.mxu1 %v11077_v41  ;;  %3779 = vmatmul.bf16.vlgmr.msrb.gmra.mxu3 %v11097_v32 }
 0x5e4   : > { %v3396_v62 = vpop.f32.mrf.mxu3 }
 0x5e7   : > { %v3496_v30 = vpop.f32.mrf.mxu0 }
 0x5e8   : > { %v4079_v40 = vpop.f32.mrf.mxu2 }
 0x5e9   : > { %v4089_v43 = vpack.c.bf16 %v4079_v40, %v4077_v37  ;;  %v4085_v37 = vpack.c.bf16 %v4059_v54, %v13128_v52  ;;  %v3510_v40 = vpack.c.bf16 %v3488_v8, %v3486_v4  ;;  %v11089_v8 = vld [vmem:[#allocation4 + $0x140] sm:$0xff] }
 0x5ea   : > { %9756 = vmatmul.msk.bf16.gmra.mxu0 %vm2501_vm2, %v12724_v34  ;;  %v4084_v34 = vpack.c.bf16 %v13114_v0, %v13104_v6  ;;  %v3511_v6 = vpack.c.bf16 %v3493_v51, %v3491_v61 }
 0x5eb   : > { %4155 = vmatpush.bf16.msra.mxu3 %v4089_v43  ;;  %v11080_v43 = vld [vmem:[#allocation4 + $0xf8] sm:$0xff] }
 0x5ec   : > { %v3398_v63 = vpop.f32.mrf.mxu3 }
 0x5ef   : > { %v3498_v13 = vpop.f32.mrf.mxu0  ;;  %4156 = vmatpush.bf16.msra.mxu3 %v4088_v21  ;;  %v11099_v21 = vld [vmem:[#allocation4 + $0x190] sm:$0xff] }
 0x5f0   : > { %v3512_v52 = vpack.c.bf16 %v3498_v13, %v3496_v30 }
 0x5f1   : > { %3228 = vmatmul.bf16.gmra.mxu1 %v11078_v18  ;;  %3784 = vmatmul.bf16.gmra.mxu3 %v11098_v14 }
 0x5f3   : > { %4157 = vmatpush.bf16.msra.mxu3 %v4087_v60  ;;  %v11101_v60 = vld [vmem:[#allocation4 + $0x1a0] sm:$0xff] }
 0x5f4   : > { %v3401_v0 = vpop.f32.mrf.mxu3 }
 0x5f7   : > { %v3501_v41 = vpop.f32.mrf.mxu0  ;;  %4158 = vmatpush.bf16.msra.mxu3 %v4086_v58 }
 0x5fa   : > { %9757 = vmatmul.msk.bf16.gmra.mxu0 %vm2501_vm2, %v12731_v50  ;;  %v4082_v50 = vpack.c.bf16 %v13076_v57, %v13072_v1  ;;  %v13170_v1 = vpop.f32.mrf.mxu1 }
 0x5fb   : > { %4159 = vmatpush.bf16.msra.mxu3 %v4085_v37 }
 0x5fc   : > { %v3403_v5 = vpop.f32.mrf.mxu3 }
 0x5ff   : > { %v3503_v22 = vpop.f32.mrf.mxu0  ;;  %4160 = vmatpush.bf16.msra.mxu3 %v4084_v34 }
 0x600   : > { %v3513_v35 = vpack.c.bf16 %v3503_v22, %v3501_v41 }
 0x601   : > { %3233 = vmatmul.bf16.gmra.mxu1 %v11079_v31  ;;  %3789 = vmatmul.bf16.gmra.mxu3 %v11099_v21  ;;  %v11103_v21 = vld [vmem:[#allocation4 + $0x1b0] sm:$0xff] }
 0x602   : > { %3579 = vmatpush.bf16.msrb.mxu1 %v3513_v35 }
 0x603   : > { %4161 = vmatpush.bf16.msra.mxu3 %v4083_v20 }
 0x604   : > { %v3406_v4 = vpop.f32.mrf.mxu3 }
 0x606   : > { %3580 = vmatpush.bf16.msrb.mxu1 %v3512_v52 }
 0x607   : > { %v13163_v54 = vpop.f32.mrf.mxu0  ;;  %4162 = vmatpush.bf16.msra.mxu3 %v4082_v50 }
 0x60a   : > { %3581 = vmatpush.bf16.msrb.mxu1 %v3511_v6 }
 0x60e   : > { %3582 = vmatpush.bf16.msrb.mxu1 %v3510_v40 }
 0x60f   : > { %v13165_v38 = vpop.f32.mrf.mxu0 }
 0x611   : > { %3238 = vmatmul.bf16.gmra.mxu1 %v11080_v43  ;;  %3794 = vmatmul.bf16.gmra.mxu3 %v11100_v2 }
 0x612   : > { %3583 = vmatpush.bf16.msrb.mxu1 %v3509_v45  ;;  %v3408_v45 = vpop.f32.mrf.mxu3 }
 0x616   : > { %3584 = vmatpush.bf16.msrb.mxu1 %v3508_v33  ;;  %v2839_v33 = vadd.f32 %v12862_v12, %v12860_v56  ;;  %v2844_v12 = vadd.f32 %v12878_v17, %v12876_v25  ;;  %v2849_v17 = vadd.f32 %v12894_v19, %v12892_v59  ;;  %v2854_v19 = vadd.f32 %v12904_v15, %v12902_v39  ;;  %v15189_v39 = vld [vmem:[#allocation21_spill] sm:$0xff]  ;;  %v15190_v15 = vld [vmem:[#allocation23_spill] sm:$0xff] }
 0x617   : > { %v13175_v57 = vpop.f32.mrf.mxu0 }
 0x618   : > { %v3053_v27 = vadd.f32 %v12991_v7, %v2839_v33  ;;  %v3055_v7 = vadd.f32 %v13012_v11, %v2844_v12  ;;  %v3057_v11 = vadd.f32 %v13028_v49, %v2849_v17  ;;  %v3059_v49 = vadd.f32 %v13043_v47, %v2854_v19  ;;  %v15188_v33 = vld [vmem:[#allocation17_spill] sm:$0xff] }
 0x619   : > { %v2859_v47 = vadd.f32 %v15190_v15, %v15189_v39  ;;  %v15196_v15 = vld [vmem:[#allocation15_spill] sm:$0xff] }
 0x61a   : > { %3585 = vmatpush.bf16.msrb.mxu1 %v3507_v23  ;;  %v3411_v10 = vpop.f32.mrf.mxu3 }
 0x61e   : > { %v3204_v61 = vpop.f32.mrf.mxu1  ;;  %3586 = vmatpush.bf16.msrb.mxu1 %v3506_v53 }
 0x61f   : > { %v3244_v26 = vadd.f32 %v3204_v61, %v12983_v36  ;;  %v13184_v42 = vpop.f32.mrf.mxu0  ;;  %v11090_v36 = vld [vmem:[#allocation4 + $0x148] sm:$0xff] }
 0x621   : > { %3587 = vmatmul.bf16.vlgmr.msrb.gmra.mxu1 %v11089_v8  ;;  %v13186_v29 = vadd.f32 %v3396_v62, %v3244_v26  ;;  %3799 = vmatmul.bf16.gmra.mxu3 %v11101_v60 }
 0x622   : > { %v3413_v13 = vpop.f32.mrf.mxu3 }
 0x626   : > { %v3206_v44 = vpop.f32.mrf.mxu1 }
 0x627   : > { %v3245_v23 = vadd.f32 %v3206_v44, %v3053_v27  ;;  %v13191_v51 = vpop.f32.mrf.mxu0 }
 0x629   : > { %v13193_v46 = vadd.f32 %v3398_v63, %v3245_v23  ;;  %v11102_v63 = vld [vmem:[#allocation4 + $0x1a8] sm:$0xff] }
 0x62a   : > { %v3416_v62 = vpop.f32.mrf.mxu3 }
 0x62e   : > { %v3209_v53 = vpop.f32.mrf.mxu1 }
 0x62f   : > { %v3246_v30 = vadd.f32 %v3209_v53, %v13004_v9  ;;  %v13196_v18 = vpop.f32.mrf.mxu0  ;;  %v11091_v9 = vld [vmem:[#allocation4 + $0x150] sm:$0xff] }
 0x630   : > { %v15191_v53 = vld [vmem:[#allocation20_spill] sm:$0xff] }
 0x631   : > { %3592 = vmatmul.bf16.gmra.mxu1 %v11090_v36  ;;  %v13198_v56 = vadd.f32 %v3401_v0, %v3246_v30  ;;  %3804 = vmatmul.bf16.gmra.mxu3 %v11102_v63  ;;  %v11104_v36 = vld [vmem:[#allocation4 + $0x1b8] sm:$0xff]  ;;  %v3061_v30 = vadd.f32 %v15191_v53, %v2859_v47  ;;  %v15197_v47 = vld [vmem:[#allocation16_spill] sm:$0xff] }
 0x632   : > { %v3418_v35 = vpop.f32.mrf.mxu3  ;;  %v2869_v53 = vadd.f32 %v15197_v47, %v15196_v15 }
 0x636   : > { %v3211_v32 = vpop.f32.mrf.mxu1 }
 0x637   : > { %v3247_v58 = vadd.f32 %v3211_v32, %v3055_v7  ;;  %v13203_v41 = vpop.f32.mrf.mxu0 }
 0x639   : > { %v13205_v37 = vadd.f32 %v3403_v5, %v3247_v58  ;;  %v11094_v58 = vld [vmem:[#allocation4 + $0x168] sm:$0xff] }
 0x63a   : > { %v3421_v50 = vpop.f32.mrf.mxu3 }
 0x63e   : > { %v3214_v34 = vpop.f32.mrf.mxu1 }
 0x63f   : > { %v3248_v31 = vadd.f32 %v3214_v34, %v13022_v48  ;;  %v13208_v22 = vpop.f32.mrf.mxu0  ;;  %v11092_v48 = vld [vmem:[#allocation4 + $0x158] sm:$0xff]  ;;  %v15192_v34 = vld [vmem:[#allocation19_spill] sm:$0xff] }
 0x641   : > { %3597 = vmatmul.bf16.gmra.mxu1 %v11091_v9  ;;  %v13210_v25 = vadd.f32 %v3406_v4, %v3248_v31  ;;  %3809 = vmatmul.bf16.gmra.mxu3 %v11103_v21 }
 0x642   : > { %v3423_v5 = vpop.f32.mrf.mxu3 }
 0x646   : > { %v3216_v20 = vpop.f32.mrf.mxu1 }
 0x647   : > { %v3249_v14 = vadd.f32 %v3216_v20, %v3057_v11  ;;  %v13215_v52 = vpop.f32.mrf.mxu0  ;;  %v11113_v11 = vld [vmem:[#allocation4 + $0x200] sm:$0xff] }
 0x648   : > { %v15193_v20 = vld [vmem:[#allocation22_spill] sm:$0xff] }
 0x649   : > { %v13217_v6 = vadd.f32 %v3408_v45, %v3249_v14  ;;  %v15194_v14 = vld [vmem:[#allocation24_spill] sm:$0xff] }
 0x64a   : > { %v3426_v26 = vpop.f32.mrf.mxu3 }
 0x64e   : > { %v3219_v0 = vpop.f32.mrf.mxu1 }
 0x64f   : > { %v3250_v40 = vadd.f32 %v3219_v0, %v13037_v3  ;;  %v13220_v43 = vpop.f32.mrf.mxu0  ;;  %v11093_v3 = vld [vmem:[#allocation4 + $0x160] sm:$0xff] }
 0x650   : > { %v15195_v0 = vld [vmem:[#allocation14_spill] sm:$0xff] }
 0x651   : > { %3602 = vmatmul.bf16.gmra.mxu1 %v11092_v48  ;;  %v13222_v59 = vadd.f32 %v3411_v10, %v3250_v40  ;;  %3814 = vmatmul.bf16.gmra.mxu3 %v11104_v36  ;;  %v2864_v48 = vadd.f32 %v15194_v14, %v15193_v20  ;;  %v11114_v36 = vld [vmem:[#allocation4 + $0x208] sm:$0xff] }
 0x652   : > { %v3428_v23 = vpop.f32.mrf.mxu3 }
 0x653   : > { %v3063_v40 = vadd.f32 %v15195_v0, %v2864_v48 }
 0x656   : > { %v3221_v4 = vpop.f32.mrf.mxu1 }
 0x657   : > { %v3251_v8 = vadd.f32 %v3221_v4, %v3059_v49  ;;  %v3875_v61 = vpop.f32.mrf.mxu0 }
 0x659   : > { %v13227_v45 = vadd.f32 %v3413_v13, %v3251_v8  ;;  %v11095_v8 = vld [vmem:[#allocation4 + $0x170] sm:$0xff] }
 0x65a   : > { %v3431_v7 = vpop.f32.mrf.mxu3 }
 0x65e   : > { %v3224_v2 = vpop.f32.mrf.mxu1 }
 0x65f   : > { %v3252_v27 = vadd.f32 %v3224_v2, %v15188_v33  ;;  %v3877_v44 = vpop.f32.mrf.mxu0 }
 0x661   : > { %3607 = vmatmul.bf16.gmra.mxu1 %v11093_v3  ;;  %v13230_v10 = vadd.f32 %v3416_v62, %v3252_v27  ;;  %4163 = vmatmul.bf16.vlgmr.msra.gmra.mxu3 %v11113_v11 }
 0x662   : > { %v3433_v62 = vpop.f32.mrf.mxu3 }
 0x666   : > { %v3226_v60 = vpop.f32.mrf.mxu1 }
 0x667   : > { %v3253_v12 = vadd.f32 %v3226_v60, %v3061_v30  ;;  %v3880_v13 = vpop.f32.mrf.mxu0  ;;  %v3065_v60 = vadd.f32 %v13074_v24, %v2869_v53  ;;  %v3893_v24 = vpack.c.bf16 %v13208_v22, %v13203_v41  ;;  %v3891_v41 = vpack.c.bf16 %v13184_v42, %v13175_v57 }
 0x669   : > { %v13235_v32 = vadd.f32 %v3418_v35, %v3253_v12 }
 0x66a   : > { %v3780_v49 = vpop.f32.mrf.mxu3 }
 0x66e   : > { %v3229_v9 = vpop.f32.mrf.mxu1 }
 0x66f   : > { %v3254_v31 = vadd.f32 %v3229_v9, %v15192_v34  ;;  %v3882_v63 = vpop.f32.mrf.mxu0  ;;  %v11096_v34 = vld [vmem:[#allocation4 + $0x178] sm:$0xff] }
 0x670   : > { %v3896_v30 = vpack.c.bf16 %v3882_v63, %v3880_v13  ;;  %v11115_v63 = vld [vmem:[#allocation4 + $0x210] sm:$0xff] }
 0x671   : > { %3612 = vmatmul.bf16.gmra.mxu1 %v11094_v58  ;;  %v13238_v17 = vadd.f32 %v3421_v50, %v3254_v31  ;;  %4168 = vmatmul.bf16.gmra.mxu3 %v11114_v36  ;;  %v3895_v58 = vpack.c.bf16 %v3877_v44, %v3875_v61  ;;  %v15198_v61 = vld [vmem:[#allocation18_spill] sm:$0xff] }
 0x672   : > { %v3782_v27 = vpop.f32.mrf.mxu3  ;;  %v2874_v44 = vadd.f32 %v13170_v1, %v15198_v61  ;;  %v11105_v1 = vld [vmem:[#allocation4 + $0x1c0] sm:$0xff] }
 0x676   : > { %v3231_v21 = vpop.f32.mrf.mxu1 }
 0x677   : > { %v3255_v19 = vadd.f32 %v3231_v21, %v3063_v40  ;;  %v3885_v35 = vpop.f32.mrf.mxu0  ;;  %v11106_v21 = vld [vmem:[#allocation4 + $0x1c8] sm:$0xff] }
 0x679   : > { %v13243_v4 = vadd.f32 %v3423_v5, %v3255_v19 }
 0x67e   : > { %v3234_v3 = vpop.f32.mrf.mxu1 }
 0x67f   : > { %v3256_v2 = vadd.f32 %v3234_v3, %v13070_v28  ;;  %v3887_v33 = vpop.f32.mrf.mxu0  ;;  %v3785_v28 = vpop.f32.mrf.mxu3 }
 0x680   : > { %v3897_v50 = vpack.c.bf16 %v3887_v33, %v3885_v35  ;;  %v11117_v35 = vld [vmem:[#allocation4 + $0x220] sm:$0xff] }
 0x681   : > { %3617 = vmatmul.bf16.gmra.mxu1 %v11095_v8  ;;  %v13246_v39 = vadd.f32 %v3426_v26, %v3256_v2  ;;  %v3894_v26 = vpack.c.bf16 %v13220_v43, %v13215_v52  ;;  %v3892_v52 = vpack.c.bf16 %v13196_v18, %v13191_v51  ;;  %v3067_v43 = vadd.f32 %v13152_v16, %v2874_v44  ;;  %v11116_v18 = vld [vmem:[#allocation4 + $0x218] sm:$0xff]  ;;  %v11110_v44 = vld [vmem:[#allocation4 + $0x1e8] sm:$0xff] }
 0x682   : > { %3963 = vmatpush.bf16.msra.mxu1 %v3897_v50  ;;  %4173 = vmatmul.bf16.gmra.mxu3 %v11115_v63 }
 0x686   : > { %v3236_v5 = vpop.f32.mrf.mxu1  ;;  %3964 = vmatpush.bf16.msra.mxu1 %v3896_v30 }
 0x687   : > { %v3257_v12 = vadd.f32 %v3236_v5, %v3065_v60  ;;  %v3787_v13 = vpop.f32.mrf.mxu3 }
 0x689   : > { %v13251_v9 = vadd.f32 %v3428_v23, %v3257_v12 }
 0x68a   : > { %3965 = vmatpush.bf16.msra.mxu1 %v3895_v58 }
 0x68e   : > { %v3239_v31 = vpop.f32.mrf.mxu1  ;;  %3966 = vmatpush.bf16.msra.mxu1 %v3894_v26 }
 0x68f   : > { %v3258_v11 = vadd.f32 %v3239_v31, %v13081_v55  ;;  %v3790_v22 = vpop.f32.mrf.mxu3  ;;  %v11109_v31 = vld [vmem:[#allocation4 + $0x1e0] sm:$0xff] }
 0x691   : > { %3622 = vmatmul.bf16.gmra.mxu1 %v11096_v34  ;;  %v13258_v20 = vadd.f32 %v3431_v7, %v3258_v11  ;;  %v3890_v7 = vpack.c.bf16 %v13165_v38, %v13163_v54 }
 0x692   : > { %3967 = vmatpush.bf16.msra.mxu1 %v3893_v24  ;;  %4178 = vmatmul.bf16.gmra.mxu3 %v11116_v18  ;;  %v11112_v18 = vld [vmem:[#allocation4 + $0x1f8] sm:$0xff] }
 0x696   : > { %v3241_v23 = vpop.f32.mrf.mxu1  ;;  %3968 = vmatpush.bf16.msra.mxu1 %v3892_v52 }
 0x697   : > { %v3259_v55 = vadd.f32 %v3241_v23, %v3067_v43  ;;  %v3792_v16 = vpop.f32.mrf.mxu3  ;;  %v11130_v23 = vld [vmem:[%s15067_s10 + $0x8] sm:$0xff] }
 0x699   : > { %v13267_v14 = vadd.f32 %v3433_v62, %v3259_v55 }
 0x69a   : > { %3969 = vmatpush.bf16.msra.mxu1 %v3891_v41 }
 0x69e   : > { %v3588_v48 = vpop.f32.mrf.mxu1  ;;  %3970 = vmatpush.bf16.msra.mxu1 %v3890_v7 }
 0x69f   : > { %v3628_v51 = vadd.f32 %v3588_v48, %v13186_v29  ;;  %v3795_v42 = vpop.f32.mrf.mxu3 }
 0x6a1   : > { %3971 = vmatmul.bf16.vlgmr.msra.gmra.mxu1 %v11105_v1  ;;  %v13272_v0 = vadd.f32 %v3780_v49, %v3628_v51 }
 0x6a2   : > { %4183 = vmatmul.bf16.gmra.mxu3 %v11117_v35  ;;  %4494 = vmatpush.bf16.msrb.mxu1 %v11130_v23 }
 0x6a6   : > { %v3590_v40 = vpop.f32.mrf.mxu1 }
 0x6a7   : > { %v3629_v57 = vadd.f32 %v3590_v40, %v13193_v46  ;;  %v3797_v38 = vpop.f32.mrf.mxu3  ;;  %v11107_v46 = vld [vmem:[#allocation4 + $0x1d0] sm:$0xff] }
 0x6a9   : > { %v13275_v62 = vadd.f32 %v3782_v27, %v3629_v57 }
 0x6ae   : > { %v3593_v19 = vpop.f32.mrf.mxu1 }
 0x6af   : > { %v3630_v54 = vadd.f32 %v3593_v19, %v13198_v56  ;;  %v3800_v3 = vpop.f32.mrf.mxu3  ;;  %v11118_v56 = vld [vmem:[#allocation4 + $0x228] sm:$0xff] }
 0x6b1   : > { %3976 = vmatmul.bf16.gmra.mxu1 %v11106_v21  ;;  %v13278_v29 = vadd.f32 %v3785_v28, %v3630_v54 }
 0x6b2   : > { %4188 = vmatmul.bf16.gmra.mxu3 %v11118_v56 }
 0x6b6   : > { %v3595_v8 = vpop.f32.mrf.mxu1 }
 0x6b7   : > { %v3631_v49 = vadd.f32 %v3595_v8, %v13205_v37  ;;  %v13284_v27 = vpop.f32.mrf.mxu3  ;;  %v11108_v37 = vld [vmem:[#allocation4 + $0x1d8] sm:$0xff] }
 0x6b9   : > { %v13281_v2 = vadd.f32 %v3787_v13, %v3631_v49  ;;  %v11120_v13 = vld [vmem:[#allocation4 + $0x238] sm:$0xff]  ;;  %v4239_v49 = vpop.permute.xlu2 %4238 }
 0x6be   : > { %v3598_v33 = vpop.f32.mrf.mxu1 }
 0x6bf   : > { %v3632_v50 = vadd.f32 %v3598_v33, %v13210_v25  ;;  %v3805_v53 = vpop.f32.mrf.mxu3  ;;  %v11119_v25 = vld [vmem:[#allocation4 + $0x230] sm:$0xff] }
 0x6c1   : > { %3981 = vmatmul.bf16.gmra.mxu1 %v11107_v46  ;;  %v13286_v36 = vadd.f32 %v3790_v22, %v3632_v50  ;;  %v11111_v22 = vld [vmem:[#allocation4 + $0x1f0] sm:$0xff]  ;;  %v4244_v50 = vpop.permute.xlu0 %4243 }
 0x6c2   : > { %4193 = vmatmul.bf16.gmra.mxu3 %v11119_v25 }
 0x6c6   : > { %v3600_v15 = vpop.f32.mrf.mxu1 }
 0x6c7   : > { %v3633_v47 = vadd.f32 %v3600_v15, %v13217_v6  ;;  %v13292_v12 = vpop.f32.mrf.mxu3 }
 0x6c9   : > { %v13289_v30 = vadd.f32 %v3792_v16, %v3633_v47 }
 0x6ce   : > { %v3603_v60 = vpop.f32.mrf.mxu1 }
 0x6cf   : > { %v3634_v5 = vadd.f32 %v3603_v60, %v13222_v59  ;;  %v3810_v6 = vpop.f32.mrf.mxu3 }
 0x6d1   : > { %3986 = vmatmul.bf16.gmra.mxu1 %v11108_v37  ;;  %v13294_v58 = vadd.f32 %v3795_v42, %v3634_v5 }
 0x6d2   : > { %4198 = vmatmul.bf16.gmra.mxu3 %v11120_v13  ;;  %v4254_v13 = vpop.permute.xlu2 %4253 }
 0x6d6   : > { %v3605_v28 = vpop.f32.mrf.mxu1 }
 0x6d7   : > { %v3635_v26 = vadd.f32 %v3605_v28, %v13227_v45  ;;  %v13302_v63 = vpop.f32.mrf.mxu3 }
 0x6d9   : > { %v13297_v34 = vadd.f32 %v3797_v38, %v3635_v26  ;;  %v4249_v26 = vpop.permute.xlu1 %4248 }
 0x6de   : > { %v3608_v11 = vpop.f32.mrf.mxu1 }
 0x6df   : > { %v3636_v24 = vadd.f32 %v3608_v11, %v13230_v10  ;;  %v3815_v43 = vpop.f32.mrf.mxu3 }
 0x6e1   : > { %3991 = vmatmul.bf16.gmra.mxu1 %v11109_v31  ;;  %v13300_v59 = vadd.f32 %v3800_v3, %v3636_v24 }
 0x6e6   : > { %v13304_v61 = vpop.f32.mrf.mxu1 }
 0x6e7   : > { %v13314_v41 = vpop.f32.mrf.mxu3 }
 0x6ee   : > { %v3613_v52 = vpop.f32.mrf.mxu1 }
 0x6ef   : > { %v3638_v45 = vadd.f32 %v3613_v52, %v13238_v17  ;;  %v4164_v17 = vpop.f32.mrf.mxu3 }
 0x6f1   : > { %3996 = vmatmul.bf16.gmra.mxu1 %v11110_v44  ;;  %v13310_v10 = vadd.f32 %v3805_v53, %v3638_v45 }
 0x6f6   : > { %v13312_v55 = vpop.f32.mrf.mxu1 }
 0x6f7   : > { %v4166_v16 = vpop.f32.mrf.mxu3 }
 0x6fe   : > { %v3618_v7 = vpop.f32.mrf.mxu1 }
 0x6ff   : > { %v3640_v1 = vadd.f32 %v3618_v7, %v13246_v39  ;;  %v4169_v19 = vpop.f32.mrf.mxu3  ;;  %v11121_v39 = vld [vmem:[%s15067_s10] sm:$0xff] }
 0x700   : > { %4412 = vmatpush.bf16.msrb.mxu0 %v11121_v39  ;;  %v4264_v39 = vpop.permute.xlu1 %4263 }
 0x701   : > { %4001 = vmatmul.bf16.gmra.mxu1 %v11111_v22  ;;  %v13317_v48 = vadd.f32 %v3810_v6, %v3640_v1 }
 0x706   : > { %v13319_v51 = vpop.f32.mrf.mxu1 }
 0x707   : > { %v4171_v35 = vpop.f32.mrf.mxu3 }
 0x70e   : > { %v3623_v40 = vpop.f32.mrf.mxu1 }
 0x70f   : > { %v3642_v57 = vadd.f32 %v3623_v40, %v13258_v20  ;;  %v4174_v56 = vpop.f32.mrf.mxu3 }
 0x711   : > { %4006 = vmatmul.bf16.gmra.mxu1 %v11112_v18  ;;  %v13322_v42 = vadd.f32 %v3815_v43, %v3642_v57 }
 0x716   : > { %v13324_v21 = vpop.f32.mrf.mxu1 }
 0x71e   : > { %v3972_v54 = vpop.f32.mrf.mxu1 }
 0x71f   : > { %v4012_v38 = vadd.f32 %v3972_v54, %v13272_v0 }
 0x721   : > { %v4204_v8 = vadd.f32 %v4164_v17, %v4012_v38 }
 0x723   : > { %v4316_v46 = vadd.f32 %v4239_v49, %v4204_v8 }
 0x725   : > { %v4332_v15 = vmul.f32 0.2, %v4316_v46 }
 0x726   : > { %v3974_v3 = vpop.f32.mrf.mxu1 }
 0x727   : > { %v4013_v20 = vadd.f32 %v3974_v3, %v13275_v62  ;;  %v4348_v60 = vmax.f32 %v4316_v46, %v4332_v15  ;;  %v4176_v62 = vpop.f32.mrf.mxu3 }
 0x729   : > { %v4205_v33 = vadd.f32 %v4166_v16, %v4013_v20 }
 0x72b   : > { %v4317_v47 = vadd.f32 %v4244_v50, %v4205_v33 }
 0x72d   : > { %v4333_v53 = vmul.f32 0.2, %v4317_v47 }
 0x72e   : > { %v3977_v37 = vpop.f32.mrf.mxu1 }
 0x72f   : > { %v4349_v5 = vmax.f32 %v4317_v47, %v4333_v53  ;;  %v4014_v25 = vadd.f32 %v3977_v37, %v13278_v29  ;;  %v4179_v45 = vpop.f32.mrf.mxu3 }
 0x731   : > { %v13332_v0 = vpack.c.bf16 %v4349_v5, %v4348_v60  ;;  %v4206_v28 = vadd.f32 %v4169_v19, %v4014_v25 }
 0x733   : > { %9835 = vmatmul.msk.bf16.vlgmr.msrb.gmra.mxu0 %vm4380_vm3, %v13332_v0  ;;  %9849 = vmatmul.msk.bf16.vlgmr.msrb.gmra.mxu1 %vm4380_vm3, %v13332_v0  ;;  %v4318_v31 = vadd.f32 %v4249_v26, %v4206_v28 }
 0x735   : > { %v4334_v44 = vmul.f32 0.2, %v4318_v31 }
 0x736   : > { %v3979_v6 = vpop.f32.mrf.mxu1 }
 0x737   : > { %v4015_v11 = vadd.f32 %v3979_v6, %v13281_v2  ;;  %v4350_v23 = vmax.f32 %v4318_v31, %v4334_v44  ;;  %v4259_v2 = vpop.permute.xlu0 %4258  ;;  %v4181_v57 = vpop.f32.mrf.mxu3  ;;  %v3637_v6 = vadd.f32 %v13304_v61, %v13235_v32 }
 0x739   : > { %v4207_v24 = vadd.f32 %v4171_v35, %v4015_v11 }
 0x73b   : > { %v4319_v29 = vadd.f32 %v4254_v13, %v4207_v24  ;;  %v3829_v24 = vadd.f32 %v13284_v27, %v3637_v6  ;;  %v11139_v6 = vld [vmem:[%s15067_s10 + $0x10] sm:$0xff] }
 0x73c   : > { %4771 = vmatpush.bf16.msra.mxu0 %v11139_v6 }
 0x73d   : > { %v4335_v52 = vmul.f32 0.2, %v4319_v29 }
 0x73e   : > { %v3982_v43 = vpop.f32.mrf.mxu1 }
 0x73f   : > { %v4351_v22 = vmax.f32 %v4319_v29, %v4335_v52  ;;  %v4016_v7 = vadd.f32 %v3982_v43, %v13286_v36  ;;  %v4184_v20 = vpop.f32.mrf.mxu3  ;;  %v4274_v53 = vpop.permute.xlu0 %4273 }
 0x741   : > { %v13340_v1 = vpack.c.bf16 %v4351_v22, %v4350_v23  ;;  %v4208_v17 = vadd.f32 %v4174_v56, %v4016_v7 }
 0x743   : > { %9836 = vmatmul.msk.bf16.gmra.mxu0 %vm4380_vm3, %v13340_v1  ;;  %9850 = vmatmul.msk.bf16.gmra.mxu1 %vm4380_vm3, %v13340_v1  ;;  %v4320_v18 = vadd.f32 %v4259_v2, %v4208_v17 }
 0x745   : > { %v4336_v54 = vmul.f32 0.2, %v4320_v18 }
 0x746   : > { %v3984_v16 = vpop.f32.mrf.mxu1 }
 0x747   : > { %v4017_v40 = vadd.f32 %v3984_v16, %v13289_v30  ;;  %v4352_v8 = vmax.f32 %v4320_v18, %v4336_v54  ;;  %v4269_v30 = vpop.permute.xlu2 %4268  ;;  %v3639_v16 = vadd.f32 %v13312_v55, %v13243_v4 }
 0x749   : > { %v4209_v19 = vadd.f32 %v4176_v62, %v4017_v40  ;;  %v3831_v40 = vadd.f32 %v13292_v12, %v3639_v16 }
 0x74b   : > { %v4321_v38 = vadd.f32 %v4264_v39, %v4209_v19 }
 0x74d   : > { %v4337_v36 = vmul.f32 0.2, %v4321_v38 }
 0x74e   : > { %v3987_v35 = vpop.f32.mrf.mxu1 }
 0x74f   : > { %v4353_v49 = vmax.f32 %v4321_v38, %v4337_v36  ;;  %v4018_v3 = vadd.f32 %v3987_v35, %v13294_v58  ;;  %v4186_v58 = vpop.f32.mrf.mxu3  ;;  %v4284_v43 = vpop.permute.xlu2 %4283 }
 0x751   : > { %v13348_v46 = vpack.c.bf16 %v4353_v49, %v4352_v8  ;;  %v4210_v33 = vadd.f32 %v4179_v45, %v4018_v3 }
 0x753   : > { %9837 = vmatmul.msk.bf16.gmra.mxu0 %vm4380_vm3, %v13348_v46  ;;  %9851 = vmatmul.msk.bf16.gmra.mxu1 %vm4380_vm3, %v13348_v46  ;;  %v4322_v56 = vadd.f32 %v4269_v30, %v4210_v33  ;;  %v3641_v33 = vadd.f32 %v13319_v51, %v13251_v9 }
 0x755   : > { %v4338_v37 = vmul.f32 0.2, %v4322_v56 }
 0x756   : > { %v3989_v50 = vpop.f32.mrf.mxu1 }
 0x757   : > { %v4019_v15 = vadd.f32 %v3989_v50, %v13297_v34  ;;  %v4354_v28 = vmax.f32 %v4322_v56, %v4338_v37  ;;  %v4279_v34 = vpop.permute.xlu1 %4278  ;;  %v4189_v44 = vpop.f32.mrf.mxu3  ;;  %v3833_v56 = vadd.f32 %v13302_v63, %v3641_v33  ;;  %v3643_v63 = vadd.f32 %v13324_v21, %v13267_v14 }
 0x759   : > { %v4211_v47 = vadd.f32 %v4181_v57, %v4019_v15  ;;  %v4289_v57 = vpop.permute.xlu0 %4288  ;;  %v4299_v15 = vpop.permute.xlu2 %4298 }
 0x75b   : > { %v4323_v60 = vadd.f32 %v4274_v53, %v4211_v47 }
 0x75d   : > { %v4339_v5 = vmul.f32 0.2, %v4323_v60 }
 0x75e   : > { %v3992_v25 = vpop.f32.mrf.mxu1 }
 0x75f   : > { %v4355_v62 = vmax.f32 %v4323_v60, %v4339_v5  ;;  %v4020_v26 = vadd.f32 %v3992_v25, %v13300_v59  ;;  %v4191_v2 = vpop.f32.mrf.mxu3  ;;  %v4294_v38 = vpop.permute.xlu1 %4293 }
 0x761   : > { %v13358_v31 = vpack.c.bf16 %v4355_v62, %v4354_v28  ;;  %v4212_v11 = vadd.f32 %v4184_v20, %v4020_v26  ;;  %v4304_v60 = vpop.permute.xlu0 %4303 }
 0x763   : > { %9838 = vmatmul.msk.bf16.gmra.mxu0 %vm4380_vm3, %v13358_v31  ;;  %9852 = vmatmul.msk.bf16.gmra.mxu1 %vm4380_vm3, %v13358_v31  ;;  %v4324_v29 = vadd.f32 %v4279_v34, %v4212_v11 }
 0x765   : > { %v4340_v45 = vmul.f32 0.2, %v4324_v29 }
 0x766   : > { %v3994_v13 = vpop.f32.mrf.mxu1 }
 0x767   : > { %v4021_v52 = vadd.f32 %v3994_v13, %v3829_v24  ;;  %v4356_v22 = vmax.f32 %v4324_v29, %v4340_v45  ;;  %v4194_v36 = vpop.f32.mrf.mxu3  ;;  %v3835_v24 = vadd.f32 %v13314_v41, %v3643_v63 }
 0x769   : > { %v4213_v59 = vadd.f32 %v4186_v58, %v4021_v52 }
 0x76b   : > { %v4325_v32 = vadd.f32 %v4284_v43, %v4213_v59  ;;  %v4314_v43 = vpop.permute.xlu2 %4313 }
 0x76d   : > { %v4341_v61 = vmul.f32 0.2, %v4325_v32 }
 0x76e   : > { %v3997_v23 = vpop.f32.mrf.mxu1 }
 0x76f   : > { %v4357_v7 = vmax.f32 %v4325_v32, %v4341_v61  ;;  %v4022_v17 = vadd.f32 %v3997_v23, %v13310_v10  ;;  %v4196_v50 = vpop.f32.mrf.mxu3 }
 0x771   : > { %v13368_v18 = vpack.c.bf16 %v4357_v7, %v4356_v22  ;;  %v4214_v27 = vadd.f32 %v4189_v44, %v4022_v17 }
 0x773   : > { %9839 = vmatmul.msk.bf16.gmra.mxu0 %vm4380_vm3, %v13368_v18  ;;  %9853 = vmatmul.msk.bf16.gmra.mxu1 %vm4380_vm3, %v13368_v18  ;;  %v4326_v39 = vadd.f32 %v4289_v57, %v4214_v27 }
 0x775   : > { %v4342_v35 = vmul.f32 0.2, %v4326_v39 }
 0x776   : > { %v3999_v19 = vpop.f32.mrf.mxu1 }
 0x777   : > { %v4023_v54 = vadd.f32 %v3999_v19, %v3831_v40  ;;  %v4358_v49 = vmax.f32 %v4326_v39, %v4342_v35  ;;  %v4199_v5 = vpop.f32.mrf.mxu3 }
 0x779   : > { %v4215_v10 = vadd.f32 %v4191_v2, %v4023_v54 }
 0x77b   : > { %v4327_v4 = vadd.f32 %v4294_v38, %v4215_v10 }
 0x77d   : > { %v4343_v55 = vmul.f32 0.2, %v4327_v4 }
 0x77e   : > { %v4002_v8 = vpop.f32.mrf.mxu1 }
 0x77f   : > { %v4359_v3 = vmax.f32 %v4327_v4, %v4343_v55  ;;  %v4024_v20 = vadd.f32 %v4002_v8, %v13317_v48  ;;  %v4201_v52 = vpop.f32.mrf.mxu3 }
 0x781   : > { %v13378_v30 = vpack.c.bf16 %v4359_v3, %v4358_v49  ;;  %v4216_v12 = vadd.f32 %v4194_v36, %v4024_v20 }
 0x783   : > { %9840 = vmatmul.msk.bf16.gmra.mxu0 %vm4380_vm3, %v13378_v30  ;;  %9854 = vmatmul.msk.bf16.gmra.mxu1 %vm4380_vm3, %v13378_v30  ;;  %v4328_v53 = vadd.f32 %v4299_v15, %v4216_v12 }
 0x785   : > { %v4344_v58 = vmul.f32 0.2, %v4328_v53 }
 0x786   : > { %v4004_v47 = vpop.f32.mrf.mxu1 }
 0x787   : > { %v4025_v37 = vadd.f32 %v4004_v47, %v3833_v56  ;;  %v4360_v28 = vmax.f32 %v4328_v53, %v4344_v58 }
 0x789   : > { %v4217_v48 = vadd.f32 %v4196_v50, %v4025_v37 }
 0x78b   : > { %v4329_v9 = vadd.f32 %v4304_v60, %v4217_v48  ;;  %v11157_v48 = vld [vmem:[%s15067_s10 + $0x20] sm:$0xff] }
 0x78c   : > { %5163 = vmatpush.bf16.msrb.mxu0 %v11157_v48 }
 0x78d   : > { %v4345_v51 = vmul.f32 0.2, %v4329_v9 }
 0x78e   : > { %v4007_v25 = vpop.f32.mrf.mxu1 }
 0x78f   : > { %v4361_v62 = vmax.f32 %v4329_v9, %v4345_v51  ;;  %v4026_v26 = vadd.f32 %v4007_v25, %v13322_v42  ;;  %v4309_v42 = vpop.permute.xlu1 %4308 }
 0x791   : > { %v13391_v11 = vpack.c.bf16 %v4361_v62, %v4360_v28  ;;  %v4218_v34 = vadd.f32 %v4199_v5, %v4026_v26 }
 0x793   : > { %9841 = vmatmul.msk.bf16.gmra.mxu0 %vm4380_vm3, %v13391_v11  ;;  %9855 = vmatmul.msk.bf16.gmra.mxu1 %vm4380_vm3, %v13391_v11  ;;  %v4330_v44 = vadd.f32 %v4309_v42, %v4218_v34 }
 0x795   : > { %v4346_v14 = vmul.f32 0.2, %v4330_v44 }
 0x796   : > { %v4009_v13 = vpop.f32.mrf.mxu1 }
 0x797   : > { %v4027_v29 = vadd.f32 %v4009_v13, %v3835_v24  ;;  %v4362_v32 = vmax.f32 %v4330_v44, %v4346_v14 }
 0x799   : > { %v4219_v59 = vadd.f32 %v4201_v52, %v4027_v29 }
 0x79b   : > { %v4331_v21 = vadd.f32 %v4314_v43, %v4219_v59 }
 0x79d   : > { %v4347_v45 = vmul.f32 0.2, %v4331_v21 }
 0x79f   : > { %v4363_v61 = vmax.f32 %v4331_v21, %v4347_v45  ;;  %v11131_v45 = vld [vmem:[#allocation6 + $0x40] sm:$0xff] }
 0x7a1   : > { %v13398_v23 = vpack.c.bf16 %v4363_v61, %v4362_v32  ;;  %v11122_v32 = vld [vmem:[#allocation6] sm:$0xff] }
 0x7a3   : > { %9842 = vmatmul.msk.bf16.gmra.mxu0 %vm4380_vm3, %v13398_v23  ;;  %9856 = vmatmul.msk.bf16.gmra.mxu1 %vm4380_vm3, %v13398_v23 }
 0x7b0   : > { %v13404_v41 = vpop.f32.mrf.mxu0  ;;  %v13406_v22 = vpop.f32.mrf.mxu1 }
 0x7b3   : > { %9927 = vmatmul.msk.bf16.vlgmr.msra.gmra.mxu0 %vm4380_vm3, %v13332_v0 }
 0x7b8   : > { %v13410_v7 = vpop.f32.mrf.mxu0  ;;  %v13412_v17 = vpop.f32.mrf.mxu1 }
 0x7b9   : > { %v4454_v2 = vpack.c.bf16 %v13410_v7, %v13404_v41  ;;  %v4536_v21 = vpack.c.bf16 %v13412_v17, %v13406_v22  ;;  %v11132_v22 = vld [vmem:[#allocation6 + $0x48] sm:$0xff]  ;;  %v11133_v7 = vld [vmem:[#allocation6 + $0x50] sm:$0xff] }
 0x7ba   : > { %v11123_v17 = vld [vmem:[#allocation6 + $0x8] sm:$0xff] }
 0x7c0   : > { %v13416_v16 = vpop.f32.mrf.mxu0  ;;  %v13418_v27 = vpop.f32.mrf.mxu1 }
 0x7c3   : > { %9928 = vmatmul.msk.bf16.gmra.mxu0 %vm4380_vm3, %v13340_v1 }
 0x7c8   : > { %v13422_v40 = vpop.f32.mrf.mxu0  ;;  %v13424_v57 = vpop.f32.mrf.mxu1 }
 0x7c9   : > { %v4455_v19 = vpack.c.bf16 %v13422_v40, %v13416_v16  ;;  %v4537_v14 = vpack.c.bf16 %v13424_v57, %v13418_v27 }
 0x7d0   : > { %v4424_v39 = vpop.f32.mrf.mxu0  ;;  %v4506_v54 = vpop.f32.mrf.mxu1 }
 0x7d3   : > { %9929 = vmatmul.msk.bf16.gmra.mxu0 %vm4380_vm3, %v13348_v46 }
 0x7d8   : > { %v4426_v10 = vpop.f32.mrf.mxu0  ;;  %v4508_v38 = vpop.f32.mrf.mxu1 }
 0x7d9   : > { %v4456_v36 = vpack.c.bf16 %v4426_v10, %v4424_v39  ;;  %v4538_v59 = vpack.c.bf16 %v4508_v38, %v4506_v54  ;;  %v11134_v10 = vld [vmem:[#allocation6 + $0x58] sm:$0xff] }
 0x7da   : > { %v11125_v38 = vld [vmem:[#allocation6 + $0x18] sm:$0xff] }
 0x7e0   : > { %v4429_v35 = vpop.f32.mrf.mxu0  ;;  %v4511_v4 = vpop.f32.mrf.mxu1 }
 0x7e3   : > { %9930 = vmatmul.msk.bf16.gmra.mxu0 %vm4380_vm3, %v13358_v31 }
 0x7e8   : > { %v4431_v55 = vpop.f32.mrf.mxu0  ;;  %v4513_v8 = vpop.f32.mrf.mxu1 }
 0x7e9   : > { %v4457_v49 = vpack.c.bf16 %v4431_v55, %v4429_v35  ;;  %v4539_v29 = vpack.c.bf16 %v4513_v8, %v4511_v4  ;;  %v11135_v4 = vld [vmem:[#allocation6 + $0x60] sm:$0xff] }
 0x7ea   : > { %v11126_v55 = vld [vmem:[#allocation6 + $0x20] sm:$0xff] }
 0x7f0   : > { %v4434_v3 = vpop.f32.mrf.mxu0  ;;  %v4516_v20 = vpop.f32.mrf.mxu1 }
 0x7f3   : > { %9931 = vmatmul.msk.bf16.gmra.mxu0 %vm4380_vm3, %v13368_v18 }
 0x7f8   : > { %v4436_v33 = vpop.f32.mrf.mxu0  ;;  %v4518_v12 = vpop.f32.mrf.mxu1 }
 0x7f9   : > { %v4458_v42 = vpack.c.bf16 %v4436_v33, %v4434_v3  ;;  %v4540_v13 = vpack.c.bf16 %v4518_v12, %v4516_v20  ;;  %v11175_v20 = vld [vmem:[%s15067_s10 + $0x30] sm:$0xff]  ;;  %v11136_v33 = vld [vmem:[#allocation6 + $0x68] sm:$0xff] }
 0x7fa   : > { %5555 = vmatpush.bf16.msra.mxu0 %v11175_v20  ;;  %v11127_v12 = vld [vmem:[#allocation6 + $0x28] sm:$0xff] }
 0x800   : > { %v4439_v50 = vpop.f32.mrf.mxu0  ;;  %v4521_v56 = vpop.f32.mrf.mxu1 }
 0x803   : > { %9932 = vmatmul.msk.bf16.gmra.mxu0 %vm4380_vm3, %v13378_v30 }
 0x808   : > { %v4441_v15 = vpop.f32.mrf.mxu0  ;;  %v4523_v47 = vpop.f32.mrf.mxu1 }
 0x809   : > { %v4459_v34 = vpack.c.bf16 %v4441_v15, %v4439_v50  ;;  %v4541_v24 = vpack.c.bf16 %v4523_v47, %v4521_v56  ;;  %v11137_v15 = vld [vmem:[#allocation6 + $0x70] sm:$0xff] }
 0x80a   : > { %v11128_v47 = vld [vmem:[#allocation6 + $0x30] sm:$0xff] }
 0x810   : > { %v4444_v53 = vpop.f32.mrf.mxu0  ;;  %v4526_v37 = vpop.f32.mrf.mxu1 }
 0x813   : > { %9933 = vmatmul.msk.bf16.gmra.mxu0 %vm4380_vm3, %v13391_v11 }
 0x818   : > { %v4446_v60 = vpop.f32.mrf.mxu0  ;;  %v4528_v58 = vpop.f32.mrf.mxu1 }
 0x819   : > { %v4460_v26 = vpack.c.bf16 %v4446_v60, %v4444_v53  ;;  %v4542_v6 = vpack.c.bf16 %v4528_v58, %v4526_v37 }
 0x820   : > { %v4449_v9 = vpop.f32.mrf.mxu0  ;;  %v4531_v51 = vpop.f32.mrf.mxu1 }
 0x823   : > { %9934 = vmatmul.msk.bf16.gmra.mxu0 %vm4380_vm3, %v13398_v23 }
 0x828   : > { %v4451_v5 = vpop.f32.mrf.mxu0  ;;  %v4533_v25 = vpop.f32.mrf.mxu1 }
 0x829   : > { %v4461_v28 = vpack.c.bf16 %v4451_v5, %v4449_v9  ;;  %v4543_v62 = vpack.c.bf16 %v4533_v25, %v4531_v51  ;;  %v11138_v51 = vld [vmem:[#allocation6 + $0x78] sm:$0xff] }
 0x82a   : > { %v11129_v5 = vld [vmem:[#allocation6 + $0x38] sm:$0xff] }
 0x82b   : > { %4609 = vmatpush.bf16.msra.mxu2 %v4543_v62  ;;  %4706 = vmatpush.bf16.msrb.mxu3 %v4461_v28 }
 0x82f   : > { %4610 = vmatpush.bf16.msra.mxu2 %v4542_v6  ;;  %4707 = vmatpush.bf16.msrb.mxu3 %v4460_v26  ;;  %v11140_v26 = vld [vmem:[#allocation6 + $0x80] sm:$0xff] }
 0x830   : > { %v13443_v63 = vpop.f32.mrf.mxu0 }
 0x833   : > { %4611 = vmatpush.bf16.msra.mxu2 %v4541_v24  ;;  %4708 = vmatpush.bf16.msrb.mxu3 %v4459_v34 }
 0x834   : > { %10019 = vmatmul.msk.bf16.vlgmr.msrb.gmra.mxu0 %vm4380_vm3, %v13332_v0 }
 0x837   : > { %4612 = vmatpush.bf16.msra.mxu2 %v4540_v13  ;;  %4709 = vmatpush.bf16.msrb.mxu3 %v4458_v42 }
 0x838   : > { %v13447_v44 = vpop.f32.mrf.mxu0 }
 0x839   : > { %v4813_v52 = vpack.c.bf16 %v13447_v44, %v13443_v63 }
 0x83b   : > { %4613 = vmatpush.bf16.msra.mxu2 %v4539_v29  ;;  %4710 = vmatpush.bf16.msrb.mxu3 %v4457_v49  ;;  %v11148_v49 = vld [vmem:[%s15067_s10 + $0x18] sm:$0xff] }
 0x83f   : > { %4614 = vmatpush.bf16.msra.mxu2 %v4538_v59  ;;  %4711 = vmatpush.bf16.msrb.mxu3 %v4456_v36 }
 0x840   : > { %v13451_v43 = vpop.f32.mrf.mxu0 }
 0x843   : > { %4615 = vmatpush.bf16.msra.mxu2 %v4537_v14  ;;  %4712 = vmatpush.bf16.msrb.mxu3 %v4455_v19 }
 0x844   : > { %10020 = vmatmul.msk.bf16.gmra.mxu0 %vm4380_vm3, %v13340_v1 }
 0x847   : > { %4616 = vmatpush.bf16.msra.mxu2 %v4536_v21  ;;  %4713 = vmatpush.bf16.msrb.mxu3 %v4454_v2  ;;  %v11124_v2 = vld [vmem:[#allocation6 + $0x10] sm:$0xff] }
 0x848   : > { %v13465_v61 = vpop.f32.mrf.mxu0 }
 0x849   : > { %v4814_v27 = vpack.c.bf16 %v13465_v61, %v13451_v43 }
 0x84a   : > { %4617 = vmatmul.bf16.vlgmr.msra.gmra.mxu2 %v11131_v45  ;;  %4714 = vmatmul.bf16.vlgmr.msrb.gmra.mxu3 %v11122_v32 }
 0x84b   : > { %4967 = vmatpush.bf16.msrb.mxu2 %v11148_v49 }
 0x850   : > { %v13469_v16 = vpop.f32.mrf.mxu0 }
 0x854   : > { %10021 = vmatmul.msk.bf16.gmra.mxu0 %vm4380_vm3, %v13348_v46 }
 0x858   : > { %v4785_v40 = vpop.f32.mrf.mxu0 }
 0x859   : > { %v4815_v57 = vpack.c.bf16 %v4785_v40, %v13469_v16  ;;  %v11142_v16 = vld [vmem:[#allocation6 + $0x90] sm:$0xff] }
 0x85a   : > { %4622 = vmatmul.bf16.gmra.mxu2 %v11132_v22  ;;  %4719 = vmatmul.bf16.gmra.mxu3 %v11123_v17 }
 0x860   : > { %v4788_v41 = vpop.f32.mrf.mxu0 }
 0x864   : > { %10022 = vmatmul.msk.bf16.gmra.mxu0 %vm4380_vm3, %v13358_v31 }
 0x868   : > { %v4790_v19 = vpop.f32.mrf.mxu0 }
 0x869   : > { %v4816_v39 = vpack.c.bf16 %v4790_v19, %v4788_v41 }
 0x86a   : > { %4627 = vmatmul.bf16.gmra.mxu2 %v11133_v7  ;;  %4724 = vmatmul.bf16.gmra.mxu3 %v11124_v2 }
 0x870   : > { %v4793_v54 = vpop.f32.mrf.mxu0 }
 0x874   : > { %10023 = vmatmul.msk.bf16.gmra.mxu0 %vm4380_vm3, %v13368_v18 }
 0x878   : > { %v4795_v36 = vpop.f32.mrf.mxu0 }
 0x879   : > { %v4817_v9 = vpack.c.bf16 %v4795_v36, %v4793_v54 }
 0x87a   : > { %4632 = vmatmul.bf16.gmra.mxu2 %v11134_v10  ;;  %4729 = vmatmul.bf16.gmra.mxu3 %v11125_v38 }
 0x880   : > { %v4798_v35 = vpop.f32.mrf.mxu0 }
 0x884   : > { %10024 = vmatmul.msk.bf16.gmra.mxu0 %vm4380_vm3, %v13378_v30 }
 0x888   : > { %v4800_v8 = vpop.f32.mrf.mxu0 }
 0x889   : > { %v4818_v60 = vpack.c.bf16 %v4800_v8, %v4798_v35  ;;  %v11144_v8 = vld [vmem:[#allocation6 + $0xa0] sm:$0xff] }
 0x88a   : > { %4637 = vmatmul.bf16.gmra.mxu2 %v11135_v4  ;;  %4734 = vmatmul.bf16.gmra.mxu3 %v11126_v55 }
 0x890   : > { %v4803_v3 = vpop.f32.mrf.mxu0 }
 0x894   : > { %10025 = vmatmul.msk.bf16.gmra.mxu0 %vm4380_vm3, %v13391_v11 }
 0x898   : > { %v4805_v50 = vpop.f32.mrf.mxu0 }
 0x899   : > { %v4819_v48 = vpack.c.bf16 %v4805_v50, %v4803_v3  ;;  %v11166_v3 = vld [vmem:[%s15067_s10 + $0x28] sm:$0xff] }
 0x89a   : > { %4642 = vmatmul.bf16.gmra.mxu2 %v11136_v33  ;;  %4739 = vmatmul.bf16.gmra.mxu3 %v11127_v12 }
 0x89b   : > { %5359 = vmatpush.bf16.msra.mxu2 %v11166_v3  ;;  %v11147_v3 = vld [vmem:[#allocation6 + $0xb8] sm:$0xff] }
 0x8a0   : > { %v4808_v56 = vpop.f32.mrf.mxu0 }
 0x8a4   : > { %10026 = vmatmul.msk.bf16.gmra.mxu0 %vm4380_vm3, %v13398_v23 }
 0x8a8   : > { %v4810_v53 = vpop.f32.mrf.mxu0 }
 0x8a9   : > { %v4820_v37 = vpack.c.bf16 %v4810_v53, %v4808_v56  ;;  %v11193_v56 = vld [vmem:[%s15067_s10 + $0x40] sm:$0xff]  ;;  %v11145_v53 = vld [vmem:[#allocation6 + $0xa8] sm:$0xff] }
 0x8aa   : > { %4647 = vmatmul.bf16.gmra.mxu2 %v11137_v15  ;;  %4744 = vmatmul.bf16.gmra.mxu3 %v11128_v47 }
 0x8ab   : > { %4886 = vmatpush.bf16.msra.mxu1 %v4820_v37  ;;  %5947 = vmatpush.bf16.msrb.mxu0 %v11193_v56 }
 0x8af   : > { %4887 = vmatpush.bf16.msra.mxu1 %v4819_v48 }
 0x8b1   : > { %v13490_v58 = vpop.f32.mrf.mxu0 }
 0x8b3   : > { %4888 = vmatpush.bf16.msra.mxu1 %v4818_v60 }
 0x8b4   : > { %10111 = vmatmul.msk.bf16.vlgmr.msra.gmra.mxu0 %vm4380_vm3, %v13332_v0 }
 0x8b7   : > { %4889 = vmatpush.bf16.msra.mxu1 %v4817_v9 }
 0x8b9   : > { %v13494_v25 = vpop.f32.mrf.mxu0 }
 0x8ba   : > { %v5205_v28 = vpack.c.bf16 %v13494_v25, %v13490_v58  ;;  %4652 = vmatmul.bf16.gmra.mxu2 %v11138_v51  ;;  %4749 = vmatmul.bf16.gmra.mxu3 %v11129_v5 }
 0x8bb   : > { %4890 = vmatpush.bf16.msra.mxu1 %v4816_v39  ;;  %v11143_v39 = vld [vmem:[#allocation6 + $0x98] sm:$0xff] }
 0x8bf   : > { %4891 = vmatpush.bf16.msra.mxu1 %v4815_v57 }
 0x8c1   : > { %v13498_v62 = vpop.f32.mrf.mxu0 }
 0x8c3   : > { %4892 = vmatpush.bf16.msra.mxu1 %v4814_v27 }
 0x8c4   : > { %10112 = vmatmul.msk.bf16.gmra.mxu0 %vm4380_vm3, %v13340_v1 }
 0x8c7   : > { %4893 = vmatpush.bf16.msra.mxu1 %v4813_v52  ;;  %v11141_v52 = vld [vmem:[#allocation6 + $0x88] sm:$0xff] }
 0x8c9   : > { %v13508_v6 = vpop.f32.mrf.mxu0 }
 0x8ca   : > { %v5206_v34 = vpack.c.bf16 %v13508_v6, %v13498_v62  ;;  %4894 = vmatmul.bf16.vlgmr.msra.gmra.mxu1 %v11140_v26  ;;  %9973 = vmatmul.msk.bf16.vlgmr.msrb.gmra.mxu2 %vm4380_vm3, %v13332_v0 }
 0x8cd   : > { %v4618_v24 = vpop.f32.mrf.mxu2  ;;  %v4715_v42 = vpop.f32.mrf.mxu3 }
 0x8ce   : > { %v13514_v13 = vadd.f32 %v4715_v42, %v4618_v24  ;;  %v11146_v24 = vld [vmem:[#allocation6 + $0xb0] sm:$0xff] }
 0x8d1   : > { %v13516_v29 = vpop.f32.mrf.mxu0 }
 0x8d4   : > { %10113 = vmatmul.msk.bf16.gmra.mxu0 %vm4380_vm3, %v13348_v46 }
 0x8d5   : > { %v13520_v63 = vpop.f32.mrf.mxu2  ;;  %v13522_v44 = vpop.f32.mrf.mxu3 }
 0x8d9   : > { %v13524_v59 = vpop.f32.mrf.mxu0 }
 0x8da   : > { %v5207_v43 = vpack.c.bf16 %v13524_v59, %v13516_v29  ;;  %4899 = vmatmul.bf16.gmra.mxu1 %v11141_v52  ;;  %9974 = vmatmul.msk.bf16.gmra.mxu2 %vm4380_vm3, %v13340_v1 }
 0x8dd   : > { %v4623_v14 = vpop.f32.mrf.mxu2  ;;  %v4720_v21 = vpop.f32.mrf.mxu3 }
 0x8de   : > { %v13530_v45 = vadd.f32 %v4720_v21, %v4623_v14 }
 0x8e1   : > { %v13532_v32 = vpop.f32.mrf.mxu0 }
 0x8e4   : > { %10114 = vmatmul.msk.bf16.gmra.mxu0 %vm4380_vm3, %v13358_v31 }
 0x8e5   : > { %v13536_v61 = vpop.f32.mrf.mxu2  ;;  %v13538_v27 = vpop.f32.mrf.mxu3 }
 0x8e9   : > { %v13540_v22 = vpop.f32.mrf.mxu0 }
 0x8ea   : > { %v5208_v17 = vpack.c.bf16 %v13540_v22, %v13532_v32  ;;  %4904 = vmatmul.bf16.gmra.mxu1 %v11142_v16  ;;  %9975 = vmatmul.msk.bf16.gmra.mxu2 %vm4380_vm3, %v13348_v46 }
 0x8ed   : > { %v4628_v40 = vpop.f32.mrf.mxu2  ;;  %v4725_v57 = vpop.f32.mrf.mxu3 }
 0x8ee   : > { %v13546_v41 = vadd.f32 %v4725_v57, %v4628_v40 }
 0x8f1   : > { %v5185_v7 = vpop.f32.mrf.mxu0 }
 0x8f4   : > { %10115 = vmatmul.msk.bf16.gmra.mxu0 %vm4380_vm3, %v13368_v18 }
 0x8f5   : > { %v13550_v2 = vpop.f32.mrf.mxu2  ;;  %v13552_v19 = vpop.f32.mrf.mxu3 }
 0x8f9   : > { %v5187_v54 = vpop.f32.mrf.mxu0 }
 0x8fa   : > { %4909 = vmatmul.bf16.gmra.mxu1 %v11143_v39  ;;  %9976 = vmatmul.msk.bf16.gmra.mxu2 %vm4380_vm3, %v13358_v31 }
 0x8fd   : > { %v4633_v10 = vpop.f32.mrf.mxu2  ;;  %v4730_v38 = vpop.f32.mrf.mxu3 }
 0x8fe   : > { %v13556_v36 = vadd.f32 %v4730_v38, %v4633_v10 }
 0x901   : > { %v5190_v35 = vpop.f32.mrf.mxu0 }
 0x904   : > { %10116 = vmatmul.msk.bf16.gmra.mxu0 %vm4380_vm3, %v13378_v30 }
 0x905   : > { %v13560_v4 = vpop.f32.mrf.mxu2  ;;  %v13562_v55 = vpop.f32.mrf.mxu3 }
 0x909   : > { %v5192_v49 = vpop.f32.mrf.mxu0 }
 0x90a   : > { %4914 = vmatmul.bf16.gmra.mxu1 %v11144_v8  ;;  %9977 = vmatmul.msk.bf16.gmra.mxu2 %vm4380_vm3, %v13368_v18  ;;  %v5210_v39 = vpack.c.bf16 %v5192_v49, %v5190_v35  ;;  %v5209_v8 = vpack.c.bf16 %v5187_v54, %v5185_v7 }
 0x90d   : > { %v4638_v20 = vpop.f32.mrf.mxu2  ;;  %v4735_v33 = vpop.f32.mrf.mxu3 }
 0x90e   : > { %v13569_v12 = vadd.f32 %v4735_v33, %v4638_v20 }
 0x911   : > { %v5195_v50 = vpop.f32.mrf.mxu0 }
 0x914   : > { %10117 = vmatmul.msk.bf16.gmra.mxu0 %vm4380_vm3, %v13391_v11 }
 0x915   : > { %v13576_v15 = vpop.f32.mrf.mxu2  ;;  %v13578_v47 = vpop.f32.mrf.mxu3 }
 0x916   : > { %15199 = vst [vmem:[#allocation25_spill] sm:$0xff] %v13576_v15 }
 0x917   : > { %15200 = vst [vmem:[#allocation28_spill] sm:$0xff] %v13578_v47 }
 0x919   : > { %v5197_v37 = vpop.f32.mrf.mxu0 }
 0x91a   : > { %4919 = vmatmul.bf16.gmra.mxu1 %v11145_v53  ;;  %9978 = vmatmul.msk.bf16.gmra.mxu2 %vm4380_vm3, %v13378_v30  ;;  %v5211_v16 = vpack.c.bf16 %v5197_v37, %v5195_v50 }
 0x91d   : > { %v4643_v48 = vpop.f32.mrf.mxu2  ;;  %v4740_v60 = vpop.f32.mrf.mxu3 }
 0x91e   : > { %v13582_v9 = vadd.f32 %v4740_v60, %v4643_v48 }
 0x921   : > { %v5200_v51 = vpop.f32.mrf.mxu0 }
 0x924   : > { %10118 = vmatmul.msk.bf16.gmra.mxu0 %vm4380_vm3, %v13398_v23 }
 0x925   : > { %v13586_v5 = vpop.f32.mrf.mxu2  ;;  %v13588_v26 = vpop.f32.mrf.mxu3 }
 0x926   : > { %15201 = vst [vmem:[#allocation26_spill] sm:$0xff] %v13586_v5 }
 0x927   : > { %15202 = vst [vmem:[#allocation29_spill] sm:$0xff] %v13588_v26 }
 0x929   : > { %v5202_v42 = vpop.f32.mrf.mxu0 }
 0x92a   : > { %v5212_v52 = vpack.c.bf16 %v5202_v42, %v5200_v51  ;;  %4924 = vmatmul.bf16.gmra.mxu1 %v11146_v24  ;;  %9979 = vmatmul.msk.bf16.gmra.mxu2 %vm4380_vm3, %v13391_v11 }
 0x92c   : > { %5278 = vmatpush.bf16.msrb.mxu1 %v5212_v52 }
 0x92d   : > { %v4648_v14 = vpop.f32.mrf.mxu2  ;;  %v4745_v21 = vpop.f32.mrf.mxu3 }
 0x92e   : > { %v13592_v40 = vadd.f32 %v4745_v21, %v4648_v14 }
 0x930   : > { %5279 = vmatpush.bf16.msrb.mxu1 %v5211_v16 }
 0x931   : > { %v13594_v57 = vpop.f32.mrf.mxu0 }
 0x934   : > { %5280 = vmatpush.bf16.msrb.mxu1 %v5210_v39  ;;  %10203 = vmatmul.msk.bf16.vlgmr.msrb.gmra.mxu0 %vm4380_vm3, %v13332_v0 }
 0x935   : > { %v13598_v10 = vpop.f32.mrf.mxu2  ;;  %v13600_v38 = vpop.f32.mrf.mxu3 }
 0x936   : > { %15203 = vst [vmem:[#allocation27_spill] sm:$0xff] %v13598_v10 }
 0x937   : > { %15204 = vst [vmem:[#allocation30_spill] sm:$0xff] %v13600_v38 }
 0x938   : > { %5281 = vmatpush.bf16.msrb.mxu1 %v5209_v8 }
 0x939   : > { %v13602_v20 = vpop.f32.mrf.mxu0 }
 0x93a   : > { %4929 = vmatmul.bf16.gmra.mxu1 %v11147_v3  ;;  %9980 = vmatmul.msk.bf16.gmra.mxu2 %vm4380_vm3, %v13398_v23 }
 0x93c   : > { %5282 = vmatpush.bf16.msrb.mxu1 %v5208_v17 }
 0x93d   : > { %v4653_v35 = vpop.f32.mrf.mxu2  ;;  %v4750_v49 = vpop.f32.mrf.mxu3 }
 0x93e   : > { %v13611_v50 = vadd.f32 %v4750_v49, %v4653_v35 }
 0x940   : > { %5283 = vmatpush.bf16.msrb.mxu1 %v5207_v43 }
 0x941   : > { %v13616_v7 = vpop.f32.mrf.mxu0 }
 0x944   : > { %5284 = vmatpush.bf16.msrb.mxu1 %v5206_v34  ;;  %10204 = vmatmul.msk.bf16.gmra.mxu0 %vm4380_vm3, %v13340_v1 }
 0x945   : > { %v13623_v54 = vpop.f32.mrf.mxu2 }
 0x946   : > { %15205 = vst [vmem:[#allocation17_spill] sm:$0xff] %v13623_v54 }
 0x947   : > { %v4895_v32 = vpop.f32.mrf.mxu1 }
 0x948   : > { %v13626_v22 = vadd.f32 %v4895_v32, %v13514_v13  ;;  %5285 = vmatpush.bf16.msrb.mxu1 %v5205_v28 }
 0x949   : > { %v13631_v29 = vpop.f32.mrf.mxu0 }
 0x94a   : > { %10065 = vmatmul.msk.bf16.vlgmr.msra.gmra.mxu2 %vm4380_vm3, %v13332_v0 }
 0x94d   : > { %v13637_v62 = vpop.f32.mrf.mxu2 }
 0x94f   : > { %v13639_v6 = vpop.f32.mrf.mxu1 }
 0x951   : > { %v13641_v34 = vpop.f32.mrf.mxu0 }
 0x954   : > { %10205 = vmatmul.msk.bf16.gmra.mxu0 %vm4380_vm3, %v13348_v46 }
 0x955   : > { %v13645_v13 = vpop.f32.mrf.mxu2 }
 0x957   : > { %v4900_v25 = vpop.f32.mrf.mxu1 }
 0x958   : > { %v13650_v28 = vadd.f32 %v4900_v25, %v13530_v45 }
 0x959   : > { %v13652_v43 = vpop.f32.mrf.mxu0 }
 0x95a   : > { %10066 = vmatmul.msk.bf16.gmra.mxu2 %vm4380_vm3, %v13340_v1 }
 0x95d   : > { %v13658_v56 = vpop.f32.mrf.mxu2 }
 0x95f   : > { %v13660_v53 = vpop.f32.mrf.mxu1 }
 0x961   : > { %v13662_v37 = vpop.f32.mrf.mxu0 }
 0x964   : > { %10206 = vmatmul.msk.bf16.gmra.mxu0 %vm4380_vm3, %v13358_v31 }
 0x965   : > { %v13666_v48 = vpop.f32.mrf.mxu2 }
 0x967   : > { %v4905_v60 = vpop.f32.mrf.mxu1 }
 0x968   : > { %v13671_v51 = vadd.f32 %v4905_v60, %v13546_v41 }
 0x969   : > { %v5574_v24 = vpop.f32.mrf.mxu0 }
 0x96a   : > { %v5600_v42 = vpack.c.bf16 %v5574_v24, %v13662_v37  ;;  %10067 = vmatmul.msk.bf16.gmra.mxu2 %vm4380_vm3, %v13348_v46 }
 0x96d   : > { %v13676_v52 = vpop.f32.mrf.mxu2 }
 0x96f   : > { %v13678_v14 = vpop.f32.mrf.mxu1 }
 0x971   : > { %v5577_v21 = vpop.f32.mrf.mxu0 }
 0x974   : > { %10207 = vmatmul.msk.bf16.gmra.mxu0 %vm4380_vm3, %v13368_v18 }
 0x975   : > { %v13682_v16 = vpop.f32.mrf.mxu2 }
 0x977   : > { %v4910_v39 = vpop.f32.mrf.mxu1 }
 0x978   : > { %v13687_v8 = vadd.f32 %v4910_v39, %v13556_v36  ;;  %v11184_v39 = vld [vmem:[%s15067_s10 + $0x38] sm:$0xff] }
 0x979   : > { %v5579_v3 = vpop.f32.mrf.mxu0  ;;  %5751 = vmatpush.bf16.msrb.mxu2 %v11184_v39 }
 0x97a   : > { %10068 = vmatmul.msk.bf16.gmra.mxu2 %vm4380_vm3, %v13358_v31  ;;  %v5601_v15 = vpack.c.bf16 %v5579_v3, %v5577_v21 }
 0x97d   : > { %v13691_v35 = vpop.f32.mrf.mxu2 }
 0x97f   : > { %v13693_v49 = vpop.f32.mrf.mxu1 }
 0x981   : > { %v5582_v32 = vpop.f32.mrf.mxu0 }
 0x984   : > { %10208 = vmatmul.msk.bf16.gmra.mxu0 %vm4380_vm3, %v13378_v30 }
 0x985   : > { %v13697_v25 = vpop.f32.mrf.mxu2 }
 0x987   : > { %v4915_v60 = vpop.f32.mrf.mxu1 }
 0x988   : > { %v13702_v36 = vadd.f32 %v4915_v60, %v13569_v12 }
 0x989   : > { %v5584_v24 = vpop.f32.mrf.mxu0 }
 0x98a   : > { %15206 = vst [vmem:[#allocation21_spill] sm:$0xff] %v13702_v36  ;;  %10069 = vmatmul.msk.bf16.gmra.mxu2 %vm4380_vm3, %v13368_v18 }
 0x98d   : > { %v4989_v58 = vpop.f32.mrf.mxu2 }
 0x98f   : > { %v13709_v45 = vpop.f32.mrf.mxu1 }
 0x990   : > { %15207 = vst [vmem:[#allocation23_spill] sm:$0xff] %v13709_v45  ;;  %v5602_v45 = vpack.c.bf16 %v5584_v24, %v5582_v32 }
 0x991   : > { %v5587_v41 = vpop.f32.mrf.mxu0 }
 0x994   : > { %10209 = vmatmul.msk.bf16.gmra.mxu0 %vm4380_vm3, %v13391_v11 }
 0x995   : > { %v4991_v37 = vpop.f32.mrf.mxu2 }
 0x997   : > { %v4920_v33 = vpop.f32.mrf.mxu1 }
 0x998   : > { %v13714_v12 = vadd.f32 %v4920_v33, %v13582_v9 }
 0x999   : > { %v5589_v60 = vpop.f32.mrf.mxu0 }
 0x99a   : > { %15208 = vst [vmem:[#allocation20_spill] sm:$0xff] %v13714_v12  ;;  %10070 = vmatmul.msk.bf16.gmra.mxu2 %vm4380_vm3, %v13378_v30  ;;  %v5603_v33 = vpack.c.bf16 %v5589_v60, %v5587_v41  ;;  %v15212_v41 = vpack.c.bf16 %v13602_v20, %v13594_v57  ;;  %v11159_v20 = vld [vmem:[#allocation6 + $0x108] sm:$0xff] }
 0x99b   : > { %v11150_v60 = vld [vmem:[#allocation6 + $0xc8] sm:$0xff] }
 0x99d   : > { %v4994_v59 = vpop.f32.mrf.mxu2 }
 0x99f   : > { %v13718_v17 = vpop.f32.mrf.mxu1 }
 0x9a0   : > { %15209 = vst [vmem:[#allocation19_spill] sm:$0xff] %v13718_v17 }
 0x9a1   : > { %v5592_v54 = vpop.f32.mrf.mxu0 }
 0x9a4   : > { %10210 = vmatmul.msk.bf16.gmra.mxu0 %vm4380_vm3, %v13398_v23 }
 0x9a5   : > { %v4996_v39 = vpop.f32.mrf.mxu2 }
 0x9a7   : > { %v4925_v38 = vpop.f32.mrf.mxu1 }
 0x9a8   : > { %v13723_v10 = vadd.f32 %v4925_v38, %v13592_v40  ;;  %v15210_v38 = vpack.c.bf16 %v13652_v43, %v13641_v34  ;;  %v5013_v43 = vpack.c.bf16 %v4991_v37, %v4989_v58  ;;  %v15215_v37 = vpack.c.bf16 %v13666_v48, %v13658_v56 }
 0x9a9   : > { %v5594_v26 = vpop.f32.mrf.mxu0 }
 0x9aa   : > { %v5604_v5 = vpack.c.bf16 %v5594_v26, %v5592_v54  ;;  %10071 = vmatmul.msk.bf16.gmra.mxu2 %vm4380_vm3, %v13391_v11 }
 0x9ac   : > { %5670 = vmatpush.bf16.msra.mxu1 %v5604_v5 }
 0x9ad   : > { %v4999_v9 = vpop.f32.mrf.mxu2 }
 0x9af   : > { %v13727_v12 = vpop.f32.mrf.mxu1 }
 0x9b0   : > { %5671 = vmatpush.bf16.msra.mxu1 %v5603_v33 }
 0x9b1   : > { %v13729_v17 = vpop.f32.mrf.mxu0 }
 0x9b4   : > { %5672 = vmatpush.bf16.msra.mxu1 %v5602_v45  ;;  %v15211_v45 = vpack.c.bf16 %v13631_v29, %v13616_v7  ;;  %v5014_v7 = vpack.c.bf16 %v4996_v39, %v4994_v59  ;;  %v15214_v59 = vpack.c.bf16 %v13682_v16, %v13676_v52  ;;  %v11160_v52 = vld [vmem:[#allocation6 + $0x110] sm:$0xff] }
 0x9b5   : > { %v5001_v47 = vpop.f32.mrf.mxu2 }
 0x9b6   : > { %v5015_v3 = vpack.c.bf16 %v5001_v47, %v4999_v9  ;;  %v15213_v47 = vpack.c.bf16 %v13697_v25, %v13691_v35  ;;  %v11149_v35 = vld [vmem:[#allocation6 + $0xc0] sm:$0xff]  ;;  %v15216_v25 = vpack.c.bf16 %v13645_v13, %v13637_v62  ;;  %v11161_v13 = vld [vmem:[#allocation6 + $0x118] sm:$0xff] }
 0x9b7   : > { %v4930_v36 = vpop.f32.mrf.mxu1 }
 0x9b8   : > { %v13732_v40 = vadd.f32 %v4930_v36, %v13611_v50  ;;  %5673 = vmatpush.bf16.msra.mxu1 %v5601_v15  ;;  %v11158_v15 = vld [vmem:[#allocation6 + $0x100] sm:$0xff] }
 0x9b9   : > { %v13734_v26 = vpop.f32.mrf.mxu0  ;;  %5286 = vmatmul.bf16.vlgmr.msrb.gmra.mxu1 %v11158_v15 }
 0x9ba   : > { %10072 = vmatmul.msk.bf16.gmra.mxu2 %vm4380_vm3, %v13398_v23 }
 0x9bc   : > { %5674 = vmatpush.bf16.msra.mxu1 %v5600_v42 }
 0x9bd   : > { %v5004_v5 = vpop.f32.mrf.mxu2 }
 0x9c0   : > { %5675 = vmatpush.bf16.msra.mxu1 %v15210_v38 }
 0x9c1   : > { %v13741_v54 = vpop.f32.mrf.mxu0 }
 0x9c4   : > { %5676 = vmatpush.bf16.msra.mxu1 %v15211_v45 }
 0x9c5   : > { %v5006_v50 = vpop.f32.mrf.mxu2 }
 0x9c6   : > { %v5016_v21 = vpack.c.bf16 %v5006_v50, %v5004_v5  ;;  %v11162_v50 = vld [vmem:[#allocation6 + $0x120] sm:$0xff] }
 0x9c8   : > { %5677 = vmatpush.bf16.msra.mxu1 %v15212_v41  ;;  %5082 = vmatpush.bf16.msra.mxu3 %v5016_v21 }
 0x9c9   : > { %v13749_v42 = vpop.f32.mrf.mxu0  ;;  %5291 = vmatmul.bf16.gmra.mxu1 %v11159_v20 }
 0x9ca   : > { %10157 = vmatmul.msk.bf16.vlgmr.msrb.gmra.mxu2 %vm4380_vm3, %v13332_v0 }
 0x9cc   : > { %5083 = vmatpush.bf16.msra.mxu3 %v5015_v3  ;;  %v11152_v3 = vld [vmem:[#allocation6 + $0xd8] sm:$0xff] }
 0x9cd   : > { %v13753_v34 = vpop.f32.mrf.mxu2 }
 0x9d0   : > { %5084 = vmatpush.bf16.msra.mxu3 %v5014_v7  ;;  %v11163_v7 = vld [vmem:[#allocation6 + $0x128] sm:$0xff] }
 0x9d1   : > { %v13755_v29 = vpop.f32.mrf.mxu0 }
 0x9d4   : > { %5085 = vmatpush.bf16.msra.mxu3 %v5013_v43 }
 0x9d5   : > { %v13757_v32 = vpop.f32.mrf.mxu2 }
 0x9d6   : > { %v5401_v57 = vpack.c.bf16 %v13757_v32, %v13753_v34 }
 0x9d8   : > { %5086 = vmatpush.bf16.msra.mxu3 %v15213_v47 }
 0x9d9   : > { %v13764_v0 = vpop.f32.mrf.mxu0  ;;  %5296 = vmatmul.bf16.gmra.mxu1 %v11160_v52 }
 0x9da   : > { %10158 = vmatmul.msk.bf16.gmra.mxu2 %vm4380_vm3, %v13340_v1 }
 0x9dc   : > { %5087 = vmatpush.bf16.msra.mxu3 %v15214_v59  ;;  %v11153_v59 = vld [vmem:[#allocation6 + $0xe0] sm:$0xff] }
 0x9dd   : > { %v13771_v58 = vpop.f32.mrf.mxu2 }
 0x9e0   : > { %5088 = vmatpush.bf16.msra.mxu3 %v15215_v37 }
 0x9e1   : > { %v13776_v36 = vpop.f32.mrf.mxu0 }
 0x9e4   : > { %5089 = vmatpush.bf16.msra.mxu3 %v15216_v25 }
 0x9e5   : > { %v13781_v24 = vpop.f32.mrf.mxu2 }
 0x9e6   : > { %v5402_v1 = vpack.c.bf16 %v13781_v24, %v13771_v58 }
 0x9e7   : > { %5090 = vmatmul.bf16.vlgmr.msra.gmra.mxu3 %v11149_v35  ;;  %v11164_v35 = vld [vmem:[#allocation6 + $0x130] sm:$0xff] }
 0x9e9   : > { %v5966_v16 = vpop.f32.mrf.mxu0  ;;  %5301 = vmatmul.bf16.gmra.mxu1 %v11161_v13 }
 0x9ea   : > { %10159 = vmatmul.msk.bf16.gmra.mxu2 %vm4380_vm3, %v13348_v46  ;;  %v11151_v46 = vld [vmem:[#allocation6 + $0xd0] sm:$0xff] }
 0x9ed   : > { %v13787_v56 = vpop.f32.mrf.mxu2 }
 0x9f1   : > { %v5969_v48 = vpop.f32.mrf.mxu0 }
 0x9f5   : > { %v13789_v39 = vpop.f32.mrf.mxu2 }
 0x9f6   : > { %v5403_v62 = vpack.c.bf16 %v13789_v39, %v13787_v56  ;;  %v11178_v56 = vld [vmem:[#allocation6 + $0x190] sm:$0xff] }
 0x9f7   : > { %5095 = vmatmul.bf16.gmra.mxu3 %v11150_v60 }
 0x9f9   : > { %v5971_v9 = vpop.f32.mrf.mxu0  ;;  %5306 = vmatmul.bf16.gmra.mxu1 %v11162_v50 }
 0x9fa   : > { %10160 = vmatmul.msk.bf16.gmra.mxu2 %vm4380_vm3, %v13358_v31  ;;  %v5993_v50 = vpack.c.bf16 %v5971_v9, %v5969_v48  ;;  %v5990_v48 = vpack.c.bf16 %v13749_v42, %v13741_v54  ;;  %v11155_v9 = vld [vmem:[#allocation6 + $0xf0] sm:$0xff]  ;;  %v11156_v42 = vld [vmem:[#allocation6 + $0xf8] sm:$0xff] }
 0x9fd   : > { %v13795_v33 = vpop.f32.mrf.mxu2 }
 0xa01   : > { %v5974_v5 = vpop.f32.mrf.mxu0 }
 0xa05   : > { %v13797_v38 = vpop.f32.mrf.mxu2 }
 0xa06   : > { %v5404_v45 = vpack.c.bf16 %v13797_v38, %v13795_v33 }
 0xa07   : > { %5100 = vmatmul.bf16.gmra.mxu3 %v11151_v46  ;;  %v11154_v46 = vld [vmem:[#allocation6 + $0xe8] sm:$0xff] }
 0xa09   : > { %v5976_v21 = vpop.f32.mrf.mxu0  ;;  %5311 = vmatmul.bf16.gmra.mxu1 %v11163_v7  ;;  %v5992_v7 = vpack.c.bf16 %v5966_v16, %v13776_v36  ;;  %v5989_v36 = vpack.c.bf16 %v13734_v26, %v13729_v17  ;;  %v11177_v26 = vld [vmem:[#allocation6 + $0x188] sm:$0xff] }
 0xa0a   : > { %10161 = vmatmul.msk.bf16.gmra.mxu2 %vm4380_vm3, %v13368_v18  ;;  %v5994_v13 = vpack.c.bf16 %v5976_v21, %v5974_v5  ;;  %v5991_v5 = vpack.c.bf16 %v13764_v0, %v13755_v29 }
 0xa0d   : > { %v5381_v15 = vpop.f32.mrf.mxu2 }
 0xa11   : > { %v5979_v41 = vpop.f32.mrf.mxu0 }
 0xa15   : > { %v5383_v31 = vpop.f32.mrf.mxu2 }
 0xa16   : > { %v5405_v54 = vpack.c.bf16 %v5383_v31, %v5381_v15  ;;  %v13833_v15 = vpop.f32.mrf.mxu3  ;;  %v11167_v31 = vld [vmem:[#allocation6 + $0x140] sm:$0xff] }
 0xa17   : > { %5105 = vmatmul.bf16.gmra.mxu3 %v11152_v3  ;;  %v11165_v3 = vld [vmem:[#allocation6 + $0x138] sm:$0xff] }
 0xa19   : > { %v5981_v43 = vpop.f32.mrf.mxu0  ;;  %5316 = vmatmul.bf16.gmra.mxu1 %v11164_v35 }
 0xa1a   : > { %10162 = vmatmul.msk.bf16.gmra.mxu2 %vm4380_vm3, %v13378_v30  ;;  %v5995_v60 = vpack.c.bf16 %v5981_v43, %v5979_v41 }
 0xa1d   : > { %v5386_v20 = vpop.f32.mrf.mxu2 }
 0xa21   : > { %v5984_v47 = vpop.f32.mrf.mxu0 }
 0xa25   : > { %v5388_v37 = vpop.f32.mrf.mxu2 }
 0xa26   : > { %v5406_v0 = vpack.c.bf16 %v5388_v37, %v5386_v20 }
 0xa27   : > { %5110 = vmatmul.bf16.gmra.mxu3 %v11153_v59 }
 0xa29   : > { %v5986_v25 = vpop.f32.mrf.mxu0  ;;  %5321 = vmatmul.bf16.gmra.mxu1 %v11165_v3 }
 0xa2a   : > { %v5996_v18 = vpack.c.bf16 %v5986_v25, %v5984_v47  ;;  %10163 = vmatmul.msk.bf16.gmra.mxu2 %vm4380_vm3, %v13391_v11  ;;  %v13810_v47 = vpop.f32.mrf.mxu1  ;;  %v11168_v25 = vld [vmem:[#allocation6 + $0x148] sm:$0xff] }
 0xa2c   : > { %6062 = vmatpush.bf16.msrb.mxu1 %v5996_v18 }
 0xa2d   : > { %v5391_v52 = vpop.f32.mrf.mxu2 }
 0xa30   : > { %6063 = vmatpush.bf16.msrb.mxu1 %v5995_v60 }
 0xa34   : > { %6064 = vmatpush.bf16.msrb.mxu1 %v5994_v13 }
 0xa35   : > { %v5393_v30 = vpop.f32.mrf.mxu2 }
 0xa36   : > { %v5287_v41 = vpop.f32.mrf.mxu1  ;;  %v5407_v43 = vpack.c.bf16 %v5393_v30, %v5391_v52 }
 0xa37   : > { %5115 = vmatmul.bf16.gmra.mxu3 %v11154_v46 }
 0xa38   : > { %6065 = vmatpush.bf16.msrb.mxu1 %v5993_v50 }
 0xa3a   : > { %10164 = vmatmul.msk.bf16.gmra.mxu2 %vm4380_vm3, %v13398_v23  ;;  %v11176_v23 = vld [vmem:[#allocation6 + $0x180] sm:$0xff] }
 0xa3b   : > { %5678 = vmatmul.bf16.vlgmr.msra.gmra.mxu1 %v11176_v23 }
 0xa3c   : > { %6066 = vmatpush.bf16.msrb.mxu1 %v5992_v7 }
 0xa3d   : > { %v5396_v11 = vpop.f32.mrf.mxu2 }
 0xa3e   : > { %v5289_v59 = vpop.f32.mrf.mxu1 }
 0xa40   : > { %6067 = vmatpush.bf16.msrb.mxu1 %v5991_v5 }
 0xa44   : > { %6068 = vmatpush.bf16.msrb.mxu1 %v5990_v48 }
 0xa45   : > { %v5398_v21 = vpop.f32.mrf.mxu2 }
 0xa46   : > { %v5408_v16 = vpack.c.bf16 %v5398_v21, %v5396_v11  ;;  %v5292_v17 = vpop.f32.mrf.mxu1  ;;  %v11169_v11 = vld [vmem:[#allocation6 + $0x150] sm:$0xff] }
 0xa47   : > { %5120 = vmatmul.bf16.gmra.mxu3 %v11155_v9 }
 0xa48   : > { %6069 = vmatpush.bf16.msrb.mxu1 %v5989_v36  ;;  %5474 = vmatpush.bf16.msrb.mxu3 %v5408_v16 }
 0xa4b   : > { %5683 = vmatmul.bf16.gmra.mxu1 %v11177_v26 }
 0xa4c   : > { %5475 = vmatpush.bf16.msrb.mxu3 %v5407_v43 }
 0xa4d   : > { %v13818_v29 = vpop.f32.mrf.mxu2 }
 0xa4e   : > { %v5294_v37 = vpop.f32.mrf.mxu1 }
 0xa50   : > { %5476 = vmatpush.bf16.msrb.mxu3 %v5406_v0  ;;  %v11170_v0 = vld [vmem:[#allocation6 + $0x158] sm:$0xff] }
 0xa54   : > { %5477 = vmatpush.bf16.msrb.mxu3 %v5405_v54 }
 0xa55   : > { %v13820_v35 = vpop.f32.mrf.mxu2 }
 0xa56   : > { %v5297_v38 = vpop.f32.mrf.mxu1 }
 0xa57   : > { %5125 = vmatmul.bf16.gmra.mxu3 %v11156_v42 }
 0xa58   : > { %5478 = vmatpush.bf16.msrb.mxu3 %v5404_v45 }
 0xa5b   : > { %5688 = vmatmul.bf16.gmra.mxu1 %v11178_v56 }
 0xa5c   : > { %5479 = vmatpush.bf16.msrb.mxu3 %v5403_v62 }
 0xa5d   : > { %v13828_v20 = vpop.f32.mrf.mxu2 }
 0xa5e   : > { %v5299_v24 = vpop.f32.mrf.mxu1 }
 0xa60   : > { %5480 = vmatpush.bf16.msrb.mxu3 %v5402_v1  ;;  %v4718_v1 = vadd.f32 %v13522_v44, %v13520_v63  ;;  %v4723_v44 = vadd.f32 %v13538_v27, %v13536_v61  ;;  %v4728_v27 = vadd.f32 %v13552_v19, %v13550_v2  ;;  %v4733_v19 = vadd.f32 %v13562_v55, %v13560_v4  ;;  %v15218_v4 = vld [vmem:[#allocation25_spill] sm:$0xff]  ;;  %v15219_v55 = vld [vmem:[#allocation28_spill] sm:$0xff] }
 0xa62   : > { %v4936_v34 = vadd.f32 %v13639_v6, %v4718_v1  ;;  %v4938_v6 = vadd.f32 %v13660_v53, %v4723_v44  ;;  %v4940_v53 = vadd.f32 %v13678_v14, %v4728_v27  ;;  %v4942_v14 = vadd.f32 %v13693_v49, %v4733_v19 }
 0xa63   : > { %v4738_v49 = vadd.f32 %v15219_v55, %v15218_v4 }
 0xa64   : > { %5481 = vmatpush.bf16.msrb.mxu3 %v5401_v57 }
 0xa65   : > { %v13838_v33 = vpop.f32.mrf.mxu2 }
 0xa66   : > { %v5302_v60 = vpop.f32.mrf.mxu1 }
 0xa67   : > { %5482 = vmatmul.bf16.vlgmr.msrb.gmra.mxu3 %v11167_v31 }
 0xa6a   : > { %v5091_v39 = vpop.f32.mrf.mxu3 }
 0xa6b   : > { %v5131_v62 = vadd.f32 %v5091_v39, %v13626_v22  ;;  %v11179_v22 = vld [vmem:[#allocation6 + $0x198] sm:$0xff]  ;;  %v11171_v39 = vld [vmem:[#allocation6 + $0x160] sm:$0xff] }
 0xa6c   : > { %5693 = vmatmul.bf16.gmra.mxu1 %v11179_v22 }
 0xa6d   : > { %v13841_v45 = vpop.f32.mrf.mxu2  ;;  %v13843_v58 = vadd.f32 %v5287_v41, %v5131_v62 }
 0xa6e   : > { %v5304_v63 = vpop.f32.mrf.mxu1 }
 0xa72   : > { %v5093_v32 = vpop.f32.mrf.mxu3 }
 0xa73   : > { %v5132_v57 = vadd.f32 %v5093_v32, %v4936_v34  ;;  %v11182_v34 = vld [vmem:[#allocation6 + $0x1b0] sm:$0xff]  ;;  %v15217_v32 = vld [vmem:[#allocation21_spill] sm:$0xff] }
 0xa75   : > { %v13848_v18 = vpop.f32.mrf.mxu2  ;;  %v13850_v52 = vadd.f32 %v5289_v59, %v5132_v57 }
 0xa76   : > { %v5307_v9 = vpop.f32.mrf.mxu1 }
 0xa77   : > { %5487 = vmatmul.bf16.gmra.mxu3 %v11168_v25 }
 0xa7a   : > { %v5096_v13 = vpop.f32.mrf.mxu3 }
 0xa7b   : > { %v5133_v46 = vadd.f32 %v5096_v13, %v13650_v28  ;;  %v11180_v28 = vld [vmem:[#allocation6 + $0x1a0] sm:$0xff]  ;;  %v15220_v13 = vld [vmem:[#allocation23_spill] sm:$0xff] }
 0xa7c   : > { %5698 = vmatmul.bf16.gmra.mxu1 %v11180_v28  ;;  %v11183_v28 = vld [vmem:[#allocation6 + $0x1b8] sm:$0xff] }
 0xa7d   : > { %v13853_v30 = vpop.f32.mrf.mxu2  ;;  %v13855_v50 = vadd.f32 %v5292_v17, %v5133_v46  ;;  %v4944_v46 = vadd.f32 %v15220_v13, %v4738_v49  ;;  %v15225_v13 = vld [vmem:[#allocation27_spill] sm:$0xff] }
 0xa7e   : > { %v5309_v61 = vpop.f32.mrf.mxu1 }
 0xa82   : > { %v5098_v3 = vpop.f32.mrf.mxu3 }
 0xa83   : > { %v5134_v7 = vadd.f32 %v5098_v3, %v4938_v6 }
 0xa85   : > { %v13860_v5 = vpop.f32.mrf.mxu2  ;;  %v13862_v48 = vadd.f32 %v5294_v37, %v5134_v7 }
 0xa86   : > { %v5312_v42 = vpop.f32.mrf.mxu1 }
 0xa87   : > { %5492 = vmatmul.bf16.gmra.mxu3 %v11169_v11 }
 0xa8a   : > { %v5101_v21 = vpop.f32.mrf.mxu3 }
 0xa8b   : > { %v5135_v36 = vadd.f32 %v5101_v21, %v13671_v51  ;;  %v11181_v51 = vld [vmem:[#allocation6 + $0x1a8] sm:$0xff] }
 0xa8c   : > { %5703 = vmatmul.bf16.gmra.mxu1 %v11181_v51 }
 0xa8d   : > { %v13865_v16 = vpop.f32.mrf.mxu2  ;;  %v13867_v41 = vadd.f32 %v5297_v38, %v5135_v36  ;;  %v15221_v36 = vld [vmem:[#allocation20_spill] sm:$0xff] }
 0xa8e   : > { %v5314_v2 = vpop.f32.mrf.mxu1 }
 0xa92   : > { %v5103_v23 = vpop.f32.mrf.mxu3 }
 0xa93   : > { %v5136_v43 = vadd.f32 %v5103_v23, %v4940_v53 }
 0xa95   : > { %v13872_v59 = vpop.f32.mrf.mxu2  ;;  %v13874_v54 = vadd.f32 %v5299_v24, %v5136_v43  ;;  %v15222_v43 = vld [vmem:[#allocation26_spill] sm:$0xff] }
 0xa96   : > { %v5317_v1 = vpop.f32.mrf.mxu1 }
 0xa97   : > { %5497 = vmatmul.bf16.gmra.mxu3 %v11170_v0  ;;  %v15223_v0 = vld [vmem:[#allocation29_spill] sm:$0xff] }
 0xa98   : > { %v4743_v51 = vadd.f32 %v15223_v0, %v15222_v43  ;;  %v11196_v43 = vld [vmem:[#allocation6 + $0x210] sm:$0xff] }
 0xa9a   : > { %v5106_v17 = vpop.f32.mrf.mxu3 }
 0xa9b   : > { %v5137_v26 = vadd.f32 %v5106_v17, %v13687_v8  ;;  %v15224_v17 = vld [vmem:[#allocation19_spill] sm:$0xff] }
 0xa9c   : > { %5708 = vmatmul.bf16.gmra.mxu1 %v11182_v34 }
 0xa9d   : > { %v5778_v37 = vpop.f32.mrf.mxu2  ;;  %v13877_v31 = vadd.f32 %v5302_v60, %v5137_v26  ;;  %v4946_v26 = vadd.f32 %v15224_v17, %v4743_v51 }
 0xa9e   : > { %v5319_v22 = vpop.f32.mrf.mxu1 }
 0xaa2   : > { %v5108_v38 = vpop.f32.mrf.mxu3 }
 0xaa3   : > { %v5138_v56 = vadd.f32 %v5108_v38, %v4942_v14 }
 0xaa5   : > { %v5780_v62 = vpop.f32.mrf.mxu2  ;;  %v13882_v24 = vadd.f32 %v5304_v63, %v5138_v56  ;;  %v11172_v63 = vld [vmem:[#allocation6 + $0x168] sm:$0xff] }
 0xaa6   : > { %v5322_v11 = vpop.f32.mrf.mxu1  ;;  %v5798_v55 = vpack.c.bf16 %v5780_v62, %v5778_v37  ;;  %v11195_v62 = vld [vmem:[#allocation6 + $0x208] sm:$0xff] }
 0xaa7   : > { %5502 = vmatmul.bf16.gmra.mxu3 %v11171_v39 }
 0xaaa   : > { %v5111_v8 = vpop.f32.mrf.mxu3 }
 0xaab   : > { %v5139_v57 = vadd.f32 %v5111_v8, %v15217_v32  ;;  %v11194_v8 = vld [vmem:[#allocation6 + $0x200] sm:$0xff] }
 0xaac   : > { %5713 = vmatmul.bf16.gmra.mxu1 %v11183_v28 }
 0xaad   : > { %v5783_v25 = vpop.f32.mrf.mxu2  ;;  %v13885_v60 = vadd.f32 %v5307_v9, %v5139_v57 }
 0xaae   : > { %v5324_v23 = vpop.f32.mrf.mxu1 }
 0xab2   : > { %v5113_v44 = vpop.f32.mrf.mxu3 }
 0xab3   : > { %v5140_v6 = vadd.f32 %v5113_v44, %v4944_v46  ;;  %v15226_v46 = vld [vmem:[#allocation30_spill] sm:$0xff] }
 0xab4   : > { %v4748_v44 = vadd.f32 %v15226_v46, %v15225_v13  ;;  %v11188_v13 = vld [vmem:[#allocation6 + $0x1d8] sm:$0xff] }
 0xab5   : > { %v5785_v3 = vpop.f32.mrf.mxu2  ;;  %v13890_v7 = vadd.f32 %v5309_v61, %v5140_v6  ;;  %v11173_v61 = vld [vmem:[#allocation6 + $0x170] sm:$0xff]  ;;  %v5797_v6 = vpack.c.bf16 %v13872_v59, %v13865_v16 }
 0xab7   : > { %5507 = vmatmul.bf16.gmra.mxu3 %v11172_v63 }
 0xab8   : > { %v5679_v34 = vpop.f32.mrf.mxu1 }
 0xaba   : > { %v5116_v21 = vpop.f32.mrf.mxu3 }
 0xabb   : > { %v5141_v9 = vadd.f32 %v5116_v21, %v15221_v36  ;;  %v15227_v36 = vld [vmem:[#allocation17_spill] sm:$0xff] }
 0xabc   : > { %6070 = vmatmul.bf16.vlgmr.msrb.gmra.mxu1 %v11194_v8  ;;  %v11198_v8 = vld [vmem:[#allocation6 + $0x220] sm:$0xff] }
 0xabd   : > { %v5788_v27 = vpop.f32.mrf.mxu2  ;;  %v13893_v53 = vadd.f32 %v5312_v42, %v5141_v9  ;;  %v5799_v42 = vpack.c.bf16 %v5785_v3, %v5783_v25  ;;  %v11174_v25 = vld [vmem:[#allocation6 + $0x178] sm:$0xff]  ;;  %v5793_v9 = vpack.c.bf16 %v13820_v35, %v13818_v29  ;;  %v11186_v29 = vld [vmem:[#allocation6 + $0x1c8] sm:$0xff] }
 0xac0   : > { %v5681_v49 = vpop.f32.mrf.mxu1 }
 0xac2   : > { %v5118_v19 = vpop.f32.mrf.mxu3 }
 0xac3   : > { %v5142_v14 = vadd.f32 %v5118_v19, %v4946_v26 }
 0xac5   : > { %v5790_v38 = vpop.f32.mrf.mxu2  ;;  %v13898_v56 = vadd.f32 %v5314_v2, %v5142_v14  ;;  %v4948_v2 = vadd.f32 %v13727_v12, %v4748_v44  ;;  %v5795_v12 = vpack.c.bf16 %v13848_v18, %v13841_v45  ;;  %v11199_v44 = vld [vmem:[#allocation6 + $0x228] sm:$0xff] }
 0xac6   : > { %v5800_v39 = vpack.c.bf16 %v5790_v38, %v5788_v27  ;;  %v11185_v27 = vld [vmem:[#allocation6 + $0x1c0] sm:$0xff] }
 0xac7   : > { %5512 = vmatmul.bf16.gmra.mxu3 %v11173_v61 }
 0xac8   : > { %5866 = vmatpush.bf16.msra.mxu3 %v5800_v39  ;;  %v5684_v37 = vpop.f32.mrf.mxu1  ;;  %v11187_v39 = vld [vmem:[#allocation6 + $0x1d0] sm:$0xff] }
 0xaca   : > { %v5121_v32 = vpop.f32.mrf.mxu3 }
 0xacb   : > { %v5143_v57 = vadd.f32 %v5121_v32, %v13723_v10  ;;  %v5796_v10 = vpack.c.bf16 %v13860_v5, %v13853_v30  ;;  %v4753_v30 = vadd.f32 %v13833_v15, %v15227_v36  ;;  %v11201_v36 = vld [vmem:[#allocation6 + $0x238] sm:$0xff] }
 0xacc   : > { %5867 = vmatpush.bf16.msra.mxu3 %v5799_v42  ;;  %6075 = vmatmul.bf16.gmra.mxu1 %v11195_v62  ;;  %v11200_v62 = vld [vmem:[#allocation6 + $0x230] sm:$0xff] }
 0xacd   : > { %v13901_v4 = vadd.f32 %v5317_v1, %v5143_v57  ;;  %v4950_v5 = vadd.f32 %v13810_v47, %v4753_v30 }
 0xad0   : > { %5868 = vmatpush.bf16.msra.mxu3 %v5798_v55  ;;  %v5686_v21 = vpop.f32.mrf.mxu1 }
 0xad2   : > { %v5123_v63 = vpop.f32.mrf.mxu3 }
 0xad3   : > { %v5144_v28 = vadd.f32 %v5123_v63, %v4948_v2 }
 0xad4   : > { %5869 = vmatpush.bf16.msra.mxu3 %v5797_v6 }
 0xad5   : > { %v13908_v3 = vadd.f32 %v5319_v22, %v5144_v28  ;;  %v5794_v22 = vpack.c.bf16 %v13838_v33, %v13828_v20 }
 0xad7   : > { %5517 = vmatmul.bf16.gmra.mxu3 %v11174_v25 }
 0xad8   : > { %5870 = vmatpush.bf16.msra.mxu3 %v5796_v10  ;;  %v11189_v10 = vld [vmem:[#allocation6 + $0x1e0] sm:$0xff] }
 0xada   : > { %v5126_v1 = vpop.f32.mrf.mxu3 }
 0xadb   : > { %v5145_v16 = vadd.f32 %v5126_v1, %v13732_v40 }
 0xadc   : > { %5871 = vmatpush.bf16.msra.mxu3 %v5795_v12  ;;  %6080 = vmatmul.bf16.gmra.mxu1 %v11196_v43 }
 0xadd   : > { %v13915_v59 = vadd.f32 %v5322_v11, %v5145_v16  ;;  %v5689_v11 = vpop.f32.mrf.mxu1 }
 0xae0   : > { %5872 = vmatpush.bf16.msra.mxu3 %v5794_v22 }
 0xae2   : > { %v5128_v45 = vpop.f32.mrf.mxu3 }
 0xae3   : > { %v5146_v18 = vadd.f32 %v5128_v45, %v4950_v5  ;;  %v11225_v45 = vld [vmem:[#allocation9 + $0x74] sm:$0xf0] }
 0xae4   : > { %5873 = vmatpush.bf16.msra.mxu3 %v5793_v9  ;;  %v10317_v9 = vld [vmem:[#allocation9 + $0x70] sm:$0xf] }
 0xae5   : > { %v13924_v40 = vadd.f32 %v5324_v23, %v5146_v18  ;;  %v5691_v0 = vpop.f32.mrf.mxu1  ;;  %v11197_v23 = vld [vmem:[#allocation6 + $0x218] sm:$0xff]  ;;  %v11224_v18 = vld [vmem:[#allocation9 + $0x74] sm:$0xf] }
 0xae7   : > { %5874 = vmatmul.bf16.vlgmr.msra.gmra.mxu3 %v11185_v27  ;;  %v10318_v27 = vor.u32 %v11225_v45, %v10317_v9 }
 0xae9   : > { %6535 = vmatpush.bf16.msra.mxu0 %v10318_v27  ;;  %v10303_v27 = vld [vmem:[#allocation9 + $0x58] sm:$0xf0] }
 0xaea   : > { %v5483_v20 = vpop.f32.mrf.mxu3 }
 0xaeb   : > { %v5523_v33 = vadd.f32 %v5483_v20, %v13843_v58 }
 0xaec   : > { %6085 = vmatmul.bf16.gmra.mxu1 %v11197_v23  ;;  %v11192_v23 = vld [vmem:[#allocation6 + $0x1f8] sm:$0xff] }
 0xaed   : > { %v13927_v15 = vadd.f32 %v5679_v34, %v5523_v33  ;;  %v5694_v17 = vpop.f32.mrf.mxu1  ;;  %v11191_v33 = vld [vmem:[#allocation6 + $0x1f0] sm:$0xff] }
 0xaf2   : > { %v5485_v47 = vpop.f32.mrf.mxu3 }
 0xaf3   : > { %v5524_v51 = vadd.f32 %v5485_v47, %v13850_v52 }
 0xaf5   : > { %v13930_v35 = vadd.f32 %v5681_v49, %v5524_v51  ;;  %v5696_v61 = vpop.f32.mrf.mxu1 }
 0xaf7   : > { %5879 = vmatmul.bf16.gmra.mxu3 %v11186_v29 }
 0xafa   : > { %v5488_v26 = vpop.f32.mrf.mxu3 }
 0xafb   : > { %v5525_v19 = vadd.f32 %v5488_v26, %v13855_v50  ;;  %v10269_v26 = vld [vmem:[#allocation9 + $0x30] sm:$0xf] }
 0xafc   : > { %6090 = vmatmul.bf16.gmra.mxu1 %v11198_v8 }
 0xafd   : > { %v13933_v14 = vadd.f32 %v5684_v37, %v5525_v19  ;;  %v5699_v52 = vpop.f32.mrf.mxu1  ;;  %v11209_v19 = vld [vmem:[#allocation9 + $0x34] sm:$0xf0] }
 0xb02   : > { %v5490_v58 = vpop.f32.mrf.mxu3 }
 0xb03   : > { %v5526_v38 = vadd.f32 %v5490_v58, %v13862_v48  ;;  %v10270_v58 = vor.u32 %v11209_v19, %v10269_v26  ;;  %v10293_v26 = vld [vmem:[#allocation9 + $0x40] sm:$0xf]  ;;  %v11219_v19 = vld [vmem:[#allocation9 + $0x44] sm:$0xf0] }
 0xb05   : > { %v13936_v34 = vadd.f32 %v5686_v21, %v5526_v38  ;;  %v13941_v55 = vpop.f32.mrf.mxu1  ;;  %v11190_v21 = vld [vmem:[#allocation6 + $0x1e8] sm:$0xff]  ;;  %v10271_v38 = vld [vmem:[#allocation9 + $0x38] sm:$0xf0]  ;;  %6356 = vmatpush.bf16.msra.mxu2 %v10270_v58  ;;  %v10294_v58 = vor.u32 %v11219_v19, %v10293_v26 }
 0xb07   : > { %5884 = vmatmul.bf16.gmra.mxu3 %v11187_v39 }
 0xb0a   : > { %v5493_v42 = vpop.f32.mrf.mxu3 }
 0xb0b   : > { %v5527_v32 = vadd.f32 %v5493_v42, %v13867_v41  ;;  %v10261_v42 = vld [vmem:[#allocation9 + $0x20] sm:$0xf] }
 0xb0c   : > { %6095 = vmatmul.bf16.gmra.mxu1 %v11199_v44  ;;  %v10309_v44 = vld [vmem:[#allocation9 + $0x60] sm:$0xf] }
 0xb0d   : > { %v13939_v57 = vadd.f32 %v5689_v11, %v5527_v32  ;;  %v5704_v48 = vpop.f32.mrf.mxu1  ;;  %v10319_v11 = vld [vmem:[#allocation9 + $0x78] sm:$0xf0]  ;;  %v11207_v32 = vld [vmem:[#allocation9 + $0x24] sm:$0xf0] }
 0xb12   : > { %v5495_v50 = vpop.f32.mrf.mxu3 }
 0xb13   : > { %v5528_v49 = vadd.f32 %v5495_v50, %v13874_v54  ;;  %v11206_v50 = vld [vmem:[#allocation9 + $0x24] sm:$0xf] }
 0xb15   : > { %v13944_v46 = vadd.f32 %v5691_v0, %v5528_v49  ;;  %v13949_v41 = vpop.f32.mrf.mxu1 }
 0xb17   : > { %5889 = vmatmul.bf16.gmra.mxu3 %v11188_v13  ;;  %v10262_v13 = vor.u32 %v11207_v32, %v10261_v42 }
 0xb19   : > { %6357 = vmatpush.bf16.msra.mxu2 %v10262_v13  ;;  %v6146_v13 = vpop.permute.xlu0 %6145 }
 0xb1a   : > { %v5498_v2 = vpop.f32.mrf.mxu3 }
 0xb1b   : > { %v5529_v6 = vadd.f32 %v5498_v2, %v13877_v31  ;;  %v11223_v2 = vld [vmem:[#allocation9 + $0x64] sm:$0xf0] }
 0xb1c   : > { %6100 = vmatmul.bf16.gmra.mxu1 %v11200_v62 }
 0xb1d   : > { %v13947_v63 = vadd.f32 %v5694_v17, %v5529_v6  ;;  %v5709_v54 = vpop.f32.mrf.mxu1 }
 0xb22   : > { %v5500_v28 = vpop.f32.mrf.mxu3 }
 0xb23   : > { %v5530_v25 = vadd.f32 %v5500_v28, %v13882_v24  ;;  %v10310_v28 = vor.u32 %v11223_v2, %v10309_v44 }
 0xb25   : > { %v13952_v37 = vadd.f32 %v5696_v61, %v5530_v25  ;;  %v13957_v31 = vpop.f32.mrf.mxu1  ;;  %v11208_v61 = vld [vmem:[#allocation9 + $0x34] sm:$0xf]  ;;  %v11222_v25 = vld [vmem:[#allocation9 + $0x64] sm:$0xf]  ;;  %6536 = vmatpush.bf16.msra.mxu0 %v10310_v28  ;;  %v6151_v28 = vpop.permute.xlu1 %6150 }
 0xb26   : > { %v10274_v39 = vor.u32 %v11208_v61, %v10271_v38  ;;  %v11218_v38 = vld [vmem:[#allocation9 + $0x44] sm:$0xf] }
 0xb27   : > { %5894 = vmatmul.bf16.gmra.mxu3 %v11189_v10  ;;  %v10311_v10 = vld [vmem:[#allocation9 + $0x68] sm:$0xf0] }
 0xb28   : > { %6405 = vmatpush.bf16.msrb.mxu3 %v10274_v39  ;;  %v10314_v62 = vor.u32 %v11222_v25, %v10311_v10  ;;  %v10295_v39 = vld [vmem:[#allocation9 + $0x48] sm:$0xf0] }
 0xb2a   : > { %v5503_v12 = vpop.f32.mrf.mxu3 }
 0xb2b   : > { %v5531_v1 = vadd.f32 %v5503_v12, %v13885_v60  ;;  %v10322_v60 = vor.u32 %v11224_v18, %v10319_v11  ;;  %v11205_v12 = vld [vmem:[#allocation9 + $0x14] sm:$0xf0] }
 0xb2c   : > { %6105 = vmatmul.bf16.gmra.mxu1 %v11201_v36 }
 0xb2d   : > { %v13955_v16 = vadd.f32 %v5699_v52, %v5531_v1  ;;  %v5714_v30 = vpop.f32.mrf.mxu1  ;;  %6584 = vmatpush.bf16.msra.mxu1 %v10322_v60  ;;  %v11204_v1 = vld [vmem:[#allocation9 + $0x14] sm:$0xf]  ;;  %v10245_v60 = vld [vmem:[#allocation9] sm:$0xf] }
 0xb31   : > { %6585 = vmatpush.bf16.msra.mxu1 %v10314_v62 }
 0xb32   : > { %v13959_v22 = vpop.f32.mrf.mxu3 }
 0xb35   : > { %v13966_v0 = vpop.f32.mrf.mxu1 }
 0xb37   : > { %5899 = vmatmul.bf16.gmra.mxu3 %v11190_v21  ;;  %v10255_v21 = vld [vmem:[#allocation9 + $0x18] sm:$0xf0] }
 0xb38   : > { %v10258_v36 = vor.u32 %v11204_v1, %v10255_v21 }
 0xb3a   : > { %v5508_v24 = vpop.f32.mrf.mxu3 }
 0xb3b   : > { %v5533_v5 = vadd.f32 %v5508_v24, %v13893_v53  ;;  %v10301_v24 = vld [vmem:[#allocation9 + $0x50] sm:$0xf] }
 0xb3d   : > { %v13962_v43 = vadd.f32 %v5704_v48, %v5533_v5  ;;  %v13971_v29 = vpop.f32.mrf.mxu1  ;;  %v10263_v48 = vld [vmem:[#allocation9 + $0x28] sm:$0xf0]  ;;  %v11220_v5 = vld [vmem:[#allocation9 + $0x54] sm:$0xf] }
 0xb3e   : > { %v10266_v6 = vor.u32 %v11206_v50, %v10263_v48  ;;  %v10306_v11 = vor.u32 %v11220_v5, %v10303_v27  ;;  %v6161_v5 = vpop.permute.xlu0 %6160 }
 0xb40   : > { %6406 = vmatpush.bf16.msrb.mxu3 %v10266_v6  ;;  %6586 = vmatpush.bf16.msra.mxu1 %v10306_v11 }
 0xb42   : > { %v13964_v20 = vpop.f32.mrf.mxu3 }
 0xb44   : > { %6407 = vmatpush.bf16.msrb.mxu3 %v10258_v36 }
 0xb45   : > { %v13975_v52 = vpop.f32.mrf.mxu1 }
 0xb47   : > { %5904 = vmatmul.bf16.gmra.mxu3 %v11191_v33  ;;  %v11203_v33 = vld [vmem:[#allocation9 + $0x4] sm:$0xf0] }
 0xb4a   : > { %v5513_v47 = vpop.f32.mrf.mxu3 }
 0xb4b   : > { %v5535_v51 = vadd.f32 %v5513_v47, %v13901_v4  ;;  %v11202_v47 = vld [vmem:[#allocation9 + $0x4] sm:$0xf] }
 0xb4d   : > { %v13969_v53 = vadd.f32 %v5709_v54, %v5535_v51  ;;  %v10253_v54 = vld [vmem:[#allocation9 + $0x10] sm:$0xf]  ;;  %v6076_v45 = vpop.f32.mrf.mxu1  ;;  %v10246_v51 = vor.u32 %v11203_v33, %v10245_v60 }
 0xb52   : > { %v13973_v17 = vpop.f32.mrf.mxu3 }
 0xb55   : > { %v6078_v32 = vpop.f32.mrf.mxu1 }
 0xb57   : > { %5909 = vmatmul.bf16.gmra.mxu3 %v11192_v23  ;;  %v10247_v23 = vld [vmem:[#allocation9 + $0x8] sm:$0xf0] }
 0xb58   : > { %v10250_v61 = vor.u32 %v11202_v47, %v10247_v23 }
 0xb5a   : > { %v5518_v8 = vpop.f32.mrf.mxu3  ;;  %6408 = vmatpush.bf16.msrb.mxu3 %v10250_v61 }
 0xb5b   : > { %v5537_v4 = vadd.f32 %v5518_v8, %v13915_v59  ;;  %v10254_v59 = vor.u32 %v11205_v12, %v10253_v54  ;;  %v10298_v8 = vor.u32 %v11218_v38, %v10295_v39 }
 0xb5d   : > { %v13978_v49 = vadd.f32 %v5714_v30, %v5537_v4  ;;  %v11221_v30 = vld [vmem:[#allocation9 + $0x54] sm:$0xf0]  ;;  %6358 = vmatpush.bf16.msra.mxu2 %v10254_v59  ;;  %6587 = vmatpush.bf16.msra.mxu1 %v10298_v8  ;;  %v6081_v25 = vpop.f32.mrf.mxu1 }
 0xb5e   : > { %v10302_v18 = vor.u32 %v11221_v30, %v10301_v24 }
 0xb60   : > { %6537 = vmatpush.bf16.msra.mxu0 %v10302_v18 }
 0xb61   : > { %6359 = vmatpush.bf16.msra.mxu2 %v10246_v51 }
 0xb62   : > { %v13980_v9 = vpop.f32.mrf.mxu3 }
 0xb64   : > { %6538 = vmatpush.bf16.msra.mxu0 %v10294_v58 }
 0xb6a   : > { %v5875_v4 = vpop.f32.mrf.mxu3 }
 0xb6b   : > { %v5915_v42 = vadd.f32 %v5875_v4, %v13927_v15 }
 0xb6d   : > { %v6111_v50 = vadd.f32 %v13971_v29, %v5915_v42 }
 0xb6f   : > { %v6223_v44 = vadd.f32 %v6146_v13, %v6111_v50 }
 0xb71   : > { %v6239_v10 = vmul.f32 0.2, %v6223_v44 }
 0xb72   : > { %v5877_v48 = vpop.f32.mrf.mxu3 }
 0xb73   : > { %v5916_v2 = vadd.f32 %v5877_v48, %v13930_v35  ;;  %v6255_v1 = vmax.f32 %v6223_v44, %v6239_v10  ;;  %v6083_v35 = vpop.f32.mrf.mxu1 }
 0xb75   : > { %v6112_v6 = vadd.f32 %v13975_v52, %v5916_v2  ;;  %v6156_v52 = vpop.permute.xlu2 %6155 }
 0xb77   : > { %v6224_v54 = vadd.f32 %v6151_v28, %v6112_v6 }
 0xb79   : > { %v6240_v62 = vmul.f32 0.2, %v6224_v54 }
 0xb7a   : > { %v5880_v12 = vpop.f32.mrf.mxu3 }
 0xb7b   : > { %v6256_v21 = vmax.f32 %v6224_v54, %v6240_v62  ;;  %v5917_v15 = vadd.f32 %v5880_v12, %v13933_v14  ;;  %v6086_v60 = vpop.f32.mrf.mxu1 }
 0xb7d   : > { %v13987_v59 = vpack.c.bf16 %v6256_v21, %v6255_v1  ;;  %v6113_v29 = vadd.f32 %v6076_v45, %v5917_v15  ;;  %v6171_v39 = vpop.permute.xlu2 %6170 }
 0xb7f   : > { %15228 = vst [vmem:[#allocation22_spill] sm:$0xff] %v13987_v59  ;;  %10275 = vmatmul.msk.bf16.vlgmr.msra.gmra.mxu2 %vm6327_vm4, %v13987_v59  ;;  %10283 = vmatmul.msk.bf16.vlgmr.msrb.gmra.mxu3 %vm6327_vm4, %v13987_v59  ;;  %v6225_v14 = vadd.f32 %v6156_v52, %v6113_v29 }
 0xb80   : > { %10323 = vmatmul.msk.bf16.vlgmr.msra.gmra.mxu0 %vm6327_vm4, %v13987_v59  ;;  %10331 = vmatmul.msk.bf16.vlgmr.msra.gmra.mxu1 %vm6327_vm4, %v13987_v59 }
 0xb81   : > { %v6241_v45 = vmul.f32 0.2, %v6225_v14 }
 0xb82   : > { %v5882_v36 = vpop.f32.mrf.mxu3 }
 0xb83   : > { %v5918_v24 = vadd.f32 %v5882_v36, %v13936_v34  ;;  %v6257_v33 = vmax.f32 %v6225_v14, %v6241_v45  ;;  %v6166_v34 = vpop.permute.xlu1 %6165  ;;  %v6088_v58 = vpop.f32.mrf.mxu1  ;;  %v5532_v36 = vadd.f32 %v13959_v22, %v13890_v7 }
 0xb85   : > { %v6114_v30 = vadd.f32 %v6078_v32, %v5918_v24 }
 0xb87   : > { %v6226_v18 = vadd.f32 %v6161_v5, %v6114_v30 }
 0xb89   : > { %v6242_v27 = vmul.f32 0.2, %v6226_v18 }
 0xb8a   : > { %v5885_v11 = vpop.f32.mrf.mxu3 }
 0xb8b   : > { %v6258_v47 = vmax.f32 %v6226_v18, %v6242_v27  ;;  %v5919_v51 = vadd.f32 %v5885_v11, %v13939_v57  ;;  %v6091_v2 = vpop.f32.mrf.mxu1  ;;  %v6181_v54 = vpop.permute.xlu1 %6180 }
 0xb8d   : > { %v13999_v23 = vpack.c.bf16 %v6258_v47, %v6257_v33  ;;  %v6115_v26 = vadd.f32 %v6081_v25, %v5919_v51 }
 0xb8f   : > { %15229 = vst [vmem:[#allocation24_spill] sm:$0xff] %v13999_v23  ;;  %10276 = vmatmul.msk.bf16.gmra.mxu2 %vm6327_vm4, %v13999_v23  ;;  %10284 = vmatmul.msk.bf16.gmra.mxu3 %vm6327_vm4, %v13999_v23  ;;  %v6227_v61 = vadd.f32 %v6166_v34, %v6115_v26 }
 0xb90   : > { %10324 = vmatmul.msk.bf16.gmra.mxu0 %vm6327_vm4, %v13999_v23  ;;  %10332 = vmatmul.msk.bf16.gmra.mxu1 %vm6327_vm4, %v13999_v23 }
 0xb91   : > { %v6243_v8 = vmul.f32 0.2, %v6227_v61 }
 0xb92   : > { %v5887_v19 = vpop.f32.mrf.mxu3 }
 0xb93   : > { %v5920_v57 = vadd.f32 %v5887_v19, %v13944_v46  ;;  %v6259_v50 = vmax.f32 %v6227_v61, %v6243_v8  ;;  %v6176_v46 = vpop.permute.xlu0 %6175  ;;  %v6093_v1 = vpop.f32.mrf.mxu1  ;;  %v5534_v19 = vadd.f32 %v13964_v20, %v13898_v56 }
 0xb95   : > { %v6116_v38 = vadd.f32 %v6083_v35, %v5920_v57  ;;  %v6196_v57 = vpop.permute.xlu1 %6195 }
 0xb97   : > { %v6228_v4 = vadd.f32 %v6171_v39, %v6116_v38 }
 0xb99   : > { %v6244_v42 = vmul.f32 0.2, %v6228_v4 }
 0xb9a   : > { %v5890_v32 = vpop.f32.mrf.mxu3 }
 0xb9b   : > { %v6260_v13 = vmax.f32 %v6228_v4, %v6244_v42  ;;  %v5921_v48 = vadd.f32 %v5890_v32, %v13947_v63  ;;  %v6096_v7 = vpop.f32.mrf.mxu1  ;;  %v6191_v18 = vpop.permute.xlu0 %6190 }
 0xb9d   : > { %v14011_v44 = vpack.c.bf16 %v6260_v13, %v6259_v50  ;;  %v6117_v6 = vadd.f32 %v6086_v60, %v5921_v48 }
 0xb9f   : > { %15230 = vst [vmem:[#allocation14_spill] sm:$0xff] %v14011_v44  ;;  %10277 = vmatmul.msk.bf16.gmra.mxu2 %vm6327_vm4, %v14011_v44  ;;  %10285 = vmatmul.msk.bf16.gmra.mxu3 %vm6327_vm4, %v14011_v44  ;;  %v6229_v25 = vadd.f32 %v6176_v46, %v6117_v6  ;;  %v5536_v6 = vadd.f32 %v13973_v17, %v13908_v3 }
 0xba0   : > { %10325 = vmatmul.msk.bf16.gmra.mxu0 %vm6327_vm4, %v14011_v44  ;;  %10333 = vmatmul.msk.bf16.gmra.mxu1 %vm6327_vm4, %v14011_v44 }
 0xba1   : > { %v6245_v62 = vmul.f32 0.2, %v6229_v25 }
 0xba2   : > { %v5892_v28 = vpop.f32.mrf.mxu3 }
 0xba3   : > { %v5922_v63 = vadd.f32 %v5892_v28, %v13952_v37  ;;  %v6261_v29 = vmax.f32 %v6229_v25, %v6245_v62  ;;  %v6186_v37 = vpop.permute.xlu2 %6185  ;;  %v6098_v34 = vpop.f32.mrf.mxu1 }
 0xba4   : > { %v6206_v25 = vpop.permute.xlu0 %6205 }
 0xba5   : > { %v6118_v10 = vadd.f32 %v6088_v58, %v5922_v63 }
 0xba7   : > { %v6230_v12 = vadd.f32 %v6181_v54, %v6118_v10  ;;  %v6211_v54 = vpop.permute.xlu1 %6210 }
 0xba9   : > { %v6246_v21 = vmul.f32 0.2, %v6230_v12 }
 0xbaa   : > { %v5895_v15 = vpop.f32.mrf.mxu3 }
 0xbab   : > { %v6262_v35 = vmax.f32 %v6230_v12, %v6246_v21  ;;  %v5923_v52 = vadd.f32 %v5895_v15, %v13955_v16  ;;  %v5728_v16 = vadd.f32 %v13941_v55, %v5532_v36  ;;  %v6201_v39 = vpop.permute.xlu2 %6200  ;;  %v6101_v8 = vpop.f32.mrf.mxu1  ;;  %v5538_v36 = vadd.f32 %v13980_v9, %v13924_v40 }
 0xbad   : > { %v14025_v14 = vpack.c.bf16 %v6262_v35, %v6261_v29  ;;  %v6119_v24 = vadd.f32 %v6091_v2, %v5923_v52 }
 0xbaf   : > { %15231 = vst [vmem:[#allocation15_spill] sm:$0xff] %v14025_v14  ;;  %10278 = vmatmul.msk.bf16.gmra.mxu2 %vm6327_vm4, %v14025_v14  ;;  %10286 = vmatmul.msk.bf16.gmra.mxu3 %vm6327_vm4, %v14025_v14  ;;  %v6231_v22 = vadd.f32 %v6186_v37, %v6119_v24 }
 0xbb0   : > { %10326 = vmatmul.msk.bf16.gmra.mxu0 %vm6327_vm4, %v14025_v14  ;;  %10334 = vmatmul.msk.bf16.gmra.mxu1 %vm6327_vm4, %v14025_v14 }
 0xbb1   : > { %v6247_v27 = vmul.f32 0.2, %v6231_v22 }
 0xbb2   : > { %v5897_v30 = vpop.f32.mrf.mxu3 }
 0xbb3   : > { %v5924_v5 = vadd.f32 %v5897_v30, %v5728_v16  ;;  %v6263_v47 = vmax.f32 %v6231_v22, %v6247_v27  ;;  %v6103_v28 = vpop.f32.mrf.mxu1  ;;  %v6216_v37 = vpop.permute.xlu2 %6215 }
 0xbb4   : > { %v6221_v22 = vpop.permute.xlu0 %6220 }
 0xbb5   : > { %v6120_v45 = vadd.f32 %v6093_v1, %v5924_v5 }
 0xbb7   : > { %v6232_v11 = vadd.f32 %v6191_v18, %v6120_v45 }
 0xbb9   : > { %v6248_v60 = vmul.f32 0.2, %v6232_v11 }
 0xbba   : > { %v5900_v33 = vpop.f32.mrf.mxu3 }
 0xbbb   : > { %v6264_v51 = vmax.f32 %v6232_v11, %v6248_v60  ;;  %v5925_v26 = vadd.f32 %v5900_v33, %v13962_v43  ;;  %v5730_v43 = vadd.f32 %v13949_v41, %v5534_v19  ;;  %v6106_v21 = vpop.f32.mrf.mxu1 }
 0xbbd   : > { %v14039_v61 = vpack.c.bf16 %v6264_v51, %v6263_v47  ;;  %v6121_v55 = vadd.f32 %v6096_v7, %v5925_v26 }
 0xbbf   : > { %15232 = vst [vmem:[#allocation16_spill] sm:$0xff] %v14039_v61  ;;  %10279 = vmatmul.msk.bf16.gmra.mxu2 %vm6327_vm4, %v14039_v61  ;;  %10287 = vmatmul.msk.bf16.gmra.mxu3 %vm6327_vm4, %v14039_v61  ;;  %v6233_v56 = vadd.f32 %v6196_v57, %v6121_v55 }
 0xbc0   : > { %10327 = vmatmul.msk.bf16.gmra.mxu0 %vm6327_vm4, %v14039_v61  ;;  %10335 = vmatmul.msk.bf16.gmra.mxu1 %vm6327_vm4, %v14039_v61 }
 0xbc1   : > { %v6249_v4 = vmul.f32 0.2, %v6233_v56 }
 0xbc2   : > { %v5902_v58 = vpop.f32.mrf.mxu3 }
 0xbc3   : > { %v5926_v20 = vadd.f32 %v5902_v58, %v5730_v43  ;;  %v6265_v13 = vmax.f32 %v6233_v56, %v6249_v4  ;;  %v6108_v30 = vpop.f32.mrf.mxu1 }
 0xbc5   : > { %v6122_v38 = vadd.f32 %v6098_v34, %v5926_v20 }
 0xbc7   : > { %v6234_v42 = vadd.f32 %v6201_v39, %v6122_v38 }
 0xbc9   : > { %v6250_v32 = vmul.f32 0.2, %v6234_v42 }
 0xbca   : > { %v5905_v50 = vpop.f32.mrf.mxu3 }
 0xbcb   : > { %v6266_v48 = vmax.f32 %v6234_v42, %v6250_v32  ;;  %v5927_v2 = vadd.f32 %v5905_v50, %v13969_v53  ;;  %v5732_v53 = vadd.f32 %v13957_v31, %v5536_v6 }
 0xbcd   : > { %v14053_v46 = vpack.c.bf16 %v6266_v48, %v6265_v13  ;;  %v6123_v41 = vadd.f32 %v6101_v8, %v5927_v2 }
 0xbcf   : > { %15233 = vst [vmem:[#allocation18_spill] sm:$0xff] %v14053_v46  ;;  %10280 = vmatmul.msk.bf16.gmra.mxu2 %vm6327_vm4, %v14053_v46  ;;  %10288 = vmatmul.msk.bf16.gmra.mxu3 %vm6327_vm4, %v14053_v46  ;;  %v6235_v17 = vadd.f32 %v6206_v25, %v6123_v41 }
 0xbd0   : > { %10328 = vmatmul.msk.bf16.gmra.mxu0 %vm6327_vm4, %v14053_v46  ;;  %10336 = vmatmul.msk.bf16.gmra.mxu1 %vm6327_vm4, %v14053_v46 }
 0xbd1   : > { %v6251_v62 = vmul.f32 0.2, %v6235_v17 }
 0xbd2   : > { %v5907_v3 = vpop.f32.mrf.mxu3 }
 0xbd3   : > { %v5928_v63 = vadd.f32 %v5907_v3, %v5732_v53  ;;  %v6267_v29 = vmax.f32 %v6235_v17, %v6251_v62 }
 0xbd5   : > { %v6124_v10 = vadd.f32 %v6103_v28, %v5928_v63 }
 0xbd7   : > { %v6236_v12 = vadd.f32 %v6211_v54, %v6124_v10 }
 0xbd9   : > { %v6252_v1 = vmul.f32 0.2, %v6236_v12 }
 0xbda   : > { %v5910_v15 = vpop.f32.mrf.mxu3 }
 0xbdb   : > { %v6268_v35 = vmax.f32 %v6236_v12, %v6252_v1  ;;  %v5929_v52 = vadd.f32 %v5910_v15, %v13978_v49  ;;  %v5734_v49 = vadd.f32 %v13966_v0, %v5538_v36 }
 0xbdd   : > { %v14067_v24 = vpack.c.bf16 %v6268_v35, %v6267_v29  ;;  %v6125_v31 = vadd.f32 %v6106_v21, %v5929_v52 }
 0xbdf   : > { %15234 = vst [vmem:[#allocation21_spill] sm:$0xff] %v14067_v24  ;;  %10281 = vmatmul.msk.bf16.gmra.mxu2 %vm6327_vm4, %v14067_v24  ;;  %10289 = vmatmul.msk.bf16.gmra.mxu3 %vm6327_vm4, %v14067_v24  ;;  %v6237_v40 = vadd.f32 %v6216_v37, %v6125_v31 }
 0xbe0   : > { %10329 = vmatmul.msk.bf16.gmra.mxu0 %vm6327_vm4, %v14067_v24  ;;  %10337 = vmatmul.msk.bf16.gmra.mxu1 %vm6327_vm4, %v14067_v24 }
 0xbe1   : > { %v6253_v5 = vmul.f32 0.2, %v6237_v40 }
 0xbe2   : > { %v5912_v16 = vpop.f32.mrf.mxu3 }
 0xbe3   : > { %v5930_v9 = vadd.f32 %v5912_v16, %v5734_v49  ;;  %v6269_v27 = vmax.f32 %v6237_v40, %v6253_v5 }
 0xbe5   : > { %v6126_v7 = vadd.f32 %v6108_v30, %v5930_v9 }
 0xbe7   : > { %v6238_v45 = vadd.f32 %v6221_v22, %v6126_v7 }
 0xbe9   : > { %v6254_v18 = vmul.f32 0.2, %v6238_v45 }
 0xbeb   : > { %v6270_v11 = vmax.f32 %v6238_v45, %v6254_v18 }
 0xbed   : > { %v14078_v60 = vpack.c.bf16 %v6270_v11, %v6269_v27 }
 0xbef   : > { %15235 = vst [vmem:[#allocation25_spill] sm:$0xff] %v14078_v60  ;;  %10282 = vmatmul.msk.bf16.gmra.mxu2 %vm6327_vm4, %v14078_v60  ;;  %10290 = vmatmul.msk.bf16.gmra.mxu3 %vm6327_vm4, %v14078_v60 }
 0xbf0   : > { %10330 = vmatmul.msk.bf16.gmra.mxu0 %vm6327_vm4, %v14078_v60  ;;  %10338 = vmatmul.msk.bf16.gmra.mxu1 %vm6327_vm4, %v14078_v60 }
 0xbfd   : > { %v14088_v0 = vpop.f32.mrf.mxu0  ;;  %v14090_v33 = vpop.f32.mrf.mxu1 }
 0xbfe   : > { %15236 = vst [vmem:[#allocation28_spill] sm:$0xff] %v14090_v33 }
 0xc02   : > { %v14092_v47 = vpop.f32.mrf.mxu2  ;;  %v14094_v51 = vpop.f32.mrf.mxu3 }
 0xc03   : > { %15237 = vst [vmem:[#allocation23_spill] sm:$0xff] %v14092_v47 }
 0xc04   : > { %15238 = vst [vmem:[#allocation20_spill] sm:$0xff] %v14094_v51 }
 0xc05   : > { %v14096_v26 = vpop.f32.mrf.mxu0  ;;  %v14098_v34 = vpop.f32.mrf.mxu1 }
 0xc06   : > { %15239 = vst [vmem:[#allocation26_spill] sm:$0xff] %v14098_v34 }
 0xc0a   : > { %v14100_v19 = vpop.f32.mrf.mxu2  ;;  %v14102_v55 = vpop.f32.mrf.mxu3 }
 0xc0b   : > { %15240 = vst [vmem:[#allocation29_spill] sm:$0xff] %v14100_v19 }
 0xc0c   : > { %15241 = vst [vmem:[#allocation19_spill] sm:$0xff] %v14102_v55 }
 0xc0d   : > { %v14104_v43 = vpop.f32.mrf.mxu0  ;;  %v14106_v57 = vpop.f32.mrf.mxu1 }
 0xc12   : > { %v14108_v58 = vpop.f32.mrf.mxu2  ;;  %v14110_v56 = vpop.f32.mrf.mxu3 }
 0xc13   : > { %15242 = vst [vmem:[#allocation27_spill] sm:$0xff] %v14108_v58 }
 0xc14   : > { %15243 = vst [vmem:[#allocation30_spill] sm:$0xff] %v14110_v56 }
 0xc15   : > { %v14112_v20 = vpop.f32.mrf.mxu0  ;;  %v14114_v38 = vpop.f32.mrf.mxu1 }
 0xc1a   : > { %v14116_v39 = vpop.f32.mrf.mxu2  ;;  %v14118_v8 = vpop.f32.mrf.mxu3 }
 0xc1b   : > { %15244 = vst [vmem:[#allocation17_spill] sm:$0xff] %v14116_v39 }
 0xc1c   : > { %15245 = vst [vmem:[#allocation31_spill] sm:$0xff] %v14118_v8 }
 0xc1d   : > { %v14120_v4 = vpop.f32.mrf.mxu0  ;;  %v14122_v42 = vpop.f32.mrf.mxu1 }
 0xc22   : > { %v14124_v32 = vpop.f32.mrf.mxu2  ;;  %v14126_v50 = vpop.f32.mrf.mxu3 }
 0xc25   : > { %v14128_v13 = vpop.f32.mrf.mxu0  ;;  %v14130_v48 = vpop.f32.mrf.mxu1 }
 0xc2a   : > { %v14132_v2 = vpop.f32.mrf.mxu2  ;;  %v14134_v6 = vpop.f32.mrf.mxu3 }
 0xc2d   : > { %v14136_v41 = vpop.f32.mrf.mxu0  ;;  %v14138_v28 = vpop.f32.mrf.mxu1 }
 0xc32   : > { %v14140_v53 = vpop.f32.mrf.mxu2  ;;  %v14142_v25 = vpop.f32.mrf.mxu3 }
 0xc35   : > { %v14144_v3 = vpop.f32.mrf.mxu0  ;;  %v14146_v17 = vpop.f32.mrf.mxu1 }
 0xc3a   : > { %v14148_v63 = vpop.f32.mrf.mxu2  ;;  %v14150_v10 = vpop.f32.mrf.mxu3 }
 0xc3d   : > { %v6560_v54 = vpop.f32.mrf.mxu0  ;;  %v6609_v62 = vpop.f32.mrf.mxu1 }
 0xc42   : > { %v14152_v12 = vpop.f32.mrf.mxu2  ;;  %v14154_v1 = vpop.f32.mrf.mxu3 }
 0xc45   : > { %v6562_v21 = vpop.f32.mrf.mxu0  ;;  %v6611_v15 = vpop.f32.mrf.mxu1 }
 0xc4a   : > { %v6383_v29 = vpop.f32.mrf.mxu2  ;;  %v6432_v35 = vpop.f32.mrf.mxu3 }
 0xc4d   : > { %v6565_v52 = vpop.f32.mrf.mxu0  ;;  %v6614_v36 = vpop.f32.mrf.mxu1 }
 0xc52   : > { %v6386_v31 = vpop.f32.mrf.mxu2  ;;  %v6435_v49 = vpop.f32.mrf.mxu3 }
 0xc55   : > { %v6567_v37 = vpop.f32.mrf.mxu0  ;;  %v6616_v16 = vpop.f32.mrf.mxu1 }
 0xc56   : > { %v6639_v39 = vpack.c.bf16 %v6567_v37, %v6565_v52  ;;  %v6640_v58 = vpack.c.bf16 %v6616_v16, %v6614_v36  ;;  %v10423_v36 = vld [vmem:[#allocation9 + $0xa8] sm:$0xf0]  ;;  %v11236_v16 = vld [vmem:[#allocation9 + $0x94] sm:$0xf] }
 0xc5a   : > { %v6388_v40 = vpop.f32.mrf.mxu2  ;;  %v6437_v9 = vpop.f32.mrf.mxu3 }
 0xc5d   : > { %v6570_v30 = vpop.f32.mrf.mxu0  ;;  %v6619_v7 = vpop.f32.mrf.mxu1 }
 0xc62   : > { %v6391_v22 = vpop.f32.mrf.mxu2  ;;  %v6440_v5 = vpop.f32.mrf.mxu3 }
 0xc65   : > { %v6572_v45 = vpop.f32.mrf.mxu0  ;;  %v6621_v18 = vpop.f32.mrf.mxu1 }
 0xc66   : > { %v6641_v55 = vpack.c.bf16 %v6572_v45, %v6570_v30  ;;  %v6642_v51 = vpack.c.bf16 %v6621_v18, %v6619_v7  ;;  %v10405_v7 = vld [vmem:[#allocation9 + $0x80] sm:$0xf]  ;;  %v10407_v45 = vld [vmem:[#allocation9 + $0x88] sm:$0xf0] }
 0xc6a   : > { %v6393_v27 = vpop.f32.mrf.mxu2  ;;  %v6442_v11 = vpop.f32.mrf.mxu3 }
 0xc6b   : > { %v6462_v34 = vpack.c.bf16 %v6393_v27, %v6391_v22  ;;  %v6463_v33 = vpack.c.bf16 %v6442_v11, %v6440_v5  ;;  %v11235_v22 = vld [vmem:[#allocation9 + $0x84] sm:$0xf0]  ;;  %v11234_v5 = vld [vmem:[#allocation9 + $0x84] sm:$0xf]  ;;  %v11232_v11 = vld [vmem:[#allocation7 + $0x70] sm:$0xff] }
 0xc6c   : > { %v10406_v18 = vor.u32 %v11235_v22, %v10405_v7  ;;  %v10410_v27 = vor.u32 %v11234_v5, %v10407_v45  ;;  %v11250_v7 = vld [vmem:[#allocation9 + $0xc4] sm:$0xf]  ;;  %v10487_v5 = vld [vmem:[#allocation9 + $0xc8] sm:$0xf0] }
 0xc6d   : > { %v6575_v60 = vpop.f32.mrf.mxu0  ;;  %v6624_v24 = vpop.f32.mrf.mxu1  ;;  %v10490_v45 = vor.u32 %v11250_v7, %v10487_v5  ;;  %v11271_v7 = vld [vmem:[#allocation9 + $0x124] sm:$0xf0] }
 0xc72   : > { %v6396_v46 = vpop.f32.mrf.mxu2  ;;  %v6445_v61 = vpop.f32.mrf.mxu3 }
 0xc75   : > { %v6577_v14 = vpop.f32.mrf.mxu0  ;;  %v6626_v44 = vpop.f32.mrf.mxu1 }
 0xc76   : > { %v6643_v23 = vpack.c.bf16 %v6577_v14, %v6575_v60  ;;  %v6644_v59 = vpack.c.bf16 %v6626_v44, %v6624_v24  ;;  %v6460_v44 = vpack.c.bf16 %v6388_v40, %v6386_v31  ;;  %v6461_v14 = vpack.c.bf16 %v6437_v9, %v6435_v49  ;;  %v10413_v31 = vld [vmem:[#allocation9 + $0x90] sm:$0xf]  ;;  %v11237_v49 = vld [vmem:[#allocation9 + $0x94] sm:$0xf0]  ;;  %v10415_v40 = vld [vmem:[#allocation9 + $0x98] sm:$0xf0] }
 0xc77   : > { %v6458_v24 = vpack.c.bf16 %v6383_v29, %v14152_v12  ;;  %v6459_v60 = vpack.c.bf16 %v6432_v35, %v14154_v1  ;;  %v10431_v12 = vld [vmem:[#allocation9 + $0xb8] sm:$0xf0]  ;;  %v11239_v29 = vld [vmem:[#allocation9 + $0xa4] sm:$0xf0]  ;;  %v11238_v35 = vld [vmem:[#allocation9 + $0xa4] sm:$0xf]  ;;  %v10414_v9 = vor.u32 %v11237_v49, %v10413_v31  ;;  %v10418_v30 = vor.u32 %v11236_v16, %v10415_v40 }
 0xc78   : > { %6710 = vmatpush.bf16.msrb.mxu2 %v6643_v23  ;;  %6744 = vmatpush.bf16.msra.mxu3 %v6644_v59  ;;  %v6637_v23 = vpack.c.bf16 %v6562_v21, %v6560_v54  ;;  %v6638_v59 = vpack.c.bf16 %v6611_v15, %v6609_v62  ;;  %v11240_v54 = vld [vmem:[#allocation9 + $0xb4] sm:$0xf]  ;;  %v11231_v21 = vld [vmem:[#allocation7 + $0x68] sm:$0xff]  ;;  %v10421_v15 = vld [vmem:[#allocation9 + $0xa0] sm:$0xf]  ;;  %v10426_v37 = vor.u32 %v11238_v35, %v10423_v36 }
 0xc79   : > { %v10434_v1 = vor.u32 %v11240_v54, %v10431_v12  ;;  %v10422_v52 = vor.u32 %v11239_v29, %v10421_v15  ;;  %v11255_v12 = vld [vmem:[#allocation9 + $0xe4] sm:$0xf0]  ;;  %v10503_v15 = vld [vmem:[#allocation9 + $0xe8] sm:$0xf0]  ;;  %v10493_v29 = vld [vmem:[#allocation9 + $0xd0] sm:$0xf] }
 0xc7a   : > { %v6398_v19 = vpop.f32.mrf.mxu2  ;;  %v6447_v47 = vpop.f32.mrf.mxu3  ;;  %v11253_v35 = vld [vmem:[#allocation9 + $0xd4] sm:$0xf0]  ;;  %v11252_v36 = vld [vmem:[#allocation9 + $0xd4] sm:$0xf]  ;;  %v10495_v31 = vld [vmem:[#allocation9 + $0xd8] sm:$0xf0] }
 0xc7b   : > { %v6464_v8 = vpack.c.bf16 %v6398_v19, %v6396_v46  ;;  %v6465_v56 = vpack.c.bf16 %v6447_v47, %v6445_v61  ;;  %v6635_v61 = vpack.c.bf16 %v14144_v3, %v14136_v41  ;;  %v6636_v46 = vpack.c.bf16 %v14146_v17, %v14138_v28  ;;  %v15254_v41 = vld [vmem:[#allocation20_spill] sm:$0xff]  ;;  %v15255_v28 = vld [vmem:[#allocation19_spill] sm:$0xff]  ;;  %v11229_v3 = vld [vmem:[#allocation7 + $0x58] sm:$0xff] }
 0xc7c   : > { %6711 = vmatpush.bf16.msrb.mxu2 %v6641_v55  ;;  %6745 = vmatpush.bf16.msra.mxu3 %v6642_v51  ;;  %v6634_v47 = vpack.c.bf16 %v14130_v48, %v14122_v42  ;;  %v6456_v51 = vpack.c.bf16 %v14148_v63, %v14140_v53  ;;  %v6631_v19 = vpack.c.bf16 %v14112_v20, %v14104_v43  ;;  %v15248_v43 = vld [vmem:[#allocation27_spill] sm:$0xff]  ;;  %v15249_v20 = vld [vmem:[#allocation17_spill] sm:$0xff]  ;;  %v11230_v17 = vld [vmem:[#allocation7 + $0x60] sm:$0xff] }
 0xc7d   : > { %6826 = vmatpush.bf16.msrb.mxu0 %v6464_v8  ;;  %6860 = vmatpush.bf16.msrb.mxu1 %v6465_v56  ;;  %v6632_v55 = vpack.c.bf16 %v14114_v38, %v14106_v57  ;;  %v6455_v56 = vpack.c.bf16 %v14134_v6, %v14126_v50  ;;  %v15246_v8 = vld [vmem:[#allocation28_spill] sm:$0xff]  ;;  %v15250_v57 = vld [vmem:[#allocation30_spill] sm:$0xff]  ;;  %v15251_v38 = vld [vmem:[#allocation31_spill] sm:$0xff]  ;;  %v10494_v49 = vor.u32 %v11253_v35, %v10493_v29 }
 0xc7e   : > { %v6453_v48 = vpack.c.bf16 %v15251_v38, %v15250_v57  ;;  %v15252_v50 = vld [vmem:[#allocation23_spill] sm:$0xff]  ;;  %v10429_v63 = vld [vmem:[#allocation9 + $0xb0] sm:$0xf]  ;;  %v10591_v35 = vld [vmem:[#allocation9 + $0x138] sm:$0xf0] }
 0xc7f   : > { %v11227_v53 = vld [vmem:[#allocation7 + $0x48] sm:$0xff] }
 0xc80   : > { %6712 = vmatpush.bf16.msrb.mxu2 %v6639_v39  ;;  %6746 = vmatpush.bf16.msra.mxu3 %v6640_v58  ;;  %v6454_v58 = vpack.c.bf16 %v14132_v2, %v14124_v32  ;;  %v6629_v39 = vpack.c.bf16 %v14096_v26, %v14088_v0  ;;  %v11226_v32 = vld [vmem:[#allocation7 + $0x40] sm:$0xff]  ;;  %v15253_v2 = vld [vmem:[#allocation29_spill] sm:$0xff]  ;;  %v6451_v0 = vpack.c.bf16 %v15255_v28, %v15254_v41  ;;  %v11256_v41 = vld [vmem:[#allocation9 + $0xf4] sm:$0xf] }
 0xc81   : > { %6827 = vmatpush.bf16.msrb.mxu0 %v6462_v34  ;;  %6861 = vmatpush.bf16.msrb.mxu1 %v6463_v33  ;;  %v6633_v33 = vpack.c.bf16 %v14128_v13, %v14120_v4  ;;  %v6457_v34 = vpack.c.bf16 %v14150_v10, %v14142_v25  ;;  %v15247_v4 = vld [vmem:[#allocation26_spill] sm:$0xff]  ;;  %v6452_v13 = vpack.c.bf16 %v15249_v20, %v15248_v43  ;;  %v11228_v25 = vld [vmem:[#allocation7 + $0x50] sm:$0xff]  ;;  %v11241_v10 = vld [vmem:[#allocation9 + $0xb4] sm:$0xf0] }
 0xc82   : > { %v6630_v42 = vpack.c.bf16 %v15247_v4, %v15246_v8  ;;  %v6450_v6 = vpack.c.bf16 %v15253_v2, %v15252_v50  ;;  %v11210_v26 = vld [vmem:[#allocation7] sm:$0xff]  ;;  %v10430_v62 = vor.u32 %v11241_v10, %v10429_v63  ;;  %v15260_v50 = vld [vmem:[#allocation16_spill] sm:$0xff] }
 0xc83   : > { %v15258_v8 = vld [vmem:[#allocation14_spill] sm:$0xff]  ;;  %v10509_v2 = vld [vmem:[#allocation9 + $0xf0] sm:$0xf] }
 0xc84   : > { %6713 = vmatpush.bf16.msrb.mxu2 %v6637_v23  ;;  %6747 = vmatpush.bf16.msra.mxu3 %v6638_v59  ;;  %v11233_v23 = vld [vmem:[#allocation7 + $0x78] sm:$0xff]  ;;  %v15256_v59 = vld [vmem:[#allocation22_spill] sm:$0xff] }
 0xc85   : > { %6828 = vmatpush.bf16.msrb.mxu0 %v6460_v44  ;;  %6862 = vmatpush.bf16.msrb.mxu1 %v6461_v14  ;;  %v15261_v63 = vld [vmem:[#allocation18_spill] sm:$0xff] }
 0xc88   : > { %6714 = vmatpush.bf16.msrb.mxu2 %v6635_v61  ;;  %6748 = vmatpush.bf16.msra.mxu3 %v6636_v46 }
 0xc89   : > { %6829 = vmatpush.bf16.msrb.mxu0 %v6458_v24  ;;  %6863 = vmatpush.bf16.msrb.mxu1 %v6459_v60 }
 0xc8c   : > { %6715 = vmatpush.bf16.msrb.mxu2 %v6633_v33  ;;  %6749 = vmatpush.bf16.msra.mxu3 %v6634_v47 }
 0xc8d   : > { %6830 = vmatpush.bf16.msrb.mxu0 %v6456_v51  ;;  %6864 = vmatpush.bf16.msrb.mxu1 %v6457_v34 }
 0xc90   : > { %6716 = vmatpush.bf16.msrb.mxu2 %v6631_v19  ;;  %6750 = vmatpush.bf16.msra.mxu3 %v6632_v55  ;;  %v15257_v19 = vld [vmem:[#allocation24_spill] sm:$0xff] }
 0xc91   : > { %6831 = vmatpush.bf16.msrb.mxu0 %v6454_v58  ;;  %6865 = vmatpush.bf16.msrb.mxu1 %v6455_v56 }
 0xc94   : > { %6717 = vmatpush.bf16.msrb.mxu2 %v6629_v39  ;;  %6751 = vmatpush.bf16.msra.mxu3 %v6630_v42 }
 0xc95   : > { %6832 = vmatpush.bf16.msrb.mxu0 %v6452_v13  ;;  %6866 = vmatpush.bf16.msrb.mxu1 %v6453_v48  ;;  %v15259_v13 = vld [vmem:[#allocation15_spill] sm:$0xff] }
 0xc97   : > { %6718 = vmatmul.bf16.vlgmr.msrb.gmra.mxu2 %v11226_v32  ;;  %6752 = vmatmul.bf16.vlgmr.msra.gmra.mxu3 %v11226_v32 }
 0xc98   : > { %6947 = vmatpush.bf16.msra.mxu2 %v10430_v62  ;;  %6996 = vmatpush.bf16.msrb.mxu3 %v10434_v1  ;;  %v10501_v62 = vld [vmem:[#allocation9 + $0xe0] sm:$0xf]  ;;  %v11254_v1 = vld [vmem:[#allocation9 + $0xe4] sm:$0xf] }
 0xc99   : > { %6833 = vmatpush.bf16.msrb.mxu0 %v6450_v6  ;;  %6867 = vmatpush.bf16.msrb.mxu1 %v6451_v0  ;;  %v11257_v6 = vld [vmem:[#allocation9 + $0xf4] sm:$0xf0]  ;;  %v10511_v0 = vld [vmem:[#allocation9 + $0xf8] sm:$0xf0] }
 0xc9a   : > { %v10510_v28 = vor.u32 %v11257_v6, %v10509_v2 }
 0xc9c   : > { %6834 = vmatmul.bf16.vlgmr.msrb.gmra.mxu0 %v11210_v26  ;;  %6868 = vmatmul.bf16.vlgmr.msrb.gmra.mxu1 %v11210_v26  ;;  %v10514_v26 = vor.u32 %v11256_v41, %v10511_v0 }
 0xc9d   : > { %6948 = vmatpush.bf16.msra.mxu2 %v10422_v52  ;;  %6997 = vmatpush.bf16.msrb.mxu3 %v10426_v37  ;;  %v10506_v52 = vor.u32 %v11254_v1, %v10503_v15  ;;  %v10498_v37 = vor.u32 %v11252_v36, %v10495_v31  ;;  %v10589_v1 = vld [vmem:[#allocation9 + $0x130] sm:$0xf]  ;;  %v11272_v15 = vld [vmem:[#allocation9 + $0x134] sm:$0xf] }
 0xca1   : > { %6949 = vmatpush.bf16.msra.mxu2 %v10414_v9  ;;  %6998 = vmatpush.bf16.msrb.mxu3 %v10418_v30  ;;  %v10485_v9 = vld [vmem:[#allocation9 + $0xc0] sm:$0xf]  ;;  %v11251_v30 = vld [vmem:[#allocation9 + $0xc4] sm:$0xf0] }
 0xca2   : > { %v10486_v22 = vor.u32 %v11251_v30, %v10485_v9  ;;  %v10581_v30 = vld [vmem:[#allocation9 + $0x120] sm:$0xf] }
 0xca3   : > { %v10582_v5 = vor.u32 %v11271_v7, %v10581_v30  ;;  %v11217_v7 = vld [vmem:[#allocation7 + $0x38] sm:$0xff] }
 0xca5   : > { %6950 = vmatpush.bf16.msra.mxu2 %v10406_v18  ;;  %6999 = vmatpush.bf16.msrb.mxu3 %v10410_v27  ;;  %v15262_v18 = vld [vmem:[#allocation21_spill] sm:$0xff] }
 0xca7   : > { %6722 = vmatmul.bf16.gmra.mxu2 %v11227_v53  ;;  %6756 = vmatmul.bf16.gmra.mxu3 %v11227_v53 }
 0xca9   : > { %7245 = vmatpush.bf16.msrb.mxu2 %v10510_v28  ;;  %7294 = vmatpush.bf16.msra.mxu3 %v10514_v26 }
 0xcad   : > { %7295 = vmatpush.bf16.msra.mxu3 %v10506_v52  ;;  %v10594_v52 = vor.u32 %v11272_v15, %v10591_v35  ;;  %v10567_v15 = vld [vmem:[#allocation9 + $0x108] sm:$0xf0] }
 0xcb1   : > { %7296 = vmatpush.bf16.msra.mxu3 %v10498_v37 }
 0xcb5   : > { %7297 = vmatpush.bf16.msra.mxu3 %v10490_v45  ;;  %v10583_v45 = vld [vmem:[#allocation9 + $0x128] sm:$0xf0] }
 0xcb7   : > { %6725 = vmatmul.bf16.gmra.mxu2 %v11228_v25  ;;  %6759 = vmatmul.bf16.gmra.mxu3 %v11228_v25 }
 0xcc7   : > { %6728 = vmatmul.bf16.gmra.mxu2 %v11229_v3  ;;  %6762 = vmatmul.bf16.gmra.mxu3 %v11229_v3 }
 0xcd7   : > { %6731 = vmatmul.bf16.gmra.mxu2 %v11230_v17  ;;  %6765 = vmatmul.bf16.gmra.mxu3 %v11230_v17 }
 0xce7   : > { %6734 = vmatmul.bf16.gmra.mxu2 %v11231_v21  ;;  %6768 = vmatmul.bf16.gmra.mxu3 %v11231_v21  ;;  %v10502_v21 = vor.u32 %v11255_v12, %v10501_v62  ;;  %v11214_v12 = vld [vmem:[#allocation7 + $0x20] sm:$0xff] }
 0xce9   : > { %7246 = vmatpush.bf16.msrb.mxu2 %v10502_v21  ;;  %v11273_v21 = vld [vmem:[#allocation9 + $0x134] sm:$0xf0] }
 0xcea   : > { %v10590_v29 = vor.u32 %v11273_v21, %v10589_v1  ;;  %v11266_v21 = vld [vmem:[#allocation9 + $0x104] sm:$0xf] }
 0xced   : > { %7247 = vmatpush.bf16.msrb.mxu2 %v10494_v49 }
 0xcf1   : > { %7248 = vmatpush.bf16.msrb.mxu2 %v10486_v22  ;;  %v11270_v22 = vld [vmem:[#allocation9 + $0x124] sm:$0xf] }
 0xcf7   : > { %6737 = vmatmul.bf16.gmra.mxu2 %v11232_v11  ;;  %6771 = vmatmul.bf16.gmra.mxu3 %v11232_v11 }
 0xd07   : > { %6740 = vmatmul.bf16.gmra.mxu2 %v11233_v23  ;;  %6774 = vmatmul.bf16.gmra.mxu3 %v11233_v23 }
 0xd17   : > { %10435 = vmatmul.msk.bf16.vlgmr.msra.gmra.mxu2 %vm6327_vm4, %v15256_v59  ;;  %10443 = vmatmul.msk.bf16.vlgmr.msrb.gmra.mxu3 %vm6327_vm4, %v15256_v59 }
 0xd18   : > { %7543 = vmatpush.bf16.msra.mxu2 %v10590_v29  ;;  %7592 = vmatpush.bf16.msrb.mxu3 %v10594_v52  ;;  %v10570_v29 = vor.u32 %v11266_v21, %v10567_v15 }
 0xd19   : > { %v6835_v44 = vpop.f32.mrf.mxu0  ;;  %v6869_v14 = vpop.f32.mrf.mxu1 }
 0xd1a   : > { %v6719_v61 = vpop.f32.mrf.mxu2  ;;  %v6753_v46 = vpop.f32.mrf.mxu3 }
 0xd1b   : > { %v14194_v24 = vadd.f32 %v6835_v44, %v6719_v61  ;;  %v14196_v60 = vadd.f32 %v6869_v14, %v6753_v46  ;;  %v15263_v14 = vld [vmem:[#allocation25_spill] sm:$0xff] }
 0xd1c   : > { %7544 = vmatpush.bf16.msra.mxu2 %v10582_v5 }
 0xd21   : > { %v6837_v33 = vpop.f32.mrf.mxu0  ;;  %v6871_v47 = vpop.f32.mrf.mxu1 }
 0xd22   : > { %v6721_v51 = vpop.f32.mrf.mxu2  ;;  %v6755_v34 = vpop.f32.mrf.mxu3 }
 0xd27   : > { %10436 = vmatmul.msk.bf16.gmra.mxu2 %vm6327_vm4, %v15257_v19  ;;  %10444 = vmatmul.msk.bf16.gmra.mxu3 %vm6327_vm4, %v15257_v19 }
 0xd2a   : > { %v6723_v55 = vpop.f32.mrf.mxu2  ;;  %v6757_v58 = vpop.f32.mrf.mxu3 }
 0xd32   : > { %v6724_v56 = vpop.f32.mrf.mxu2  ;;  %v6758_v39 = vpop.f32.mrf.mxu3 }
 0xd37   : > { %10437 = vmatmul.msk.bf16.gmra.mxu2 %vm6327_vm4, %v15258_v8  ;;  %10445 = vmatmul.msk.bf16.gmra.mxu3 %vm6327_vm4, %v15258_v8 }
 0xd3a   : > { %v6726_v4 = vpop.f32.mrf.mxu2  ;;  %v6760_v42 = vpop.f32.mrf.mxu3 }
 0xd3b   : > { %v11211_v4 = vld [vmem:[#allocation7 + $0x8] sm:$0xff] }
 0xd3c   : > { %6838 = vmatmul.bf16.gmra.mxu0 %v11211_v4  ;;  %6872 = vmatmul.bf16.gmra.mxu1 %v11211_v4 }
 0xd42   : > { %v6727_v43 = vpop.f32.mrf.mxu2  ;;  %v6761_v20 = vpop.f32.mrf.mxu3 }
 0xd47   : > { %10438 = vmatmul.msk.bf16.gmra.mxu2 %vm6327_vm4, %v15259_v13  ;;  %10446 = vmatmul.msk.bf16.gmra.mxu3 %vm6327_vm4, %v15259_v13 }
 0xd4a   : > { %v6729_v57 = vpop.f32.mrf.mxu2  ;;  %v6763_v38 = vpop.f32.mrf.mxu3 }
 0xd52   : > { %v6730_v48 = vpop.f32.mrf.mxu2  ;;  %v6764_v32 = vpop.f32.mrf.mxu3 }
 0xd53   : > { %v11212_v32 = vld [vmem:[#allocation7 + $0x10] sm:$0xff] }
 0xd54   : > { %6841 = vmatmul.bf16.gmra.mxu0 %v11212_v32  ;;  %6875 = vmatmul.bf16.gmra.mxu1 %v11212_v32  ;;  %v11216_v32 = vld [vmem:[#allocation7 + $0x30] sm:$0xff] }
 0xd57   : > { %10439 = vmatmul.msk.bf16.gmra.mxu2 %vm6327_vm4, %v15260_v50  ;;  %10447 = vmatmul.msk.bf16.gmra.mxu3 %vm6327_vm4, %v15260_v50 }
 0xd5a   : > { %v6732_v53 = vpop.f32.mrf.mxu2  ;;  %v6766_v25 = vpop.f32.mrf.mxu3 }
 0xd5b   : > { %v11213_v53 = vld [vmem:[#allocation7 + $0x18] sm:$0xff] }
 0xd62   : > { %v6733_v3 = vpop.f32.mrf.mxu2  ;;  %v6767_v17 = vpop.f32.mrf.mxu3 }
 0xd64   : > { %6844 = vmatmul.bf16.gmra.mxu0 %v11213_v53  ;;  %6878 = vmatmul.bf16.gmra.mxu1 %v11213_v53  ;;  %v10565_v53 = vld [vmem:[#allocation9 + $0x100] sm:$0xf] }
 0xd67   : > { %10440 = vmatmul.msk.bf16.gmra.mxu2 %vm6327_vm4, %v15261_v63  ;;  %10448 = vmatmul.msk.bf16.gmra.mxu3 %vm6327_vm4, %v15261_v63 }
 0xd6a   : > { %v6735_v10 = vpop.f32.mrf.mxu2  ;;  %v6769_v54 = vpop.f32.mrf.mxu3 }
 0xd72   : > { %v6736_v16 = vpop.f32.mrf.mxu2  ;;  %v6770_v40 = vpop.f32.mrf.mxu3 }
 0xd73   : > { %v11215_v16 = vld [vmem:[#allocation7 + $0x28] sm:$0xff] }
 0xd74   : > { %6847 = vmatmul.bf16.gmra.mxu0 %v11214_v12  ;;  %6881 = vmatmul.bf16.gmra.mxu1 %v11214_v12  ;;  %v11267_v12 = vld [vmem:[#allocation9 + $0x104] sm:$0xf0] }
 0xd75   : > { %v10566_v1 = vor.u32 %v11267_v12, %v10565_v53 }
 0xd77   : > { %10441 = vmatmul.msk.bf16.gmra.mxu2 %vm6327_vm4, %v15262_v18  ;;  %10449 = vmatmul.msk.bf16.gmra.mxu3 %vm6327_vm4, %v15262_v18 }
 0xd7a   : > { %v6738_v27 = vpop.f32.mrf.mxu2  ;;  %v6772_v11 = vpop.f32.mrf.mxu3 }
 0xd7b   : > { %v10573_v27 = vld [vmem:[#allocation9 + $0x110] sm:$0xf]  ;;  %v11269_v11 = vld [vmem:[#allocation9 + $0x114] sm:$0xf0] }
 0xd82   : > { %v6739_v23 = vpop.f32.mrf.mxu2  ;;  %v6773_v44 = vpop.f32.mrf.mxu3 }
 0xd83   : > { %v10586_v23 = vor.u32 %v11270_v22, %v10583_v45  ;;  %v11268_v44 = vld [vmem:[#allocation9 + $0x114] sm:$0xf] }
 0xd84   : > { %6850 = vmatmul.bf16.gmra.mxu0 %v11215_v16  ;;  %6884 = vmatmul.bf16.gmra.mxu1 %v11215_v16 }
 0xd85   : > { %7593 = vmatpush.bf16.msrb.mxu3 %v10586_v23 }
 0xd87   : > { %10442 = vmatmul.msk.bf16.gmra.mxu2 %vm6327_vm4, %v15263_v14  ;;  %10450 = vmatmul.msk.bf16.gmra.mxu3 %vm6327_vm4, %v15263_v14 }
 0xd8a   : > { %v6741_v61 = vpop.f32.mrf.mxu2  ;;  %v6775_v46 = vpop.f32.mrf.mxu3 }
 0xd8b   : > { %v10575_v61 = vld [vmem:[#allocation9 + $0x118] sm:$0xf0]  ;;  %v10574_v46 = vor.u32 %v11269_v11, %v10573_v27 }
 0xd8d   : > { %7545 = vmatpush.bf16.msra.mxu2 %v10574_v46 }
 0xd91   : > { %7546 = vmatpush.bf16.msra.mxu2 %v10566_v1 }
 0xd92   : > { %v6742_v33 = vpop.f32.mrf.mxu2  ;;  %v6776_v47 = vpop.f32.mrf.mxu3 }
 0xd93   : > { %v10578_v33 = vor.u32 %v11268_v44, %v10575_v61 }
 0xd94   : > { %6853 = vmatmul.bf16.gmra.mxu0 %v11216_v32  ;;  %6887 = vmatmul.bf16.gmra.mxu1 %v11216_v32 }
 0xd95   : > { %7594 = vmatpush.bf16.msrb.mxu3 %v10578_v33 }
 0xd97   : > { %10515 = vmatmul.msk.bf16.vlgmr.msrb.gmra.mxu2 %vm6327_vm4, %v15256_v59  ;;  %10523 = vmatmul.msk.bf16.vlgmr.msra.gmra.mxu3 %vm6327_vm4, %v15256_v59 }
 0xd99   : > { %7595 = vmatpush.bf16.msrb.mxu3 %v10570_v29 }
 0xd9a   : > { %v14230_v51 = vpop.f32.mrf.mxu2  ;;  %v14232_v34 = vpop.f32.mrf.mxu3 }
 0xda2   : > { %v14234_v55 = vpop.f32.mrf.mxu2  ;;  %v14236_v58 = vpop.f32.mrf.mxu3 }
 0xda3   : > { %v7041_v56 = vpack.c.bf16 %v14234_v55, %v14230_v51  ;;  %v7042_v39 = vpack.c.bf16 %v14236_v58, %v14232_v34 }
 0xda4   : > { %6856 = vmatmul.bf16.gmra.mxu0 %v11217_v7  ;;  %6890 = vmatmul.bf16.gmra.mxu1 %v11217_v7  ;;  %v10669_v7 = vld [vmem:[#allocation9 + $0x170] sm:$0xf] }
 0xda7   : > { %10516 = vmatmul.msk.bf16.gmra.mxu2 %vm6327_vm4, %v15257_v19  ;;  %10524 = vmatmul.msk.bf16.gmra.mxu3 %vm6327_vm4, %v15257_v19 }
 0xdaa   : > { %v14246_v42 = vpop.f32.mrf.mxu2  ;;  %v14248_v43 = vpop.f32.mrf.mxu3 }
 0xdb2   : > { %v14250_v20 = vpop.f32.mrf.mxu2  ;;  %v14252_v57 = vpop.f32.mrf.mxu3 }
 0xdb3   : > { %v7043_v38 = vpack.c.bf16 %v14250_v20, %v14246_v42  ;;  %v7044_v48 = vpack.c.bf16 %v14252_v57, %v14248_v43 }
 0xdb7   : > { %10517 = vmatmul.msk.bf16.gmra.mxu2 %vm6327_vm4, %v15258_v8  ;;  %10525 = vmatmul.msk.bf16.gmra.mxu3 %vm6327_vm4, %v15258_v8 }
 0xdba   : > { %v14262_v2 = vpop.f32.mrf.mxu2  ;;  %v14264_v6 = vpop.f32.mrf.mxu3 }
 0xdc2   : > { %v14266_v41 = vpop.f32.mrf.mxu2  ;;  %v14268_v28 = vpop.f32.mrf.mxu3 }
 0xdc3   : > { %v7045_v0 = vpack.c.bf16 %v14266_v41, %v14262_v2  ;;  %v7046_v26 = vpack.c.bf16 %v14268_v28, %v14264_v6  ;;  %v11242_v2 = vld [vmem:[#allocation7 + $0x80] sm:$0xff] }
 0xdc7   : > { %10518 = vmatmul.msk.bf16.gmra.mxu2 %vm6327_vm4, %v15259_v13  ;;  %10526 = vmatmul.msk.bf16.gmra.mxu3 %vm6327_vm4, %v15259_v13 }
 0xdca   : > { %v14278_v25 = vpop.f32.mrf.mxu2  ;;  %v14280_v3 = vpop.f32.mrf.mxu3 }
 0xdd2   : > { %v14282_v17 = vpop.f32.mrf.mxu2  ;;  %v14284_v10 = vpop.f32.mrf.mxu3 }
 0xdd3   : > { %v7047_v54 = vpack.c.bf16 %v14282_v17, %v14278_v25  ;;  %v7048_v62 = vpack.c.bf16 %v14284_v10, %v14280_v3 }
 0xdd7   : > { %10519 = vmatmul.msk.bf16.gmra.mxu2 %vm6327_vm4, %v15260_v50  ;;  %10527 = vmatmul.msk.bf16.gmra.mxu3 %vm6327_vm4, %v15260_v50 }
 0xdda   : > { %v14294_v36 = vpop.f32.mrf.mxu2  ;;  %v14296_v31 = vpop.f32.mrf.mxu3 }
 0xde2   : > { %v14298_v49 = vpop.f32.mrf.mxu2  ;;  %v14300_v37 = vpop.f32.mrf.mxu3 }
 0xde3   : > { %v7049_v12 = vpack.c.bf16 %v14298_v49, %v14294_v36  ;;  %v7050_v1 = vpack.c.bf16 %v14300_v37, %v14296_v31  ;;  %v11244_v49 = vld [vmem:[#allocation7 + $0x90] sm:$0xff] }
 0xde7   : > { %10520 = vmatmul.msk.bf16.gmra.mxu2 %vm6327_vm4, %v15261_v63  ;;  %10528 = vmatmul.msk.bf16.gmra.mxu3 %vm6327_vm4, %v15261_v63 }
 0xdea   : > { %v6977_v40 = vpop.f32.mrf.mxu2  ;;  %v7026_v9 = vpop.f32.mrf.mxu3 }
 0xdf2   : > { %v6979_v47 = vpop.f32.mrf.mxu2  ;;  %v7028_v4 = vpop.f32.mrf.mxu3 }
 0xdf3   : > { %v7051_v32 = vpack.c.bf16 %v6979_v47, %v6977_v40  ;;  %v7052_v53 = vpack.c.bf16 %v7028_v4, %v7026_v9  ;;  %v6839_v9 = vpop.f32.mrf.mxu0  ;;  %v6873_v47 = vpop.f32.mrf.mxu1 }
 0xdf7   : > { %10521 = vmatmul.msk.bf16.gmra.mxu2 %vm6327_vm4, %v15262_v18  ;;  %10529 = vmatmul.msk.bf16.gmra.mxu3 %vm6327_vm4, %v15262_v18 }
 0xdfa   : > { %v6982_v35 = vpop.f32.mrf.mxu2  ;;  %v7031_v52 = vpop.f32.mrf.mxu3 }
 0xdfb   : > { %v6840_v3 = vpop.f32.mrf.mxu0  ;;  %v6874_v10 = vpop.f32.mrf.mxu1 }
 0xe02   : > { %v6984_v16 = vpop.f32.mrf.mxu2  ;;  %v7033_v30 = vpop.f32.mrf.mxu3 }
 0xe03   : > { %v7053_v44 = vpack.c.bf16 %v6984_v16, %v6982_v35  ;;  %v7054_v61 = vpack.c.bf16 %v7033_v30, %v7031_v52  ;;  %v6842_v20 = vpop.f32.mrf.mxu0  ;;  %v6876_v57 = vpop.f32.mrf.mxu1 }
 0xe04   : > { %v11287_v20 = vld [vmem:[#allocation9 + $0x164] sm:$0xf0]  ;;  %v11286_v57 = vld [vmem:[#allocation9 + $0x164] sm:$0xf] }
 0xe07   : > { %10522 = vmatmul.msk.bf16.gmra.mxu2 %vm6327_vm4, %v15263_v14  ;;  %10530 = vmatmul.msk.bf16.gmra.mxu3 %vm6327_vm4, %v15263_v14 }
 0xe0a   : > { %v6987_v22 = vpop.f32.mrf.mxu2  ;;  %v7036_v5 = vpop.f32.mrf.mxu3 }
 0xe0b   : > { %v6843_v55 = vpop.f32.mrf.mxu0  ;;  %v6877_v58 = vpop.f32.mrf.mxu1 }
 0xe12   : > { %v6989_v45 = vpop.f32.mrf.mxu2  ;;  %v7038_v27 = vpop.f32.mrf.mxu3 }
 0xe13   : > { %v7055_v11 = vpack.c.bf16 %v6989_v45, %v6987_v22  ;;  %v7056_v23 = vpack.c.bf16 %v7038_v27, %v7036_v5  ;;  %v11289_v22 = vld [vmem:[#allocation9 + $0x174] sm:$0xf0]  ;;  %v11288_v5 = vld [vmem:[#allocation9 + $0x174] sm:$0xf]  ;;  %v10671_v27 = vld [vmem:[#allocation9 + $0x178] sm:$0xf0] }
 0xe14   : > { %v10670_v45 = vor.u32 %v11289_v22, %v10669_v7  ;;  %v11246_v22 = vld [vmem:[#allocation7 + $0xa0] sm:$0xff] }
 0xe15   : > { %7122 = vmatpush.bf16.msra.mxu0 %v7055_v11  ;;  %7156 = vmatpush.bf16.msra.mxu1 %v7056_v23  ;;  %v10674_v11 = vor.u32 %v11288_v5, %v10671_v27 }
 0xe16   : > { %7841 = vmatpush.bf16.msrb.mxu2 %v10670_v45 }
 0xe17   : > { %10595 = vmatmul.msk.bf16.vlgmr.msra.gmra.mxu2 %vm6327_vm4, %v15256_v59  ;;  %10603 = vmatmul.msk.bf16.vlgmr.msrb.gmra.mxu3 %vm6327_vm4, %v15256_v59 }
 0xe18   : > { %7890 = vmatpush.bf16.msra.mxu3 %v10674_v11 }
 0xe19   : > { %7123 = vmatpush.bf16.msra.mxu0 %v7053_v44  ;;  %7157 = vmatpush.bf16.msra.mxu1 %v7054_v61 }
 0xe1a   : > { %v14318_v46 = vpop.f32.mrf.mxu2  ;;  %v14320_v33 = vpop.f32.mrf.mxu3 }
 0xe1d   : > { %7124 = vmatpush.bf16.msra.mxu0 %v7051_v32  ;;  %7158 = vmatpush.bf16.msra.mxu1 %v7052_v53  ;;  %v11245_v53 = vld [vmem:[#allocation7 + $0x98] sm:$0xff] }
 0xe21   : > { %7125 = vmatpush.bf16.msra.mxu0 %v7049_v12  ;;  %7159 = vmatpush.bf16.msra.mxu1 %v7050_v1 }
 0xe22   : > { %v14326_v21 = vpop.f32.mrf.mxu2  ;;  %v14328_v15 = vpop.f32.mrf.mxu3 }
 0xe23   : > { %v7339_v29 = vpack.c.bf16 %v14326_v21, %v14318_v46  ;;  %v7340_v40 = vpack.c.bf16 %v14328_v15, %v14320_v33  ;;  %v11259_v15 = vld [vmem:[#allocation7 + $0xc8] sm:$0xff] }
 0xe25   : > { %7126 = vmatpush.bf16.msra.mxu0 %v7047_v54  ;;  %7160 = vmatpush.bf16.msra.mxu1 %v7048_v62 }
 0xe27   : > { %10596 = vmatmul.msk.bf16.gmra.mxu2 %vm6327_vm4, %v15257_v19  ;;  %10604 = vmatmul.msk.bf16.gmra.mxu3 %vm6327_vm4, %v15257_v19 }
 0xe29   : > { %7127 = vmatpush.bf16.msra.mxu0 %v7045_v0  ;;  %7161 = vmatpush.bf16.msra.mxu1 %v7046_v26  ;;  %v6845_v0 = vpop.f32.mrf.mxu0  ;;  %v6879_v26 = vpop.f32.mrf.mxu1 }
 0xe2a   : > { %v14350_v25 = vpop.f32.mrf.mxu2  ;;  %v14352_v17 = vpop.f32.mrf.mxu3  ;;  %v10663_v0 = vld [vmem:[#allocation9 + $0x168] sm:$0xf0]  ;;  %v10653_v26 = vld [vmem:[#allocation9 + $0x150] sm:$0xf] }
 0xe2d   : > { %7128 = vmatpush.bf16.msra.mxu0 %v7043_v38  ;;  %7162 = vmatpush.bf16.msra.mxu1 %v7044_v48 }
 0xe31   : > { %7129 = vmatpush.bf16.msra.mxu0 %v7041_v56  ;;  %7163 = vmatpush.bf16.msra.mxu1 %v7042_v39  ;;  %v11243_v56 = vld [vmem:[#allocation7 + $0x88] sm:$0xff]  ;;  %v6846_v36 = vpop.f32.mrf.mxu0  ;;  %v6880_v31 = vpop.f32.mrf.mxu1 }
 0xe32   : > { %v14366_v6 = vpop.f32.mrf.mxu2  ;;  %v14368_v41 = vpop.f32.mrf.mxu3  ;;  %v11285_v36 = vld [vmem:[#allocation9 + $0x154] sm:$0xf0]  ;;  %v10666_v31 = vor.u32 %v11286_v57, %v10663_v0 }
 0xe33   : > { %v7341_v42 = vpack.c.bf16 %v14366_v6, %v14350_v25  ;;  %v7342_v43 = vpack.c.bf16 %v14368_v41, %v14352_v17 }
 0xe34   : > { %7130 = vmatmul.bf16.vlgmr.msra.gmra.mxu0 %v11242_v2  ;;  %7164 = vmatmul.bf16.vlgmr.msra.gmra.mxu1 %v11242_v2  ;;  %v10661_v2 = vld [vmem:[#allocation9 + $0x160] sm:$0xf] }
 0xe35   : > { %7891 = vmatpush.bf16.msra.mxu3 %v10666_v31 }
 0xe37   : > { %10597 = vmatmul.msk.bf16.gmra.mxu2 %vm6327_vm4, %v15258_v8  ;;  %10605 = vmatmul.msk.bf16.gmra.mxu3 %vm6327_vm4, %v15258_v8 }
 0xe39   : > { %v6848_v16 = vpop.f32.mrf.mxu0  ;;  %v6882_v30 = vpop.f32.mrf.mxu1 }
 0xe3a   : > { %v14378_v51 = vpop.f32.mrf.mxu2  ;;  %v14380_v34 = vpop.f32.mrf.mxu3  ;;  %v10655_v16 = vld [vmem:[#allocation9 + $0x158] sm:$0xf0]  ;;  %v10654_v30 = vor.u32 %v11285_v36, %v10653_v26 }
 0xe41   : > { %v6849_v61 = vpop.f32.mrf.mxu0  ;;  %v6883_v32 = vpop.f32.mrf.mxu1 }
 0xe42   : > { %v14382_v39 = vpop.f32.mrf.mxu2  ;;  %v14384_v38 = vpop.f32.mrf.mxu3  ;;  %v10645_v61 = vld [vmem:[#allocation9 + $0x140] sm:$0xf]  ;;  %v11283_v32 = vld [vmem:[#allocation9 + $0x144] sm:$0xf0] }
 0xe43   : > { %v7343_v48 = vpack.c.bf16 %v14382_v39, %v14378_v51  ;;  %v7344_v28 = vpack.c.bf16 %v14384_v38, %v14380_v34 }
 0xe44   : > { %7134 = vmatmul.bf16.gmra.mxu0 %v11243_v56  ;;  %7168 = vmatmul.bf16.gmra.mxu1 %v11243_v56  ;;  %v10662_v56 = vor.u32 %v11287_v20, %v10661_v2 }
 0xe46   : > { %7842 = vmatpush.bf16.msrb.mxu2 %v10662_v56  ;;  %v11247_v56 = vld [vmem:[#allocation7 + $0xa8] sm:$0xff] }
 0xe47   : > { %10598 = vmatmul.msk.bf16.gmra.mxu2 %vm6327_vm4, %v15259_v13  ;;  %10606 = vmatmul.msk.bf16.gmra.mxu3 %vm6327_vm4, %v15259_v13 }
 0xe49   : > { %v6851_v9 = vpop.f32.mrf.mxu0  ;;  %v6885_v47 = vpop.f32.mrf.mxu1 }
 0xe4a   : > { %v14394_v54 = vpop.f32.mrf.mxu2  ;;  %v14396_v62 = vpop.f32.mrf.mxu3  ;;  %7843 = vmatpush.bf16.msrb.mxu2 %v10654_v30  ;;  %v10646_v9 = vor.u32 %v11283_v32, %v10645_v61  ;;  %v10647_v47 = vld [vmem:[#allocation9 + $0x148] sm:$0xf0] }
 0xe4e   : > { %7844 = vmatpush.bf16.msrb.mxu2 %v10646_v9 }
 0xe51   : > { %v6852_v55 = vpop.f32.mrf.mxu0  ;;  %v6886_v58 = vpop.f32.mrf.mxu1 }
 0xe52   : > { %v14398_v37 = vpop.f32.mrf.mxu2  ;;  %v14400_v4 = vpop.f32.mrf.mxu3 }
 0xe53   : > { %v7345_v35 = vpack.c.bf16 %v14398_v37, %v14394_v54  ;;  %v7346_v52 = vpack.c.bf16 %v14400_v4, %v14396_v62  ;;  %v11258_v62 = vld [vmem:[#allocation7 + $0xc0] sm:$0xff] }
 0xe54   : > { %7137 = vmatmul.bf16.gmra.mxu0 %v11244_v49  ;;  %7171 = vmatmul.bf16.gmra.mxu1 %v11244_v49  ;;  %v11284_v49 = vld [vmem:[#allocation9 + $0x154] sm:$0xf] }
 0xe55   : > { %v10658_v7 = vor.u32 %v11284_v49, %v10655_v16 }
 0xe57   : > { %10599 = vmatmul.msk.bf16.gmra.mxu2 %vm6327_vm4, %v15260_v50  ;;  %10607 = vmatmul.msk.bf16.gmra.mxu3 %vm6327_vm4, %v15260_v50 }
 0xe58   : > { %7892 = vmatpush.bf16.msra.mxu3 %v10658_v7 }
 0xe59   : > { %v6854_v27 = vpop.f32.mrf.mxu0  ;;  %v6888_v11 = vpop.f32.mrf.mxu1 }
 0xe5a   : > { %v14410_v23 = vpop.f32.mrf.mxu2  ;;  %v14412_v44 = vpop.f32.mrf.mxu3 }
 0xe61   : > { %v6855_v55 = vpop.f32.mrf.mxu0  ;;  %v6889_v58 = vpop.f32.mrf.mxu1 }
 0xe62   : > { %v14414_v12 = vpop.f32.mrf.mxu2  ;;  %v14416_v1 = vpop.f32.mrf.mxu3 }
 0xe64   : > { %7140 = vmatmul.bf16.gmra.mxu0 %v11245_v53  ;;  %7174 = vmatmul.bf16.gmra.mxu1 %v11245_v53  ;;  %v11282_v53 = vld [vmem:[#allocation9 + $0x144] sm:$0xf] }
 0xe65   : > { %v10650_v2 = vor.u32 %v11282_v53, %v10647_v47 }
 0xe67   : > { %10600 = vmatmul.msk.bf16.gmra.mxu2 %vm6327_vm4, %v15261_v63  ;;  %10608 = vmatmul.msk.bf16.gmra.mxu3 %vm6327_vm4, %v15261_v63 }
 0xe68   : > { %7893 = vmatpush.bf16.msra.mxu3 %v10650_v2 }
 0xe69   : > { %v6857_v36 = vpop.f32.mrf.mxu0  ;;  %v6891_v31 = vpop.f32.mrf.mxu1 }
 0xe6a   : > { %v14422_v3 = vpop.f32.mrf.mxu2  ;;  %v14424_v10 = vpop.f32.mrf.mxu3  ;;  %v10749_v31 = vld [vmem:[#allocation9 + $0x1b0] sm:$0xf] }
 0xe71   : > { %v6858_v30 = vpop.f32.mrf.mxu0  ;;  %v6892_v7 = vpop.f32.mrf.mxu1 }
 0xe72   : > { %v7277_v5 = vpop.f32.mrf.mxu2  ;;  %v7326_v45 = vpop.f32.mrf.mxu3  ;;  %v10751_v7 = vld [vmem:[#allocation9 + $0x1b8] sm:$0xf0] }
 0xe73   : > { %v7349_v55 = vpack.c.bf16 %v7277_v5, %v14422_v3  ;;  %v7350_v58 = vpack.c.bf16 %v7326_v45, %v14424_v10 }
 0xe74   : > { %7143 = vmatmul.bf16.gmra.mxu0 %v11246_v22  ;;  %7177 = vmatmul.bf16.gmra.mxu1 %v11246_v22  ;;  %v11248_v22 = vld [vmem:[#allocation7 + $0xb0] sm:$0xff] }
 0xe77   : > { %10601 = vmatmul.msk.bf16.gmra.mxu2 %vm6327_vm4, %v15262_v18  ;;  %10609 = vmatmul.msk.bf16.gmra.mxu3 %vm6327_vm4, %v15262_v18 }
 0xe7a   : > { %v7280_v20 = vpop.f32.mrf.mxu2  ;;  %v7329_v57 = vpop.f32.mrf.mxu3 }
 0xe82   : > { %v7282_v0 = vpop.f32.mrf.mxu2  ;;  %v7331_v26 = vpop.f32.mrf.mxu3 }
 0xe83   : > { %v7351_v53 = vpack.c.bf16 %v7282_v0, %v7280_v20  ;;  %v7352_v9 = vpack.c.bf16 %v7331_v26, %v7329_v57  ;;  %v7347_v20 = vpack.c.bf16 %v14414_v12, %v14410_v23  ;;  %v7348_v57 = vpack.c.bf16 %v14416_v1, %v14412_v44  ;;  %v11260_v23 = vld [vmem:[#allocation7 + $0xd0] sm:$0xff] }
 0xe84   : > { %7146 = vmatmul.bf16.gmra.mxu0 %v11247_v56  ;;  %7180 = vmatmul.bf16.gmra.mxu1 %v11247_v56  ;;  %v11249_v56 = vld [vmem:[#allocation7 + $0xb8] sm:$0xff] }
 0xe87   : > { %10602 = vmatmul.msk.bf16.gmra.mxu2 %vm6327_vm4, %v15263_v14  ;;  %10610 = vmatmul.msk.bf16.gmra.mxu3 %vm6327_vm4, %v15263_v14 }
 0xe8a   : > { %v7285_v49 = vpop.f32.mrf.mxu2  ;;  %v7334_v16 = vpop.f32.mrf.mxu3 }
 0xe92   : > { %v7287_v27 = vpop.f32.mrf.mxu2  ;;  %v7336_v11 = vpop.f32.mrf.mxu3 }
 0xe93   : > { %v7353_v61 = vpack.c.bf16 %v7287_v27, %v7285_v49  ;;  %v7354_v32 = vpack.c.bf16 %v7336_v11, %v7334_v16  ;;  %v11305_v49 = vld [vmem:[#allocation9 + $0x1b4] sm:$0xf0]  ;;  %v11304_v16 = vld [vmem:[#allocation9 + $0x1b4] sm:$0xf] }
 0xe94   : > { %7149 = vmatmul.bf16.gmra.mxu0 %v11248_v22  ;;  %7183 = vmatmul.bf16.gmra.mxu1 %v11248_v22  ;;  %v10750_v30 = vor.u32 %v11305_v49, %v10749_v31  ;;  %v10754_v11 = vor.u32 %v11304_v16, %v10751_v7  ;;  %v11262_v49 = vld [vmem:[#allocation7 + $0xe0] sm:$0xff] }
 0xe95   : > { %7420 = vmatpush.bf16.msrb.mxu0 %v7353_v61  ;;  %7454 = vmatpush.bf16.msrb.mxu1 %v7354_v32 }
 0xe96   : > { %8139 = vmatpush.bf16.msra.mxu2 %v10750_v30  ;;  %8188 = vmatpush.bf16.msrb.mxu3 %v10754_v11  ;;  %v11299_v11 = vld [vmem:[#allocation9 + $0x184] sm:$0xf0] }
 0xe97   : > { %10675 = vmatmul.msk.bf16.vlgmr.msrb.gmra.mxu2 %vm6327_vm4, %v15256_v59  ;;  %10683 = vmatmul.msk.bf16.vlgmr.msra.gmra.mxu3 %vm6327_vm4, %v15256_v59 }
 0xe99   : > { %7421 = vmatpush.bf16.msrb.mxu0 %v7351_v53  ;;  %7455 = vmatpush.bf16.msrb.mxu1 %v7352_v9  ;;  %v11261_v53 = vld [vmem:[#allocation7 + $0xd8] sm:$0xff] }
 0xe9a   : > { %v14438_v47 = vpop.f32.mrf.mxu2  ;;  %v14440_v2 = vpop.f32.mrf.mxu3 }
 0xe9d   : > { %7422 = vmatpush.bf16.msrb.mxu0 %v7349_v55  ;;  %7456 = vmatpush.bf16.msrb.mxu1 %v7350_v58 }
 0xea1   : > { %7423 = vmatpush.bf16.msrb.mxu0 %v7347_v20  ;;  %7457 = vmatpush.bf16.msrb.mxu1 %v7348_v57 }
 0xea2   : > { %v14448_v0 = vpop.f32.mrf.mxu2  ;;  %v14450_v26 = vpop.f32.mrf.mxu3 }
 0xea3   : > { %v7637_v3 = vpack.c.bf16 %v14448_v0, %v14438_v47  ;;  %v7638_v10 = vpack.c.bf16 %v14450_v26, %v14440_v2 }
 0xea4   : > { %7152 = vmatmul.bf16.gmra.mxu0 %v11249_v56  ;;  %7186 = vmatmul.bf16.gmra.mxu1 %v11249_v56 }
 0xea5   : > { %7424 = vmatpush.bf16.msrb.mxu0 %v7345_v35  ;;  %7458 = vmatpush.bf16.msrb.mxu1 %v7346_v52 }
 0xea7   : > { %10676 = vmatmul.msk.bf16.gmra.mxu2 %vm6327_vm4, %v15257_v19  ;;  %10684 = vmatmul.msk.bf16.gmra.mxu3 %vm6327_vm4, %v15257_v19 }
 0xea9   : > { %7425 = vmatpush.bf16.msrb.mxu0 %v7343_v48  ;;  %7459 = vmatpush.bf16.msrb.mxu1 %v7344_v28 }
 0xeaa   : > { %v14472_v54 = vpop.f32.mrf.mxu2  ;;  %v14474_v37 = vpop.f32.mrf.mxu3 }
 0xead   : > { %7426 = vmatpush.bf16.msrb.mxu0 %v7341_v42  ;;  %7460 = vmatpush.bf16.msrb.mxu1 %v7342_v43 }
 0xeb1   : > { %v7131_v4 = vpop.f32.mrf.mxu0  ;;  %v7165_v51 = vpop.f32.mrf.mxu1  ;;  %7427 = vmatpush.bf16.msrb.mxu0 %v7339_v29  ;;  %7461 = vmatpush.bf16.msrb.mxu1 %v7340_v40 }
 0xeb2   : > { %v14489_v34 = vadd.f32 %v7131_v4, %v14194_v24  ;;  %v14492_v25 = vadd.f32 %v7165_v51, %v14196_v60  ;;  %v14494_v6 = vpop.f32.mrf.mxu2  ;;  %v14496_v17 = vpop.f32.mrf.mxu3  ;;  %v10741_v51 = vld [vmem:[#allocation9 + $0x1a0] sm:$0xf] }
 0xeb3   : > { %v7639_v41 = vpack.c.bf16 %v14494_v6, %v14472_v54  ;;  %v7640_v46 = vpack.c.bf16 %v14496_v17, %v14474_v37 }
 0xeb4   : > { %7428 = vmatmul.bf16.vlgmr.msrb.gmra.mxu0 %v11258_v62  ;;  %7462 = vmatmul.bf16.vlgmr.msrb.gmra.mxu1 %v11258_v62 }
 0xeb7   : > { %10677 = vmatmul.msk.bf16.gmra.mxu2 %vm6327_vm4, %v15258_v8  ;;  %10685 = vmatmul.msk.bf16.gmra.mxu3 %vm6327_vm4, %v15258_v8 }
 0xeb9   : > { %v7133_v24 = vpop.f32.mrf.mxu0  ;;  %v7167_v60 = vpop.f32.mrf.mxu1 }
 0xeba   : > { %v14506_v33 = vpop.f32.mrf.mxu2  ;;  %v14508_v21 = vpop.f32.mrf.mxu3  ;;  %v11303_v24 = vld [vmem:[#allocation9 + $0x1a4] sm:$0xf0]  ;;  %v11302_v60 = vld [vmem:[#allocation9 + $0x1a4] sm:$0xf] }
 0xec1   : > { %v7135_v29 = vpop.f32.mrf.mxu0  ;;  %v7169_v40 = vpop.f32.mrf.mxu1 }
 0xec2   : > { %v14510_v42 = vpop.f32.mrf.mxu2  ;;  %v14512_v43 = vpop.f32.mrf.mxu3  ;;  %v10743_v29 = vld [vmem:[#allocation9 + $0x1a8] sm:$0xf0]  ;;  %v10733_v40 = vld [vmem:[#allocation9 + $0x190] sm:$0xf] }
 0xec3   : > { %v7641_v39 = vpack.c.bf16 %v14510_v42, %v14506_v33  ;;  %v7642_v38 = vpack.c.bf16 %v14512_v43, %v14508_v21 }
 0xec4   : > { %7432 = vmatmul.bf16.gmra.mxu0 %v11259_v15  ;;  %7466 = vmatmul.bf16.gmra.mxu1 %v11259_v15  ;;  %v10742_v15 = vor.u32 %v11303_v24, %v10741_v51 }
 0xec6   : > { %8140 = vmatpush.bf16.msra.mxu2 %v10742_v15  ;;  %v11263_v15 = vld [vmem:[#allocation7 + $0xe8] sm:$0xff] }
 0xec7   : > { %10678 = vmatmul.msk.bf16.gmra.mxu2 %vm6327_vm4, %v15259_v13  ;;  %10686 = vmatmul.msk.bf16.gmra.mxu3 %vm6327_vm4, %v15259_v13 }
 0xec9   : > { %v7136_v48 = vpop.f32.mrf.mxu0  ;;  %v7170_v28 = vpop.f32.mrf.mxu1 }
 0xeca   : > { %v14522_v35 = vpop.f32.mrf.mxu2  ;;  %v14524_v52 = vpop.f32.mrf.mxu3  ;;  %v11301_v48 = vld [vmem:[#allocation9 + $0x194] sm:$0xf0]  ;;  %v10746_v28 = vor.u32 %v11302_v60, %v10743_v29 }
 0xecc   : > { %8189 = vmatpush.bf16.msrb.mxu3 %v10746_v28 }
 0xed1   : > { %v7138_v44 = vpop.f32.mrf.mxu0  ;;  %v7172_v12 = vpop.f32.mrf.mxu1 }
 0xed2   : > { %v14526_v1 = vpop.f32.mrf.mxu2  ;;  %v14528_v5 = vpop.f32.mrf.mxu3  ;;  %v10735_v44 = vld [vmem:[#allocation9 + $0x198] sm:$0xf0]  ;;  %v10734_v12 = vor.u32 %v11301_v48, %v10733_v40 }
 0xed3   : > { %v7643_v45 = vpack.c.bf16 %v14526_v1, %v14522_v35  ;;  %v7644_v36 = vpack.c.bf16 %v14528_v5, %v14524_v52  ;;  %v11274_v1 = vld [vmem:[#allocation7 + $0x100] sm:$0xff] }
 0xed4   : > { %7435 = vmatmul.bf16.gmra.mxu0 %v11260_v23  ;;  %7469 = vmatmul.bf16.gmra.mxu1 %v11260_v23  ;;  %v11300_v23 = vld [vmem:[#allocation9 + $0x194] sm:$0xf] }
 0xed5   : > { %v10738_v31 = vor.u32 %v11300_v23, %v10735_v44  ;;  %8141 = vmatpush.bf16.msra.mxu2 %v10734_v12 }
 0xed7   : > { %10679 = vmatmul.msk.bf16.gmra.mxu2 %vm6327_vm4, %v15260_v50  ;;  %10687 = vmatmul.msk.bf16.gmra.mxu3 %vm6327_vm4, %v15260_v50 }
 0xed8   : > { %8190 = vmatpush.bf16.msrb.mxu3 %v10738_v31 }
 0xed9   : > { %v7139_v22 = vpop.f32.mrf.mxu0  ;;  %v7173_v27 = vpop.f32.mrf.mxu1 }
 0xeda   : > { %v14538_v61 = vpop.f32.mrf.mxu2  ;;  %v14540_v32 = vpop.f32.mrf.mxu3  ;;  %v10725_v27 = vld [vmem:[#allocation9 + $0x180] sm:$0xf] }
 0xee1   : > { %v7141_v9 = vpop.f32.mrf.mxu0  ;;  %v7175_v55 = vpop.f32.mrf.mxu1 }
 0xee2   : > { %v14542_v58 = vpop.f32.mrf.mxu2  ;;  %v14544_v20 = vpop.f32.mrf.mxu3  ;;  %v10726_v9 = vor.u32 %v11299_v11, %v10725_v27  ;;  %v10727_v55 = vld [vmem:[#allocation9 + $0x188] sm:$0xf0] }
 0xee4   : > { %7438 = vmatmul.bf16.gmra.mxu0 %v11261_v53  ;;  %7472 = vmatmul.bf16.gmra.mxu1 %v11261_v53  ;;  %v11298_v53 = vld [vmem:[#allocation9 + $0x184] sm:$0xf] }
 0xee5   : > { %8142 = vmatpush.bf16.msra.mxu2 %v10726_v9 }
 0xee7   : > { %10680 = vmatmul.msk.bf16.gmra.mxu2 %vm6327_vm4, %v15261_v63  ;;  %10688 = vmatmul.msk.bf16.gmra.mxu3 %vm6327_vm4, %v15261_v63 }
 0xee9   : > { %v7142_v57 = vpop.f32.mrf.mxu0  ;;  %v7176_v56 = vpop.f32.mrf.mxu1 }
 0xeea   : > { %v14550_v62 = vpop.f32.mrf.mxu2  ;;  %v14552_v4 = vpop.f32.mrf.mxu3  ;;  %v10730_v57 = vor.u32 %v11298_v53, %v10727_v55 }
 0xeec   : > { %8191 = vmatpush.bf16.msrb.mxu3 %v10730_v57 }
 0xef1   : > { %v7144_v16 = vpop.f32.mrf.mxu0  ;;  %v7178_v30 = vpop.f32.mrf.mxu1 }
 0xef2   : > { %v7575_v7 = vpop.f32.mrf.mxu2  ;;  %v7624_v22 = vpop.f32.mrf.mxu3 }
 0xef4   : > { %7441 = vmatmul.bf16.gmra.mxu0 %v11262_v49  ;;  %7475 = vmatmul.bf16.gmra.mxu1 %v11262_v49  ;;  %v11264_v49 = vld [vmem:[#allocation7 + $0xf0] sm:$0xff] }
 0xef7   : > { %10681 = vmatmul.msk.bf16.gmra.mxu2 %vm6327_vm4, %v15262_v18  ;;  %10689 = vmatmul.msk.bf16.gmra.mxu3 %vm6327_vm4, %v15262_v18 }
 0xef9   : > { %v7145_v56 = vpop.f32.mrf.mxu0  ;;  %v7179_v51 = vpop.f32.mrf.mxu1 }
 0xefa   : > { %v7578_v24 = vpop.f32.mrf.mxu2  ;;  %v7627_v60 = vpop.f32.mrf.mxu3 }
 0xf01   : > { %v7147_v29 = vpop.f32.mrf.mxu0  ;;  %v7181_v40 = vpop.f32.mrf.mxu1 }
 0xf02   : > { %v7580_v48 = vpop.f32.mrf.mxu2  ;;  %v7629_v28 = vpop.f32.mrf.mxu3  ;;  %v7647_v40 = vpack.c.bf16 %v7575_v7, %v14550_v62 }
 0xf03   : > { %v7649_v55 = vpack.c.bf16 %v7580_v48, %v7578_v24  ;;  %v7650_v57 = vpack.c.bf16 %v7629_v28, %v7627_v60  ;;  %v7645_v24 = vpack.c.bf16 %v14542_v58, %v14538_v61  ;;  %v7646_v60 = vpack.c.bf16 %v14544_v20, %v14540_v32  ;;  %v11265_v48 = vld [vmem:[#allocation7 + $0xf8] sm:$0xff]  ;;  %v11276_v58 = vld [vmem:[#allocation7 + $0x110] sm:$0xff] }
 0xf04   : > { %7444 = vmatmul.bf16.gmra.mxu0 %v11263_v15  ;;  %7478 = vmatmul.bf16.gmra.mxu1 %v11263_v15 }
 0xf07   : > { %10682 = vmatmul.msk.bf16.gmra.mxu2 %vm6327_vm4, %v15263_v14  ;;  %10690 = vmatmul.msk.bf16.gmra.mxu3 %vm6327_vm4, %v15263_v14 }
 0xf09   : > { %v7148_v23 = vpop.f32.mrf.mxu0  ;;  %v7182_v44 = vpop.f32.mrf.mxu1 }
 0xf0a   : > { %v7583_v12 = vpop.f32.mrf.mxu2  ;;  %v7632_v31 = vpop.f32.mrf.mxu3  ;;  %v7648_v23 = vpack.c.bf16 %v7624_v22, %v14552_v4 }
 0xf11   : > { %v7150_v16 = vpop.f32.mrf.mxu0  ;;  %v7184_v30 = vpop.f32.mrf.mxu1 }
 0xf12   : > { %v7585_v27 = vpop.f32.mrf.mxu2  ;;  %v7634_v11 = vpop.f32.mrf.mxu3 }
 0xf13   : > { %v7651_v53 = vpack.c.bf16 %v7585_v27, %v7583_v12  ;;  %v7652_v9 = vpack.c.bf16 %v7634_v11, %v7632_v31  ;;  %v10829_v27 = vld [vmem:[#allocation9 + $0x1f0] sm:$0xf]  ;;  %v11321_v11 = vld [vmem:[#allocation9 + $0x1f4] sm:$0xf0] }
 0xf14   : > { %7447 = vmatmul.bf16.gmra.mxu0 %v11264_v49  ;;  %7481 = vmatmul.bf16.gmra.mxu1 %v11264_v49 }
 0xf15   : > { %7718 = vmatpush.bf16.msra.mxu0 %v7651_v53  ;;  %7752 = vmatpush.bf16.msra.mxu1 %v7652_v9  ;;  %v11320_v53 = vld [vmem:[#allocation9 + $0x1f4] sm:$0xf]  ;;  %v10830_v9 = vor.u32 %v11321_v11, %v10829_v27  ;;  %v11278_v11 = vld [vmem:[#allocation7 + $0x120] sm:$0xff] }
 0xf17   : > { %10755 = vmatmul.msk.bf16.vlgmr.msra.gmra.mxu2 %vm6327_vm4, %v15256_v59  ;;  %10763 = vmatmul.msk.bf16.vlgmr.msrb.gmra.mxu3 %vm6327_vm4, %v15256_v59 }
 0xf18   : > { %8437 = vmatpush.bf16.msrb.mxu2 %v10830_v9 }
 0xf19   : > { %v7151_v56 = vpop.f32.mrf.mxu0  ;;  %v7185_v51 = vpop.f32.mrf.mxu1  ;;  %7719 = vmatpush.bf16.msra.mxu0 %v7649_v55  ;;  %7753 = vmatpush.bf16.msra.mxu1 %v7650_v57  ;;  %v10831_v55 = vld [vmem:[#allocation9 + $0x1f8] sm:$0xf0] }
 0xf1a   : > { %v14566_v15 = vpop.f32.mrf.mxu2  ;;  %v14568_v29 = vpop.f32.mrf.mxu3  ;;  %v10834_v51 = vor.u32 %v11320_v53, %v10831_v55 }
 0xf1c   : > { %8486 = vmatpush.bf16.msra.mxu3 %v10834_v51  ;;  %v11315_v51 = vld [vmem:[#allocation9 + $0x1c4] sm:$0xf0] }
 0xf1d   : > { %7720 = vmatpush.bf16.msra.mxu0 %v7647_v40  ;;  %7754 = vmatpush.bf16.msra.mxu1 %v7648_v23 }
 0xf21   : > { %v7153_v28 = vpop.f32.mrf.mxu0  ;;  %v7187_v44 = vpop.f32.mrf.mxu1  ;;  %7721 = vmatpush.bf16.msra.mxu0 %v7645_v24  ;;  %7755 = vmatpush.bf16.msra.mxu1 %v7646_v60  ;;  %v11277_v24 = vld [vmem:[#allocation7 + $0x118] sm:$0xff] }
 0xf22   : > { %v14576_v12 = vpop.f32.mrf.mxu2  ;;  %v14578_v31 = vpop.f32.mrf.mxu3 }
 0xf23   : > { %v7935_v62 = vpack.c.bf16 %v14576_v12, %v14566_v15  ;;  %v7936_v4 = vpack.c.bf16 %v14578_v31, %v14568_v29 }
 0xf24   : > { %7450 = vmatmul.bf16.gmra.mxu0 %v11265_v48  ;;  %7484 = vmatmul.bf16.gmra.mxu1 %v11265_v48 }
 0xf25   : > { %7722 = vmatpush.bf16.msra.mxu0 %v7643_v45  ;;  %7756 = vmatpush.bf16.msra.mxu1 %v7644_v36 }
 0xf27   : > { %10756 = vmatmul.msk.bf16.gmra.mxu2 %vm6327_vm4, %v15257_v19  ;;  %10764 = vmatmul.msk.bf16.gmra.mxu3 %vm6327_vm4, %v15257_v19 }
 0xf29   : > { %v7154_v61 = vpop.f32.mrf.mxu0  ;;  %v7188_v32 = vpop.f32.mrf.mxu1  ;;  %7723 = vmatpush.bf16.msra.mxu0 %v7641_v39  ;;  %7757 = vmatpush.bf16.msra.mxu1 %v7642_v38 }
 0xf2a   : > { %v14600_v35 = vpop.f32.mrf.mxu2  ;;  %v14602_v52 = vpop.f32.mrf.mxu3 }
 0xf2d   : > { %7724 = vmatpush.bf16.msra.mxu0 %v7639_v41  ;;  %7758 = vmatpush.bf16.msra.mxu1 %v7640_v46 }
 0xf31   : > { %v7429_v5 = vpop.f32.mrf.mxu0  ;;  %v7463_v33 = vpop.f32.mrf.mxu1  ;;  %7725 = vmatpush.bf16.msra.mxu0 %v7637_v3  ;;  %7759 = vmatpush.bf16.msra.mxu1 %v7638_v10  ;;  %v11275_v10 = vld [vmem:[#allocation7 + $0x108] sm:$0xff] }
 0xf32   : > { %v14617_v21 = vadd.f32 %v7429_v5, %v14489_v34  ;;  %v14620_v54 = vadd.f32 %v7463_v33, %v14492_v25  ;;  %v14622_v6 = vpop.f32.mrf.mxu2  ;;  %v14624_v37 = vpop.f32.mrf.mxu3  ;;  %v10821_v33 = vld [vmem:[#allocation9 + $0x1e0] sm:$0xf] }
 0xf33   : > { %v7937_v17 = vpack.c.bf16 %v14622_v6, %v14600_v35  ;;  %v7938_v47 = vpack.c.bf16 %v14624_v37, %v14602_v52 }
 0xf34   : > { %7726 = vmatmul.bf16.vlgmr.msra.gmra.mxu0 %v11274_v1  ;;  %7760 = vmatmul.bf16.vlgmr.msra.gmra.mxu1 %v11274_v1 }
 0xf37   : > { %10757 = vmatmul.msk.bf16.gmra.mxu2 %vm6327_vm4, %v15258_v8  ;;  %10765 = vmatmul.msk.bf16.gmra.mxu3 %vm6327_vm4, %v15258_v8 }
 0xf39   : > { %v7431_v2 = vpop.f32.mrf.mxu0  ;;  %v7465_v0 = vpop.f32.mrf.mxu1 }
 0xf3a   : > { %v14634_v26 = vpop.f32.mrf.mxu2  ;;  %v14636_v3 = vpop.f32.mrf.mxu3  ;;  %v11319_v2 = vld [vmem:[#allocation9 + $0x1e4] sm:$0xf0]  ;;  %v11318_v0 = vld [vmem:[#allocation9 + $0x1e4] sm:$0xf] }
 0xf41   : > { %v7433_v34 = vpop.f32.mrf.mxu0  ;;  %v7467_v25 = vpop.f32.mrf.mxu1 }
 0xf42   : > { %v14638_v41 = vpop.f32.mrf.mxu2  ;;  %v14640_v46 = vpop.f32.mrf.mxu3  ;;  %v10823_v34 = vld [vmem:[#allocation9 + $0x1e8] sm:$0xf0]  ;;  %v10813_v25 = vld [vmem:[#allocation9 + $0x1d0] sm:$0xf] }
 0xf43   : > { %v7939_v42 = vpack.c.bf16 %v14638_v41, %v14634_v26  ;;  %v7940_v43 = vpack.c.bf16 %v14640_v46, %v14636_v3 }
 0xf44   : > { %7730 = vmatmul.bf16.gmra.mxu0 %v11275_v10  ;;  %7764 = vmatmul.bf16.gmra.mxu1 %v11275_v10  ;;  %v10822_v10 = vor.u32 %v11319_v2, %v10821_v33 }
 0xf46   : > { %8438 = vmatpush.bf16.msrb.mxu2 %v10822_v10  ;;  %v11279_v10 = vld [vmem:[#allocation7 + $0x128] sm:$0xff] }
 0xf47   : > { %10758 = vmatmul.msk.bf16.gmra.mxu2 %vm6327_vm4, %v15259_v13  ;;  %10766 = vmatmul.msk.bf16.gmra.mxu3 %vm6327_vm4, %v15259_v13 }
 0xf49   : > { %v7434_v39 = vpop.f32.mrf.mxu0  ;;  %v7468_v38 = vpop.f32.mrf.mxu1 }
 0xf4a   : > { %v14650_v45 = vpop.f32.mrf.mxu2  ;;  %v14652_v36 = vpop.f32.mrf.mxu3  ;;  %v11317_v39 = vld [vmem:[#allocation9 + $0x1d4] sm:$0xf0]  ;;  %v10826_v38 = vor.u32 %v11318_v0, %v10823_v34 }
 0xf4c   : > { %8487 = vmatpush.bf16.msra.mxu3 %v10826_v38 }
 0xf51   : > { %v7436_v20 = vpop.f32.mrf.mxu0  ;;  %v7470_v7 = vpop.f32.mrf.mxu1 }
 0xf52   : > { %v14654_v22 = vpop.f32.mrf.mxu2  ;;  %v14656_v49 = vpop.f32.mrf.mxu3  ;;  %v10815_v20 = vld [vmem:[#allocation9 + $0x1d8] sm:$0xf0]  ;;  %v10814_v7 = vor.u32 %v11317_v39, %v10813_v25 }
 0xf53   : > { %v7941_v16 = vpack.c.bf16 %v14654_v22, %v14650_v45  ;;  %v7942_v30 = vpack.c.bf16 %v14656_v49, %v14652_v36  ;;  %v11290_v22 = vld [vmem:[#allocation7 + $0x140] sm:$0xff] }
 0xf54   : > { %7733 = vmatmul.bf16.gmra.mxu0 %v11276_v58  ;;  %7767 = vmatmul.bf16.gmra.mxu1 %v11276_v58  ;;  %v11316_v58 = vld [vmem:[#allocation9 + $0x1d4] sm:$0xf] }
 0xf55   : > { %v10818_v27 = vor.u32 %v11316_v58, %v10815_v20  ;;  %8439 = vmatpush.bf16.msrb.mxu2 %v10814_v7 }
 0xf57   : > { %10759 = vmatmul.msk.bf16.gmra.mxu2 %vm6327_vm4, %v15260_v50  ;;  %10767 = vmatmul.msk.bf16.gmra.mxu3 %vm6327_vm4, %v15260_v50 }
 0xf58   : > { %8488 = vmatpush.bf16.msra.mxu3 %v10818_v27 }
 0xf59   : > { %v7437_v57 = vpop.f32.mrf.mxu0  ;;  %v7471_v56 = vpop.f32.mrf.mxu1 }
 0xf5a   : > { %v14666_v40 = vpop.f32.mrf.mxu2  ;;  %v14668_v23 = vpop.f32.mrf.mxu3  ;;  %v10805_v56 = vld [vmem:[#allocation9 + $0x1c0] sm:$0xf] }
 0xf61   : > { %v7439_v60 = vpop.f32.mrf.mxu0  ;;  %v7473_v48 = vpop.f32.mrf.mxu1 }
 0xf62   : > { %v14670_v28 = vpop.f32.mrf.mxu2  ;;  %v14672_v44 = vpop.f32.mrf.mxu3  ;;  %v10806_v60 = vor.u32 %v11315_v51, %v10805_v56  ;;  %v10807_v48 = vld [vmem:[#allocation9 + $0x1c8] sm:$0xf0] }
 0xf64   : > { %7736 = vmatmul.bf16.gmra.mxu0 %v11277_v24  ;;  %7770 = vmatmul.bf16.gmra.mxu1 %v11277_v24  ;;  %v11314_v24 = vld [vmem:[#allocation9 + $0x1c4] sm:$0xf] }
 0xf65   : > { %8440 = vmatpush.bf16.msrb.mxu2 %v10806_v60 }
 0xf67   : > { %10760 = vmatmul.msk.bf16.gmra.mxu2 %vm6327_vm4, %v15261_v63  ;;  %10768 = vmatmul.msk.bf16.gmra.mxu3 %vm6327_vm4, %v15261_v63 }
 0xf69   : > { %v7440_v61 = vpop.f32.mrf.mxu0  ;;  %v7474_v32 = vpop.f32.mrf.mxu1 }
 0xf6a   : > { %v14678_v1 = vpop.f32.mrf.mxu2  ;;  %v14680_v5 = vpop.f32.mrf.mxu3  ;;  %v10810_v61 = vor.u32 %v11314_v24, %v10807_v48 }
 0xf6c   : > { %8489 = vmatpush.bf16.msra.mxu3 %v10810_v61 }
 0xf71   : > { %v7442_v53 = vpop.f32.mrf.mxu0  ;;  %v7476_v9 = vpop.f32.mrf.mxu1 }
 0xf72   : > { %v7873_v55 = vpop.f32.mrf.mxu2  ;;  %v7922_v57 = vpop.f32.mrf.mxu3 }
 0xf74   : > { %7739 = vmatmul.bf16.gmra.mxu0 %v11278_v11  ;;  %7773 = vmatmul.bf16.gmra.mxu1 %v11278_v11  ;;  %v11280_v11 = vld [vmem:[#allocation7 + $0x130] sm:$0xff] }
 0xf77   : > { %10761 = vmatmul.msk.bf16.gmra.mxu2 %vm6327_vm4, %v15262_v18  ;;  %10769 = vmatmul.msk.bf16.gmra.mxu3 %vm6327_vm4, %v15262_v18 }
 0xf79   : > { %v7443_v32 = vpop.f32.mrf.mxu0  ;;  %v7477_v33 = vpop.f32.mrf.mxu1 }
 0xf7a   : > { %v7876_v2 = vpop.f32.mrf.mxu2  ;;  %v7925_v0 = vpop.f32.mrf.mxu3 }
 0xf81   : > { %v7445_v34 = vpop.f32.mrf.mxu0  ;;  %v7479_v25 = vpop.f32.mrf.mxu1 }
 0xf82   : > { %v7878_v39 = vpop.f32.mrf.mxu2  ;;  %v7927_v38 = vpop.f32.mrf.mxu3  ;;  %v7945_v25 = vpack.c.bf16 %v7873_v55, %v14678_v1 }
 0xf83   : > { %v7947_v48 = vpack.c.bf16 %v7878_v39, %v7876_v2  ;;  %v7948_v61 = vpack.c.bf16 %v7927_v38, %v7925_v0  ;;  %v7943_v2 = vpack.c.bf16 %v14670_v28, %v14666_v40  ;;  %v7944_v0 = vpack.c.bf16 %v14672_v44, %v14668_v23  ;;  %v11281_v39 = vld [vmem:[#allocation7 + $0x138] sm:$0xff]  ;;  %v11292_v28 = vld [vmem:[#allocation7 + $0x150] sm:$0xff] }
 0xf84   : > { %7742 = vmatmul.bf16.gmra.mxu0 %v11279_v10  ;;  %7776 = vmatmul.bf16.gmra.mxu1 %v11279_v10 }
 0xf87   : > { %10762 = vmatmul.msk.bf16.gmra.mxu2 %vm6327_vm4, %v15263_v14  ;;  %10770 = vmatmul.msk.bf16.gmra.mxu3 %vm6327_vm4, %v15263_v14 }
 0xf89   : > { %v7446_v58 = vpop.f32.mrf.mxu0  ;;  %v7480_v20 = vpop.f32.mrf.mxu1 }
 0xf8a   : > { %v7881_v7 = vpop.f32.mrf.mxu2  ;;  %v7930_v27 = vpop.f32.mrf.mxu3  ;;  %v7946_v58 = vpack.c.bf16 %v7922_v57, %v14680_v5 }
 0xf91   : > { %v7448_v53 = vpop.f32.mrf.mxu0  ;;  %v7482_v9 = vpop.f32.mrf.mxu1 }
 0xf92   : > { %v7883_v56 = vpop.f32.mrf.mxu2  ;;  %v7932_v51 = vpop.f32.mrf.mxu3 }
 0xf93   : > { %v7949_v24 = vpack.c.bf16 %v7883_v56, %v7881_v7  ;;  %v7950_v60 = vpack.c.bf16 %v7932_v51, %v7930_v27  ;;  %v10909_v56 = vld [vmem:[#allocation9 + $0x230] sm:$0xf]  ;;  %v11337_v51 = vld [vmem:[#allocation9 + $0x234] sm:$0xf0] }
 0xf94   : > { %7745 = vmatmul.bf16.gmra.mxu0 %v11280_v11  ;;  %7779 = vmatmul.bf16.gmra.mxu1 %v11280_v11 }
 0xf95   : > { %8016 = vmatpush.bf16.msrb.mxu0 %v7949_v24  ;;  %8050 = vmatpush.bf16.msrb.mxu1 %v7950_v60  ;;  %v11336_v24 = vld [vmem:[#allocation9 + $0x234] sm:$0xf]  ;;  %v10910_v60 = vor.u32 %v11337_v51, %v10909_v56  ;;  %v11294_v51 = vld [vmem:[#allocation7 + $0x160] sm:$0xff] }
 0xf97   : > { %10835 = vmatmul.msk.bf16.vlgmr.msrb.gmra.mxu2 %vm6327_vm4, %v15256_v59  ;;  %10843 = vmatmul.msk.bf16.vlgmr.msra.gmra.mxu3 %vm6327_vm4, %v15256_v59 }
 0xf98   : > { %8735 = vmatpush.bf16.msra.mxu2 %v10910_v60 }
 0xf99   : > { %v7449_v32 = vpop.f32.mrf.mxu0  ;;  %v7483_v33 = vpop.f32.mrf.mxu1  ;;  %8017 = vmatpush.bf16.msrb.mxu0 %v7947_v48  ;;  %8051 = vmatpush.bf16.msrb.mxu1 %v7948_v61  ;;  %v10911_v48 = vld [vmem:[#allocation9 + $0x238] sm:$0xf0] }
 0xf9a   : > { %v14694_v10 = vpop.f32.mrf.mxu2  ;;  %v14696_v34 = vpop.f32.mrf.mxu3  ;;  %v10914_v33 = vor.u32 %v11336_v24, %v10911_v48 }
 0xf9c   : > { %8784 = vmatpush.bf16.msrb.mxu3 %v10914_v33  ;;  %v11331_v33 = vld [vmem:[#allocation9 + $0x204] sm:$0xf0] }
 0xf9d   : > { %8018 = vmatpush.bf16.msrb.mxu0 %v7945_v25  ;;  %8052 = vmatpush.bf16.msrb.mxu1 %v7946_v58 }
 0xfa1   : > { %v7451_v38 = vpop.f32.mrf.mxu0  ;;  %v7485_v20 = vpop.f32.mrf.mxu1  ;;  %8019 = vmatpush.bf16.msrb.mxu0 %v7943_v2  ;;  %8053 = vmatpush.bf16.msrb.mxu1 %v7944_v0  ;;  %v11293_v2 = vld [vmem:[#allocation7 + $0x158] sm:$0xff] }
 0xfa2   : > { %v14704_v7 = vpop.f32.mrf.mxu2  ;;  %v14706_v27 = vpop.f32.mrf.mxu3 }
 0xfa3   : > { %v8233_v1 = vpack.c.bf16 %v14704_v7, %v14694_v10  ;;  %v8234_v5 = vpack.c.bf16 %v14706_v27, %v14696_v34 }
 0xfa4   : > { %7748 = vmatmul.bf16.gmra.mxu0 %v11281_v39  ;;  %7782 = vmatmul.bf16.gmra.mxu1 %v11281_v39 }
 0xfa5   : > { %8020 = vmatpush.bf16.msrb.mxu0 %v7941_v16  ;;  %8054 = vmatpush.bf16.msrb.mxu1 %v7942_v30 }
 0xfa7   : > { %10836 = vmatmul.msk.bf16.gmra.mxu2 %vm6327_vm4, %v15257_v19  ;;  %10844 = vmatmul.msk.bf16.gmra.mxu3 %vm6327_vm4, %v15257_v19 }
 0xfa9   : > { %v7452_v40 = vpop.f32.mrf.mxu0  ;;  %v7486_v23 = vpop.f32.mrf.mxu1  ;;  %8021 = vmatpush.bf16.msrb.mxu0 %v7939_v42  ;;  %8055 = vmatpush.bf16.msrb.mxu1 %v7940_v43 }
 0xfaa   : > { %v14728_v45 = vpop.f32.mrf.mxu2  ;;  %v14730_v36 = vpop.f32.mrf.mxu3 }
 0xfad   : > { %8022 = vmatpush.bf16.msrb.mxu0 %v7937_v17  ;;  %8056 = vmatpush.bf16.msrb.mxu1 %v7938_v47 }
 0xfb1   : > { %v7727_v49 = vpop.f32.mrf.mxu0  ;;  %v7761_v26 = vpop.f32.mrf.mxu1  ;;  %8023 = vmatpush.bf16.msrb.mxu0 %v7935_v62  ;;  %8057 = vmatpush.bf16.msrb.mxu1 %v7936_v4  ;;  %v11291_v4 = vld [vmem:[#allocation7 + $0x148] sm:$0xff] }
 0xfb2   : > { %v14745_v3 = vadd.f32 %v7727_v49, %v14617_v21  ;;  %v14748_v35 = vadd.f32 %v7761_v26, %v14620_v54  ;;  %v14750_v6 = vpop.f32.mrf.mxu2  ;;  %v14752_v52 = vpop.f32.mrf.mxu3  ;;  %v10901_v26 = vld [vmem:[#allocation9 + $0x220] sm:$0xf] }
 0xfb3   : > { %v8235_v37 = vpack.c.bf16 %v14750_v6, %v14728_v45  ;;  %v8236_v15 = vpack.c.bf16 %v14752_v52, %v14730_v36 }
 0xfb4   : > { %8024 = vmatmul.bf16.vlgmr.msrb.gmra.mxu0 %v11290_v22  ;;  %8058 = vmatmul.bf16.vlgmr.msrb.gmra.mxu1 %v11290_v22 }
 0xfb7   : > { %10837 = vmatmul.msk.bf16.gmra.mxu2 %vm6327_vm4, %v15258_v8  ;;  %10845 = vmatmul.msk.bf16.gmra.mxu3 %vm6327_vm4, %v15258_v8 }
 0xfb9   : > { %v7729_v29 = vpop.f32.mrf.mxu0  ;;  %v7763_v12 = vpop.f32.mrf.mxu1 }
 0xfba   : > { %v14762_v31 = vpop.f32.mrf.mxu2  ;;  %v14764_v62 = vpop.f32.mrf.mxu3  ;;  %v11335_v29 = vld [vmem:[#allocation9 + $0x224] sm:$0xf0]  ;;  %v11334_v12 = vld [vmem:[#allocation9 + $0x224] sm:$0xf] }
 0xfc1   : > { %v7731_v21 = vpop.f32.mrf.mxu0  ;;  %v7765_v54 = vpop.f32.mrf.mxu1 }
 0xfc2   : > { %v14766_v17 = vpop.f32.mrf.mxu2  ;;  %v14768_v47 = vpop.f32.mrf.mxu3  ;;  %v10903_v21 = vld [vmem:[#allocation9 + $0x228] sm:$0xf0]  ;;  %v10893_v54 = vld [vmem:[#allocation9 + $0x210] sm:$0xf] }
 0xfc3   : > { %v8237_v41 = vpack.c.bf16 %v14766_v17, %v14762_v31  ;;  %v8238_v46 = vpack.c.bf16 %v14768_v47, %v14764_v62 }
 0xfc4   : > { %8028 = vmatmul.bf16.gmra.mxu0 %v11291_v4  ;;  %8062 = vmatmul.bf16.gmra.mxu1 %v11291_v4  ;;  %v10902_v4 = vor.u32 %v11335_v29, %v10901_v26 }
 0xfc6   : > { %8736 = vmatpush.bf16.msra.mxu2 %v10902_v4  ;;  %v11295_v4 = vld [vmem:[#allocation7 + $0x168] sm:$0xff] }
 0xfc7   : > { %10838 = vmatmul.msk.bf16.gmra.mxu2 %vm6327_vm4, %v15259_v13  ;;  %10846 = vmatmul.msk.bf16.gmra.mxu3 %vm6327_vm4, %v15259_v13 }
 0xfc9   : > { %v7732_v42 = vpop.f32.mrf.mxu0  ;;  %v7766_v43 = vpop.f32.mrf.mxu1 }
 0xfca   : > { %v14778_v16 = vpop.f32.mrf.mxu2  ;;  %v14780_v30 = vpop.f32.mrf.mxu3  ;;  %v11333_v42 = vld [vmem:[#allocation9 + $0x214] sm:$0xf0]  ;;  %v10906_v43 = vor.u32 %v11334_v12, %v10903_v21 }
 0xfcc   : > { %8785 = vmatpush.bf16.msrb.mxu3 %v10906_v43 }
 0xfd1   : > { %v7734_v44 = vpop.f32.mrf.mxu0  ;;  %v7768_v55 = vpop.f32.mrf.mxu1 }
 0xfd2   : > { %v14782_v57 = vpop.f32.mrf.mxu2  ;;  %v14784_v11 = vpop.f32.mrf.mxu3  ;;  %v10895_v44 = vld [vmem:[#allocation9 + $0x218] sm:$0xf0]  ;;  %v10894_v55 = vor.u32 %v11333_v42, %v10893_v54 }
 0xfd3   : > { %v8239_v53 = vpack.c.bf16 %v14782_v57, %v14778_v16  ;;  %v8240_v9 = vpack.c.bf16 %v14784_v11, %v14780_v30 }
 0xfd4   : > { %8031 = vmatmul.bf16.gmra.mxu0 %v11292_v28  ;;  %8065 = vmatmul.bf16.gmra.mxu1 %v11292_v28  ;;  %v11332_v28 = vld [vmem:[#allocation9 + $0x214] sm:$0xf] }
 0xfd5   : > { %v10898_v56 = vor.u32 %v11332_v28, %v10895_v44  ;;  %8737 = vmatpush.bf16.msra.mxu2 %v10894_v55 }
 0xfd7   : > { %10839 = vmatmul.msk.bf16.gmra.mxu2 %vm6327_vm4, %v15260_v50  ;;  %10847 = vmatmul.msk.bf16.gmra.mxu3 %vm6327_vm4, %v15260_v50 }
 0xfd8   : > { %8786 = vmatpush.bf16.msrb.mxu3 %v10898_v56 }
 0xfd9   : > { %v7735_v61 = vpop.f32.mrf.mxu0  ;;  %v7769_v32 = vpop.f32.mrf.mxu1 }
 0xfda   : > { %v14794_v25 = vpop.f32.mrf.mxu2  ;;  %v14796_v58 = vpop.f32.mrf.mxu3  ;;  %v10885_v32 = vld [vmem:[#allocation9 + $0x200] sm:$0xf] }
 0xfe1   : > { %v7737_v0 = vpop.f32.mrf.mxu0  ;;  %v7771_v39 = vpop.f32.mrf.mxu1 }
 0xfe2   : > { %v14798_v38 = vpop.f32.mrf.mxu2  ;;  %v14800_v20 = vpop.f32.mrf.mxu3  ;;  %v10886_v0 = vor.u32 %v11331_v33, %v10885_v32  ;;  %v10887_v39 = vld [vmem:[#allocation9 + $0x208] sm:$0xf0] }
 0xfe4   : > { %8034 = vmatmul.bf16.gmra.mxu0 %v11293_v2  ;;  %8068 = vmatmul.bf16.gmra.mxu1 %v11293_v2  ;;  %v11330_v2 = vld [vmem:[#allocation9 + $0x204] sm:$0xf] }
 0xfe5   : > { %8738 = vmatpush.bf16.msra.mxu2 %v10886_v0 }
 0xfe7   : > { %10840 = vmatmul.msk.bf16.gmra.mxu2 %vm6327_vm4, %v15261_v63  ;;  %10848 = vmatmul.msk.bf16.gmra.mxu3 %vm6327_vm4, %v15261_v63 }
 0xfe9   : > { %v7738_v40 = vpop.f32.mrf.mxu0  ;;  %v7772_v23 = vpop.f32.mrf.mxu1 }
 0xfea   : > { %v14806_v22 = vpop.f32.mrf.mxu2  ;;  %v14808_v49 = vpop.f32.mrf.mxu3  ;;  %v10890_v40 = vor.u32 %v11330_v2, %v10887_v39 }
 0xfec   : > { %8787 = vmatpush.bf16.msrb.mxu3 %v10890_v40 }
 0xff1   : > { %v7740_v24 = vpop.f32.mrf.mxu0  ;;  %v7774_v60 = vpop.f32.mrf.mxu1 }
 0xff2   : > { %v8171_v48 = vpop.f32.mrf.mxu2  ;;  %v8220_v61 = vpop.f32.mrf.mxu3 }
 0xff4   : > { %8037 = vmatmul.bf16.gmra.mxu0 %v11294_v51  ;;  %8071 = vmatmul.bf16.gmra.mxu1 %v11294_v51  ;;  %v11296_v51 = vld [vmem:[#allocation7 + $0x170] sm:$0xff] }
 0xff7   : > { %10841 = vmatmul.msk.bf16.gmra.mxu2 %vm6327_vm4, %v15262_v18  ;;  %10849 = vmatmul.msk.bf16.gmra.mxu3 %vm6327_vm4, %v15262_v18 }
 0xff9   : > { %v7741_v23 = vpop.f32.mrf.mxu0  ;;  %v7775_v26 = vpop.f32.mrf.mxu1 }
 0xffa   : > { %v8174_v29 = vpop.f32.mrf.mxu2  ;;  %v8223_v12 = vpop.f32.mrf.mxu3 }
0x1001   : > { %v7743_v21 = vpop.f32.mrf.mxu0  ;;  %v7777_v54 = vpop.f32.mrf.mxu1 }
0x1002   : > { %v8176_v42 = vpop.f32.mrf.mxu2  ;;  %v8225_v43 = vpop.f32.mrf.mxu3  ;;  %v8243_v54 = vpack.c.bf16 %v8171_v48, %v14806_v22 }
0x1003   : > { %v8245_v39 = vpack.c.bf16 %v8176_v42, %v8174_v29  ;;  %v8246_v40 = vpack.c.bf16 %v8225_v43, %v8223_v12  ;;  %v8241_v29 = vpack.c.bf16 %v14798_v38, %v14794_v25  ;;  %v11297_v12 = vld [vmem:[#allocation7 + $0x178] sm:$0xff] }
0x1004   : > { %8040 = vmatmul.bf16.gmra.mxu0 %v11295_v4  ;;  %8074 = vmatmul.bf16.gmra.mxu1 %v11295_v4 }
0x1007   : > { %10842 = vmatmul.msk.bf16.gmra.mxu2 %vm6327_vm4, %v15263_v14  ;;  %10850 = vmatmul.msk.bf16.gmra.mxu3 %vm6327_vm4, %v15263_v14 }
0x1009   : > { %v7744_v28 = vpop.f32.mrf.mxu0  ;;  %v7778_v44 = vpop.f32.mrf.mxu1 }
0x100a   : > { %v8179_v55 = vpop.f32.mrf.mxu2  ;;  %v8228_v56 = vpop.f32.mrf.mxu3  ;;  %v8244_v28 = vpack.c.bf16 %v8220_v61, %v14808_v49 }
0x1011   : > { %v7746_v24 = vpop.f32.mrf.mxu0  ;;  %v7780_v60 = vpop.f32.mrf.mxu1 }
0x1012   : > { %v8181_v32 = vpop.f32.mrf.mxu2  ;;  %v8230_v33 = vpop.f32.mrf.mxu3 }
0x1013   : > { %v8247_v2 = vpack.c.bf16 %v8181_v32, %v8179_v55  ;;  %v8248_v0 = vpack.c.bf16 %v8230_v33, %v8228_v56  ;;  %v11309_v32 = vld [vmem:[#allocation7 + $0x198] sm:$0xff] }
0x1014   : > { %8043 = vmatmul.bf16.gmra.mxu0 %v11296_v51  ;;  %8077 = vmatmul.bf16.gmra.mxu1 %v11296_v51 }
0x1015   : > { %8314 = vmatpush.bf16.msra.mxu0 %v8247_v2  ;;  %8348 = vmatpush.bf16.msra.mxu1 %v8248_v0 }
0x1017   : > { %10915 = vmatmul.msk.bf16.vlgmr.msra.gmra.mxu2 %vm6327_vm4, %v15256_v59  ;;  %10923 = vmatmul.msk.bf16.vlgmr.msrb.gmra.mxu3 %vm6327_vm4, %v15256_v59  ;;  %v8242_v59 = vpack.c.bf16 %v14800_v20, %v14796_v58 }
0x1019   : > { %v7747_v23 = vpop.f32.mrf.mxu0  ;;  %v7781_v26 = vpop.f32.mrf.mxu1  ;;  %8315 = vmatpush.bf16.msra.mxu0 %v8245_v39  ;;  %8349 = vmatpush.bf16.msra.mxu1 %v8246_v40 }
0x101a   : > { %v14822_v4 = vpop.f32.mrf.mxu2  ;;  %v14824_v21 = vpop.f32.mrf.mxu3 }
0x101d   : > { %8316 = vmatpush.bf16.msra.mxu0 %v8243_v54  ;;  %8350 = vmatpush.bf16.msra.mxu1 %v8244_v28  ;;  %v11310_v54 = vld [vmem:[#allocation7 + $0x1a0] sm:$0xff] }
0x1021   : > { %v7749_v42 = vpop.f32.mrf.mxu0  ;;  %v7783_v43 = vpop.f32.mrf.mxu1  ;;  %8317 = vmatpush.bf16.msra.mxu0 %v8241_v29  ;;  %8351 = vmatpush.bf16.msra.mxu1 %v8242_v59 }
0x1022   : > { %v14832_v44 = vpop.f32.mrf.mxu2  ;;  %v14834_v55 = vpop.f32.mrf.mxu3 }
0x1023   : > { %v8531_v22 = vpack.c.bf16 %v14832_v44, %v14822_v4  ;;  %v8532_v49 = vpack.c.bf16 %v14834_v55, %v14824_v21 }
0x1024   : > { %8046 = vmatmul.bf16.gmra.mxu0 %v11297_v12  ;;  %8080 = vmatmul.bf16.gmra.mxu1 %v11297_v12 }
0x1025   : > { %8318 = vmatpush.bf16.msra.mxu0 %v8239_v53  ;;  %8352 = vmatpush.bf16.msra.mxu1 %v8240_v9  ;;  %v11308_v53 = vld [vmem:[#allocation7 + $0x190] sm:$0xff] }
0x1027   : > { %10916 = vmatmul.msk.bf16.gmra.mxu2 %vm6327_vm4, %v15257_v19  ;;  %10924 = vmatmul.msk.bf16.gmra.mxu3 %vm6327_vm4, %v15257_v19  ;;  %v11306_v19 = vld [vmem:[#allocation7 + $0x180] sm:$0xff] }
0x1029   : > { %v7750_v25 = vpop.f32.mrf.mxu0  ;;  %v7784_v58 = vpop.f32.mrf.mxu1  ;;  %8319 = vmatpush.bf16.msra.mxu0 %v8237_v41  ;;  %8353 = vmatpush.bf16.msra.mxu1 %v8238_v46 }
0x102a   : > { %v14856_v16 = vpop.f32.mrf.mxu2  ;;  %v14858_v30 = vpop.f32.mrf.mxu3  ;;  %v11311_v58 = vld [vmem:[#allocation7 + $0x1a8] sm:$0xff] }
0x102d   : > { %8320 = vmatpush.bf16.msra.mxu0 %v8235_v37  ;;  %8354 = vmatpush.bf16.msra.mxu1 %v8236_v15 }
0x1031   : > { %v8025_v57 = vpop.f32.mrf.mxu0  ;;  %v8059_v31 = vpop.f32.mrf.mxu1  ;;  %8321 = vmatpush.bf16.msra.mxu0 %v8233_v1  ;;  %8355 = vmatpush.bf16.msra.mxu1 %v8234_v5  ;;  %v11307_v5 = vld [vmem:[#allocation7 + $0x188] sm:$0xff] }
0x1032   : > { %v14873_v62 = vadd.f32 %v8025_v57, %v14745_v3  ;;  %v14876_v45 = vadd.f32 %v8059_v31, %v14748_v35  ;;  %v14878_v6 = vpop.f32.mrf.mxu2  ;;  %v14880_v36 = vpop.f32.mrf.mxu3 }
0x1033   : > { %v8533_v52 = vpack.c.bf16 %v14878_v6, %v14856_v16  ;;  %v8534_v10 = vpack.c.bf16 %v14880_v36, %v14858_v30 }
0x1034   : > { %8322 = vmatmul.bf16.vlgmr.msra.gmra.mxu0 %v11306_v19  ;;  %8356 = vmatmul.bf16.vlgmr.msra.gmra.mxu1 %v11306_v19 }
0x1037   : > { %10917 = vmatmul.msk.bf16.gmra.mxu2 %vm6327_vm4, %v15258_v8  ;;  %10925 = vmatmul.msk.bf16.gmra.mxu3 %vm6327_vm4, %v15258_v8 }
0x1039   : > { %v8027_v34 = vpop.f32.mrf.mxu0  ;;  %v8061_v7 = vpop.f32.mrf.mxu1 }
0x103a   : > { %v14890_v27 = vpop.f32.mrf.mxu2  ;;  %v14892_v1 = vpop.f32.mrf.mxu3 }
0x1041   : > { %v8029_v3 = vpop.f32.mrf.mxu0  ;;  %v8063_v35 = vpop.f32.mrf.mxu1 }
0x1042   : > { %v14894_v37 = vpop.f32.mrf.mxu2  ;;  %v14896_v15 = vpop.f32.mrf.mxu3  ;;  %v11312_v35 = vld [vmem:[#allocation7 + $0x1b0] sm:$0xff] }
0x1043   : > { %v8535_v17 = vpack.c.bf16 %v14894_v37, %v14890_v27  ;;  %v8536_v47 = vpack.c.bf16 %v14896_v15, %v14892_v1 }
0x1044   : > { %8326 = vmatmul.bf16.gmra.mxu0 %v11307_v5  ;;  %8360 = vmatmul.bf16.gmra.mxu1 %v11307_v5 }
0x1047   : > { %10918 = vmatmul.msk.bf16.gmra.mxu2 %vm6327_vm4, %v15259_v13  ;;  %10926 = vmatmul.msk.bf16.gmra.mxu3 %vm6327_vm4, %v15259_v13 }
0x1049   : > { %v8030_v8 = vpop.f32.mrf.mxu0  ;;  %v8064_v41 = vpop.f32.mrf.mxu1 }
0x104a   : > { %v14906_v46 = vpop.f32.mrf.mxu2  ;;  %v14908_v11 = vpop.f32.mrf.mxu3 }
0x1051   : > { %v8032_v9 = vpop.f32.mrf.mxu0  ;;  %v8066_v38 = vpop.f32.mrf.mxu1 }
0x1052   : > { %v14910_v20 = vpop.f32.mrf.mxu2  ;;  %v14912_v48 = vpop.f32.mrf.mxu3 }
0x1053   : > { %v8537_v61 = vpack.c.bf16 %v14910_v20, %v14906_v46  ;;  %v8538_v56 = vpack.c.bf16 %v14912_v48, %v14908_v11  ;;  %v11322_v46 = vld [vmem:[#allocation7 + $0x1c0] sm:$0xff] }
0x1054   : > { %8329 = vmatmul.bf16.gmra.mxu0 %v11308_v53  ;;  %8363 = vmatmul.bf16.gmra.mxu1 %v11308_v53 }
0x1057   : > { %10919 = vmatmul.msk.bf16.gmra.mxu2 %vm6327_vm4, %v15260_v50  ;;  %10927 = vmatmul.msk.bf16.gmra.mxu3 %vm6327_vm4, %v15260_v50 }
0x1059   : > { %v8033_v13 = vpop.f32.mrf.mxu0  ;;  %v8067_v51 = vpop.f32.mrf.mxu1 }
0x105a   : > { %v14922_v24 = vpop.f32.mrf.mxu2  ;;  %v14924_v60 = vpop.f32.mrf.mxu3 }
0x1061   : > { %v8035_v33 = vpop.f32.mrf.mxu0  ;;  %v8069_v2 = vpop.f32.mrf.mxu1 }
0x1062   : > { %v14926_v0 = vpop.f32.mrf.mxu2  ;;  %v14928_v39 = vpop.f32.mrf.mxu3 }
0x1064   : > { %8332 = vmatmul.bf16.gmra.mxu0 %v11309_v32  ;;  %8366 = vmatmul.bf16.gmra.mxu1 %v11309_v32 }
0x1067   : > { %10920 = vmatmul.msk.bf16.gmra.mxu2 %vm6327_vm4, %v15261_v63  ;;  %10928 = vmatmul.msk.bf16.gmra.mxu3 %vm6327_vm4, %v15261_v63 }
0x1069   : > { %v8036_v50 = vpop.f32.mrf.mxu0  ;;  %v8070_v40 = vpop.f32.mrf.mxu1 }
0x106a   : > { %v8467_v23 = vpop.f32.mrf.mxu2  ;;  %v8516_v26 = vpop.f32.mrf.mxu3 }
0x1071   : > { %v8038_v28 = vpop.f32.mrf.mxu0  ;;  %v8072_v29 = vpop.f32.mrf.mxu1 }
0x1072   : > { %v8469_v59 = vpop.f32.mrf.mxu2  ;;  %v8518_v12 = vpop.f32.mrf.mxu3  ;;  %v8539_v28 = vpack.c.bf16 %v14926_v0, %v14922_v24  ;;  %v8540_v29 = vpack.c.bf16 %v14928_v39, %v14924_v60 }
0x1073   : > { %v8541_v40 = vpack.c.bf16 %v8469_v59, %v8467_v23 }
0x1074   : > { %8335 = vmatmul.bf16.gmra.mxu0 %v11310_v54  ;;  %8369 = vmatmul.bf16.gmra.mxu1 %v11310_v54  ;;  %v8542_v54 = vpack.c.bf16 %v8518_v12, %v8516_v26 }
0x1077   : > { %10921 = vmatmul.msk.bf16.gmra.mxu2 %vm6327_vm4, %v15262_v18  ;;  %10929 = vmatmul.msk.bf16.gmra.mxu3 %vm6327_vm4, %v15262_v18 }
0x1079   : > { %v8039_v42 = vpop.f32.mrf.mxu0  ;;  %v8073_v43 = vpop.f32.mrf.mxu1 }
0x107a   : > { %v8472_v63 = vpop.f32.mrf.mxu2  ;;  %v8521_v25 = vpop.f32.mrf.mxu3  ;;  %v11313_v42 = vld [vmem:[#allocation7 + $0x1b8] sm:$0xff] }
0x1081   : > { %v8041_v19 = vpop.f32.mrf.mxu0  ;;  %v8075_v57 = vpop.f32.mrf.mxu1 }
0x1082   : > { %v8474_v31 = vpop.f32.mrf.mxu2  ;;  %v8523_v34 = vpop.f32.mrf.mxu3 }
0x1083   : > { %v8543_v51 = vpack.c.bf16 %v8474_v31, %v8472_v63  ;;  %v8544_v32 = vpack.c.bf16 %v8523_v34, %v8521_v25 }
0x1084   : > { %8338 = vmatmul.bf16.gmra.mxu0 %v11311_v58  ;;  %8372 = vmatmul.bf16.gmra.mxu1 %v11311_v58 }
0x1087   : > { %10922 = vmatmul.msk.bf16.gmra.mxu2 %vm6327_vm4, %v15263_v14  ;;  %10930 = vmatmul.msk.bf16.gmra.mxu3 %vm6327_vm4, %v15263_v14 }
0x1089   : > { %v8042_v7 = vpop.f32.mrf.mxu0  ;;  %v8076_v5 = vpop.f32.mrf.mxu1 }
0x108a   : > { %v8477_v18 = vpop.f32.mrf.mxu2  ;;  %v8526_v3 = vpop.f32.mrf.mxu3 }
0x1091   : > { %v8044_v8 = vpop.f32.mrf.mxu0  ;;  %v8078_v41 = vpop.f32.mrf.mxu1 }
0x1092   : > { %v8479_v53 = vpop.f32.mrf.mxu2  ;;  %v8528_v9 = vpop.f32.mrf.mxu3 }
0x1093   : > { %v8545_v38 = vpack.c.bf16 %v8479_v53, %v8477_v18  ;;  %v8546_v13 = vpack.c.bf16 %v8528_v9, %v8526_v3  ;;  %v11325_v3 = vld [vmem:[#allocation7 + $0x1d8] sm:$0xff] }
0x1094   : > { %8341 = vmatmul.bf16.gmra.mxu0 %v11312_v35  ;;  %8375 = vmatmul.bf16.gmra.mxu1 %v11312_v35 }
0x1095   : > { %8612 = vmatpush.bf16.msrb.mxu0 %v8545_v38  ;;  %8646 = vmatpush.bf16.msrb.mxu1 %v8546_v13 }
0x1099   : > { %v8045_v33 = vpop.f32.mrf.mxu0  ;;  %v8079_v2 = vpop.f32.mrf.mxu1  ;;  %8613 = vmatpush.bf16.msrb.mxu0 %v8543_v51  ;;  %8647 = vmatpush.bf16.msrb.mxu1 %v8544_v32  ;;  %v11326_v32 = vld [vmem:[#allocation7 + $0x1e0] sm:$0xff] }
0x109a   : > { %v14942_v14 = vpop.f32.mrf.mxu2  ;;  %v14944_v50 = vpop.f32.mrf.mxu3 }
0x109d   : > { %8614 = vmatpush.bf16.msrb.mxu0 %v8541_v40  ;;  %8648 = vmatpush.bf16.msrb.mxu1 %v8542_v54 }
0x10a1   : > { %v8047_v43 = vpop.f32.mrf.mxu0  ;;  %v8081_v63 = vpop.f32.mrf.mxu1  ;;  %8615 = vmatpush.bf16.msrb.mxu0 %v8539_v28  ;;  %8649 = vmatpush.bf16.msrb.mxu1 %v8540_v29 }
0x10a2   : > { %v14950_v25 = vpop.f32.mrf.mxu2  ;;  %v14952_v58 = vpop.f32.mrf.mxu3  ;;  %v11327_v63 = vld [vmem:[#allocation7 + $0x1e8] sm:$0xff] }
0x10a3   : > { %v8829_v23 = vpack.c.bf16 %v14950_v25, %v14942_v14  ;;  %v8830_v26 = vpack.c.bf16 %v14952_v58, %v14944_v50  ;;  %v11340_v25 = vld [vmem:[#allocation7 + $0x210] sm:$0xff] }
0x10a4   : > { %8344 = vmatmul.bf16.gmra.mxu0 %v11313_v42  ;;  %8378 = vmatmul.bf16.gmra.mxu1 %v11313_v42 }
0x10a5   : > { %8616 = vmatpush.bf16.msrb.mxu0 %v8537_v61  ;;  %8650 = vmatpush.bf16.msrb.mxu1 %v8538_v56  ;;  %v11324_v61 = vld [vmem:[#allocation7 + $0x1d0] sm:$0xff] }
0x10a9   : > { %v8048_v24 = vpop.f32.mrf.mxu0  ;;  %v8082_v60 = vpop.f32.mrf.mxu1  ;;  %8617 = vmatpush.bf16.msrb.mxu0 %v8535_v17  ;;  %8651 = vmatpush.bf16.msrb.mxu1 %v8536_v47 }
0x10aa   : > { %v14970_v0 = vpop.f32.mrf.mxu2  ;;  %v14972_v39 = vpop.f32.mrf.mxu3 }
0x10ad   : > { %8618 = vmatpush.bf16.msrb.mxu0 %v8533_v52  ;;  %8652 = vmatpush.bf16.msrb.mxu1 %v8534_v10 }
0x10b1   : > { %v8323_v11 = vpop.f32.mrf.mxu0  ;;  %v8357_v27 = vpop.f32.mrf.mxu1  ;;  %8619 = vmatpush.bf16.msrb.mxu0 %v8531_v22  ;;  %8653 = vmatpush.bf16.msrb.mxu1 %v8532_v49  ;;  %v11323_v49 = vld [vmem:[#allocation7 + $0x1c8] sm:$0xff] }
0x10b2   : > { %v14987_v1 = vadd.f32 %v8323_v11, %v14873_v62  ;;  %v14990_v16 = vadd.f32 %v8357_v27, %v14876_v45  ;;  %v14992_v6 = vpop.f32.mrf.mxu2  ;;  %v14994_v30 = vpop.f32.mrf.mxu3 }
0x10b3   : > { %v8831_v36 = vpack.c.bf16 %v14992_v6, %v14970_v0  ;;  %v8832_v4 = vpack.c.bf16 %v14994_v30, %v14972_v39  ;;  %v11339_v30 = vld [vmem:[#allocation7 + $0x208] sm:$0xff] }
0x10b4   : > { %8620 = vmatmul.bf16.vlgmr.msrb.gmra.mxu0 %v11322_v46  ;;  %8654 = vmatmul.bf16.vlgmr.msrb.gmra.mxu1 %v11322_v46 }
0x10b9   : > { %v8325_v21 = vpop.f32.mrf.mxu0  ;;  %v8359_v44 = vpop.f32.mrf.mxu1 }
0x10ba   : > { %v15000_v55 = vpop.f32.mrf.mxu2  ;;  %v15002_v22 = vpop.f32.mrf.mxu3 }
0x10c1   : > { %v8327_v62 = vpop.f32.mrf.mxu0  ;;  %v8361_v45 = vpop.f32.mrf.mxu1 }
0x10c2   : > { %v15004_v52 = vpop.f32.mrf.mxu2  ;;  %v15006_v10 = vpop.f32.mrf.mxu3  ;;  %v11328_v62 = vld [vmem:[#allocation7 + $0x1f0] sm:$0xff] }
0x10c3   : > { %v8833_v37 = vpack.c.bf16 %v15004_v52, %v15000_v55  ;;  %v8834_v15 = vpack.c.bf16 %v15006_v10, %v15002_v22 }
0x10c4   : > { %8624 = vmatmul.bf16.gmra.mxu0 %v11323_v49  ;;  %8658 = vmatmul.bf16.gmra.mxu1 %v11323_v49 }
0x10c9   : > { %v8328_v17 = vpop.f32.mrf.mxu0  ;;  %v8362_v47 = vpop.f32.mrf.mxu1 }
0x10ca   : > { %v15012_v20 = vpop.f32.mrf.mxu2  ;;  %v15014_v48 = vpop.f32.mrf.mxu3 }
0x10d1   : > { %v8330_v56 = vpop.f32.mrf.mxu0  ;;  %v8364_v59 = vpop.f32.mrf.mxu1 }
0x10d2   : > { %v15016_v12 = vpop.f32.mrf.mxu2  ;;  %v15018_v19 = vpop.f32.mrf.mxu3 }
0x10d3   : > { %v8835_v57 = vpack.c.bf16 %v15016_v12, %v15012_v20  ;;  %v8836_v31 = vpack.c.bf16 %v15018_v19, %v15014_v48  ;;  %v11338_v20 = vld [vmem:[#allocation7 + $0x200] sm:$0xff] }
0x10d4   : > { %8627 = vmatmul.bf16.gmra.mxu0 %v11324_v61  ;;  %8661 = vmatmul.bf16.gmra.mxu1 %v11324_v61 }
0x10d9   : > { %v8331_v34 = vpop.f32.mrf.mxu0  ;;  %v8365_v7 = vpop.f32.mrf.mxu1 }
0x10da   : > { %v8760_v5 = vpop.f32.mrf.mxu2  ;;  %v8809_v18 = vpop.f32.mrf.mxu3 }
0x10e1   : > { %v8333_v35 = vpop.f32.mrf.mxu0  ;;  %v8367_v8 = vpop.f32.mrf.mxu1 }
0x10e2   : > { %v8762_v41 = vpop.f32.mrf.mxu2  ;;  %v8811_v53 = vpop.f32.mrf.mxu3 }
0x10e4   : > { %8630 = vmatmul.bf16.gmra.mxu0 %v11325_v3  ;;  %8664 = vmatmul.bf16.gmra.mxu1 %v11325_v3 }
0x10e9   : > { %v8334_v9 = vpop.f32.mrf.mxu0  ;;  %v8368_v38 = vpop.f32.mrf.mxu1 }
0x10ea   : > { %v8765_v13 = vpop.f32.mrf.mxu2  ;;  %v8814_v51 = vpop.f32.mrf.mxu3  ;;  %v8837_v38 = vpack.c.bf16 %v8762_v41, %v8760_v5 }
0x10f1   : > { %v8336_v33 = vpop.f32.mrf.mxu0  ;;  %v8370_v2 = vpop.f32.mrf.mxu1 }
0x10f2   : > { %v8767_v40 = vpop.f32.mrf.mxu2  ;;  %v8816_v54 = vpop.f32.mrf.mxu3  ;;  %v11329_v33 = vld [vmem:[#allocation7 + $0x1f8] sm:$0xff] }
0x10f3   : > { %v8839_v8 = vpack.c.bf16 %v8767_v40, %v8765_v13  ;;  %v8840_v9 = vpack.c.bf16 %v8816_v54, %v8814_v51 }
0x10f4   : > { %8633 = vmatmul.bf16.gmra.mxu0 %v11326_v32  ;;  %8667 = vmatmul.bf16.gmra.mxu1 %v11326_v32  ;;  %v8838_v32 = vpack.c.bf16 %v8811_v53, %v8809_v18  ;;  %v11343_v18 = vld [vmem:[#allocation7 + $0x228] sm:$0xff] }
0x10f9   : > { %v8337_v28 = vpop.f32.mrf.mxu0  ;;  %v8371_v29 = vpop.f32.mrf.mxu1 }
0x10fa   : > { %v8770_v42 = vpop.f32.mrf.mxu2  ;;  %v8819_v43 = vpop.f32.mrf.mxu3  ;;  %v11344_v29 = vld [vmem:[#allocation7 + $0x230] sm:$0xff] }
0x1101   : > { %v8339_v24 = vpop.f32.mrf.mxu0  ;;  %v8373_v60 = vpop.f32.mrf.mxu1 }
0x1102   : > { %v8772_v46 = vpop.f32.mrf.mxu2  ;;  %v8821_v11 = vpop.f32.mrf.mxu3  ;;  %v11345_v60 = vld [vmem:[#allocation7 + $0x238] sm:$0xff] }
0x1103   : > { %v8841_v34 = vpack.c.bf16 %v8772_v46, %v8770_v42  ;;  %v8842_v7 = vpack.c.bf16 %v8821_v11, %v8819_v43 }
0x1104   : > { %8636 = vmatmul.bf16.gmra.mxu0 %v11327_v63  ;;  %8670 = vmatmul.bf16.gmra.mxu1 %v11327_v63 }
0x1109   : > { %v8340_v27 = vpop.f32.mrf.mxu0  ;;  %v8374_v21 = vpop.f32.mrf.mxu1 }
0x110a   : > { %v8775_v44 = vpop.f32.mrf.mxu2  ;;  %v8824_v49 = vpop.f32.mrf.mxu3 }
0x1111   : > { %v8342_v45 = vpop.f32.mrf.mxu0  ;;  %v8376_v17 = vpop.f32.mrf.mxu1 }
0x1112   : > { %v8777_v47 = vpop.f32.mrf.mxu2  ;;  %v8826_v61 = vpop.f32.mrf.mxu3 }
0x1113   : > { %v8843_v56 = vpack.c.bf16 %v8777_v47, %v8775_v44  ;;  %v8844_v59 = vpack.c.bf16 %v8826_v61, %v8824_v49  ;;  %v8984_v17 = vpop.permute.xlu1 %8983 }
0x1114   : > { %8639 = vmatmul.bf16.gmra.mxu0 %v11328_v62  ;;  %8673 = vmatmul.bf16.gmra.mxu1 %v11328_v62 }
0x1115   : > { %8910 = vmatpush.bf16.msra.mxu0 %v8843_v56  ;;  %8944 = vmatpush.bf16.msra.mxu1 %v8844_v59 }
0x1119   : > { %v8343_v3 = vpop.f32.mrf.mxu0  ;;  %v8377_v35 = vpop.f32.mrf.mxu1  ;;  %8911 = vmatpush.bf16.msra.mxu0 %v8841_v34  ;;  %8945 = vmatpush.bf16.msra.mxu1 %v8842_v7 }
0x111d   : > { %8912 = vmatpush.bf16.msra.mxu0 %v8839_v8  ;;  %8946 = vmatpush.bf16.msra.mxu1 %v8840_v9 }
0x1121   : > { %v8345_v2 = vpop.f32.mrf.mxu0  ;;  %v8379_v28 = vpop.f32.mrf.mxu1  ;;  %8913 = vmatpush.bf16.msra.mxu0 %v8837_v38  ;;  %8947 = vmatpush.bf16.msra.mxu1 %v8838_v32 }
0x1124   : > { %8642 = vmatmul.bf16.gmra.mxu0 %v11329_v33  ;;  %8676 = vmatmul.bf16.gmra.mxu1 %v11329_v33 }
0x1125   : > { %8914 = vmatpush.bf16.msra.mxu0 %v8835_v57  ;;  %8948 = vmatpush.bf16.msra.mxu1 %v8836_v31 }
0x1129   : > { %v8346_v13 = vpop.f32.mrf.mxu0  ;;  %v8380_v51 = vpop.f32.mrf.mxu1  ;;  %8915 = vmatpush.bf16.msra.mxu0 %v8833_v37  ;;  %8949 = vmatpush.bf16.msra.mxu1 %v8834_v15  ;;  %v11342_v15 = vld [vmem:[#allocation7 + $0x220] sm:$0xff] }
0x112d   : > { %8916 = vmatpush.bf16.msra.mxu0 %v8831_v36  ;;  %8950 = vmatpush.bf16.msra.mxu1 %v8832_v4 }
0x1131   : > { %v8621_v48 = vpop.f32.mrf.mxu0  ;;  %v8655_v12 = vpop.f32.mrf.mxu1  ;;  %8917 = vmatpush.bf16.msra.mxu0 %v8829_v23  ;;  %8951 = vmatpush.bf16.msra.mxu1 %v8830_v26  ;;  %v11341_v26 = vld [vmem:[#allocation7 + $0x218] sm:$0xff] }
0x1132   : > { %v8680_v55 = vadd.f32 %v8621_v48, %v14987_v1  ;;  %v8681_v0 = vadd.f32 %v8655_v12, %v14990_v16 }
0x1134   : > { %8918 = vmatmul.bf16.vlgmr.msra.gmra.mxu0 %v11338_v20  ;;  %8952 = vmatmul.bf16.vlgmr.msra.gmra.mxu1 %v11338_v20 }
0x1139   : > { %v8623_v6 = vpop.f32.mrf.mxu0  ;;  %v8657_v39 = vpop.f32.mrf.mxu1 }
0x1141   : > { %v8625_v36 = vpop.f32.mrf.mxu0  ;;  %v8659_v4 = vpop.f32.mrf.mxu1 }
0x1144   : > { %8922 = vmatmul.bf16.gmra.mxu0 %v11339_v30  ;;  %8956 = vmatmul.bf16.gmra.mxu1 %v11339_v30 }
0x1149   : > { %v8626_v22 = vpop.f32.mrf.mxu0  ;;  %v8660_v14 = vpop.f32.mrf.mxu1 }
0x1151   : > { %v8628_v23 = vpop.f32.mrf.mxu0  ;;  %v8662_v52 = vpop.f32.mrf.mxu1 }
0x1154   : > { %8925 = vmatmul.bf16.gmra.mxu0 %v11340_v25  ;;  %8959 = vmatmul.bf16.gmra.mxu1 %v11340_v25 }
0x1159   : > { %v8629_v50 = vpop.f32.mrf.mxu0  ;;  %v8663_v58 = vpop.f32.mrf.mxu1 }
0x1161   : > { %v8631_v1 = vpop.f32.mrf.mxu0  ;;  %v8665_v16 = vpop.f32.mrf.mxu1 }
0x1164   : > { %8928 = vmatmul.bf16.gmra.mxu0 %v11341_v26  ;;  %8962 = vmatmul.bf16.gmra.mxu1 %v11341_v26 }
0x1169   : > { %v8632_v10 = vpop.f32.mrf.mxu0  ;;  %v8666_v37 = vpop.f32.mrf.mxu1 }
0x1171   : > { %v8634_v19 = vpop.f32.mrf.mxu0  ;;  %v8668_v57 = vpop.f32.mrf.mxu1 }
0x1174   : > { %8931 = vmatmul.bf16.gmra.mxu0 %v11342_v15  ;;  %8965 = vmatmul.bf16.gmra.mxu1 %v11342_v15 }
0x1179   : > { %v8635_v31 = vpop.f32.mrf.mxu0  ;;  %v8669_v5 = vpop.f32.mrf.mxu1 }
0x1181   : > { %v8637_v41 = vpop.f32.mrf.mxu0  ;;  %v8671_v53 = vpop.f32.mrf.mxu1 }
0x1184   : > { %8934 = vmatmul.bf16.gmra.mxu0 %v11343_v18  ;;  %8968 = vmatmul.bf16.gmra.mxu1 %v11343_v18 }
0x1189   : > { %v8638_v40 = vpop.f32.mrf.mxu0  ;;  %v8672_v54 = vpop.f32.mrf.mxu1 }
0x1191   : > { %v8640_v42 = vpop.f32.mrf.mxu0  ;;  %v8674_v43 = vpop.f32.mrf.mxu1 }
0x1194   : > { %8937 = vmatmul.bf16.gmra.mxu0 %v11344_v29  ;;  %8971 = vmatmul.bf16.gmra.mxu1 %v11344_v29 }
0x1199   : > { %v8641_v63 = vpop.f32.mrf.mxu0  ;;  %v8675_v24 = vpop.f32.mrf.mxu1 }
0x11a1   : > { %v8643_v46 = vpop.f32.mrf.mxu0  ;;  %v8677_v11 = vpop.f32.mrf.mxu1 }
0x11a4   : > { %8940 = vmatmul.bf16.gmra.mxu0 %v11345_v60  ;;  %8974 = vmatmul.bf16.gmra.mxu1 %v11345_v60 }
0x11a9   : > { %v8644_v27 = vpop.f32.mrf.mxu0  ;;  %v8678_v21 = vpop.f32.mrf.mxu1 }
0x11b1   : > { %v8919_v44 = vpop.f32.mrf.mxu0  ;;  %v8953_v49 = vpop.f32.mrf.mxu1 }
0x11b2   : > { %v8978_v62 = vadd.f32 %v8919_v44, %v8680_v55  ;;  %v8979_v45 = vadd.f32 %v8953_v49, %v8681_v0 }
0x11b4   : > { %v8987_v47 = vadd.f32 %v8984_v17, %v8979_v45  ;;  %v8986_v61 = vadd.f32 %v8984_v17, %v8978_v62 }
0x11b6   : > { %v8990_v56 = vrot.slane %v8987_v47, 4 }
0x11b8   : > { %v8992_v59 = vsel %vm8991_vm5, %v8986_v61, %v8990_v56 }
0x11b9   : > { %8994 = vst [vmem:[%s577_s30] sm:$0x77] %v8992_v59  ;;  %v8921_v34 = vpop.f32.mrf.mxu0  ;;  %v8955_v7 = vpop.f32.mrf.mxu1 }
0x11c1   : > { %v8923_v3 = vpop.f32.mrf.mxu0  ;;  %v8957_v35 = vpop.f32.mrf.mxu1 }
0x11c9   : > { %v8924_v8 = vpop.f32.mrf.mxu0  ;;  %v8958_v9 = vpop.f32.mrf.mxu1 }
0x11d1   : > { %v8926_v38 = vpop.f32.mrf.mxu0  ;;  %v8960_v32 = vpop.f32.mrf.mxu1 }
0x11d9   : > { %v8927_v33 = vpop.f32.mrf.mxu0  ;;  %v8961_v2 = vpop.f32.mrf.mxu1 }
0x11e1   : > { %v8929_v28 = vpop.f32.mrf.mxu0  ;;  %v8963_v13 = vpop.f32.mrf.mxu1 }
0x11e9   : > { %v8930_v51 = vpop.f32.mrf.mxu0  ;;  %v8964_v20 = vpop.f32.mrf.mxu1 }
0x11f1   : > { %v8932_v48 = vpop.f32.mrf.mxu0  ;;  %v8966_v12 = vpop.f32.mrf.mxu1 }
0x11f9   : > { %v8933_v55 = vpop.f32.mrf.mxu0  ;;  %v8967_v0 = vpop.f32.mrf.mxu1 }
0x1201   : > { %v8935_v6 = vpop.f32.mrf.mxu0  ;;  %v8969_v39 = vpop.f32.mrf.mxu1 }
0x1209   : > { %v8936_v30 = vpop.f32.mrf.mxu0  ;;  %v8970_v36 = vpop.f32.mrf.mxu1 }
0x1211   : > { %v8938_v4 = vpop.f32.mrf.mxu0  ;;  %v8972_v22 = vpop.f32.mrf.mxu1 }
0x1219   : > { %v8939_v14 = vpop.f32.mrf.mxu0  ;;  %v8973_v25 = vpop.f32.mrf.mxu1 }
0x1221   : > { %v8941_v23 = vpop.f32.mrf.mxu0  ;;  %v8975_v52 = vpop.f32.mrf.mxu1 }
0x1229   : > { %v8942_v50 = vpop.f32.mrf.mxu0  ;;  %v8976_v58 = vpop.f32.mrf.mxu1 }
0x122a PF: > { %s15265_s19 = sld [smem:[#allocation13_spill]] }
0x1230   : > { %s28_s18 = sadd.s32 1, %s15265_s19  }
0x1231   : > { %p25_p7 = scmp.ge.s32.totalorder %s28_s18, 4  }
0x1233   :  { %27 = sbr.rel (!%p25_p7) target bundleno = 8 (0x8), region = 195 }
0x1238   :  { %9016 = vsyncpa [#allocation3], 1 }
0x1239   :  { %9018 = vsyncpa [#allocation3 + $0x1], 1 }
0x123a   :  { %9019 = vsyncpa [#allocation5], 1 }
0x123b   :  { %9020 = vsyncpa [#allocation8], 1 }

</bundles_post_ra>
